<compile_context>
chip_gen: v7x
topology: tpu7x:2x2x1
jax: 0.10.0
libtpu: 0.0.40
codegen_flags: <defaults>
</compile_context>

<pallas_src>
import functools

import jax
import jax.numpy as jnp
from jax.experimental import pallas as pl
from jax.experimental.pallas import tpu as pltpu

KERNEL_SIZES = (9, 19, 39)
BOTTLENECK_CHANNELS = 32
K_MAX = max(KERNEL_SIZES)          # common tap grid for the branch convs
P_MAX = K_MAX // 2                 # "same" padding of the widest conv
MODULE_KEYS = ("inc1", "inc2", "inc3")


# ------------------------------ Pallas kernel -------------------------------

def _inception_block_kernel(x_ref, w0_ref, b0_ref, wbig_ref, bbig_ref,
                            gamma_ref, beta_ref, o_ref, cols_ref,
                            *, seq_len, mxu_dtype, eps):
    """Fused InceptionBlock forward on one lane-dense (C, B*L) slab.

    x_ref     : (C_mod, NL)                block input, channels zero-padded
    w0_ref    : (C_out+32, C_mod)          folded [shortcut ; bottleneck_1] 1x1
    b0_ref    : (C_out+32, 1)
    wbig_ref  : (M, C_mod+32, 39*32+C_mod) per-module block-diag weight with the
                                           NEXT module's bottleneck folded in
    bbig_ref  : (M, C_mod+32, 1)
    gamma_ref : (C_out, 1)                 BatchNorm affine
    beta_ref  : (C_out, 1)
    o_ref     : (C_out, NL)
    cols_ref  : (39*32 + C_mod, NL) scratch in mxu_dtype — reused im2col slab
    """
    f32 = jnp.float32
    c_mod, nl = x_ref.shape
    c_out = o_ref.shape[0]
    n_modules = wbig_ref.shape[0]
    c_bott = wbig_ref.shape[1] - c_mod
    k_taps = (cols_ref.shape[0] - c_mod) // c_bott   # == K_MAX
    p_half = k_taps // 2

    # Lane position inside its own sample (lanes packed as b*L + l).  Used to
    # mask conv taps / maxpool neighbours that cross a sample boundary, i.e.
    # "same" padding is handled in-kernel (no jnp.pad HBM copies).
    pos_b = jax.lax.broadcasted_iota(jnp.int32, (c_bott, nl), 1) % seq_len
    pos_m = jax.lax.broadcasted_iota(jnp.int32, (c_mod, nl), 1) % seq_len

    # Maxpool boundary masks are module-invariant: hoisted out of the unroll.
    pool_left_ok = pos_m >= 1
    pool_right_ok = pos_m < seq_len - 1

    def mm(w, a):
        # MXU matmul; operands in mxu_dtype, accumulation in f32.
        return jnp.dot(w, a.astype(w.dtype), preferred_element_type=f32)

    def shift_taps(a, s):
        # a[:, b*L + l] -> a[:, b*L + (l + s)], zero where l + s leaves [0, L).
        # Since l is already in [0, L) only ONE bound can be violated per sign,
        # so a single compare suffices.
        if s == 0:
            return a
        rolled = pltpu.roll(a, (-s) % nl, axis=1)
        valid = (pos_b < seq_len - s) if s > 0 else (pos_b >= -s)
        return jnp.where(valid, rolled, 0.0)

    def maxpool3(a):
        # MaxPool1d(kernel_size=3, stride=1, padding=1): implicit -inf padding.
        # finfo.min (not -inf) is benign here because the unmasked centre
        # element is always included in the max — do not "fix" this.
        neg = f32(jnp.finfo(f32).min)
        left = jnp.where(pool_left_ok, pltpu.roll(a, 1, axis=1), neg)
        right = jnp.where(pool_right_ok, pltpu.roll(a, nl - 1, axis=1), neg)
        return jnp.maximum(a, jnp.maximum(left, right))

    x_in = x_ref[...].astype(f32)                      # (C_mod, NL)

    # Head matmul: residual shortcut AND module-1 bottleneck in one MXU op.
    head = mm(w0_ref[...], x_in) + b0_ref[...]         # (C_out+32, NL) f32
    shortcut = head[:c_out]
    bott = head[c_out:]                                # module-1 bottleneck
    xm = x_in                                          # module-1 input

    for m in range(n_modules):                         # static unroll (3 modules)
        # im2col on the common 39-tap grid, written tap-by-tap (in mxu_dtype)
        # into the reused VMEM scratch; maxpool'd module input as extra rows.
        for k in range(k_taps):
            cols_ref[k * c_bott:(k + 1) * c_bott, :] = (
                shift_taps(bott, k - p_half).astype(mxu_dtype))
        cols_ref[k_taps * c_bott:, :] = maxpool3(xm).astype(mxu_dtype)

        # ONE deep contraction gives the module's concatenated output (three
        # branch convs + maxpool->1x1) AND the next module's bottleneck.
        big = mm(wbig_ref[m], cols_ref[...]) + bbig_ref[m]   # (C_mod+32, NL)
        xm = big[:c_mod]
        bott = big[c_mod:]          # zeros (unused) after the last module

    # Residual add, then BatchNorm1d (training mode: biased batch statistics
    # over B*L == lanes) in f32, then ReLU.
    z = xm + shortcut                                  # (C_out, NL)
    mean = jnp.mean(z, axis=1, keepdims=True)
    var = jnp.mean(jnp.square(z - mean), axis=1, keepdims=True)
    inv = jax.lax.rsqrt(var + eps)
    y = (z - mean) * (inv * gamma_ref[...]) + beta_ref[...]
    o_ref[...] = jnp.maximum(y, 0.0).astype(o_ref.dtype)


# ------------------------- parameter packing (wrapper) ----------------------

def _pad_in_channels(w2d, c_total):
    """Zero-pad the input-channel (last) axis of a 2-D weight to c_total."""
    return jnp.pad(w2d, ((0, 0), (0, c_total - w2d.shape[1])))


def _embed_branch_weight(w):
    """(C_b, 32, K) conv weight -> (C_b, K_MAX*32) rows on the common tap grid.

    Columns are tap-major / channel-minor (matching the in-kernel im2col row
    order); the K taps are centred in the K_MAX grid, which is exactly the
    original `padding = K // 2` "same" convolution.
    """
    c_b, c_in, k = w.shape
    off = (K_MAX - k) // 2
    w_full = jnp.zeros((c_b, c_in, K_MAX), jnp.float32)
    w_full = w_full.at[:, :, off:off + k].set(w)
    return jnp.transpose(w_full, (0, 2, 1)).reshape(c_b, K_MAX * c_in)


def _pack_module(mp, c_mod):
    """Pack one InceptionModule into (wb, bb, wmod, bmod)."""
    wb_raw, bb_raw = mp["bottleneck"]                  # (32, c_in, 1), (32,)
    wb = _pad_in_channels(wb_raw[:, :, 0], c_mod)      # (32, c_mod)
    bb = bb_raw.reshape(-1, 1)

    branch_w = jnp.concatenate(
        [_embed_branch_weight(w) for w, _ in mp["convs"]], axis=0)   # (12, 1248)
    branch_b = jnp.concatenate([b for _, b in mp["convs"]])          # (12,)
    wp_raw, bp_raw = mp["conv_pool"]                   # (4, c_in, 1), (4,)
    wp = _pad_in_channels(wp_raw[:, :, 0], c_mod)      # (4, c_mod)

    n_branch, n_taps = branch_w.shape
    wmod = jnp.zeros((n_branch + wp.shape[0], n_taps + c_mod), jnp.float32)
    wmod = wmod.at[:n_branch, :n_taps].set(branch_w)   # three branch convs
    wmod = wmod.at[n_branch:, n_taps:].set(wp)         # conv_pool (block-diag)
    bmod = jnp.concatenate([branch_b, bp_raw]).reshape(-1, 1)
    return wb, bb, wmod, bmod


# ------------------------------ module forward ------------------------------

def inception_block_forward(x, p, eps=1e-5, mxu_dtype=jnp.bfloat16):
    """InceptionBlock forward.  x: (B, C_in, L) -> (B, C_out, L)."""
    b, c_in, seq_len = x.shape
    c_out = p["gamma"].shape[0]
    assert c_in <= c_out, "fused packing assumes in_channels <= out_channels"
    c_mod = c_out                        # uniform per-module channel width
    nl = b * seq_len
    hi = jax.lax.Precision.HIGHEST

    # ---- parameter packing + 1x1 folding (tiny, weight-only, f32) ----------
    packed = [_pack_module(p[k], c_mod) for k in MODULE_KEYS]
    c_bott = packed[0][0].shape[0]                     # 32
    n_cols = K_MAX * c_bott + c_mod                    # im2col depth

    ws_raw, bs_raw = p["shortcut"]
    ws = _pad_in_channels(ws_raw[:, :, 0], c_mod)
    bs = bs_raw.reshape(-1, 1)

    # Head matmul weight: [shortcut ; module-1 bottleneck], both on the input.
    w0 = jnp.concatenate([ws, packed[0][0]], axis=0)             # (c_out+32, c_mod)
    b0 = jnp.concatenate([bs, packed[0][1]], axis=0)             # (c_out+32, 1)

    # Per-module weight with the NEXT module's bottleneck folded in (there is
    # no nonlinearity between a module's concat output and the next 1x1).
    wbig_list, bbig_list = [], []
    n_mod = len(packed)
    for m in range(n_mod):
        _, _, wmod, bmod = packed[m]
        if m + 1 < n_mod:
            wb_next, bb_next = packed[m + 1][0], packed[m + 1][1]
            fold_w = jnp.dot(wb_next, wmod, precision=hi)        # (32, n_cols)
            fold_b = jnp.dot(wb_next, bmod, precision=hi) + bb_next
        else:
            fold_w = jnp.zeros((c_bott, wmod.shape[1]), jnp.float32)
            fold_b = jnp.zeros((c_bott, 1), jnp.float32)
        wbig_list.append(jnp.concatenate([wmod, fold_w], axis=0))
        bbig_list.append(jnp.concatenate([bmod, fold_b], axis=0))
    wbig = jnp.stack(wbig_list).astype(mxu_dtype)      # (3, c_mod+32, n_cols)
    bbig = jnp.stack(bbig_list)                        # (3, c_mod+32, 1) f32
    w0 = w0.astype(mxu_dtype)

    gamma = p["gamma"].reshape(-1, 1).astype(jnp.float32)
    beta = p["beta"].reshape(-1, 1).astype(jnp.float32)

    # ---- input layout plumbing: (B, C_in, L) -> lane-dense (c_mod, B*L) ----
    x2d = jnp.zeros((c_mod, nl), jnp.float32)
    x2d = x2d.at[:c_in, :].set(
        jnp.transpose(x, (1, 0, 2)).reshape(c_in, nl).astype(jnp.float32))

    kernel = functools.partial(_inception_block_kernel, seq_len=seq_len,
                               mxu_dtype=mxu_dtype, eps=float(eps))

    def full_spec(shape):
        nd = len(shape)
        return pl.BlockSpec(shape, lambda i, _nd=nd: (0,) * _nd)

    inputs = (x2d, w0, b0, wbig, bbig, gamma, beta)
    out2d = pl.pallas_call(
        kernel,
        out_shape=jax.ShapeDtypeStruct((c_out, nl), jnp.float32),
        grid=(1,),                       # whole block fused: one program
        in_specs=[full_spec(a.shape) for a in inputs],
        out_specs=full_spec((c_out, nl)),
        scratch_shapes=[pltpu.VMEM((n_cols, nl), mxu_dtype)],   # reused cols slab
        compiler_params=pltpu.CompilerParams(
            dimension_semantics=("arbitrary",),
            vmem_limit_bytes=32 * 1024 * 1024),
    )(*inputs)

    # ---- output layout plumbing: (c_out, B*L) -> (B, c_out, L) -------------
    # TODO(synk): tile NL across a "parallel" grid axis for long SleepPPG
    # sequences (two-pass BatchNorm for global stats; bf16 cols tile <= ~4096
    # lanes to stay inside v7x's 64 MiB VMEM).
    return jnp.transpose(out2d.reshape(c_out, b, seq_len), (1, 0, 2))


# ------------------------- deterministic parameters -------------------------

def _conv_params(key, c_out, c_in, k, scale=0.05):
    kw, kb = jax.random.split(key)
    w = scale * jax.random.normal(kw, (c_out, c_in, k), jnp.float32)
    b = scale * jax.random.normal(kb, (c_out,), jnp.float32)
    return w, b


def init_inception_module_params(key, in_ch, out_ch):
    keys = jax.random.split(key, 2 + len(KERNEL_SIZES))
    return {
        "bottleneck": _conv_params(keys[0], BOTTLENECK_CHANNELS, in_ch, 1),
        "convs": [_conv_params(keys[1 + i], out_ch, BOTTLENECK_CHANNELS, k)
                  for i, k in enumerate(KERNEL_SIZES)],
        "conv_pool": _conv_params(keys[-1], out_ch, in_ch, 1),
    }


def init_inception_block_params(key, in_ch, out_ch):
    k1, k2, k3, ks = jax.random.split(key, 4)
    return {
        "inc1": init_inception_module_params(k1, in_ch, out_ch // 4),
        "inc2": init_inception_module_params(k2, out_ch, out_ch // 4),
        "inc3": init_inception_module_params(k3, out_ch, out_ch // 4),
        "shortcut": _conv_params(ks, out_ch, in_ch, 1),
        "gamma": jnp.ones((out_ch,), jnp.float32),   # BN affine init
        "beta": jnp.zeros((out_ch,), jnp.float32),
    }


# ------------------------------ plain-JAX reference -------------------------

def _reference_forward(x, p, eps=1e-5):
    """f32 / HIGHEST-precision reference of the PyTorch InceptionBlock."""
    def conv1d(a, w, bias, padding):
        out = jax.lax.conv_general_dilated(
            a, w, window_strides=(1,), padding=[(padding, padding)],
            dimension_numbers=("NCH", "OIH", "NCH"),
            precision=jax.lax.Precision.HIGHEST)
        return out + bias[None, :, None]

    def maxpool3(a):
        return jax.lax.reduce_window(
            a, -jnp.inf, jax.lax.max, (1, 1, 3), (1, 1, 1),
            [(0, 0), (0, 0), (1, 1)])

    def module(a, mp):
        bott = conv1d(a, *mp["bottleneck"], padding=0)
        outs = [conv1d(bott, w, bias, padding=w.shape[-1] // 2)
                for w, bias in mp["convs"]]
        outs.append(conv1d(maxpool3(a), *mp["conv_pool"], padding=0))
        return jnp.concatenate(outs, axis=1)

    out = module(x, p["inc1"])
    out = module(out, p["inc2"])
    out = module(out, p["inc3"])
    z = out + conv1d(x, *p["shortcut"], padding=0)
    mean = jnp.mean(z, axis=(0, 2), keepdims=True)
    var = jnp.mean(jnp.square(z - mean), axis=(0, 2), keepdims=True)
    zn = (z - mean) * jax.lax.rsqrt(var + eps)
    y = zn * p["gamma"][None, :, None] + p["beta"][None, :, None]
    return jnp.maximum(y, 0.0)


# ----------------------------------- main ------------------------------------

if __name__ == "__main__":
    B, C_IN, C_OUT, L = 2, 4, 16, 64      # B*L = 128 lanes -> fully lane-dense
    key = jax.random.PRNGKey(0)
    k_x, k_p = jax.random.split(key)
    x = jax.random.normal(k_x, (B, C_IN, L), jnp.float32)
    params = init_inception_block_params(k_p, C_IN, C_OUT)

    # Default path: bf16 MXU operands, f32 accumulation / elementwise / BN.
    fwd = jax.jit(inception_block_forward)
    y = jax.block_until_ready(fwd(x, params))

    assert y.shape == (B, C_OUT, L), y.shape
    assert bool(jnp.all(jnp.isfinite(y)))
    assert bool(jnp.all(y >= 0.0))                    # ReLU output

    y_ref = _reference_forward(x, params)
    # bf16 inputs through three chained ~1264-deep contractions, then BN
    # normalization (divide by per-channel sigma ~0.1) amplifies the
    # quantization noise -> use a bf16-appropriate tolerance.
    err_bf16 = float(jnp.max(jnp.abs(y - y_ref)))
    assert err_bf16 < 6e-2, f"bf16 mismatch vs reference: {err_bf16}"

    # Exact-semantics path (f32 MXU operands) against the same reference.
    fwd_f32 = jax.jit(functools.partial(inception_block_forward,
                                        mxu_dtype=jnp.float32))
    y32 = jax.block_until_ready(fwd_f32(x, params))
    err_f32 = float(jnp.max(jnp.abs(y32 - y_ref)))
    assert err_f32 < 2e-2, f"f32 mismatch vs reference: {err_f32}"

    print("KERNEL_OK")
</pallas_src>

<mosaic_0001>
module attributes {stable_mosaic.version = 11 : i64} {
  func.func @_inception_block_kernel(%arg0: i32, %arg1: memref<16x128xf32, #tpu.memory_space<vmem>>, %arg2: memref<48x16xbf16, #tpu.memory_space<vmem>>, %arg3: memref<48x1xf32, #tpu.memory_space<vmem>>, %arg4: memref<3x48x1264xbf16, #tpu.memory_space<vmem>>, %arg5: memref<3x48x1xf32, #tpu.memory_space<vmem>>, %arg6: memref<16x1xf32, #tpu.memory_space<vmem>>, %arg7: memref<16x1xf32, #tpu.memory_space<vmem>>, %arg8: memref<16x128xf32, #tpu.memory_space<vmem>>, %arg9: memref<1264x128xbf16, #tpu.memory_space<vmem>>) attributes {dimension_semantics = [#tpu.dimension_semantics<arbitrary>], iteration_bounds = array<i64: 1>, scalar_prefetch = 0 : i64, scratch_operands = 1 : i64, tpu.core_type = #tpu.core_type<tc>, window_params = [{pipeline_mode = #tpu.pipeline_mode<synchronous>, transform_indices = @transform_0, window_bounds = array<i64: 16, 128>}, {pipeline_mode = #tpu.pipeline_mode<synchronous>, transform_indices = @transform_1, window_bounds = array<i64: 48, 16>}, {pipeline_mode = #tpu.pipeline_mode<synchronous>, transform_indices = @transform_2, window_bounds = array<i64: 48, 1>}, {pipeline_mode = #tpu.pipeline_mode<synchronous>, transform_indices = @transform_3, window_bounds = array<i64: 3, 48, 1264>}, {pipeline_mode = #tpu.pipeline_mode<synchronous>, transform_indices = @transform_4, window_bounds = array<i64: 3, 48, 1>}, {pipeline_mode = #tpu.pipeline_mode<synchronous>, transform_indices = @transform_5, window_bounds = array<i64: 16, 1>}, {pipeline_mode = #tpu.pipeline_mode<synchronous>, transform_indices = @transform_6, window_bounds = array<i64: 16, 1>}, {pipeline_mode = #tpu.pipeline_mode<synchronous>, transform_indices = @transform_7, window_bounds = array<i64: 16, 128>}]} {
    %0 = tpu.iota {dimensions = array<i32: 1>} : vector<32x128xi32>
    %c64_i32 = arith.constant 64 : i32
    %c0_i32 = arith.constant 0 : i32
    %1 = arith.cmpi eq, %c64_i32, %c0_i32 : i32
    %c1_i32 = arith.constant 1 : i32
    %2 = arith.select %1, %c1_i32, %c64_i32 : i32
    %3 = vector.broadcast %2 : i32 to vector<32x128xi32>
    %4 = arith.remsi %0, %3 : vector<32x128xi32>
    %c0_i32_0 = arith.constant 0 : i32
    %5 = vector.broadcast %c0_i32_0 : i32 to vector<32x128xi32>
    %6 = arith.cmpi ne, %4, %5 : vector<32x128xi32>
    %c0_i32_1 = arith.constant 0 : i32
    %7 = vector.broadcast %c0_i32_1 : i32 to vector<32x128xi32>
    %8 = arith.cmpi slt, %4, %7 : vector<32x128xi32>
    %c0_i32_2 = arith.constant 0 : i32
    %9 = arith.cmpi slt, %2, %c0_i32_2 : i32
    %10 = vector.broadcast %9 : i1 to vector<32x128xi1>
    %11 = vector.broadcast %10 : vector<32x128xi1> to vector<32x128xi1>
    %12 = arith.xori %8, %11 : vector<32x128xi1>
    %13 = arith.andi %12, %6 : vector<32x128xi1>
    %14 = vector.broadcast %2 : i32 to vector<32x128xi32>
    %15 = arith.addi %4, %14 : vector<32x128xi32>
    %16 = arith.select %13, %15, %4 : vector<32x128xi1>, vector<32x128xi32>
    %17 = tpu.iota {dimensions = array<i32: 1>} : vector<16x128xi32>
    %c64_i32_3 = arith.constant 64 : i32
    %c0_i32_4 = arith.constant 0 : i32
    %18 = arith.cmpi eq, %c64_i32_3, %c0_i32_4 : i32
    %c1_i32_5 = arith.constant 1 : i32
    %19 = arith.select %18, %c1_i32_5, %c64_i32_3 : i32
    %20 = vector.broadcast %19 : i32 to vector<16x128xi32>
    %21 = arith.remsi %17, %20 : vector<16x128xi32>
    %c0_i32_6 = arith.constant 0 : i32
    %22 = vector.broadcast %c0_i32_6 : i32 to vector<16x128xi32>
    %23 = arith.cmpi ne, %21, %22 : vector<16x128xi32>
    %c0_i32_7 = arith.constant 0 : i32
    %24 = vector.broadcast %c0_i32_7 : i32 to vector<16x128xi32>
    %25 = arith.cmpi slt, %21, %24 : vector<16x128xi32>
    %c0_i32_8 = arith.constant 0 : i32
    %26 = arith.cmpi slt, %19, %c0_i32_8 : i32
    %27 = vector.broadcast %26 : i1 to vector<16x128xi1>
    %28 = vector.broadcast %27 : vector<16x128xi1> to vector<16x128xi1>
    %29 = arith.xori %25, %28 : vector<16x128xi1>
    %30 = arith.andi %29, %23 : vector<16x128xi1>
    %31 = vector.broadcast %19 : i32 to vector<16x128xi32>
    %32 = arith.addi %21, %31 : vector<16x128xi32>
    %33 = arith.select %30, %32, %21 : vector<16x128xi1>, vector<16x128xi32>
    %c1_i32_9 = arith.constant 1 : i32
    %34 = vector.broadcast %c1_i32_9 : i32 to vector<16x128xi32>
    %35 = arith.cmpi sge, %33, %34 : vector<16x128xi32>
    %c63_i32 = arith.constant 63 : i32
    %36 = vector.broadcast %c63_i32 : i32 to vector<16x128xi32>
    %37 = arith.cmpi slt, %33, %36 : vector<16x128xi32>
    %c0 = arith.constant 0 : index
    %c0_10 = arith.constant 0 : index
    %38 = vector.load %arg1[%c0, %c0_10] : memref<16x128xf32, #tpu.memory_space<vmem>>, vector<16x128xf32>
    %c0_11 = arith.constant 0 : index
    %c0_12 = arith.constant 0 : index
    %39 = vector.load %arg2[%c0_11, %c0_12] : memref<48x16xbf16, #tpu.memory_space<vmem>>, vector<48x16xbf16>
    %40 = arith.truncf %38 : vector<16x128xf32> to vector<16x128xbf16>
    %cst = arith.constant dense<0.000000e+00> : vector<48x128xf32>
    %41 = tpu.matmul %39, %40, %cst {dimension_numbers = #tpu.dot_dimension_numbers<[1], [0], [0], [1], [0, 0, 1, 1], [], []>} : vector<48x16xbf16>, vector<16x128xbf16>, vector<48x128xf32> -> vector<48x128xf32>
    %c0_13 = arith.constant 0 : index
    %c0_14 = arith.constant 0 : index
    %42 = vector.load %arg3[%c0_13, %c0_14] : memref<48x1xf32, #tpu.memory_space<vmem>>, vector<48x1xf32>
    %43 = vector.broadcast %42 : vector<48x1xf32> to vector<48x128xf32>
    %44 = arith.addf %41, %43 : vector<48x128xf32>
    %45 = vector.extract_strided_slice %44 {offsets = [0, 0], sizes = [16, 128], strides = [1, 1]} : vector<48x128xf32> to vector<16x128xf32>
    %46 = vector.extract_strided_slice %44 {offsets = [16, 0], sizes = [32, 128], strides = [1, 1]} : vector<48x128xf32> to vector<32x128xf32>
    %c19_i32 = arith.constant 19 : i32
    %47 = tpu.dynamic_rotate %46 by %c19_i32 dim 1 : vector<32x128xf32>, i32 -> vector<32x128xf32>
    %c19_i32_15 = arith.constant 19 : i32
    %48 = vector.broadcast %c19_i32_15 : i32 to vector<32x128xi32>
    %49 = arith.cmpi sge, %16, %48 : vector<32x128xi32>
    %cst_16 = arith.constant 0.000000e+00 : f32
    %50 = vector.broadcast %cst_16 : f32 to vector<32x128xf32>
    %51 = arith.select %49, %47, %50 : vector<32x128xi1>, vector<32x128xf32>
    %52 = arith.truncf %51 : vector<32x128xf32> to vector<32x128xbf16>
    %c0_17 = arith.constant 0 : index
    %c0_18 = arith.constant 0 : index
    %53 = vector.load %arg9[%c0_17, %c0_18] : memref<1264x128xbf16, #tpu.memory_space<vmem>>, vector<32x128xbf16>
    tpu.vector_store %arg9[%c0_17, %c0_18], %52 {strides = array<i32>} : memref<1264x128xbf16, #tpu.memory_space<vmem>>, vector<32x128xbf16>,
    %c18_i32 = arith.constant 18 : i32
    %54 = tpu.dynamic_rotate %46 by %c18_i32 dim 1 : vector<32x128xf32>, i32 -> vector<32x128xf32>
    %c18_i32_19 = arith.constant 18 : i32
    %55 = vector.broadcast %c18_i32_19 : i32 to vector<32x128xi32>
    %56 = arith.cmpi sge, %16, %55 : vector<32x128xi32>
    %cst_20 = arith.constant 0.000000e+00 : f32
    %57 = vector.broadcast %cst_20 : f32 to vector<32x128xf32>
    %58 = arith.select %56, %54, %57 : vector<32x128xi1>, vector<32x128xf32>
    %59 = arith.truncf %58 : vector<32x128xf32> to vector<32x128xbf16>
    %c32 = arith.constant 32 : index
    %c0_21 = arith.constant 0 : index
    %60 = vector.load %arg9[%c32, %c0_21] : memref<1264x128xbf16, #tpu.memory_space<vmem>>, vector<32x128xbf16>
    tpu.vector_store %arg9[%c32, %c0_21], %59 {strides = array<i32>} : memref<1264x128xbf16, #tpu.memory_space<vmem>>, vector<32x128xbf16>,
    %c17_i32 = arith.constant 17 : i32
    %61 = tpu.dynamic_rotate %46 by %c17_i32 dim 1 : vector<32x128xf32>, i32 -> vector<32x128xf32>
    %c17_i32_22 = arith.constant 17 : i32
    %62 = vector.broadcast %c17_i32_22 : i32 to vector<32x128xi32>
    %63 = arith.cmpi sge, %16, %62 : vector<32x128xi32>
    %cst_23 = arith.constant 0.000000e+00 : f32
    %64 = vector.broadcast %cst_23 : f32 to vector<32x128xf32>
    %65 = arith.select %63, %61, %64 : vector<32x128xi1>, vector<32x128xf32>
    %66 = arith.truncf %65 : vector<32x128xf32> to vector<32x128xbf16>
    %c64 = arith.constant 64 : index
    %c0_24 = arith.constant 0 : index
    %67 = vector.load %arg9[%c64, %c0_24] : memref<1264x128xbf16, #tpu.memory_space<vmem>>, vector<32x128xbf16>
    tpu.vector_store %arg9[%c64, %c0_24], %66 {strides = array<i32>} : memref<1264x128xbf16, #tpu.memory_space<vmem>>, vector<32x128xbf16>,
    %c16_i32 = arith.constant 16 : i32
    %68 = tpu.dynamic_rotate %46 by %c16_i32 dim 1 : vector<32x128xf32>, i32 -> vector<32x128xf32>
    %c16_i32_25 = arith.constant 16 : i32
    %69 = vector.broadcast %c16_i32_25 : i32 to vector<32x128xi32>
    %70 = arith.cmpi sge, %16, %69 : vector<32x128xi32>
    %cst_26 = arith.constant 0.000000e+00 : f32
    %71 = vector.broadcast %cst_26 : f32 to vector<32x128xf32>
    %72 = arith.select %70, %68, %71 : vector<32x128xi1>, vector<32x128xf32>
    %73 = arith.truncf %72 : vector<32x128xf32> to vector<32x128xbf16>
    %c96 = arith.constant 96 : index
    %c0_27 = arith.constant 0 : index
    %74 = vector.load %arg9[%c96, %c0_27] : memref<1264x128xbf16, #tpu.memory_space<vmem>>, vector<32x128xbf16>
    tpu.vector_store %arg9[%c96, %c0_27], %73 {strides = array<i32>} : memref<1264x128xbf16, #tpu.memory_space<vmem>>, vector<32x128xbf16>,
    %c15_i32 = arith.constant 15 : i32
    %75 = tpu.dynamic_rotate %46 by %c15_i32 dim 1 : vector<32x128xf32>, i32 -> vector<32x128xf32>
    %c15_i32_28 = arith.constant 15 : i32
    %76 = vector.broadcast %c15_i32_28 : i32 to vector<32x128xi32>
    %77 = arith.cmpi sge, %16, %76 : vector<32x128xi32>
    %cst_29 = arith.constant 0.000000e+00 : f32
    %78 = vector.broadcast %cst_29 : f32 to vector<32x128xf32>
    %79 = arith.select %77, %75, %78 : vector<32x128xi1>, vector<32x128xf32>
    %80 = arith.truncf %79 : vector<32x128xf32> to vector<32x128xbf16>
    %c128 = arith.constant 128 : index
    %c0_30 = arith.constant 0 : index
    %81 = vector.load %arg9[%c128, %c0_30] : memref<1264x128xbf16, #tpu.memory_space<vmem>>, vector<32x128xbf16>
    tpu.vector_store %arg9[%c128, %c0_30], %80 {strides = array<i32>} : memref<1264x128xbf16, #tpu.memory_space<vmem>>, vector<32x128xbf16>,
    %c14_i32 = arith.constant 14 : i32
    %82 = tpu.dynamic_rotate %46 by %c14_i32 dim 1 : vector<32x128xf32>, i32 -> vector<32x128xf32>
    %c14_i32_31 = arith.constant 14 : i32
    %83 = vector.broadcast %c14_i32_31 : i32 to vector<32x128xi32>
    %84 = arith.cmpi sge, %16, %83 : vector<32x128xi32>
    %cst_32 = arith.constant 0.000000e+00 : f32
    %85 = vector.broadcast %cst_32 : f32 to vector<32x128xf32>
    %86 = arith.select %84, %82, %85 : vector<32x128xi1>, vector<32x128xf32>
    %87 = arith.truncf %86 : vector<32x128xf32> to vector<32x128xbf16>
    %c160 = arith.constant 160 : index
    %c0_33 = arith.constant 0 : index
    %88 = vector.load %arg9[%c160, %c0_33] : memref<1264x128xbf16, #tpu.memory_space<vmem>>, vector<32x128xbf16>
    tpu.vector_store %arg9[%c160, %c0_33], %87 {strides = array<i32>} : memref<1264x128xbf16, #tpu.memory_space<vmem>>, vector<32x128xbf16>,
    %c13_i32 = arith.constant 13 : i32
    %89 = tpu.dynamic_rotate %46 by %c13_i32 dim 1 : vector<32x128xf32>, i32 -> vector<32x128xf32>
    %c13_i32_34 = arith.constant 13 : i32
    %90 = vector.broadcast %c13_i32_34 : i32 to vector<32x128xi32>
    %91 = arith.cmpi sge, %16, %90 : vector<32x128xi32>
    %cst_35 = arith.constant 0.000000e+00 : f32
    %92 = vector.broadcast %cst_35 : f32 to vector<32x128xf32>
    %93 = arith.select %91, %89, %92 : vector<32x128xi1>, vector<32x128xf32>
    %94 = arith.truncf %93 : vector<32x128xf32> to vector<32x128xbf16>
    %c192 = arith.constant 192 : index
    %c0_36 = arith.constant 0 : index
    %95 = vector.load %arg9[%c192, %c0_36] : memref<1264x128xbf16, #tpu.memory_space<vmem>>, vector<32x128xbf16>
    tpu.vector_store %arg9[%c192, %c0_36], %94 {strides = array<i32>} : memref<1264x128xbf16, #tpu.memory_space<vmem>>, vector<32x128xbf16>,
    %c12_i32 = arith.constant 12 : i32
    %96 = tpu.dynamic_rotate %46 by %c12_i32 dim 1 : vector<32x128xf32>, i32 -> vector<32x128xf32>
    %c12_i32_37 = arith.constant 12 : i32
    %97 = vector.broadcast %c12_i32_37 : i32 to vector<32x128xi32>
    %98 = arith.cmpi sge, %16, %97 : vector<32x128xi32>
    %cst_38 = arith.constant 0.000000e+00 : f32
    %99 = vector.broadcast %cst_38 : f32 to vector<32x128xf32>
    %100 = arith.select %98, %96, %99 : vector<32x128xi1>, vector<32x128xf32>
    %101 = arith.truncf %100 : vector<32x128xf32> to vector<32x128xbf16>
    %c224 = arith.constant 224 : index
    %c0_39 = arith.constant 0 : index
    %102 = vector.load %arg9[%c224, %c0_39] : memref<1264x128xbf16, #tpu.memory_space<vmem>>, vector<32x128xbf16>
    tpu.vector_store %arg9[%c224, %c0_39], %101 {strides = array<i32>} : memref<1264x128xbf16, #tpu.memory_space<vmem>>, vector<32x128xbf16>,
    %c11_i32 = arith.constant 11 : i32
    %103 = tpu.dynamic_rotate %46 by %c11_i32 dim 1 : vector<32x128xf32>, i32 -> vector<32x128xf32>
    %c11_i32_40 = arith.constant 11 : i32
    %104 = vector.broadcast %c11_i32_40 : i32 to vector<32x128xi32>
    %105 = arith.cmpi sge, %16, %104 : vector<32x128xi32>
    %cst_41 = arith.constant 0.000000e+00 : f32
    %106 = vector.broadcast %cst_41 : f32 to vector<32x128xf32>
    %107 = arith.select %105, %103, %106 : vector<32x128xi1>, vector<32x128xf32>
    %108 = arith.truncf %107 : vector<32x128xf32> to vector<32x128xbf16>
    %c256 = arith.constant 256 : index
    %c0_42 = arith.constant 0 : index
    %109 = vector.load %arg9[%c256, %c0_42] : memref<1264x128xbf16, #tpu.memory_space<vmem>>, vector<32x128xbf16>
    tpu.vector_store %arg9[%c256, %c0_42], %108 {strides = array<i32>} : memref<1264x128xbf16, #tpu.memory_space<vmem>>, vector<32x128xbf16>,
    %c10_i32 = arith.constant 10 : i32
    %110 = tpu.dynamic_rotate %46 by %c10_i32 dim 1 : vector<32x128xf32>, i32 -> vector<32x128xf32>
    %c10_i32_43 = arith.constant 10 : i32
    %111 = vector.broadcast %c10_i32_43 : i32 to vector<32x128xi32>
    %112 = arith.cmpi sge, %16, %111 : vector<32x128xi32>
    %cst_44 = arith.constant 0.000000e+00 : f32
    %113 = vector.broadcast %cst_44 : f32 to vector<32x128xf32>
    %114 = arith.select %112, %110, %113 : vector<32x128xi1>, vector<32x128xf32>
    %115 = arith.truncf %114 : vector<32x128xf32> to vector<32x128xbf16>
    %c288 = arith.constant 288 : index
    %c0_45 = arith.constant 0 : index
    %116 = vector.load %arg9[%c288, %c0_45] : memref<1264x128xbf16, #tpu.memory_space<vmem>>, vector<32x128xbf16>
    tpu.vector_store %arg9[%c288, %c0_45], %115 {strides = array<i32>} : memref<1264x128xbf16, #tpu.memory_space<vmem>>, vector<32x128xbf16>,
    %c9_i32 = arith.constant 9 : i32
    %117 = tpu.dynamic_rotate %46 by %c9_i32 dim 1 : vector<32x128xf32>, i32 -> vector<32x128xf32>
    %c9_i32_46 = arith.constant 9 : i32
    %118 = vector.broadcast %c9_i32_46 : i32 to vector<32x128xi32>
    %119 = arith.cmpi sge, %16, %118 : vector<32x128xi32>
    %cst_47 = arith.constant 0.000000e+00 : f32
    %120 = vector.broadcast %cst_47 : f32 to vector<32x128xf32>
    %121 = arith.select %119, %117, %120 : vector<32x128xi1>, vector<32x128xf32>
    %122 = arith.truncf %121 : vector<32x128xf32> to vector<32x128xbf16>
    %c320 = arith.constant 320 : index
    %c0_48 = arith.constant 0 : index
    %123 = vector.load %arg9[%c320, %c0_48] : memref<1264x128xbf16, #tpu.memory_space<vmem>>, vector<32x128xbf16>
    tpu.vector_store %arg9[%c320, %c0_48], %122 {strides = array<i32>} : memref<1264x128xbf16, #tpu.memory_space<vmem>>, vector<32x128xbf16>,
    %c8_i32 = arith.constant 8 : i32
    %124 = tpu.dynamic_rotate %46 by %c8_i32 dim 1 : vector<32x128xf32>, i32 -> vector<32x128xf32>
    %c8_i32_49 = arith.constant 8 : i32
    %125 = vector.broadcast %c8_i32_49 : i32 to vector<32x128xi32>
    %126 = arith.cmpi sge, %16, %125 : vector<32x128xi32>
    %cst_50 = arith.constant 0.000000e+00 : f32
    %127 = vector.broadcast %cst_50 : f32 to vector<32x128xf32>
    %128 = arith.select %126, %124, %127 : vector<32x128xi1>, vector<32x128xf32>
    %129 = arith.truncf %128 : vector<32x128xf32> to vector<32x128xbf16>
    %c352 = arith.constant 352 : index
    %c0_51 = arith.constant 0 : index
    %130 = vector.load %arg9[%c352, %c0_51] : memref<1264x128xbf16, #tpu.memory_space<vmem>>, vector<32x128xbf16>
    tpu.vector_store %arg9[%c352, %c0_51], %129 {strides = array<i32>} : memref<1264x128xbf16, #tpu.memory_space<vmem>>, vector<32x128xbf16>,
    %c7_i32 = arith.constant 7 : i32
    %131 = tpu.dynamic_rotate %46 by %c7_i32 dim 1 : vector<32x128xf32>, i32 -> vector<32x128xf32>
    %c7_i32_52 = arith.constant 7 : i32
    %132 = vector.broadcast %c7_i32_52 : i32 to vector<32x128xi32>
    %133 = arith.cmpi sge, %16, %132 : vector<32x128xi32>
    %cst_53 = arith.constant 0.000000e+00 : f32
    %134 = vector.broadcast %cst_53 : f32 to vector<32x128xf32>
    %135 = arith.select %133, %131, %134 : vector<32x128xi1>, vector<32x128xf32>
    %136 = arith.truncf %135 : vector<32x128xf32> to vector<32x128xbf16>
    %c384 = arith.constant 384 : index
    %c0_54 = arith.constant 0 : index
    %137 = vector.load %arg9[%c384, %c0_54] : memref<1264x128xbf16, #tpu.memory_space<vmem>>, vector<32x128xbf16>
    tpu.vector_store %arg9[%c384, %c0_54], %136 {strides = array<i32>} : memref<1264x128xbf16, #tpu.memory_space<vmem>>, vector<32x128xbf16>,
    %c6_i32 = arith.constant 6 : i32
    %138 = tpu.dynamic_rotate %46 by %c6_i32 dim 1 : vector<32x128xf32>, i32 -> vector<32x128xf32>
    %c6_i32_55 = arith.constant 6 : i32
    %139 = vector.broadcast %c6_i32_55 : i32 to vector<32x128xi32>
    %140 = arith.cmpi sge, %16, %139 : vector<32x128xi32>
    %cst_56 = arith.constant 0.000000e+00 : f32
    %141 = vector.broadcast %cst_56 : f32 to vector<32x128xf32>
    %142 = arith.select %140, %138, %141 : vector<32x128xi1>, vector<32x128xf32>
    %143 = arith.truncf %142 : vector<32x128xf32> to vector<32x128xbf16>
    %c416 = arith.constant 416 : index
    %c0_57 = arith.constant 0 : index
    %144 = vector.load %arg9[%c416, %c0_57] : memref<1264x128xbf16, #tpu.memory_space<vmem>>, vector<32x128xbf16>
    tpu.vector_store %arg9[%c416, %c0_57], %143 {strides = array<i32>} : memref<1264x128xbf16, #tpu.memory_space<vmem>>, vector<32x128xbf16>,
    %c5_i32 = arith.constant 5 : i32
    %145 = tpu.dynamic_rotate %46 by %c5_i32 dim 1 : vector<32x128xf32>, i32 -> vector<32x128xf32>
    %c5_i32_58 = arith.constant 5 : i32
    %146 = vector.broadcast %c5_i32_58 : i32 to vector<32x128xi32>
    %147 = arith.cmpi sge, %16, %146 : vector<32x128xi32>
    %cst_59 = arith.constant 0.000000e+00 : f32
    %148 = vector.broadcast %cst_59 : f32 to vector<32x128xf32>
    %149 = arith.select %147, %145, %148 : vector<32x128xi1>, vector<32x128xf32>
    %150 = arith.truncf %149 : vector<32x128xf32> to vector<32x128xbf16>
    %c448 = arith.constant 448 : index
    %c0_60 = arith.constant 0 : index
    %151 = vector.load %arg9[%c448, %c0_60] : memref<1264x128xbf16, #tpu.memory_space<vmem>>, vector<32x128xbf16>
    tpu.vector_store %arg9[%c448, %c0_60], %150 {strides = array<i32>} : memref<1264x128xbf16, #tpu.memory_space<vmem>>, vector<32x128xbf16>,
    %c4_i32 = arith.constant 4 : i32
    %152 = tpu.dynamic_rotate %46 by %c4_i32 dim 1 : vector<32x128xf32>, i32 -> vector<32x128xf32>
    %c4_i32_61 = arith.constant 4 : i32
    %153 = vector.broadcast %c4_i32_61 : i32 to vector<32x128xi32>
    %154 = arith.cmpi sge, %16, %153 : vector<32x128xi32>
    %cst_62 = arith.constant 0.000000e+00 : f32
    %155 = vector.broadcast %cst_62 : f32 to vector<32x128xf32>
    %156 = arith.select %154, %152, %155 : vector<32x128xi1>, vector<32x128xf32>
    %157 = arith.truncf %156 : vector<32x128xf32> to vector<32x128xbf16>
    %c480 = arith.constant 480 : index
    %c0_63 = arith.constant 0 : index
    %158 = vector.load %arg9[%c480, %c0_63] : memref<1264x128xbf16, #tpu.memory_space<vmem>>, vector<32x128xbf16>
    tpu.vector_store %arg9[%c480, %c0_63], %157 {strides = array<i32>} : memref<1264x128xbf16, #tpu.memory_space<vmem>>, vector<32x128xbf16>,
    %c3_i32 = arith.constant 3 : i32
    %159 = tpu.dynamic_rotate %46 by %c3_i32 dim 1 : vector<32x128xf32>, i32 -> vector<32x128xf32>
    %c3_i32_64 = arith.constant 3 : i32
    %160 = vector.broadcast %c3_i32_64 : i32 to vector<32x128xi32>
    %161 = arith.cmpi sge, %16, %160 : vector<32x128xi32>
    %cst_65 = arith.constant 0.000000e+00 : f32
    %162 = vector.broadcast %cst_65 : f32 to vector<32x128xf32>
    %163 = arith.select %161, %159, %162 : vector<32x128xi1>, vector<32x128xf32>
    %164 = arith.truncf %163 : vector<32x128xf32> to vector<32x128xbf16>
    %c512 = arith.constant 512 : index
    %c0_66 = arith.constant 0 : index
    %165 = vector.load %arg9[%c512, %c0_66] : memref<1264x128xbf16, #tpu.memory_space<vmem>>, vector<32x128xbf16>
    tpu.vector_store %arg9[%c512, %c0_66], %164 {strides = array<i32>} : memref<1264x128xbf16, #tpu.memory_space<vmem>>, vector<32x128xbf16>,
    %c2_i32 = arith.constant 2 : i32
    %166 = tpu.dynamic_rotate %46 by %c2_i32 dim 1 : vector<32x128xf32>, i32 -> vector<32x128xf32>
    %c2_i32_67 = arith.constant 2 : i32
    %167 = vector.broadcast %c2_i32_67 : i32 to vector<32x128xi32>
    %168 = arith.cmpi sge, %16, %167 : vector<32x128xi32>
    %cst_68 = arith.constant 0.000000e+00 : f32
    %169 = vector.broadcast %cst_68 : f32 to vector<32x128xf32>
    %170 = arith.select %168, %166, %169 : vector<32x128xi1>, vector<32x128xf32>
    %171 = arith.truncf %170 : vector<32x128xf32> to vector<32x128xbf16>
    %c544 = arith.constant 544 : index
    %c0_69 = arith.constant 0 : index
    %172 = vector.load %arg9[%c544, %c0_69] : memref<1264x128xbf16, #tpu.memory_space<vmem>>, vector<32x128xbf16>
    tpu.vector_store %arg9[%c544, %c0_69], %171 {strides = array<i32>} : memref<1264x128xbf16, #tpu.memory_space<vmem>>, vector<32x128xbf16>,
    %c1_i32_70 = arith.constant 1 : i32
    %173 = tpu.dynamic_rotate %46 by %c1_i32_70 dim 1 : vector<32x128xf32>, i32 -> vector<32x128xf32>
    %c1_i32_71 = arith.constant 1 : i32
    %174 = vector.broadcast %c1_i32_71 : i32 to vector<32x128xi32>
    %175 = arith.cmpi sge, %16, %174 : vector<32x128xi32>
    %cst_72 = arith.constant 0.000000e+00 : f32
    %176 = vector.broadcast %cst_72 : f32 to vector<32x128xf32>
    %177 = arith.select %175, %173, %176 : vector<32x128xi1>, vector<32x128xf32>
    %178 = arith.truncf %177 : vector<32x128xf32> to vector<32x128xbf16>
    %c576 = arith.constant 576 : index
    %c0_73 = arith.constant 0 : index
    %179 = vector.load %arg9[%c576, %c0_73] : memref<1264x128xbf16, #tpu.memory_space<vmem>>, vector<32x128xbf16>
    tpu.vector_store %arg9[%c576, %c0_73], %178 {strides = array<i32>} : memref<1264x128xbf16, #tpu.memory_space<vmem>>, vector<32x128xbf16>,
    %180 = arith.truncf %46 : vector<32x128xf32> to vector<32x128xbf16>
    %c608 = arith.constant 608 : index
    %c0_74 = arith.constant 0 : index
    %181 = vector.load %arg9[%c608, %c0_74] : memref<1264x128xbf16, #tpu.memory_space<vmem>>, vector<32x128xbf16>
    tpu.vector_store %arg9[%c608, %c0_74], %180 {strides = array<i32>} : memref<1264x128xbf16, #tpu.memory_space<vmem>>, vector<32x128xbf16>,
    %c127_i32 = arith.constant 127 : i32
    %182 = tpu.dynamic_rotate %46 by %c127_i32 dim 1 : vector<32x128xf32>, i32 -> vector<32x128xf32>
    %c63_i32_75 = arith.constant 63 : i32
    %183 = vector.broadcast %c63_i32_75 : i32 to vector<32x128xi32>
    %184 = arith.cmpi slt, %16, %183 : vector<32x128xi32>
    %cst_76 = arith.constant 0.000000e+00 : f32
    %185 = vector.broadcast %cst_76 : f32 to vector<32x128xf32>
    %186 = arith.select %184, %182, %185 : vector<32x128xi1>, vector<32x128xf32>
    %187 = arith.truncf %186 : vector<32x128xf32> to vector<32x128xbf16>
    %c640 = arith.constant 640 : index
    %c0_77 = arith.constant 0 : index
    %188 = vector.load %arg9[%c640, %c0_77] : memref<1264x128xbf16, #tpu.memory_space<vmem>>, vector<32x128xbf16>
    tpu.vector_store %arg9[%c640, %c0_77], %187 {strides = array<i32>} : memref<1264x128xbf16, #tpu.memory_space<vmem>>, vector<32x128xbf16>,
    %c126_i32 = arith.constant 126 : i32
    %189 = tpu.dynamic_rotate %46 by %c126_i32 dim 1 : vector<32x128xf32>, i32 -> vector<32x128xf32>
    %c62_i32 = arith.constant 62 : i32
    %190 = vector.broadcast %c62_i32 : i32 to vector<32x128xi32>
    %191 = arith.cmpi slt, %16, %190 : vector<32x128xi32>
    %cst_78 = arith.constant 0.000000e+00 : f32
    %192 = vector.broadcast %cst_78 : f32 to vector<32x128xf32>
    %193 = arith.select %191, %189, %192 : vector<32x128xi1>, vector<32x128xf32>
    %194 = arith.truncf %193 : vector<32x128xf32> to vector<32x128xbf16>
    %c672 = arith.constant 672 : index
    %c0_79 = arith.constant 0 : index
    %195 = vector.load %arg9[%c672, %c0_79] : memref<1264x128xbf16, #tpu.memory_space<vmem>>, vector<32x128xbf16>
    tpu.vector_store %arg9[%c672, %c0_79], %194 {strides = array<i32>} : memref<1264x128xbf16, #tpu.memory_space<vmem>>, vector<32x128xbf16>,
    %c125_i32 = arith.constant 125 : i32
    %196 = tpu.dynamic_rotate %46 by %c125_i32 dim 1 : vector<32x128xf32>, i32 -> vector<32x128xf32>
    %c61_i32 = arith.constant 61 : i32
    %197 = vector.broadcast %c61_i32 : i32 to vector<32x128xi32>
    %198 = arith.cmpi slt, %16, %197 : vector<32x128xi32>
    %cst_80 = arith.constant 0.000000e+00 : f32
    %199 = vector.broadcast %cst_80 : f32 to vector<32x128xf32>
    %200 = arith.select %198, %196, %199 : vector<32x128xi1>, vector<32x128xf32>
    %201 = arith.truncf %200 : vector<32x128xf32> to vector<32x128xbf16>
    %c704 = arith.constant 704 : index
    %c0_81 = arith.constant 0 : index
    %202 = vector.load %arg9[%c704, %c0_81] : memref<1264x128xbf16, #tpu.memory_space<vmem>>, vector<32x128xbf16>
    tpu.vector_store %arg9[%c704, %c0_81], %201 {strides = array<i32>} : memref<1264x128xbf16, #tpu.memory_space<vmem>>, vector<32x128xbf16>,
    %c124_i32 = arith.constant 124 : i32
    %203 = tpu.dynamic_rotate %46 by %c124_i32 dim 1 : vector<32x128xf32>, i32 -> vector<32x128xf32>
    %c60_i32 = arith.constant 60 : i32
    %204 = vector.broadcast %c60_i32 : i32 to vector<32x128xi32>
    %205 = arith.cmpi slt, %16, %204 : vector<32x128xi32>
    %cst_82 = arith.constant 0.000000e+00 : f32
    %206 = vector.broadcast %cst_82 : f32 to vector<32x128xf32>
    %207 = arith.select %205, %203, %206 : vector<32x128xi1>, vector<32x128xf32>
    %208 = arith.truncf %207 : vector<32x128xf32> to vector<32x128xbf16>
    %c736 = arith.constant 736 : index
    %c0_83 = arith.constant 0 : index
    %209 = vector.load %arg9[%c736, %c0_83] : memref<1264x128xbf16, #tpu.memory_space<vmem>>, vector<32x128xbf16>
    tpu.vector_store %arg9[%c736, %c0_83], %208 {strides = array<i32>} : memref<1264x128xbf16, #tpu.memory_space<vmem>>, vector<32x128xbf16>,
    %c123_i32 = arith.constant 123 : i32
    %210 = tpu.dynamic_rotate %46 by %c123_i32 dim 1 : vector<32x128xf32>, i32 -> vector<32x128xf32>
    %c59_i32 = arith.constant 59 : i32
    %211 = vector.broadcast %c59_i32 : i32 to vector<32x128xi32>
    %212 = arith.cmpi slt, %16, %211 : vector<32x128xi32>
    %cst_84 = arith.constant 0.000000e+00 : f32
    %213 = vector.broadcast %cst_84 : f32 to vector<32x128xf32>
    %214 = arith.select %212, %210, %213 : vector<32x128xi1>, vector<32x128xf32>
    %215 = arith.truncf %214 : vector<32x128xf32> to vector<32x128xbf16>
    %c768 = arith.constant 768 : index
    %c0_85 = arith.constant 0 : index
    %216 = vector.load %arg9[%c768, %c0_85] : memref<1264x128xbf16, #tpu.memory_space<vmem>>, vector<32x128xbf16>
    tpu.vector_store %arg9[%c768, %c0_85], %215 {strides = array<i32>} : memref<1264x128xbf16, #tpu.memory_space<vmem>>, vector<32x128xbf16>,
    %c122_i32 = arith.constant 122 : i32
    %217 = tpu.dynamic_rotate %46 by %c122_i32 dim 1 : vector<32x128xf32>, i32 -> vector<32x128xf32>
    %c58_i32 = arith.constant 58 : i32
    %218 = vector.broadcast %c58_i32 : i32 to vector<32x128xi32>
    %219 = arith.cmpi slt, %16, %218 : vector<32x128xi32>
    %cst_86 = arith.constant 0.000000e+00 : f32
    %220 = vector.broadcast %cst_86 : f32 to vector<32x128xf32>
    %221 = arith.select %219, %217, %220 : vector<32x128xi1>, vector<32x128xf32>
    %222 = arith.truncf %221 : vector<32x128xf32> to vector<32x128xbf16>
    %c800 = arith.constant 800 : index
    %c0_87 = arith.constant 0 : index
    %223 = vector.load %arg9[%c800, %c0_87] : memref<1264x128xbf16, #tpu.memory_space<vmem>>, vector<32x128xbf16>
    tpu.vector_store %arg9[%c800, %c0_87], %222 {strides = array<i32>} : memref<1264x128xbf16, #tpu.memory_space<vmem>>, vector<32x128xbf16>,
    %c121_i32 = arith.constant 121 : i32
    %224 = tpu.dynamic_rotate %46 by %c121_i32 dim 1 : vector<32x128xf32>, i32 -> vector<32x128xf32>
    %c57_i32 = arith.constant 57 : i32
    %225 = vector.broadcast %c57_i32 : i32 to vector<32x128xi32>
    %226 = arith.cmpi slt, %16, %225 : vector<32x128xi32>
    %cst_88 = arith.constant 0.000000e+00 : f32
    %227 = vector.broadcast %cst_88 : f32 to vector<32x128xf32>
    %228 = arith.select %226, %224, %227 : vector<32x128xi1>, vector<32x128xf32>
    %229 = arith.truncf %228 : vector<32x128xf32> to vector<32x128xbf16>
    %c832 = arith.constant 832 : index
    %c0_89 = arith.constant 0 : index
    %230 = vector.load %arg9[%c832, %c0_89] : memref<1264x128xbf16, #tpu.memory_space<vmem>>, vector<32x128xbf16>
    tpu.vector_store %arg9[%c832, %c0_89], %229 {strides = array<i32>} : memref<1264x128xbf16, #tpu.memory_space<vmem>>, vector<32x128xbf16>,
    %c120_i32 = arith.constant 120 : i32
    %231 = tpu.dynamic_rotate %46 by %c120_i32 dim 1 : vector<32x128xf32>, i32 -> vector<32x128xf32>
    %c56_i32 = arith.constant 56 : i32
    %232 = vector.broadcast %c56_i32 : i32 to vector<32x128xi32>
    %233 = arith.cmpi slt, %16, %232 : vector<32x128xi32>
    %cst_90 = arith.constant 0.000000e+00 : f32
    %234 = vector.broadcast %cst_90 : f32 to vector<32x128xf32>
    %235 = arith.select %233, %231, %234 : vector<32x128xi1>, vector<32x128xf32>
    %236 = arith.truncf %235 : vector<32x128xf32> to vector<32x128xbf16>
    %c864 = arith.constant 864 : index
    %c0_91 = arith.constant 0 : index
    %237 = vector.load %arg9[%c864, %c0_91] : memref<1264x128xbf16, #tpu.memory_space<vmem>>, vector<32x128xbf16>
    tpu.vector_store %arg9[%c864, %c0_91], %236 {strides = array<i32>} : memref<1264x128xbf16, #tpu.memory_space<vmem>>, vector<32x128xbf16>,
    %c119_i32 = arith.constant 119 : i32
    %238 = tpu.dynamic_rotate %46 by %c119_i32 dim 1 : vector<32x128xf32>, i32 -> vector<32x128xf32>
    %c55_i32 = arith.constant 55 : i32
    %239 = vector.broadcast %c55_i32 : i32 to vector<32x128xi32>
    %240 = arith.cmpi slt, %16, %239 : vector<32x128xi32>
    %cst_92 = arith.constant 0.000000e+00 : f32
    %241 = vector.broadcast %cst_92 : f32 to vector<32x128xf32>
    %242 = arith.select %240, %238, %241 : vector<32x128xi1>, vector<32x128xf32>
    %243 = arith.truncf %242 : vector<32x128xf32> to vector<32x128xbf16>
    %c896 = arith.constant 896 : index
    %c0_93 = arith.constant 0 : index
    %244 = vector.load %arg9[%c896, %c0_93] : memref<1264x128xbf16, #tpu.memory_space<vmem>>, vector<32x128xbf16>
    tpu.vector_store %arg9[%c896, %c0_93], %243 {strides = array<i32>} : memref<1264x128xbf16, #tpu.memory_space<vmem>>, vector<32x128xbf16>,
    %c118_i32 = arith.constant 118 : i32
    %245 = tpu.dynamic_rotate %46 by %c118_i32 dim 1 : vector<32x128xf32>, i32 -> vector<32x128xf32>
    %c54_i32 = arith.constant 54 : i32
    %246 = vector.broadcast %c54_i32 : i32 to vector<32x128xi32>
    %247 = arith.cmpi slt, %16, %246 : vector<32x128xi32>
    %cst_94 = arith.constant 0.000000e+00 : f32
    %248 = vector.broadcast %cst_94 : f32 to vector<32x128xf32>
    %249 = arith.select %247, %245, %248 : vector<32x128xi1>, vector<32x128xf32>
    %250 = arith.truncf %249 : vector<32x128xf32> to vector<32x128xbf16>
    %c928 = arith.constant 928 : index
    %c0_95 = arith.constant 0 : index
    %251 = vector.load %arg9[%c928, %c0_95] : memref<1264x128xbf16, #tpu.memory_space<vmem>>, vector<32x128xbf16>
    tpu.vector_store %arg9[%c928, %c0_95], %250 {strides = array<i32>} : memref<1264x128xbf16, #tpu.memory_space<vmem>>, vector<32x128xbf16>,
    %c117_i32 = arith.constant 117 : i32
    %252 = tpu.dynamic_rotate %46 by %c117_i32 dim 1 : vector<32x128xf32>, i32 -> vector<32x128xf32>
    %c53_i32 = arith.constant 53 : i32
    %253 = vector.broadcast %c53_i32 : i32 to vector<32x128xi32>
    %254 = arith.cmpi slt, %16, %253 : vector<32x128xi32>
    %cst_96 = arith.constant 0.000000e+00 : f32
    %255 = vector.broadcast %cst_96 : f32 to vector<32x128xf32>
    %256 = arith.select %254, %252, %255 : vector<32x128xi1>, vector<32x128xf32>
    %257 = arith.truncf %256 : vector<32x128xf32> to vector<32x128xbf16>
    %c960 = arith.constant 960 : index
    %c0_97 = arith.constant 0 : index
    %258 = vector.load %arg9[%c960, %c0_97] : memref<1264x128xbf16, #tpu.memory_space<vmem>>, vector<32x128xbf16>
    tpu.vector_store %arg9[%c960, %c0_97], %257 {strides = array<i32>} : memref<1264x128xbf16, #tpu.memory_space<vmem>>, vector<32x128xbf16>,
    %c116_i32 = arith.constant 116 : i32
    %259 = tpu.dynamic_rotate %46 by %c116_i32 dim 1 : vector<32x128xf32>, i32 -> vector<32x128xf32>
    %c52_i32 = arith.constant 52 : i32
    %260 = vector.broadcast %c52_i32 : i32 to vector<32x128xi32>
    %261 = arith.cmpi slt, %16, %260 : vector<32x128xi32>
    %cst_98 = arith.constant 0.000000e+00 : f32
    %262 = vector.broadcast %cst_98 : f32 to vector<32x128xf32>
    %263 = arith.select %261, %259, %262 : vector<32x128xi1>, vector<32x128xf32>
    %264 = arith.truncf %263 : vector<32x128xf32> to vector<32x128xbf16>
    %c992 = arith.constant 992 : index
    %c0_99 = arith.constant 0 : index
    %265 = vector.load %arg9[%c992, %c0_99] : memref<1264x128xbf16, #tpu.memory_space<vmem>>, vector<32x128xbf16>
    tpu.vector_store %arg9[%c992, %c0_99], %264 {strides = array<i32>} : memref<1264x128xbf16, #tpu.memory_space<vmem>>, vector<32x128xbf16>,
    %c115_i32 = arith.constant 115 : i32
    %266 = tpu.dynamic_rotate %46 by %c115_i32 dim 1 : vector<32x128xf32>, i32 -> vector<32x128xf32>
    %c51_i32 = arith.constant 51 : i32
    %267 = vector.broadcast %c51_i32 : i32 to vector<32x128xi32>
    %268 = arith.cmpi slt, %16, %267 : vector<32x128xi32>
    %cst_100 = arith.constant 0.000000e+00 : f32
    %269 = vector.broadcast %cst_100 : f32 to vector<32x128xf32>
    %270 = arith.select %268, %266, %269 : vector<32x128xi1>, vector<32x128xf32>
    %271 = arith.truncf %270 : vector<32x128xf32> to vector<32x128xbf16>
    %c1024 = arith.constant 1024 : index
    %c0_101 = arith.constant 0 : index
    %272 = vector.load %arg9[%c1024, %c0_101] : memref<1264x128xbf16, #tpu.memory_space<vmem>>, vector<32x128xbf16>
    tpu.vector_store %arg9[%c1024, %c0_101], %271 {strides = array<i32>} : memref<1264x128xbf16, #tpu.memory_space<vmem>>, vector<32x128xbf16>,
    %c114_i32 = arith.constant 114 : i32
    %273 = tpu.dynamic_rotate %46 by %c114_i32 dim 1 : vector<32x128xf32>, i32 -> vector<32x128xf32>
    %c50_i32 = arith.constant 50 : i32
    %274 = vector.broadcast %c50_i32 : i32 to vector<32x128xi32>
    %275 = arith.cmpi slt, %16, %274 : vector<32x128xi32>
    %cst_102 = arith.constant 0.000000e+00 : f32
    %276 = vector.broadcast %cst_102 : f32 to vector<32x128xf32>
    %277 = arith.select %275, %273, %276 : vector<32x128xi1>, vector<32x128xf32>
    %278 = arith.truncf %277 : vector<32x128xf32> to vector<32x128xbf16>
    %c1056 = arith.constant 1056 : index
    %c0_103 = arith.constant 0 : index
    %279 = vector.load %arg9[%c1056, %c0_103] : memref<1264x128xbf16, #tpu.memory_space<vmem>>, vector<32x128xbf16>
    tpu.vector_store %arg9[%c1056, %c0_103], %278 {strides = array<i32>} : memref<1264x128xbf16, #tpu.memory_space<vmem>>, vector<32x128xbf16>,
    %c113_i32 = arith.constant 113 : i32
    %280 = tpu.dynamic_rotate %46 by %c113_i32 dim 1 : vector<32x128xf32>, i32 -> vector<32x128xf32>
    %c49_i32 = arith.constant 49 : i32
    %281 = vector.broadcast %c49_i32 : i32 to vector<32x128xi32>
    %282 = arith.cmpi slt, %16, %281 : vector<32x128xi32>
    %cst_104 = arith.constant 0.000000e+00 : f32
    %283 = vector.broadcast %cst_104 : f32 to vector<32x128xf32>
    %284 = arith.select %282, %280, %283 : vector<32x128xi1>, vector<32x128xf32>
    %285 = arith.truncf %284 : vector<32x128xf32> to vector<32x128xbf16>
    %c1088 = arith.constant 1088 : index
    %c0_105 = arith.constant 0 : index
    %286 = vector.load %arg9[%c1088, %c0_105] : memref<1264x128xbf16, #tpu.memory_space<vmem>>, vector<32x128xbf16>
    tpu.vector_store %arg9[%c1088, %c0_105], %285 {strides = array<i32>} : memref<1264x128xbf16, #tpu.memory_space<vmem>>, vector<32x128xbf16>,
    %c112_i32 = arith.constant 112 : i32
    %287 = tpu.dynamic_rotate %46 by %c112_i32 dim 1 : vector<32x128xf32>, i32 -> vector<32x128xf32>
    %c48_i32 = arith.constant 48 : i32
    %288 = vector.broadcast %c48_i32 : i32 to vector<32x128xi32>
    %289 = arith.cmpi slt, %16, %288 : vector<32x128xi32>
    %cst_106 = arith.constant 0.000000e+00 : f32
    %290 = vector.broadcast %cst_106 : f32 to vector<32x128xf32>
    %291 = arith.select %289, %287, %290 : vector<32x128xi1>, vector<32x128xf32>
    %292 = arith.truncf %291 : vector<32x128xf32> to vector<32x128xbf16>
    %c1120 = arith.constant 1120 : index
    %c0_107 = arith.constant 0 : index
    %293 = vector.load %arg9[%c1120, %c0_107] : memref<1264x128xbf16, #tpu.memory_space<vmem>>, vector<32x128xbf16>
    tpu.vector_store %arg9[%c1120, %c0_107], %292 {strides = array<i32>} : memref<1264x128xbf16, #tpu.memory_space<vmem>>, vector<32x128xbf16>,
    %c111_i32 = arith.constant 111 : i32
    %294 = tpu.dynamic_rotate %46 by %c111_i32 dim 1 : vector<32x128xf32>, i32 -> vector<32x128xf32>
    %c47_i32 = arith.constant 47 : i32
    %295 = vector.broadcast %c47_i32 : i32 to vector<32x128xi32>
    %296 = arith.cmpi slt, %16, %295 : vector<32x128xi32>
    %cst_108 = arith.constant 0.000000e+00 : f32
    %297 = vector.broadcast %cst_108 : f32 to vector<32x128xf32>
    %298 = arith.select %296, %294, %297 : vector<32x128xi1>, vector<32x128xf32>
    %299 = arith.truncf %298 : vector<32x128xf32> to vector<32x128xbf16>
    %c1152 = arith.constant 1152 : index
    %c0_109 = arith.constant 0 : index
    %300 = vector.load %arg9[%c1152, %c0_109] : memref<1264x128xbf16, #tpu.memory_space<vmem>>, vector<32x128xbf16>
    tpu.vector_store %arg9[%c1152, %c0_109], %299 {strides = array<i32>} : memref<1264x128xbf16, #tpu.memory_space<vmem>>, vector<32x128xbf16>,
    %c110_i32 = arith.constant 110 : i32
    %301 = tpu.dynamic_rotate %46 by %c110_i32 dim 1 : vector<32x128xf32>, i32 -> vector<32x128xf32>
    %c46_i32 = arith.constant 46 : i32
    %302 = vector.broadcast %c46_i32 : i32 to vector<32x128xi32>
    %303 = arith.cmpi slt, %16, %302 : vector<32x128xi32>
    %cst_110 = arith.constant 0.000000e+00 : f32
    %304 = vector.broadcast %cst_110 : f32 to vector<32x128xf32>
    %305 = arith.select %303, %301, %304 : vector<32x128xi1>, vector<32x128xf32>
    %306 = arith.truncf %305 : vector<32x128xf32> to vector<32x128xbf16>
    %c1184 = arith.constant 1184 : index
    %c0_111 = arith.constant 0 : index
    %307 = vector.load %arg9[%c1184, %c0_111] : memref<1264x128xbf16, #tpu.memory_space<vmem>>, vector<32x128xbf16>
    tpu.vector_store %arg9[%c1184, %c0_111], %306 {strides = array<i32>} : memref<1264x128xbf16, #tpu.memory_space<vmem>>, vector<32x128xbf16>,
    %c109_i32 = arith.constant 109 : i32
    %308 = tpu.dynamic_rotate %46 by %c109_i32 dim 1 : vector<32x128xf32>, i32 -> vector<32x128xf32>
    %c45_i32 = arith.constant 45 : i32
    %309 = vector.broadcast %c45_i32 : i32 to vector<32x128xi32>
    %310 = arith.cmpi slt, %16, %309 : vector<32x128xi32>
    %cst_112 = arith.constant 0.000000e+00 : f32
    %311 = vector.broadcast %cst_112 : f32 to vector<32x128xf32>
    %312 = arith.select %310, %308, %311 : vector<32x128xi1>, vector<32x128xf32>
    %313 = arith.truncf %312 : vector<32x128xf32> to vector<32x128xbf16>
    %c1216 = arith.constant 1216 : index
    %c0_113 = arith.constant 0 : index
    %314 = vector.load %arg9[%c1216, %c0_113] : memref<1264x128xbf16, #tpu.memory_space<vmem>>, vector<32x128xbf16>
    tpu.vector_store %arg9[%c1216, %c0_113], %313 {strides = array<i32>} : memref<1264x128xbf16, #tpu.memory_space<vmem>>, vector<32x128xbf16>,
    %c1_i32_114 = arith.constant 1 : i32
    %315 = tpu.dynamic_rotate %38 by %c1_i32_114 dim 1 : vector<16x128xf32>, i32 -> vector<16x128xf32>
    %cst_115 = arith.constant -3.40282347E+38 : f32
    %316 = vector.broadcast %cst_115 : f32 to vector<16x128xf32>
    %317 = arith.select %35, %315, %316 : vector<16x128xi1>, vector<16x128xf32>
    %c127_i32_116 = arith.constant 127 : i32
    %318 = tpu.dynamic_rotate %38 by %c127_i32_116 dim 1 : vector<16x128xf32>, i32 -> vector<16x128xf32>
    %cst_117 = arith.constant -3.40282347E+38 : f32
    %319 = vector.broadcast %cst_117 : f32 to vector<16x128xf32>
    %320 = arith.select %37, %318, %319 : vector<16x128xi1>, vector<16x128xf32>
    %321 = arith.maximumf %317, %320 : vector<16x128xf32>
    %322 = arith.maximumf %38, %321 : vector<16x128xf32>
    %323 = arith.truncf %322 : vector<16x128xf32> to vector<16x128xbf16>
    %c1248 = arith.constant 1248 : index
    %c0_118 = arith.constant 0 : index
    %324 = vector.load %arg9[%c1248, %c0_118] : memref<1264x128xbf16, #tpu.memory_space<vmem>>, vector<16x128xbf16>
    tpu.vector_store %arg9[%c1248, %c0_118], %323 {strides = array<i32>} : memref<1264x128xbf16, #tpu.memory_space<vmem>>, vector<16x128xbf16>,
    %c0_119 = arith.constant 0 : index
    %c0_120 = arith.constant 0 : index
    %c0_121 = arith.constant 0 : index
    %325 = vector.load %arg4[%c0_119, %c0_120, %c0_121] : memref<3x48x1264xbf16, #tpu.memory_space<vmem>>, vector<1x48x1264xbf16>
    %326 = vector.shape_cast %325 : vector<1x48x1264xbf16> to vector<48x1264xbf16>
    %c0_122 = arith.constant 0 : index
    %c0_123 = arith.constant 0 : index
    %327 = vector.load %arg9[%c0_122, %c0_123] : memref<1264x128xbf16, #tpu.memory_space<vmem>>, vector<1264x128xbf16>
    %cst_124 = arith.constant dense<0.000000e+00> : vector<48x128xf32>
    %328 = tpu.matmul %326, %327, %cst_124 {dimension_numbers = #tpu.dot_dimension_numbers<[1], [0], [0], [1], [0, 0, 1, 1], [], []>} : vector<48x1264xbf16>, vector<1264x128xbf16>, vector<48x128xf32> -> vector<48x128xf32>
    %c0_125 = arith.constant 0 : index
    %c0_126 = arith.constant 0 : index
    %c0_127 = arith.constant 0 : index
    %329 = vector.load %arg5[%c0_125, %c0_126, %c0_127] : memref<3x48x1xf32, #tpu.memory_space<vmem>>, vector<1x48x1xf32>
    %330 = vector.shape_cast %329 : vector<1x48x1xf32> to vector<48x1xf32>
    %331 = vector.broadcast %330 : vector<48x1xf32> to vector<48x128xf32>
    %332 = arith.addf %328, %331 : vector<48x128xf32>
    %333 = vector.extract_strided_slice %332 {offsets = [0, 0], sizes = [16, 128], strides = [1, 1]} : vector<48x128xf32> to vector<16x128xf32>
    %334 = vector.extract_strided_slice %332 {offsets = [16, 0], sizes = [32, 128], strides = [1, 1]} : vector<48x128xf32> to vector<32x128xf32>
    %c19_i32_128 = arith.constant 19 : i32
    %335 = tpu.dynamic_rotate %334 by %c19_i32_128 dim 1 : vector<32x128xf32>, i32 -> vector<32x128xf32>
    %c19_i32_129 = arith.constant 19 : i32
    %336 = vector.broadcast %c19_i32_129 : i32 to vector<32x128xi32>
    %337 = arith.cmpi sge, %16, %336 : vector<32x128xi32>
    %cst_130 = arith.constant 0.000000e+00 : f32
    %338 = vector.broadcast %cst_130 : f32 to vector<32x128xf32>
    %339 = arith.select %337, %335, %338 : vector<32x128xi1>, vector<32x128xf32>
    %340 = arith.truncf %339 : vector<32x128xf32> to vector<32x128xbf16>
    %c0_131 = arith.constant 0 : index
    %c0_132 = arith.constant 0 : index
    %341 = vector.load %arg9[%c0_131, %c0_132] : memref<1264x128xbf16, #tpu.memory_space<vmem>>, vector<32x128xbf16>
    tpu.vector_store %arg9[%c0_131, %c0_132], %340 {strides = array<i32>} : memref<1264x128xbf16, #tpu.memory_space<vmem>>, vector<32x128xbf16>,
    %c18_i32_133 = arith.constant 18 : i32
    %342 = tpu.dynamic_rotate %334 by %c18_i32_133 dim 1 : vector<32x128xf32>, i32 -> vector<32x128xf32>
    %c18_i32_134 = arith.constant 18 : i32
    %343 = vector.broadcast %c18_i32_134 : i32 to vector<32x128xi32>
    %344 = arith.cmpi sge, %16, %343 : vector<32x128xi32>
    %cst_135 = arith.constant 0.000000e+00 : f32
    %345 = vector.broadcast %cst_135 : f32 to vector<32x128xf32>
    %346 = arith.select %344, %342, %345 : vector<32x128xi1>, vector<32x128xf32>
    %347 = arith.truncf %346 : vector<32x128xf32> to vector<32x128xbf16>
    %c32_136 = arith.constant 32 : index
    %c0_137 = arith.constant 0 : index
    %348 = vector.load %arg9[%c32_136, %c0_137] : memref<1264x128xbf16, #tpu.memory_space<vmem>>, vector<32x128xbf16>
    tpu.vector_store %arg9[%c32_136, %c0_137], %347 {strides = array<i32>} : memref<1264x128xbf16, #tpu.memory_space<vmem>>, vector<32x128xbf16>,
    %c17_i32_138 = arith.constant 17 : i32
    %349 = tpu.dynamic_rotate %334 by %c17_i32_138 dim 1 : vector<32x128xf32>, i32 -> vector<32x128xf32>
    %c17_i32_139 = arith.constant 17 : i32
    %350 = vector.broadcast %c17_i32_139 : i32 to vector<32x128xi32>
    %351 = arith.cmpi sge, %16, %350 : vector<32x128xi32>
    %cst_140 = arith.constant 0.000000e+00 : f32
    %352 = vector.broadcast %cst_140 : f32 to vector<32x128xf32>
    %353 = arith.select %351, %349, %352 : vector<32x128xi1>, vector<32x128xf32>
    %354 = arith.truncf %353 : vector<32x128xf32> to vector<32x128xbf16>
    %c64_141 = arith.constant 64 : index
    %c0_142 = arith.constant 0 : index
    %355 = vector.load %arg9[%c64_141, %c0_142] : memref<1264x128xbf16, #tpu.memory_space<vmem>>, vector<32x128xbf16>
    tpu.vector_store %arg9[%c64_141, %c0_142], %354 {strides = array<i32>} : memref<1264x128xbf16, #tpu.memory_space<vmem>>, vector<32x128xbf16>,
    %c16_i32_143 = arith.constant 16 : i32
    %356 = tpu.dynamic_rotate %334 by %c16_i32_143 dim 1 : vector<32x128xf32>, i32 -> vector<32x128xf32>
    %c16_i32_144 = arith.constant 16 : i32
    %357 = vector.broadcast %c16_i32_144 : i32 to vector<32x128xi32>
    %358 = arith.cmpi sge, %16, %357 : vector<32x128xi32>
    %cst_145 = arith.constant 0.000000e+00 : f32
    %359 = vector.broadcast %cst_145 : f32 to vector<32x128xf32>
    %360 = arith.select %358, %356, %359 : vector<32x128xi1>, vector<32x128xf32>
    %361 = arith.truncf %360 : vector<32x128xf32> to vector<32x128xbf16>
    %c96_146 = arith.constant 96 : index
    %c0_147 = arith.constant 0 : index
    %362 = vector.load %arg9[%c96_146, %c0_147] : memref<1264x128xbf16, #tpu.memory_space<vmem>>, vector<32x128xbf16>
    tpu.vector_store %arg9[%c96_146, %c0_147], %361 {strides = array<i32>} : memref<1264x128xbf16, #tpu.memory_space<vmem>>, vector<32x128xbf16>,
    %c15_i32_148 = arith.constant 15 : i32
    %363 = tpu.dynamic_rotate %334 by %c15_i32_148 dim 1 : vector<32x128xf32>, i32 -> vector<32x128xf32>
    %c15_i32_149 = arith.constant 15 : i32
    %364 = vector.broadcast %c15_i32_149 : i32 to vector<32x128xi32>
    %365 = arith.cmpi sge, %16, %364 : vector<32x128xi32>
    %cst_150 = arith.constant 0.000000e+00 : f32
    %366 = vector.broadcast %cst_150 : f32 to vector<32x128xf32>
    %367 = arith.select %365, %363, %366 : vector<32x128xi1>, vector<32x128xf32>
    %368 = arith.truncf %367 : vector<32x128xf32> to vector<32x128xbf16>
    %c128_151 = arith.constant 128 : index
    %c0_152 = arith.constant 0 : index
    %369 = vector.load %arg9[%c128_151, %c0_152] : memref<1264x128xbf16, #tpu.memory_space<vmem>>, vector<32x128xbf16>
    tpu.vector_store %arg9[%c128_151, %c0_152], %368 {strides = array<i32>} : memref<1264x128xbf16, #tpu.memory_space<vmem>>, vector<32x128xbf16>,
    %c14_i32_153 = arith.constant 14 : i32
    %370 = tpu.dynamic_rotate %334 by %c14_i32_153 dim 1 : vector<32x128xf32>, i32 -> vector<32x128xf32>
    %c14_i32_154 = arith.constant 14 : i32
    %371 = vector.broadcast %c14_i32_154 : i32 to vector<32x128xi32>
    %372 = arith.cmpi sge, %16, %371 : vector<32x128xi32>
    %cst_155 = arith.constant 0.000000e+00 : f32
    %373 = vector.broadcast %cst_155 : f32 to vector<32x128xf32>
    %374 = arith.select %372, %370, %373 : vector<32x128xi1>, vector<32x128xf32>
    %375 = arith.truncf %374 : vector<32x128xf32> to vector<32x128xbf16>
    %c160_156 = arith.constant 160 : index
    %c0_157 = arith.constant 0 : index
    %376 = vector.load %arg9[%c160_156, %c0_157] : memref<1264x128xbf16, #tpu.memory_space<vmem>>, vector<32x128xbf16>
    tpu.vector_store %arg9[%c160_156, %c0_157], %375 {strides = array<i32>} : memref<1264x128xbf16, #tpu.memory_space<vmem>>, vector<32x128xbf16>,
    %c13_i32_158 = arith.constant 13 : i32
    %377 = tpu.dynamic_rotate %334 by %c13_i32_158 dim 1 : vector<32x128xf32>, i32 -> vector<32x128xf32>
    %c13_i32_159 = arith.constant 13 : i32
    %378 = vector.broadcast %c13_i32_159 : i32 to vector<32x128xi32>
    %379 = arith.cmpi sge, %16, %378 : vector<32x128xi32>
    %cst_160 = arith.constant 0.000000e+00 : f32
    %380 = vector.broadcast %cst_160 : f32 to vector<32x128xf32>
    %381 = arith.select %379, %377, %380 : vector<32x128xi1>, vector<32x128xf32>
    %382 = arith.truncf %381 : vector<32x128xf32> to vector<32x128xbf16>
    %c192_161 = arith.constant 192 : index
    %c0_162 = arith.constant 0 : index
    %383 = vector.load %arg9[%c192_161, %c0_162] : memref<1264x128xbf16, #tpu.memory_space<vmem>>, vector<32x128xbf16>
    tpu.vector_store %arg9[%c192_161, %c0_162], %382 {strides = array<i32>} : memref<1264x128xbf16, #tpu.memory_space<vmem>>, vector<32x128xbf16>,
    %c12_i32_163 = arith.constant 12 : i32
    %384 = tpu.dynamic_rotate %334 by %c12_i32_163 dim 1 : vector<32x128xf32>, i32 -> vector<32x128xf32>
    %c12_i32_164 = arith.constant 12 : i32
    %385 = vector.broadcast %c12_i32_164 : i32 to vector<32x128xi32>
    %386 = arith.cmpi sge, %16, %385 : vector<32x128xi32>
    %cst_165 = arith.constant 0.000000e+00 : f32
    %387 = vector.broadcast %cst_165 : f32 to vector<32x128xf32>
    %388 = arith.select %386, %384, %387 : vector<32x128xi1>, vector<32x128xf32>
    %389 = arith.truncf %388 : vector<32x128xf32> to vector<32x128xbf16>
    %c224_166 = arith.constant 224 : index
    %c0_167 = arith.constant 0 : index
    %390 = vector.load %arg9[%c224_166, %c0_167] : memref<1264x128xbf16, #tpu.memory_space<vmem>>, vector<32x128xbf16>
    tpu.vector_store %arg9[%c224_166, %c0_167], %389 {strides = array<i32>} : memref<1264x128xbf16, #tpu.memory_space<vmem>>, vector<32x128xbf16>,
    %c11_i32_168 = arith.constant 11 : i32
    %391 = tpu.dynamic_rotate %334 by %c11_i32_168 dim 1 : vector<32x128xf32>, i32 -> vector<32x128xf32>
    %c11_i32_169 = arith.constant 11 : i32
    %392 = vector.broadcast %c11_i32_169 : i32 to vector<32x128xi32>
    %393 = arith.cmpi sge, %16, %392 : vector<32x128xi32>
    %cst_170 = arith.constant 0.000000e+00 : f32
    %394 = vector.broadcast %cst_170 : f32 to vector<32x128xf32>
    %395 = arith.select %393, %391, %394 : vector<32x128xi1>, vector<32x128xf32>
    %396 = arith.truncf %395 : vector<32x128xf32> to vector<32x128xbf16>
    %c256_171 = arith.constant 256 : index
    %c0_172 = arith.constant 0 : index
    %397 = vector.load %arg9[%c256_171, %c0_172] : memref<1264x128xbf16, #tpu.memory_space<vmem>>, vector<32x128xbf16>
    tpu.vector_store %arg9[%c256_171, %c0_172], %396 {strides = array<i32>} : memref<1264x128xbf16, #tpu.memory_space<vmem>>, vector<32x128xbf16>,
    %c10_i32_173 = arith.constant 10 : i32
    %398 = tpu.dynamic_rotate %334 by %c10_i32_173 dim 1 : vector<32x128xf32>, i32 -> vector<32x128xf32>
    %c10_i32_174 = arith.constant 10 : i32
    %399 = vector.broadcast %c10_i32_174 : i32 to vector<32x128xi32>
    %400 = arith.cmpi sge, %16, %399 : vector<32x128xi32>
    %cst_175 = arith.constant 0.000000e+00 : f32
    %401 = vector.broadcast %cst_175 : f32 to vector<32x128xf32>
    %402 = arith.select %400, %398, %401 : vector<32x128xi1>, vector<32x128xf32>
    %403 = arith.truncf %402 : vector<32x128xf32> to vector<32x128xbf16>
    %c288_176 = arith.constant 288 : index
    %c0_177 = arith.constant 0 : index
    %404 = vector.load %arg9[%c288_176, %c0_177] : memref<1264x128xbf16, #tpu.memory_space<vmem>>, vector<32x128xbf16>
    tpu.vector_store %arg9[%c288_176, %c0_177], %403 {strides = array<i32>} : memref<1264x128xbf16, #tpu.memory_space<vmem>>, vector<32x128xbf16>,
    %c9_i32_178 = arith.constant 9 : i32
    %405 = tpu.dynamic_rotate %334 by %c9_i32_178 dim 1 : vector<32x128xf32>, i32 -> vector<32x128xf32>
    %c9_i32_179 = arith.constant 9 : i32
    %406 = vector.broadcast %c9_i32_179 : i32 to vector<32x128xi32>
    %407 = arith.cmpi sge, %16, %406 : vector<32x128xi32>
    %cst_180 = arith.constant 0.000000e+00 : f32
    %408 = vector.broadcast %cst_180 : f32 to vector<32x128xf32>
    %409 = arith.select %407, %405, %408 : vector<32x128xi1>, vector<32x128xf32>
    %410 = arith.truncf %409 : vector<32x128xf32> to vector<32x128xbf16>
    %c320_181 = arith.constant 320 : index
    %c0_182 = arith.constant 0 : index
    %411 = vector.load %arg9[%c320_181, %c0_182] : memref<1264x128xbf16, #tpu.memory_space<vmem>>, vector<32x128xbf16>
    tpu.vector_store %arg9[%c320_181, %c0_182], %410 {strides = array<i32>} : memref<1264x128xbf16, #tpu.memory_space<vmem>>, vector<32x128xbf16>,
    %c8_i32_183 = arith.constant 8 : i32
    %412 = tpu.dynamic_rotate %334 by %c8_i32_183 dim 1 : vector<32x128xf32>, i32 -> vector<32x128xf32>
    %c8_i32_184 = arith.constant 8 : i32
    %413 = vector.broadcast %c8_i32_184 : i32 to vector<32x128xi32>
    %414 = arith.cmpi sge, %16, %413 : vector<32x128xi32>
    %cst_185 = arith.constant 0.000000e+00 : f32
    %415 = vector.broadcast %cst_185 : f32 to vector<32x128xf32>
    %416 = arith.select %414, %412, %415 : vector<32x128xi1>, vector<32x128xf32>
    %417 = arith.truncf %416 : vector<32x128xf32> to vector<32x128xbf16>
    %c352_186 = arith.constant 352 : index
    %c0_187 = arith.constant 0 : index
    %418 = vector.load %arg9[%c352_186, %c0_187] : memref<1264x128xbf16, #tpu.memory_space<vmem>>, vector<32x128xbf16>
    tpu.vector_store %arg9[%c352_186, %c0_187], %417 {strides = array<i32>} : memref<1264x128xbf16, #tpu.memory_space<vmem>>, vector<32x128xbf16>,
    %c7_i32_188 = arith.constant 7 : i32
    %419 = tpu.dynamic_rotate %334 by %c7_i32_188 dim 1 : vector<32x128xf32>, i32 -> vector<32x128xf32>
    %c7_i32_189 = arith.constant 7 : i32
    %420 = vector.broadcast %c7_i32_189 : i32 to vector<32x128xi32>
    %421 = arith.cmpi sge, %16, %420 : vector<32x128xi32>
    %cst_190 = arith.constant 0.000000e+00 : f32
    %422 = vector.broadcast %cst_190 : f32 to vector<32x128xf32>
    %423 = arith.select %421, %419, %422 : vector<32x128xi1>, vector<32x128xf32>
    %424 = arith.truncf %423 : vector<32x128xf32> to vector<32x128xbf16>
    %c384_191 = arith.constant 384 : index
    %c0_192 = arith.constant 0 : index
    %425 = vector.load %arg9[%c384_191, %c0_192] : memref<1264x128xbf16, #tpu.memory_space<vmem>>, vector<32x128xbf16>
    tpu.vector_store %arg9[%c384_191, %c0_192], %424 {strides = array<i32>} : memref<1264x128xbf16, #tpu.memory_space<vmem>>, vector<32x128xbf16>,
    %c6_i32_193 = arith.constant 6 : i32
    %426 = tpu.dynamic_rotate %334 by %c6_i32_193 dim 1 : vector<32x128xf32>, i32 -> vector<32x128xf32>
    %c6_i32_194 = arith.constant 6 : i32
    %427 = vector.broadcast %c6_i32_194 : i32 to vector<32x128xi32>
    %428 = arith.cmpi sge, %16, %427 : vector<32x128xi32>
    %cst_195 = arith.constant 0.000000e+00 : f32
    %429 = vector.broadcast %cst_195 : f32 to vector<32x128xf32>
    %430 = arith.select %428, %426, %429 : vector<32x128xi1>, vector<32x128xf32>
    %431 = arith.truncf %430 : vector<32x128xf32> to vector<32x128xbf16>
    %c416_196 = arith.constant 416 : index
    %c0_197 = arith.constant 0 : index
    %432 = vector.load %arg9[%c416_196, %c0_197] : memref<1264x128xbf16, #tpu.memory_space<vmem>>, vector<32x128xbf16>
    tpu.vector_store %arg9[%c416_196, %c0_197], %431 {strides = array<i32>} : memref<1264x128xbf16, #tpu.memory_space<vmem>>, vector<32x128xbf16>,
    %c5_i32_198 = arith.constant 5 : i32
    %433 = tpu.dynamic_rotate %334 by %c5_i32_198 dim 1 : vector<32x128xf32>, i32 -> vector<32x128xf32>
    %c5_i32_199 = arith.constant 5 : i32
    %434 = vector.broadcast %c5_i32_199 : i32 to vector<32x128xi32>
    %435 = arith.cmpi sge, %16, %434 : vector<32x128xi32>
    %cst_200 = arith.constant 0.000000e+00 : f32
    %436 = vector.broadcast %cst_200 : f32 to vector<32x128xf32>
    %437 = arith.select %435, %433, %436 : vector<32x128xi1>, vector<32x128xf32>
    %438 = arith.truncf %437 : vector<32x128xf32> to vector<32x128xbf16>
    %c448_201 = arith.constant 448 : index
    %c0_202 = arith.constant 0 : index
    %439 = vector.load %arg9[%c448_201, %c0_202] : memref<1264x128xbf16, #tpu.memory_space<vmem>>, vector<32x128xbf16>
    tpu.vector_store %arg9[%c448_201, %c0_202], %438 {strides = array<i32>} : memref<1264x128xbf16, #tpu.memory_space<vmem>>, vector<32x128xbf16>,
    %c4_i32_203 = arith.constant 4 : i32
    %440 = tpu.dynamic_rotate %334 by %c4_i32_203 dim 1 : vector<32x128xf32>, i32 -> vector<32x128xf32>
    %c4_i32_204 = arith.constant 4 : i32
    %441 = vector.broadcast %c4_i32_204 : i32 to vector<32x128xi32>
    %442 = arith.cmpi sge, %16, %441 : vector<32x128xi32>
    %cst_205 = arith.constant 0.000000e+00 : f32
    %443 = vector.broadcast %cst_205 : f32 to vector<32x128xf32>
    %444 = arith.select %442, %440, %443 : vector<32x128xi1>, vector<32x128xf32>
    %445 = arith.truncf %444 : vector<32x128xf32> to vector<32x128xbf16>
    %c480_206 = arith.constant 480 : index
    %c0_207 = arith.constant 0 : index
    %446 = vector.load %arg9[%c480_206, %c0_207] : memref<1264x128xbf16, #tpu.memory_space<vmem>>, vector<32x128xbf16>
    tpu.vector_store %arg9[%c480_206, %c0_207], %445 {strides = array<i32>} : memref<1264x128xbf16, #tpu.memory_space<vmem>>, vector<32x128xbf16>,
    %c3_i32_208 = arith.constant 3 : i32
    %447 = tpu.dynamic_rotate %334 by %c3_i32_208 dim 1 : vector<32x128xf32>, i32 -> vector<32x128xf32>
    %c3_i32_209 = arith.constant 3 : i32
    %448 = vector.broadcast %c3_i32_209 : i32 to vector<32x128xi32>
    %449 = arith.cmpi sge, %16, %448 : vector<32x128xi32>
    %cst_210 = arith.constant 0.000000e+00 : f32
    %450 = vector.broadcast %cst_210 : f32 to vector<32x128xf32>
    %451 = arith.select %449, %447, %450 : vector<32x128xi1>, vector<32x128xf32>
    %452 = arith.truncf %451 : vector<32x128xf32> to vector<32x128xbf16>
    %c512_211 = arith.constant 512 : index
    %c0_212 = arith.constant 0 : index
    %453 = vector.load %arg9[%c512_211, %c0_212] : memref<1264x128xbf16, #tpu.memory_space<vmem>>, vector<32x128xbf16>
    tpu.vector_store %arg9[%c512_211, %c0_212], %452 {strides = array<i32>} : memref<1264x128xbf16, #tpu.memory_space<vmem>>, vector<32x128xbf16>,
    %c2_i32_213 = arith.constant 2 : i32
    %454 = tpu.dynamic_rotate %334 by %c2_i32_213 dim 1 : vector<32x128xf32>, i32 -> vector<32x128xf32>
    %c2_i32_214 = arith.constant 2 : i32
    %455 = vector.broadcast %c2_i32_214 : i32 to vector<32x128xi32>
    %456 = arith.cmpi sge, %16, %455 : vector<32x128xi32>
    %cst_215 = arith.constant 0.000000e+00 : f32
    %457 = vector.broadcast %cst_215 : f32 to vector<32x128xf32>
    %458 = arith.select %456, %454, %457 : vector<32x128xi1>, vector<32x128xf32>
    %459 = arith.truncf %458 : vector<32x128xf32> to vector<32x128xbf16>
    %c544_216 = arith.constant 544 : index
    %c0_217 = arith.constant 0 : index
    %460 = vector.load %arg9[%c544_216, %c0_217] : memref<1264x128xbf16, #tpu.memory_space<vmem>>, vector<32x128xbf16>
    tpu.vector_store %arg9[%c544_216, %c0_217], %459 {strides = array<i32>} : memref<1264x128xbf16, #tpu.memory_space<vmem>>, vector<32x128xbf16>,
    %c1_i32_218 = arith.constant 1 : i32
    %461 = tpu.dynamic_rotate %334 by %c1_i32_218 dim 1 : vector<32x128xf32>, i32 -> vector<32x128xf32>
    %c1_i32_219 = arith.constant 1 : i32
    %462 = vector.broadcast %c1_i32_219 : i32 to vector<32x128xi32>
    %463 = arith.cmpi sge, %16, %462 : vector<32x128xi32>
    %cst_220 = arith.constant 0.000000e+00 : f32
    %464 = vector.broadcast %cst_220 : f32 to vector<32x128xf32>
    %465 = arith.select %463, %461, %464 : vector<32x128xi1>, vector<32x128xf32>
    %466 = arith.truncf %465 : vector<32x128xf32> to vector<32x128xbf16>
    %c576_221 = arith.constant 576 : index
    %c0_222 = arith.constant 0 : index
    %467 = vector.load %arg9[%c576_221, %c0_222] : memref<1264x128xbf16, #tpu.memory_space<vmem>>, vector<32x128xbf16>
    tpu.vector_store %arg9[%c576_221, %c0_222], %466 {strides = array<i32>} : memref<1264x128xbf16, #tpu.memory_space<vmem>>, vector<32x128xbf16>,
    %468 = arith.truncf %334 : vector<32x128xf32> to vector<32x128xbf16>
    %c608_223 = arith.constant 608 : index
    %c0_224 = arith.constant 0 : index
    %469 = vector.load %arg9[%c608_223, %c0_224] : memref<1264x128xbf16, #tpu.memory_space<vmem>>, vector<32x128xbf16>
    tpu.vector_store %arg9[%c608_223, %c0_224], %468 {strides = array<i32>} : memref<1264x128xbf16, #tpu.memory_space<vmem>>, vector<32x128xbf16>,
    %c127_i32_225 = arith.constant 127 : i32
    %470 = tpu.dynamic_rotate %334 by %c127_i32_225 dim 1 : vector<32x128xf32>, i32 -> vector<32x128xf32>
    %c63_i32_226 = arith.constant 63 : i32
    %471 = vector.broadcast %c63_i32_226 : i32 to vector<32x128xi32>
    %472 = arith.cmpi slt, %16, %471 : vector<32x128xi32>
    %cst_227 = arith.constant 0.000000e+00 : f32
    %473 = vector.broadcast %cst_227 : f32 to vector<32x128xf32>
    %474 = arith.select %472, %470, %473 : vector<32x128xi1>, vector<32x128xf32>
    %475 = arith.truncf %474 : vector<32x128xf32> to vector<32x128xbf16>
    %c640_228 = arith.constant 640 : index
    %c0_229 = arith.constant 0 : index
    %476 = vector.load %arg9[%c640_228, %c0_229] : memref<1264x128xbf16, #tpu.memory_space<vmem>>, vector<32x128xbf16>
    tpu.vector_store %arg9[%c640_228, %c0_229], %475 {strides = array<i32>} : memref<1264x128xbf16, #tpu.memory_space<vmem>>, vector<32x128xbf16>,
    %c126_i32_230 = arith.constant 126 : i32
    %477 = tpu.dynamic_rotate %334 by %c126_i32_230 dim 1 : vector<32x128xf32>, i32 -> vector<32x128xf32>
    %c62_i32_231 = arith.constant 62 : i32
    %478 = vector.broadcast %c62_i32_231 : i32 to vector<32x128xi32>
    %479 = arith.cmpi slt, %16, %478 : vector<32x128xi32>
    %cst_232 = arith.constant 0.000000e+00 : f32
    %480 = vector.broadcast %cst_232 : f32 to vector<32x128xf32>
    %481 = arith.select %479, %477, %480 : vector<32x128xi1>, vector<32x128xf32>
    %482 = arith.truncf %481 : vector<32x128xf32> to vector<32x128xbf16>
    %c672_233 = arith.constant 672 : index
    %c0_234 = arith.constant 0 : index
    %483 = vector.load %arg9[%c672_233, %c0_234] : memref<1264x128xbf16, #tpu.memory_space<vmem>>, vector<32x128xbf16>
    tpu.vector_store %arg9[%c672_233, %c0_234], %482 {strides = array<i32>} : memref<1264x128xbf16, #tpu.memory_space<vmem>>, vector<32x128xbf16>,
    %c125_i32_235 = arith.constant 125 : i32
    %484 = tpu.dynamic_rotate %334 by %c125_i32_235 dim 1 : vector<32x128xf32>, i32 -> vector<32x128xf32>
    %c61_i32_236 = arith.constant 61 : i32
    %485 = vector.broadcast %c61_i32_236 : i32 to vector<32x128xi32>
    %486 = arith.cmpi slt, %16, %485 : vector<32x128xi32>
    %cst_237 = arith.constant 0.000000e+00 : f32
    %487 = vector.broadcast %cst_237 : f32 to vector<32x128xf32>
    %488 = arith.select %486, %484, %487 : vector<32x128xi1>, vector<32x128xf32>
    %489 = arith.truncf %488 : vector<32x128xf32> to vector<32x128xbf16>
    %c704_238 = arith.constant 704 : index
    %c0_239 = arith.constant 0 : index
    %490 = vector.load %arg9[%c704_238, %c0_239] : memref<1264x128xbf16, #tpu.memory_space<vmem>>, vector<32x128xbf16>
    tpu.vector_store %arg9[%c704_238, %c0_239], %489 {strides = array<i32>} : memref<1264x128xbf16, #tpu.memory_space<vmem>>, vector<32x128xbf16>,
    %c124_i32_240 = arith.constant 124 : i32
    %491 = tpu.dynamic_rotate %334 by %c124_i32_240 dim 1 : vector<32x128xf32>, i32 -> vector<32x128xf32>
    %c60_i32_241 = arith.constant 60 : i32
    %492 = vector.broadcast %c60_i32_241 : i32 to vector<32x128xi32>
    %493 = arith.cmpi slt, %16, %492 : vector<32x128xi32>
    %cst_242 = arith.constant 0.000000e+00 : f32
    %494 = vector.broadcast %cst_242 : f32 to vector<32x128xf32>
    %495 = arith.select %493, %491, %494 : vector<32x128xi1>, vector<32x128xf32>
    %496 = arith.truncf %495 : vector<32x128xf32> to vector<32x128xbf16>
    %c736_243 = arith.constant 736 : index
    %c0_244 = arith.constant 0 : index
    %497 = vector.load %arg9[%c736_243, %c0_244] : memref<1264x128xbf16, #tpu.memory_space<vmem>>, vector<32x128xbf16>
    tpu.vector_store %arg9[%c736_243, %c0_244], %496 {strides = array<i32>} : memref<1264x128xbf16, #tpu.memory_space<vmem>>, vector<32x128xbf16>,
    %c123_i32_245 = arith.constant 123 : i32
    %498 = tpu.dynamic_rotate %334 by %c123_i32_245 dim 1 : vector<32x128xf32>, i32 -> vector<32x128xf32>
    %c59_i32_246 = arith.constant 59 : i32
    %499 = vector.broadcast %c59_i32_246 : i32 to vector<32x128xi32>
    %500 = arith.cmpi slt, %16, %499 : vector<32x128xi32>
    %cst_247 = arith.constant 0.000000e+00 : f32
    %501 = vector.broadcast %cst_247 : f32 to vector<32x128xf32>
    %502 = arith.select %500, %498, %501 : vector<32x128xi1>, vector<32x128xf32>
    %503 = arith.truncf %502 : vector<32x128xf32> to vector<32x128xbf16>
    %c768_248 = arith.constant 768 : index
    %c0_249 = arith.constant 0 : index
    %504 = vector.load %arg9[%c768_248, %c0_249] : memref<1264x128xbf16, #tpu.memory_space<vmem>>, vector<32x128xbf16>
    tpu.vector_store %arg9[%c768_248, %c0_249], %503 {strides = array<i32>} : memref<1264x128xbf16, #tpu.memory_space<vmem>>, vector<32x128xbf16>,
    %c122_i32_250 = arith.constant 122 : i32
    %505 = tpu.dynamic_rotate %334 by %c122_i32_250 dim 1 : vector<32x128xf32>, i32 -> vector<32x128xf32>
    %c58_i32_251 = arith.constant 58 : i32
    %506 = vector.broadcast %c58_i32_251 : i32 to vector<32x128xi32>
    %507 = arith.cmpi slt, %16, %506 : vector<32x128xi32>
    %cst_252 = arith.constant 0.000000e+00 : f32
    %508 = vector.broadcast %cst_252 : f32 to vector<32x128xf32>
    %509 = arith.select %507, %505, %508 : vector<32x128xi1>, vector<32x128xf32>
    %510 = arith.truncf %509 : vector<32x128xf32> to vector<32x128xbf16>
    %c800_253 = arith.constant 800 : index
    %c0_254 = arith.constant 0 : index
    %511 = vector.load %arg9[%c800_253, %c0_254] : memref<1264x128xbf16, #tpu.memory_space<vmem>>, vector<32x128xbf16>
    tpu.vector_store %arg9[%c800_253, %c0_254], %510 {strides = array<i32>} : memref<1264x128xbf16, #tpu.memory_space<vmem>>, vector<32x128xbf16>,
    %c121_i32_255 = arith.constant 121 : i32
    %512 = tpu.dynamic_rotate %334 by %c121_i32_255 dim 1 : vector<32x128xf32>, i32 -> vector<32x128xf32>
    %c57_i32_256 = arith.constant 57 : i32
    %513 = vector.broadcast %c57_i32_256 : i32 to vector<32x128xi32>
    %514 = arith.cmpi slt, %16, %513 : vector<32x128xi32>
    %cst_257 = arith.constant 0.000000e+00 : f32
    %515 = vector.broadcast %cst_257 : f32 to vector<32x128xf32>
    %516 = arith.select %514, %512, %515 : vector<32x128xi1>, vector<32x128xf32>
    %517 = arith.truncf %516 : vector<32x128xf32> to vector<32x128xbf16>
    %c832_258 = arith.constant 832 : index
    %c0_259 = arith.constant 0 : index
    %518 = vector.load %arg9[%c832_258, %c0_259] : memref<1264x128xbf16, #tpu.memory_space<vmem>>, vector<32x128xbf16>
    tpu.vector_store %arg9[%c832_258, %c0_259], %517 {strides = array<i32>} : memref<1264x128xbf16, #tpu.memory_space<vmem>>, vector<32x128xbf16>,
    %c120_i32_260 = arith.constant 120 : i32
    %519 = tpu.dynamic_rotate %334 by %c120_i32_260 dim 1 : vector<32x128xf32>, i32 -> vector<32x128xf32>
    %c56_i32_261 = arith.constant 56 : i32
    %520 = vector.broadcast %c56_i32_261 : i32 to vector<32x128xi32>
    %521 = arith.cmpi slt, %16, %520 : vector<32x128xi32>
    %cst_262 = arith.constant 0.000000e+00 : f32
    %522 = vector.broadcast %cst_262 : f32 to vector<32x128xf32>
    %523 = arith.select %521, %519, %522 : vector<32x128xi1>, vector<32x128xf32>
    %524 = arith.truncf %523 : vector<32x128xf32> to vector<32x128xbf16>
    %c864_263 = arith.constant 864 : index
    %c0_264 = arith.constant 0 : index
    %525 = vector.load %arg9[%c864_263, %c0_264] : memref<1264x128xbf16, #tpu.memory_space<vmem>>, vector<32x128xbf16>
    tpu.vector_store %arg9[%c864_263, %c0_264], %524 {strides = array<i32>} : memref<1264x128xbf16, #tpu.memory_space<vmem>>, vector<32x128xbf16>,
    %c119_i32_265 = arith.constant 119 : i32
    %526 = tpu.dynamic_rotate %334 by %c119_i32_265 dim 1 : vector<32x128xf32>, i32 -> vector<32x128xf32>
    %c55_i32_266 = arith.constant 55 : i32
    %527 = vector.broadcast %c55_i32_266 : i32 to vector<32x128xi32>
    %528 = arith.cmpi slt, %16, %527 : vector<32x128xi32>
    %cst_267 = arith.constant 0.000000e+00 : f32
    %529 = vector.broadcast %cst_267 : f32 to vector<32x128xf32>
    %530 = arith.select %528, %526, %529 : vector<32x128xi1>, vector<32x128xf32>
    %531 = arith.truncf %530 : vector<32x128xf32> to vector<32x128xbf16>
    %c896_268 = arith.constant 896 : index
    %c0_269 = arith.constant 0 : index
    %532 = vector.load %arg9[%c896_268, %c0_269] : memref<1264x128xbf16, #tpu.memory_space<vmem>>, vector<32x128xbf16>
    tpu.vector_store %arg9[%c896_268, %c0_269], %531 {strides = array<i32>} : memref<1264x128xbf16, #tpu.memory_space<vmem>>, vector<32x128xbf16>,
    %c118_i32_270 = arith.constant 118 : i32
    %533 = tpu.dynamic_rotate %334 by %c118_i32_270 dim 1 : vector<32x128xf32>, i32 -> vector<32x128xf32>
    %c54_i32_271 = arith.constant 54 : i32
    %534 = vector.broadcast %c54_i32_271 : i32 to vector<32x128xi32>
    %535 = arith.cmpi slt, %16, %534 : vector<32x128xi32>
    %cst_272 = arith.constant 0.000000e+00 : f32
    %536 = vector.broadcast %cst_272 : f32 to vector<32x128xf32>
    %537 = arith.select %535, %533, %536 : vector<32x128xi1>, vector<32x128xf32>
    %538 = arith.truncf %537 : vector<32x128xf32> to vector<32x128xbf16>
    %c928_273 = arith.constant 928 : index
    %c0_274 = arith.constant 0 : index
    %539 = vector.load %arg9[%c928_273, %c0_274] : memref<1264x128xbf16, #tpu.memory_space<vmem>>, vector<32x128xbf16>
    tpu.vector_store %arg9[%c928_273, %c0_274], %538 {strides = array<i32>} : memref<1264x128xbf16, #tpu.memory_space<vmem>>, vector<32x128xbf16>,
    %c117_i32_275 = arith.constant 117 : i32
    %540 = tpu.dynamic_rotate %334 by %c117_i32_275 dim 1 : vector<32x128xf32>, i32 -> vector<32x128xf32>
    %c53_i32_276 = arith.constant 53 : i32
    %541 = vector.broadcast %c53_i32_276 : i32 to vector<32x128xi32>
    %542 = arith.cmpi slt, %16, %541 : vector<32x128xi32>
    %cst_277 = arith.constant 0.000000e+00 : f32
    %543 = vector.broadcast %cst_277 : f32 to vector<32x128xf32>
    %544 = arith.select %542, %540, %543 : vector<32x128xi1>, vector<32x128xf32>
    %545 = arith.truncf %544 : vector<32x128xf32> to vector<32x128xbf16>
    %c960_278 = arith.constant 960 : index
    %c0_279 = arith.constant 0 : index
    %546 = vector.load %arg9[%c960_278, %c0_279] : memref<1264x128xbf16, #tpu.memory_space<vmem>>, vector<32x128xbf16>
    tpu.vector_store %arg9[%c960_278, %c0_279], %545 {strides = array<i32>} : memref<1264x128xbf16, #tpu.memory_space<vmem>>, vector<32x128xbf16>,
    %c116_i32_280 = arith.constant 116 : i32
    %547 = tpu.dynamic_rotate %334 by %c116_i32_280 dim 1 : vector<32x128xf32>, i32 -> vector<32x128xf32>
    %c52_i32_281 = arith.constant 52 : i32
    %548 = vector.broadcast %c52_i32_281 : i32 to vector<32x128xi32>
    %549 = arith.cmpi slt, %16, %548 : vector<32x128xi32>
    %cst_282 = arith.constant 0.000000e+00 : f32
    %550 = vector.broadcast %cst_282 : f32 to vector<32x128xf32>
    %551 = arith.select %549, %547, %550 : vector<32x128xi1>, vector<32x128xf32>
    %552 = arith.truncf %551 : vector<32x128xf32> to vector<32x128xbf16>
    %c992_283 = arith.constant 992 : index
    %c0_284 = arith.constant 0 : index
    %553 = vector.load %arg9[%c992_283, %c0_284] : memref<1264x128xbf16, #tpu.memory_space<vmem>>, vector<32x128xbf16>
    tpu.vector_store %arg9[%c992_283, %c0_284], %552 {strides = array<i32>} : memref<1264x128xbf16, #tpu.memory_space<vmem>>, vector<32x128xbf16>,
    %c115_i32_285 = arith.constant 115 : i32
    %554 = tpu.dynamic_rotate %334 by %c115_i32_285 dim 1 : vector<32x128xf32>, i32 -> vector<32x128xf32>
    %c51_i32_286 = arith.constant 51 : i32
    %555 = vector.broadcast %c51_i32_286 : i32 to vector<32x128xi32>
    %556 = arith.cmpi slt, %16, %555 : vector<32x128xi32>
    %cst_287 = arith.constant 0.000000e+00 : f32
    %557 = vector.broadcast %cst_287 : f32 to vector<32x128xf32>
    %558 = arith.select %556, %554, %557 : vector<32x128xi1>, vector<32x128xf32>
    %559 = arith.truncf %558 : vector<32x128xf32> to vector<32x128xbf16>
    %c1024_288 = arith.constant 1024 : index
    %c0_289 = arith.constant 0 : index
    %560 = vector.load %arg9[%c1024_288, %c0_289] : memref<1264x128xbf16, #tpu.memory_space<vmem>>, vector<32x128xbf16>
    tpu.vector_store %arg9[%c1024_288, %c0_289], %559 {strides = array<i32>} : memref<1264x128xbf16, #tpu.memory_space<vmem>>, vector<32x128xbf16>,
    %c114_i32_290 = arith.constant 114 : i32
    %561 = tpu.dynamic_rotate %334 by %c114_i32_290 dim 1 : vector<32x128xf32>, i32 -> vector<32x128xf32>
    %c50_i32_291 = arith.constant 50 : i32
    %562 = vector.broadcast %c50_i32_291 : i32 to vector<32x128xi32>
    %563 = arith.cmpi slt, %16, %562 : vector<32x128xi32>
    %cst_292 = arith.constant 0.000000e+00 : f32
    %564 = vector.broadcast %cst_292 : f32 to vector<32x128xf32>
    %565 = arith.select %563, %561, %564 : vector<32x128xi1>, vector<32x128xf32>
    %566 = arith.truncf %565 : vector<32x128xf32> to vector<32x128xbf16>
    %c1056_293 = arith.constant 1056 : index
    %c0_294 = arith.constant 0 : index
    %567 = vector.load %arg9[%c1056_293, %c0_294] : memref<1264x128xbf16, #tpu.memory_space<vmem>>, vector<32x128xbf16>
    tpu.vector_store %arg9[%c1056_293, %c0_294], %566 {strides = array<i32>} : memref<1264x128xbf16, #tpu.memory_space<vmem>>, vector<32x128xbf16>,
    %c113_i32_295 = arith.constant 113 : i32
    %568 = tpu.dynamic_rotate %334 by %c113_i32_295 dim 1 : vector<32x128xf32>, i32 -> vector<32x128xf32>
    %c49_i32_296 = arith.constant 49 : i32
    %569 = vector.broadcast %c49_i32_296 : i32 to vector<32x128xi32>
    %570 = arith.cmpi slt, %16, %569 : vector<32x128xi32>
    %cst_297 = arith.constant 0.000000e+00 : f32
    %571 = vector.broadcast %cst_297 : f32 to vector<32x128xf32>
    %572 = arith.select %570, %568, %571 : vector<32x128xi1>, vector<32x128xf32>
    %573 = arith.truncf %572 : vector<32x128xf32> to vector<32x128xbf16>
    %c1088_298 = arith.constant 1088 : index
    %c0_299 = arith.constant 0 : index
    %574 = vector.load %arg9[%c1088_298, %c0_299] : memref<1264x128xbf16, #tpu.memory_space<vmem>>, vector<32x128xbf16>
    tpu.vector_store %arg9[%c1088_298, %c0_299], %573 {strides = array<i32>} : memref<1264x128xbf16, #tpu.memory_space<vmem>>, vector<32x128xbf16>,
    %c112_i32_300 = arith.constant 112 : i32
    %575 = tpu.dynamic_rotate %334 by %c112_i32_300 dim 1 : vector<32x128xf32>, i32 -> vector<32x128xf32>
    %c48_i32_301 = arith.constant 48 : i32
    %576 = vector.broadcast %c48_i32_301 : i32 to vector<32x128xi32>
    %577 = arith.cmpi slt, %16, %576 : vector<32x128xi32>
    %cst_302 = arith.constant 0.000000e+00 : f32
    %578 = vector.broadcast %cst_302 : f32 to vector<32x128xf32>
    %579 = arith.select %577, %575, %578 : vector<32x128xi1>, vector<32x128xf32>
    %580 = arith.truncf %579 : vector<32x128xf32> to vector<32x128xbf16>
    %c1120_303 = arith.constant 1120 : index
    %c0_304 = arith.constant 0 : index
    %581 = vector.load %arg9[%c1120_303, %c0_304] : memref<1264x128xbf16, #tpu.memory_space<vmem>>, vector<32x128xbf16>
    tpu.vector_store %arg9[%c1120_303, %c0_304], %580 {strides = array<i32>} : memref<1264x128xbf16, #tpu.memory_space<vmem>>, vector<32x128xbf16>,
    %c111_i32_305 = arith.constant 111 : i32
    %582 = tpu.dynamic_rotate %334 by %c111_i32_305 dim 1 : vector<32x128xf32>, i32 -> vector<32x128xf32>
    %c47_i32_306 = arith.constant 47 : i32
    %583 = vector.broadcast %c47_i32_306 : i32 to vector<32x128xi32>
    %584 = arith.cmpi slt, %16, %583 : vector<32x128xi32>
    %cst_307 = arith.constant 0.000000e+00 : f32
    %585 = vector.broadcast %cst_307 : f32 to vector<32x128xf32>
    %586 = arith.select %584, %582, %585 : vector<32x128xi1>, vector<32x128xf32>
    %587 = arith.truncf %586 : vector<32x128xf32> to vector<32x128xbf16>
    %c1152_308 = arith.constant 1152 : index
    %c0_309 = arith.constant 0 : index
    %588 = vector.load %arg9[%c1152_308, %c0_309] : memref<1264x128xbf16, #tpu.memory_space<vmem>>, vector<32x128xbf16>
    tpu.vector_store %arg9[%c1152_308, %c0_309], %587 {strides = array<i32>} : memref<1264x128xbf16, #tpu.memory_space<vmem>>, vector<32x128xbf16>,
    %c110_i32_310 = arith.constant 110 : i32
    %589 = tpu.dynamic_rotate %334 by %c110_i32_310 dim 1 : vector<32x128xf32>, i32 -> vector<32x128xf32>
    %c46_i32_311 = arith.constant 46 : i32
    %590 = vector.broadcast %c46_i32_311 : i32 to vector<32x128xi32>
    %591 = arith.cmpi slt, %16, %590 : vector<32x128xi32>
    %cst_312 = arith.constant 0.000000e+00 : f32
    %592 = vector.broadcast %cst_312 : f32 to vector<32x128xf32>
    %593 = arith.select %591, %589, %592 : vector<32x128xi1>, vector<32x128xf32>
    %594 = arith.truncf %593 : vector<32x128xf32> to vector<32x128xbf16>
    %c1184_313 = arith.constant 1184 : index
    %c0_314 = arith.constant 0 : index
    %595 = vector.load %arg9[%c1184_313, %c0_314] : memref<1264x128xbf16, #tpu.memory_space<vmem>>, vector<32x128xbf16>
    tpu.vector_store %arg9[%c1184_313, %c0_314], %594 {strides = array<i32>} : memref<1264x128xbf16, #tpu.memory_space<vmem>>, vector<32x128xbf16>,
    %c109_i32_315 = arith.constant 109 : i32
    %596 = tpu.dynamic_rotate %334 by %c109_i32_315 dim 1 : vector<32x128xf32>, i32 -> vector<32x128xf32>
    %c45_i32_316 = arith.constant 45 : i32
    %597 = vector.broadcast %c45_i32_316 : i32 to vector<32x128xi32>
    %598 = arith.cmpi slt, %16, %597 : vector<32x128xi32>
    %cst_317 = arith.constant 0.000000e+00 : f32
    %599 = vector.broadcast %cst_317 : f32 to vector<32x128xf32>
    %600 = arith.select %598, %596, %599 : vector<32x128xi1>, vector<32x128xf32>
    %601 = arith.truncf %600 : vector<32x128xf32> to vector<32x128xbf16>
    %c1216_318 = arith.constant 1216 : index
    %c0_319 = arith.constant 0 : index
    %602 = vector.load %arg9[%c1216_318, %c0_319] : memref<1264x128xbf16, #tpu.memory_space<vmem>>, vector<32x128xbf16>
    tpu.vector_store %arg9[%c1216_318, %c0_319], %601 {strides = array<i32>} : memref<1264x128xbf16, #tpu.memory_space<vmem>>, vector<32x128xbf16>,
    %c1_i32_320 = arith.constant 1 : i32
    %603 = tpu.dynamic_rotate %333 by %c1_i32_320 dim 1 : vector<16x128xf32>, i32 -> vector<16x128xf32>
    %cst_321 = arith.constant -3.40282347E+38 : f32
    %604 = vector.broadcast %cst_321 : f32 to vector<16x128xf32>
    %605 = arith.select %35, %603, %604 : vector<16x128xi1>, vector<16x128xf32>
    %c127_i32_322 = arith.constant 127 : i32
    %606 = tpu.dynamic_rotate %333 by %c127_i32_322 dim 1 : vector<16x128xf32>, i32 -> vector<16x128xf32>
    %cst_323 = arith.constant -3.40282347E+38 : f32
    %607 = vector.broadcast %cst_323 : f32 to vector<16x128xf32>
    %608 = arith.select %37, %606, %607 : vector<16x128xi1>, vector<16x128xf32>
    %609 = arith.maximumf %605, %608 : vector<16x128xf32>
    %610 = arith.maximumf %333, %609 : vector<16x128xf32>
    %611 = arith.truncf %610 : vector<16x128xf32> to vector<16x128xbf16>
    %c1248_324 = arith.constant 1248 : index
    %c0_325 = arith.constant 0 : index
    %612 = vector.load %arg9[%c1248_324, %c0_325] : memref<1264x128xbf16, #tpu.memory_space<vmem>>, vector<16x128xbf16>
    tpu.vector_store %arg9[%c1248_324, %c0_325], %611 {strides = array<i32>} : memref<1264x128xbf16, #tpu.memory_space<vmem>>, vector<16x128xbf16>,
    %c1 = arith.constant 1 : index
    %c0_326 = arith.constant 0 : index
    %c0_327 = arith.constant 0 : index
    %613 = vector.load %arg4[%c1, %c0_326, %c0_327] : memref<3x48x1264xbf16, #tpu.memory_space<vmem>>, vector<1x48x1264xbf16>
    %614 = vector.shape_cast %613 : vector<1x48x1264xbf16> to vector<48x1264xbf16>
    %c0_328 = arith.constant 0 : index
    %c0_329 = arith.constant 0 : index
    %615 = vector.load %arg9[%c0_328, %c0_329] : memref<1264x128xbf16, #tpu.memory_space<vmem>>, vector<1264x128xbf16>
    %cst_330 = arith.constant dense<0.000000e+00> : vector<48x128xf32>
    %616 = tpu.matmul %614, %615, %cst_330 {dimension_numbers = #tpu.dot_dimension_numbers<[1], [0], [0], [1], [0, 0, 1, 1], [], []>} : vector<48x1264xbf16>, vector<1264x128xbf16>, vector<48x128xf32> -> vector<48x128xf32>
    %c1_331 = arith.constant 1 : index
    %c0_332 = arith.constant 0 : index
    %c0_333 = arith.constant 0 : index
    %617 = vector.load %arg5[%c1_331, %c0_332, %c0_333] : memref<3x48x1xf32, #tpu.memory_space<vmem>>, vector<1x48x1xf32>
    %618 = vector.shape_cast %617 : vector<1x48x1xf32> to vector<48x1xf32>
    %619 = vector.broadcast %618 : vector<48x1xf32> to vector<48x128xf32>
    %620 = arith.addf %616, %619 : vector<48x128xf32>
    %621 = vector.extract_strided_slice %620 {offsets = [0, 0], sizes = [16, 128], strides = [1, 1]} : vector<48x128xf32> to vector<16x128xf32>
    %622 = vector.extract_strided_slice %620 {offsets = [16, 0], sizes = [32, 128], strides = [1, 1]} : vector<48x128xf32> to vector<32x128xf32>
    %c19_i32_334 = arith.constant 19 : i32
    %623 = tpu.dynamic_rotate %622 by %c19_i32_334 dim 1 : vector<32x128xf32>, i32 -> vector<32x128xf32>
    %c19_i32_335 = arith.constant 19 : i32
    %624 = vector.broadcast %c19_i32_335 : i32 to vector<32x128xi32>
    %625 = arith.cmpi sge, %16, %624 : vector<32x128xi32>
    %cst_336 = arith.constant 0.000000e+00 : f32
    %626 = vector.broadcast %cst_336 : f32 to vector<32x128xf32>
    %627 = arith.select %625, %623, %626 : vector<32x128xi1>, vector<32x128xf32>
    %628 = arith.truncf %627 : vector<32x128xf32> to vector<32x128xbf16>
    %c0_337 = arith.constant 0 : index
    %c0_338 = arith.constant 0 : index
    %629 = vector.load %arg9[%c0_337, %c0_338] : memref<1264x128xbf16, #tpu.memory_space<vmem>>, vector<32x128xbf16>
    tpu.vector_store %arg9[%c0_337, %c0_338], %628 {strides = array<i32>} : memref<1264x128xbf16, #tpu.memory_space<vmem>>, vector<32x128xbf16>,
    %c18_i32_339 = arith.constant 18 : i32
    %630 = tpu.dynamic_rotate %622 by %c18_i32_339 dim 1 : vector<32x128xf32>, i32 -> vector<32x128xf32>
    %c18_i32_340 = arith.constant 18 : i32
    %631 = vector.broadcast %c18_i32_340 : i32 to vector<32x128xi32>
    %632 = arith.cmpi sge, %16, %631 : vector<32x128xi32>
    %cst_341 = arith.constant 0.000000e+00 : f32
    %633 = vector.broadcast %cst_341 : f32 to vector<32x128xf32>
    %634 = arith.select %632, %630, %633 : vector<32x128xi1>, vector<32x128xf32>
    %635 = arith.truncf %634 : vector<32x128xf32> to vector<32x128xbf16>
    %c32_342 = arith.constant 32 : index
    %c0_343 = arith.constant 0 : index
    %636 = vector.load %arg9[%c32_342, %c0_343] : memref<1264x128xbf16, #tpu.memory_space<vmem>>, vector<32x128xbf16>
    tpu.vector_store %arg9[%c32_342, %c0_343], %635 {strides = array<i32>} : memref<1264x128xbf16, #tpu.memory_space<vmem>>, vector<32x128xbf16>,
    %c17_i32_344 = arith.constant 17 : i32
    %637 = tpu.dynamic_rotate %622 by %c17_i32_344 dim 1 : vector<32x128xf32>, i32 -> vector<32x128xf32>
    %c17_i32_345 = arith.constant 17 : i32
    %638 = vector.broadcast %c17_i32_345 : i32 to vector<32x128xi32>
    %639 = arith.cmpi sge, %16, %638 : vector<32x128xi32>
    %cst_346 = arith.constant 0.000000e+00 : f32
    %640 = vector.broadcast %cst_346 : f32 to vector<32x128xf32>
    %641 = arith.select %639, %637, %640 : vector<32x128xi1>, vector<32x128xf32>
    %642 = arith.truncf %641 : vector<32x128xf32> to vector<32x128xbf16>
    %c64_347 = arith.constant 64 : index
    %c0_348 = arith.constant 0 : index
    %643 = vector.load %arg9[%c64_347, %c0_348] : memref<1264x128xbf16, #tpu.memory_space<vmem>>, vector<32x128xbf16>
    tpu.vector_store %arg9[%c64_347, %c0_348], %642 {strides = array<i32>} : memref<1264x128xbf16, #tpu.memory_space<vmem>>, vector<32x128xbf16>,
    %c16_i32_349 = arith.constant 16 : i32
    %644 = tpu.dynamic_rotate %622 by %c16_i32_349 dim 1 : vector<32x128xf32>, i32 -> vector<32x128xf32>
    %c16_i32_350 = arith.constant 16 : i32
    %645 = vector.broadcast %c16_i32_350 : i32 to vector<32x128xi32>
    %646 = arith.cmpi sge, %16, %645 : vector<32x128xi32>
    %cst_351 = arith.constant 0.000000e+00 : f32
    %647 = vector.broadcast %cst_351 : f32 to vector<32x128xf32>
    %648 = arith.select %646, %644, %647 : vector<32x128xi1>, vector<32x128xf32>
    %649 = arith.truncf %648 : vector<32x128xf32> to vector<32x128xbf16>
    %c96_352 = arith.constant 96 : index
    %c0_353 = arith.constant 0 : index
    %650 = vector.load %arg9[%c96_352, %c0_353] : memref<1264x128xbf16, #tpu.memory_space<vmem>>, vector<32x128xbf16>
    tpu.vector_store %arg9[%c96_352, %c0_353], %649 {strides = array<i32>} : memref<1264x128xbf16, #tpu.memory_space<vmem>>, vector<32x128xbf16>,
    %c15_i32_354 = arith.constant 15 : i32
    %651 = tpu.dynamic_rotate %622 by %c15_i32_354 dim 1 : vector<32x128xf32>, i32 -> vector<32x128xf32>
    %c15_i32_355 = arith.constant 15 : i32
    %652 = vector.broadcast %c15_i32_355 : i32 to vector<32x128xi32>
    %653 = arith.cmpi sge, %16, %652 : vector<32x128xi32>
    %cst_356 = arith.constant 0.000000e+00 : f32
    %654 = vector.broadcast %cst_356 : f32 to vector<32x128xf32>
    %655 = arith.select %653, %651, %654 : vector<32x128xi1>, vector<32x128xf32>
    %656 = arith.truncf %655 : vector<32x128xf32> to vector<32x128xbf16>
    %c128_357 = arith.constant 128 : index
    %c0_358 = arith.constant 0 : index
    %657 = vector.load %arg9[%c128_357, %c0_358] : memref<1264x128xbf16, #tpu.memory_space<vmem>>, vector<32x128xbf16>
    tpu.vector_store %arg9[%c128_357, %c0_358], %656 {strides = array<i32>} : memref<1264x128xbf16, #tpu.memory_space<vmem>>, vector<32x128xbf16>,
    %c14_i32_359 = arith.constant 14 : i32
    %658 = tpu.dynamic_rotate %622 by %c14_i32_359 dim 1 : vector<32x128xf32>, i32 -> vector<32x128xf32>
    %c14_i32_360 = arith.constant 14 : i32
    %659 = vector.broadcast %c14_i32_360 : i32 to vector<32x128xi32>
    %660 = arith.cmpi sge, %16, %659 : vector<32x128xi32>
    %cst_361 = arith.constant 0.000000e+00 : f32
    %661 = vector.broadcast %cst_361 : f32 to vector<32x128xf32>
    %662 = arith.select %660, %658, %661 : vector<32x128xi1>, vector<32x128xf32>
    %663 = arith.truncf %662 : vector<32x128xf32> to vector<32x128xbf16>
    %c160_362 = arith.constant 160 : index
    %c0_363 = arith.constant 0 : index
    %664 = vector.load %arg9[%c160_362, %c0_363] : memref<1264x128xbf16, #tpu.memory_space<vmem>>, vector<32x128xbf16>
    tpu.vector_store %arg9[%c160_362, %c0_363], %663 {strides = array<i32>} : memref<1264x128xbf16, #tpu.memory_space<vmem>>, vector<32x128xbf16>,
    %c13_i32_364 = arith.constant 13 : i32
    %665 = tpu.dynamic_rotate %622 by %c13_i32_364 dim 1 : vector<32x128xf32>, i32 -> vector<32x128xf32>
    %c13_i32_365 = arith.constant 13 : i32
    %666 = vector.broadcast %c13_i32_365 : i32 to vector<32x128xi32>
    %667 = arith.cmpi sge, %16, %666 : vector<32x128xi32>
    %cst_366 = arith.constant 0.000000e+00 : f32
    %668 = vector.broadcast %cst_366 : f32 to vector<32x128xf32>
    %669 = arith.select %667, %665, %668 : vector<32x128xi1>, vector<32x128xf32>
    %670 = arith.truncf %669 : vector<32x128xf32> to vector<32x128xbf16>
    %c192_367 = arith.constant 192 : index
    %c0_368 = arith.constant 0 : index
    %671 = vector.load %arg9[%c192_367, %c0_368] : memref<1264x128xbf16, #tpu.memory_space<vmem>>, vector<32x128xbf16>
    tpu.vector_store %arg9[%c192_367, %c0_368], %670 {strides = array<i32>} : memref<1264x128xbf16, #tpu.memory_space<vmem>>, vector<32x128xbf16>,
    %c12_i32_369 = arith.constant 12 : i32
    %672 = tpu.dynamic_rotate %622 by %c12_i32_369 dim 1 : vector<32x128xf32>, i32 -> vector<32x128xf32>
    %c12_i32_370 = arith.constant 12 : i32
    %673 = vector.broadcast %c12_i32_370 : i32 to vector<32x128xi32>
    %674 = arith.cmpi sge, %16, %673 : vector<32x128xi32>
    %cst_371 = arith.constant 0.000000e+00 : f32
    %675 = vector.broadcast %cst_371 : f32 to vector<32x128xf32>
    %676 = arith.select %674, %672, %675 : vector<32x128xi1>, vector<32x128xf32>
    %677 = arith.truncf %676 : vector<32x128xf32> to vector<32x128xbf16>
    %c224_372 = arith.constant 224 : index
    %c0_373 = arith.constant 0 : index
    %678 = vector.load %arg9[%c224_372, %c0_373] : memref<1264x128xbf16, #tpu.memory_space<vmem>>, vector<32x128xbf16>
    tpu.vector_store %arg9[%c224_372, %c0_373], %677 {strides = array<i32>} : memref<1264x128xbf16, #tpu.memory_space<vmem>>, vector<32x128xbf16>,
    %c11_i32_374 = arith.constant 11 : i32
    %679 = tpu.dynamic_rotate %622 by %c11_i32_374 dim 1 : vector<32x128xf32>, i32 -> vector<32x128xf32>
    %c11_i32_375 = arith.constant 11 : i32
    %680 = vector.broadcast %c11_i32_375 : i32 to vector<32x128xi32>
    %681 = arith.cmpi sge, %16, %680 : vector<32x128xi32>
    %cst_376 = arith.constant 0.000000e+00 : f32
    %682 = vector.broadcast %cst_376 : f32 to vector<32x128xf32>
    %683 = arith.select %681, %679, %682 : vector<32x128xi1>, vector<32x128xf32>
    %684 = arith.truncf %683 : vector<32x128xf32> to vector<32x128xbf16>
    %c256_377 = arith.constant 256 : index
    %c0_378 = arith.constant 0 : index
    %685 = vector.load %arg9[%c256_377, %c0_378] : memref<1264x128xbf16, #tpu.memory_space<vmem>>, vector<32x128xbf16>
    tpu.vector_store %arg9[%c256_377, %c0_378], %684 {strides = array<i32>} : memref<1264x128xbf16, #tpu.memory_space<vmem>>, vector<32x128xbf16>,
    %c10_i32_379 = arith.constant 10 : i32
    %686 = tpu.dynamic_rotate %622 by %c10_i32_379 dim 1 : vector<32x128xf32>, i32 -> vector<32x128xf32>
    %c10_i32_380 = arith.constant 10 : i32
    %687 = vector.broadcast %c10_i32_380 : i32 to vector<32x128xi32>
    %688 = arith.cmpi sge, %16, %687 : vector<32x128xi32>
    %cst_381 = arith.constant 0.000000e+00 : f32
    %689 = vector.broadcast %cst_381 : f32 to vector<32x128xf32>
    %690 = arith.select %688, %686, %689 : vector<32x128xi1>, vector<32x128xf32>
    %691 = arith.truncf %690 : vector<32x128xf32> to vector<32x128xbf16>
    %c288_382 = arith.constant 288 : index
    %c0_383 = arith.constant 0 : index
    %692 = vector.load %arg9[%c288_382, %c0_383] : memref<1264x128xbf16, #tpu.memory_space<vmem>>, vector<32x128xbf16>
    tpu.vector_store %arg9[%c288_382, %c0_383], %691 {strides = array<i32>} : memref<1264x128xbf16, #tpu.memory_space<vmem>>, vector<32x128xbf16>,
    %c9_i32_384 = arith.constant 9 : i32
    %693 = tpu.dynamic_rotate %622 by %c9_i32_384 dim 1 : vector<32x128xf32>, i32 -> vector<32x128xf32>
    %c9_i32_385 = arith.constant 9 : i32
    %694 = vector.broadcast %c9_i32_385 : i32 to vector<32x128xi32>
    %695 = arith.cmpi sge, %16, %694 : vector<32x128xi32>
    %cst_386 = arith.constant 0.000000e+00 : f32
    %696 = vector.broadcast %cst_386 : f32 to vector<32x128xf32>
    %697 = arith.select %695, %693, %696 : vector<32x128xi1>, vector<32x128xf32>
    %698 = arith.truncf %697 : vector<32x128xf32> to vector<32x128xbf16>
    %c320_387 = arith.constant 320 : index
    %c0_388 = arith.constant 0 : index
    %699 = vector.load %arg9[%c320_387, %c0_388] : memref<1264x128xbf16, #tpu.memory_space<vmem>>, vector<32x128xbf16>
    tpu.vector_store %arg9[%c320_387, %c0_388], %698 {strides = array<i32>} : memref<1264x128xbf16, #tpu.memory_space<vmem>>, vector<32x128xbf16>,
    %c8_i32_389 = arith.constant 8 : i32
    %700 = tpu.dynamic_rotate %622 by %c8_i32_389 dim 1 : vector<32x128xf32>, i32 -> vector<32x128xf32>
    %c8_i32_390 = arith.constant 8 : i32
    %701 = vector.broadcast %c8_i32_390 : i32 to vector<32x128xi32>
    %702 = arith.cmpi sge, %16, %701 : vector<32x128xi32>
    %cst_391 = arith.constant 0.000000e+00 : f32
    %703 = vector.broadcast %cst_391 : f32 to vector<32x128xf32>
    %704 = arith.select %702, %700, %703 : vector<32x128xi1>, vector<32x128xf32>
    %705 = arith.truncf %704 : vector<32x128xf32> to vector<32x128xbf16>
    %c352_392 = arith.constant 352 : index
    %c0_393 = arith.constant 0 : index
    %706 = vector.load %arg9[%c352_392, %c0_393] : memref<1264x128xbf16, #tpu.memory_space<vmem>>, vector<32x128xbf16>
    tpu.vector_store %arg9[%c352_392, %c0_393], %705 {strides = array<i32>} : memref<1264x128xbf16, #tpu.memory_space<vmem>>, vector<32x128xbf16>,
    %c7_i32_394 = arith.constant 7 : i32
    %707 = tpu.dynamic_rotate %622 by %c7_i32_394 dim 1 : vector<32x128xf32>, i32 -> vector<32x128xf32>
    %c7_i32_395 = arith.constant 7 : i32
    %708 = vector.broadcast %c7_i32_395 : i32 to vector<32x128xi32>
    %709 = arith.cmpi sge, %16, %708 : vector<32x128xi32>
    %cst_396 = arith.constant 0.000000e+00 : f32
    %710 = vector.broadcast %cst_396 : f32 to vector<32x128xf32>
    %711 = arith.select %709, %707, %710 : vector<32x128xi1>, vector<32x128xf32>
    %712 = arith.truncf %711 : vector<32x128xf32> to vector<32x128xbf16>
    %c384_397 = arith.constant 384 : index
    %c0_398 = arith.constant 0 : index
    %713 = vector.load %arg9[%c384_397, %c0_398] : memref<1264x128xbf16, #tpu.memory_space<vmem>>, vector<32x128xbf16>
    tpu.vector_store %arg9[%c384_397, %c0_398], %712 {strides = array<i32>} : memref<1264x128xbf16, #tpu.memory_space<vmem>>, vector<32x128xbf16>,
    %c6_i32_399 = arith.constant 6 : i32
    %714 = tpu.dynamic_rotate %622 by %c6_i32_399 dim 1 : vector<32x128xf32>, i32 -> vector<32x128xf32>
    %c6_i32_400 = arith.constant 6 : i32
    %715 = vector.broadcast %c6_i32_400 : i32 to vector<32x128xi32>
    %716 = arith.cmpi sge, %16, %715 : vector<32x128xi32>
    %cst_401 = arith.constant 0.000000e+00 : f32
    %717 = vector.broadcast %cst_401 : f32 to vector<32x128xf32>
    %718 = arith.select %716, %714, %717 : vector<32x128xi1>, vector<32x128xf32>
    %719 = arith.truncf %718 : vector<32x128xf32> to vector<32x128xbf16>
    %c416_402 = arith.constant 416 : index
    %c0_403 = arith.constant 0 : index
    %720 = vector.load %arg9[%c416_402, %c0_403] : memref<1264x128xbf16, #tpu.memory_space<vmem>>, vector<32x128xbf16>
    tpu.vector_store %arg9[%c416_402, %c0_403], %719 {strides = array<i32>} : memref<1264x128xbf16, #tpu.memory_space<vmem>>, vector<32x128xbf16>,
    %c5_i32_404 = arith.constant 5 : i32
    %721 = tpu.dynamic_rotate %622 by %c5_i32_404 dim 1 : vector<32x128xf32>, i32 -> vector<32x128xf32>
    %c5_i32_405 = arith.constant 5 : i32
    %722 = vector.broadcast %c5_i32_405 : i32 to vector<32x128xi32>
    %723 = arith.cmpi sge, %16, %722 : vector<32x128xi32>
    %cst_406 = arith.constant 0.000000e+00 : f32
    %724 = vector.broadcast %cst_406 : f32 to vector<32x128xf32>
    %725 = arith.select %723, %721, %724 : vector<32x128xi1>, vector<32x128xf32>
    %726 = arith.truncf %725 : vector<32x128xf32> to vector<32x128xbf16>
    %c448_407 = arith.constant 448 : index
    %c0_408 = arith.constant 0 : index
    %727 = vector.load %arg9[%c448_407, %c0_408] : memref<1264x128xbf16, #tpu.memory_space<vmem>>, vector<32x128xbf16>
    tpu.vector_store %arg9[%c448_407, %c0_408], %726 {strides = array<i32>} : memref<1264x128xbf16, #tpu.memory_space<vmem>>, vector<32x128xbf16>,
    %c4_i32_409 = arith.constant 4 : i32
    %728 = tpu.dynamic_rotate %622 by %c4_i32_409 dim 1 : vector<32x128xf32>, i32 -> vector<32x128xf32>
    %c4_i32_410 = arith.constant 4 : i32
    %729 = vector.broadcast %c4_i32_410 : i32 to vector<32x128xi32>
    %730 = arith.cmpi sge, %16, %729 : vector<32x128xi32>
    %cst_411 = arith.constant 0.000000e+00 : f32
    %731 = vector.broadcast %cst_411 : f32 to vector<32x128xf32>
    %732 = arith.select %730, %728, %731 : vector<32x128xi1>, vector<32x128xf32>
    %733 = arith.truncf %732 : vector<32x128xf32> to vector<32x128xbf16>
    %c480_412 = arith.constant 480 : index
    %c0_413 = arith.constant 0 : index
    %734 = vector.load %arg9[%c480_412, %c0_413] : memref<1264x128xbf16, #tpu.memory_space<vmem>>, vector<32x128xbf16>
    tpu.vector_store %arg9[%c480_412, %c0_413], %733 {strides = array<i32>} : memref<1264x128xbf16, #tpu.memory_space<vmem>>, vector<32x128xbf16>,
    %c3_i32_414 = arith.constant 3 : i32
    %735 = tpu.dynamic_rotate %622 by %c3_i32_414 dim 1 : vector<32x128xf32>, i32 -> vector<32x128xf32>
    %c3_i32_415 = arith.constant 3 : i32
    %736 = vector.broadcast %c3_i32_415 : i32 to vector<32x128xi32>
    %737 = arith.cmpi sge, %16, %736 : vector<32x128xi32>
    %cst_416 = arith.constant 0.000000e+00 : f32
    %738 = vector.broadcast %cst_416 : f32 to vector<32x128xf32>
    %739 = arith.select %737, %735, %738 : vector<32x128xi1>, vector<32x128xf32>
    %740 = arith.truncf %739 : vector<32x128xf32> to vector<32x128xbf16>
    %c512_417 = arith.constant 512 : index
    %c0_418 = arith.constant 0 : index
    %741 = vector.load %arg9[%c512_417, %c0_418] : memref<1264x128xbf16, #tpu.memory_space<vmem>>, vector<32x128xbf16>
    tpu.vector_store %arg9[%c512_417, %c0_418], %740 {strides = array<i32>} : memref<1264x128xbf16, #tpu.memory_space<vmem>>, vector<32x128xbf16>,
    %c2_i32_419 = arith.constant 2 : i32
    %742 = tpu.dynamic_rotate %622 by %c2_i32_419 dim 1 : vector<32x128xf32>, i32 -> vector<32x128xf32>
    %c2_i32_420 = arith.constant 2 : i32
    %743 = vector.broadcast %c2_i32_420 : i32 to vector<32x128xi32>
    %744 = arith.cmpi sge, %16, %743 : vector<32x128xi32>
    %cst_421 = arith.constant 0.000000e+00 : f32
    %745 = vector.broadcast %cst_421 : f32 to vector<32x128xf32>
    %746 = arith.select %744, %742, %745 : vector<32x128xi1>, vector<32x128xf32>
    %747 = arith.truncf %746 : vector<32x128xf32> to vector<32x128xbf16>
    %c544_422 = arith.constant 544 : index
    %c0_423 = arith.constant 0 : index
    %748 = vector.load %arg9[%c544_422, %c0_423] : memref<1264x128xbf16, #tpu.memory_space<vmem>>, vector<32x128xbf16>
    tpu.vector_store %arg9[%c544_422, %c0_423], %747 {strides = array<i32>} : memref<1264x128xbf16, #tpu.memory_space<vmem>>, vector<32x128xbf16>,
    %c1_i32_424 = arith.constant 1 : i32
    %749 = tpu.dynamic_rotate %622 by %c1_i32_424 dim 1 : vector<32x128xf32>, i32 -> vector<32x128xf32>
    %c1_i32_425 = arith.constant 1 : i32
    %750 = vector.broadcast %c1_i32_425 : i32 to vector<32x128xi32>
    %751 = arith.cmpi sge, %16, %750 : vector<32x128xi32>
    %cst_426 = arith.constant 0.000000e+00 : f32
    %752 = vector.broadcast %cst_426 : f32 to vector<32x128xf32>
    %753 = arith.select %751, %749, %752 : vector<32x128xi1>, vector<32x128xf32>
    %754 = arith.truncf %753 : vector<32x128xf32> to vector<32x128xbf16>
    %c576_427 = arith.constant 576 : index
    %c0_428 = arith.constant 0 : index
    %755 = vector.load %arg9[%c576_427, %c0_428] : memref<1264x128xbf16, #tpu.memory_space<vmem>>, vector<32x128xbf16>
    tpu.vector_store %arg9[%c576_427, %c0_428], %754 {strides = array<i32>} : memref<1264x128xbf16, #tpu.memory_space<vmem>>, vector<32x128xbf16>,
    %756 = arith.truncf %622 : vector<32x128xf32> to vector<32x128xbf16>
    %c608_429 = arith.constant 608 : index
    %c0_430 = arith.constant 0 : index
    %757 = vector.load %arg9[%c608_429, %c0_430] : memref<1264x128xbf16, #tpu.memory_space<vmem>>, vector<32x128xbf16>
    tpu.vector_store %arg9[%c608_429, %c0_430], %756 {strides = array<i32>} : memref<1264x128xbf16, #tpu.memory_space<vmem>>, vector<32x128xbf16>,
    %c127_i32_431 = arith.constant 127 : i32
    %758 = tpu.dynamic_rotate %622 by %c127_i32_431 dim 1 : vector<32x128xf32>, i32 -> vector<32x128xf32>
    %c63_i32_432 = arith.constant 63 : i32
    %759 = vector.broadcast %c63_i32_432 : i32 to vector<32x128xi32>
    %760 = arith.cmpi slt, %16, %759 : vector<32x128xi32>
    %cst_433 = arith.constant 0.000000e+00 : f32
    %761 = vector.broadcast %cst_433 : f32 to vector<32x128xf32>
    %762 = arith.select %760, %758, %761 : vector<32x128xi1>, vector<32x128xf32>
    %763 = arith.truncf %762 : vector<32x128xf32> to vector<32x128xbf16>
    %c640_434 = arith.constant 640 : index
    %c0_435 = arith.constant 0 : index
    %764 = vector.load %arg9[%c640_434, %c0_435] : memref<1264x128xbf16, #tpu.memory_space<vmem>>, vector<32x128xbf16>
    tpu.vector_store %arg9[%c640_434, %c0_435], %763 {strides = array<i32>} : memref<1264x128xbf16, #tpu.memory_space<vmem>>, vector<32x128xbf16>,
    %c126_i32_436 = arith.constant 126 : i32
    %765 = tpu.dynamic_rotate %622 by %c126_i32_436 dim 1 : vector<32x128xf32>, i32 -> vector<32x128xf32>
    %c62_i32_437 = arith.constant 62 : i32
    %766 = vector.broadcast %c62_i32_437 : i32 to vector<32x128xi32>
    %767 = arith.cmpi slt, %16, %766 : vector<32x128xi32>
    %cst_438 = arith.constant 0.000000e+00 : f32
    %768 = vector.broadcast %cst_438 : f32 to vector<32x128xf32>
    %769 = arith.select %767, %765, %768 : vector<32x128xi1>, vector<32x128xf32>
    %770 = arith.truncf %769 : vector<32x128xf32> to vector<32x128xbf16>
    %c672_439 = arith.constant 672 : index
    %c0_440 = arith.constant 0 : index
    %771 = vector.load %arg9[%c672_439, %c0_440] : memref<1264x128xbf16, #tpu.memory_space<vmem>>, vector<32x128xbf16>
    tpu.vector_store %arg9[%c672_439, %c0_440], %770 {strides = array<i32>} : memref<1264x128xbf16, #tpu.memory_space<vmem>>, vector<32x128xbf16>,
    %c125_i32_441 = arith.constant 125 : i32
    %772 = tpu.dynamic_rotate %622 by %c125_i32_441 dim 1 : vector<32x128xf32>, i32 -> vector<32x128xf32>
    %c61_i32_442 = arith.constant 61 : i32
    %773 = vector.broadcast %c61_i32_442 : i32 to vector<32x128xi32>
    %774 = arith.cmpi slt, %16, %773 : vector<32x128xi32>
    %cst_443 = arith.constant 0.000000e+00 : f32
    %775 = vector.broadcast %cst_443 : f32 to vector<32x128xf32>
    %776 = arith.select %774, %772, %775 : vector<32x128xi1>, vector<32x128xf32>
    %777 = arith.truncf %776 : vector<32x128xf32> to vector<32x128xbf16>
    %c704_444 = arith.constant 704 : index
    %c0_445 = arith.constant 0 : index
    %778 = vector.load %arg9[%c704_444, %c0_445] : memref<1264x128xbf16, #tpu.memory_space<vmem>>, vector<32x128xbf16>
    tpu.vector_store %arg9[%c704_444, %c0_445], %777 {strides = array<i32>} : memref<1264x128xbf16, #tpu.memory_space<vmem>>, vector<32x128xbf16>,
    %c124_i32_446 = arith.constant 124 : i32
    %779 = tpu.dynamic_rotate %622 by %c124_i32_446 dim 1 : vector<32x128xf32>, i32 -> vector<32x128xf32>
    %c60_i32_447 = arith.constant 60 : i32
    %780 = vector.broadcast %c60_i32_447 : i32 to vector<32x128xi32>
    %781 = arith.cmpi slt, %16, %780 : vector<32x128xi32>
    %cst_448 = arith.constant 0.000000e+00 : f32
    %782 = vector.broadcast %cst_448 : f32 to vector<32x128xf32>
    %783 = arith.select %781, %779, %782 : vector<32x128xi1>, vector<32x128xf32>
    %784 = arith.truncf %783 : vector<32x128xf32> to vector<32x128xbf16>
    %c736_449 = arith.constant 736 : index
    %c0_450 = arith.constant 0 : index
    %785 = vector.load %arg9[%c736_449, %c0_450] : memref<1264x128xbf16, #tpu.memory_space<vmem>>, vector<32x128xbf16>
    tpu.vector_store %arg9[%c736_449, %c0_450], %784 {strides = array<i32>} : memref<1264x128xbf16, #tpu.memory_space<vmem>>, vector<32x128xbf16>,
    %c123_i32_451 = arith.constant 123 : i32
    %786 = tpu.dynamic_rotate %622 by %c123_i32_451 dim 1 : vector<32x128xf32>, i32 -> vector<32x128xf32>
    %c59_i32_452 = arith.constant 59 : i32
    %787 = vector.broadcast %c59_i32_452 : i32 to vector<32x128xi32>
    %788 = arith.cmpi slt, %16, %787 : vector<32x128xi32>
    %cst_453 = arith.constant 0.000000e+00 : f32
    %789 = vector.broadcast %cst_453 : f32 to vector<32x128xf32>
    %790 = arith.select %788, %786, %789 : vector<32x128xi1>, vector<32x128xf32>
    %791 = arith.truncf %790 : vector<32x128xf32> to vector<32x128xbf16>
    %c768_454 = arith.constant 768 : index
    %c0_455 = arith.constant 0 : index
    %792 = vector.load %arg9[%c768_454, %c0_455] : memref<1264x128xbf16, #tpu.memory_space<vmem>>, vector<32x128xbf16>
    tpu.vector_store %arg9[%c768_454, %c0_455], %791 {strides = array<i32>} : memref<1264x128xbf16, #tpu.memory_space<vmem>>, vector<32x128xbf16>,
    %c122_i32_456 = arith.constant 122 : i32
    %793 = tpu.dynamic_rotate %622 by %c122_i32_456 dim 1 : vector<32x128xf32>, i32 -> vector<32x128xf32>
    %c58_i32_457 = arith.constant 58 : i32
    %794 = vector.broadcast %c58_i32_457 : i32 to vector<32x128xi32>
    %795 = arith.cmpi slt, %16, %794 : vector<32x128xi32>
    %cst_458 = arith.constant 0.000000e+00 : f32
    %796 = vector.broadcast %cst_458 : f32 to vector<32x128xf32>
    %797 = arith.select %795, %793, %796 : vector<32x128xi1>, vector<32x128xf32>
    %798 = arith.truncf %797 : vector<32x128xf32> to vector<32x128xbf16>
    %c800_459 = arith.constant 800 : index
    %c0_460 = arith.constant 0 : index
    %799 = vector.load %arg9[%c800_459, %c0_460] : memref<1264x128xbf16, #tpu.memory_space<vmem>>, vector<32x128xbf16>
    tpu.vector_store %arg9[%c800_459, %c0_460], %798 {strides = array<i32>} : memref<1264x128xbf16, #tpu.memory_space<vmem>>, vector<32x128xbf16>,
    %c121_i32_461 = arith.constant 121 : i32
    %800 = tpu.dynamic_rotate %622 by %c121_i32_461 dim 1 : vector<32x128xf32>, i32 -> vector<32x128xf32>
    %c57_i32_462 = arith.constant 57 : i32
    %801 = vector.broadcast %c57_i32_462 : i32 to vector<32x128xi32>
    %802 = arith.cmpi slt, %16, %801 : vector<32x128xi32>
    %cst_463 = arith.constant 0.000000e+00 : f32
    %803 = vector.broadcast %cst_463 : f32 to vector<32x128xf32>
    %804 = arith.select %802, %800, %803 : vector<32x128xi1>, vector<32x128xf32>
    %805 = arith.truncf %804 : vector<32x128xf32> to vector<32x128xbf16>
    %c832_464 = arith.constant 832 : index
    %c0_465 = arith.constant 0 : index
    %806 = vector.load %arg9[%c832_464, %c0_465] : memref<1264x128xbf16, #tpu.memory_space<vmem>>, vector<32x128xbf16>
    tpu.vector_store %arg9[%c832_464, %c0_465], %805 {strides = array<i32>} : memref<1264x128xbf16, #tpu.memory_space<vmem>>, vector<32x128xbf16>,
    %c120_i32_466 = arith.constant 120 : i32
    %807 = tpu.dynamic_rotate %622 by %c120_i32_466 dim 1 : vector<32x128xf32>, i32 -> vector<32x128xf32>
    %c56_i32_467 = arith.constant 56 : i32
    %808 = vector.broadcast %c56_i32_467 : i32 to vector<32x128xi32>
    %809 = arith.cmpi slt, %16, %808 : vector<32x128xi32>
    %cst_468 = arith.constant 0.000000e+00 : f32
    %810 = vector.broadcast %cst_468 : f32 to vector<32x128xf32>
    %811 = arith.select %809, %807, %810 : vector<32x128xi1>, vector<32x128xf32>
    %812 = arith.truncf %811 : vector<32x128xf32> to vector<32x128xbf16>
    %c864_469 = arith.constant 864 : index
    %c0_470 = arith.constant 0 : index
    %813 = vector.load %arg9[%c864_469, %c0_470] : memref<1264x128xbf16, #tpu.memory_space<vmem>>, vector<32x128xbf16>
    tpu.vector_store %arg9[%c864_469, %c0_470], %812 {strides = array<i32>} : memref<1264x128xbf16, #tpu.memory_space<vmem>>, vector<32x128xbf16>,
    %c119_i32_471 = arith.constant 119 : i32
    %814 = tpu.dynamic_rotate %622 by %c119_i32_471 dim 1 : vector<32x128xf32>, i32 -> vector<32x128xf32>
    %c55_i32_472 = arith.constant 55 : i32
    %815 = vector.broadcast %c55_i32_472 : i32 to vector<32x128xi32>
    %816 = arith.cmpi slt, %16, %815 : vector<32x128xi32>
    %cst_473 = arith.constant 0.000000e+00 : f32
    %817 = vector.broadcast %cst_473 : f32 to vector<32x128xf32>
    %818 = arith.select %816, %814, %817 : vector<32x128xi1>, vector<32x128xf32>
    %819 = arith.truncf %818 : vector<32x128xf32> to vector<32x128xbf16>
    %c896_474 = arith.constant 896 : index
    %c0_475 = arith.constant 0 : index
    %820 = vector.load %arg9[%c896_474, %c0_475] : memref<1264x128xbf16, #tpu.memory_space<vmem>>, vector<32x128xbf16>
    tpu.vector_store %arg9[%c896_474, %c0_475], %819 {strides = array<i32>} : memref<1264x128xbf16, #tpu.memory_space<vmem>>, vector<32x128xbf16>,
    %c118_i32_476 = arith.constant 118 : i32
    %821 = tpu.dynamic_rotate %622 by %c118_i32_476 dim 1 : vector<32x128xf32>, i32 -> vector<32x128xf32>
    %c54_i32_477 = arith.constant 54 : i32
    %822 = vector.broadcast %c54_i32_477 : i32 to vector<32x128xi32>
    %823 = arith.cmpi slt, %16, %822 : vector<32x128xi32>
    %cst_478 = arith.constant 0.000000e+00 : f32
    %824 = vector.broadcast %cst_478 : f32 to vector<32x128xf32>
    %825 = arith.select %823, %821, %824 : vector<32x128xi1>, vector<32x128xf32>
    %826 = arith.truncf %825 : vector<32x128xf32> to vector<32x128xbf16>
    %c928_479 = arith.constant 928 : index
    %c0_480 = arith.constant 0 : index
    %827 = vector.load %arg9[%c928_479, %c0_480] : memref<1264x128xbf16, #tpu.memory_space<vmem>>, vector<32x128xbf16>
    tpu.vector_store %arg9[%c928_479, %c0_480], %826 {strides = array<i32>} : memref<1264x128xbf16, #tpu.memory_space<vmem>>, vector<32x128xbf16>,
    %c117_i32_481 = arith.constant 117 : i32
    %828 = tpu.dynamic_rotate %622 by %c117_i32_481 dim 1 : vector<32x128xf32>, i32 -> vector<32x128xf32>
    %c53_i32_482 = arith.constant 53 : i32
    %829 = vector.broadcast %c53_i32_482 : i32 to vector<32x128xi32>
    %830 = arith.cmpi slt, %16, %829 : vector<32x128xi32>
    %cst_483 = arith.constant 0.000000e+00 : f32
    %831 = vector.broadcast %cst_483 : f32 to vector<32x128xf32>
    %832 = arith.select %830, %828, %831 : vector<32x128xi1>, vector<32x128xf32>
    %833 = arith.truncf %832 : vector<32x128xf32> to vector<32x128xbf16>
    %c960_484 = arith.constant 960 : index
    %c0_485 = arith.constant 0 : index
    %834 = vector.load %arg9[%c960_484, %c0_485] : memref<1264x128xbf16, #tpu.memory_space<vmem>>, vector<32x128xbf16>
    tpu.vector_store %arg9[%c960_484, %c0_485], %833 {strides = array<i32>} : memref<1264x128xbf16, #tpu.memory_space<vmem>>, vector<32x128xbf16>,
    %c116_i32_486 = arith.constant 116 : i32
    %835 = tpu.dynamic_rotate %622 by %c116_i32_486 dim 1 : vector<32x128xf32>, i32 -> vector<32x128xf32>
    %c52_i32_487 = arith.constant 52 : i32
    %836 = vector.broadcast %c52_i32_487 : i32 to vector<32x128xi32>
    %837 = arith.cmpi slt, %16, %836 : vector<32x128xi32>
    %cst_488 = arith.constant 0.000000e+00 : f32
    %838 = vector.broadcast %cst_488 : f32 to vector<32x128xf32>
    %839 = arith.select %837, %835, %838 : vector<32x128xi1>, vector<32x128xf32>
    %840 = arith.truncf %839 : vector<32x128xf32> to vector<32x128xbf16>
    %c992_489 = arith.constant 992 : index
    %c0_490 = arith.constant 0 : index
    %841 = vector.load %arg9[%c992_489, %c0_490] : memref<1264x128xbf16, #tpu.memory_space<vmem>>, vector<32x128xbf16>
    tpu.vector_store %arg9[%c992_489, %c0_490], %840 {strides = array<i32>} : memref<1264x128xbf16, #tpu.memory_space<vmem>>, vector<32x128xbf16>,
    %c115_i32_491 = arith.constant 115 : i32
    %842 = tpu.dynamic_rotate %622 by %c115_i32_491 dim 1 : vector<32x128xf32>, i32 -> vector<32x128xf32>
    %c51_i32_492 = arith.constant 51 : i32
    %843 = vector.broadcast %c51_i32_492 : i32 to vector<32x128xi32>
    %844 = arith.cmpi slt, %16, %843 : vector<32x128xi32>
    %cst_493 = arith.constant 0.000000e+00 : f32
    %845 = vector.broadcast %cst_493 : f32 to vector<32x128xf32>
    %846 = arith.select %844, %842, %845 : vector<32x128xi1>, vector<32x128xf32>
    %847 = arith.truncf %846 : vector<32x128xf32> to vector<32x128xbf16>
    %c1024_494 = arith.constant 1024 : index
    %c0_495 = arith.constant 0 : index
    %848 = vector.load %arg9[%c1024_494, %c0_495] : memref<1264x128xbf16, #tpu.memory_space<vmem>>, vector<32x128xbf16>
    tpu.vector_store %arg9[%c1024_494, %c0_495], %847 {strides = array<i32>} : memref<1264x128xbf16, #tpu.memory_space<vmem>>, vector<32x128xbf16>,
    %c114_i32_496 = arith.constant 114 : i32
    %849 = tpu.dynamic_rotate %622 by %c114_i32_496 dim 1 : vector<32x128xf32>, i32 -> vector<32x128xf32>
    %c50_i32_497 = arith.constant 50 : i32
    %850 = vector.broadcast %c50_i32_497 : i32 to vector<32x128xi32>
    %851 = arith.cmpi slt, %16, %850 : vector<32x128xi32>
    %cst_498 = arith.constant 0.000000e+00 : f32
    %852 = vector.broadcast %cst_498 : f32 to vector<32x128xf32>
    %853 = arith.select %851, %849, %852 : vector<32x128xi1>, vector<32x128xf32>
    %854 = arith.truncf %853 : vector<32x128xf32> to vector<32x128xbf16>
    %c1056_499 = arith.constant 1056 : index
    %c0_500 = arith.constant 0 : index
    %855 = vector.load %arg9[%c1056_499, %c0_500] : memref<1264x128xbf16, #tpu.memory_space<vmem>>, vector<32x128xbf16>
    tpu.vector_store %arg9[%c1056_499, %c0_500], %854 {strides = array<i32>} : memref<1264x128xbf16, #tpu.memory_space<vmem>>, vector<32x128xbf16>,
    %c113_i32_501 = arith.constant 113 : i32
    %856 = tpu.dynamic_rotate %622 by %c113_i32_501 dim 1 : vector<32x128xf32>, i32 -> vector<32x128xf32>
    %c49_i32_502 = arith.constant 49 : i32
    %857 = vector.broadcast %c49_i32_502 : i32 to vector<32x128xi32>
    %858 = arith.cmpi slt, %16, %857 : vector<32x128xi32>
    %cst_503 = arith.constant 0.000000e+00 : f32
    %859 = vector.broadcast %cst_503 : f32 to vector<32x128xf32>
    %860 = arith.select %858, %856, %859 : vector<32x128xi1>, vector<32x128xf32>
    %861 = arith.truncf %860 : vector<32x128xf32> to vector<32x128xbf16>
    %c1088_504 = arith.constant 1088 : index
    %c0_505 = arith.constant 0 : index
    %862 = vector.load %arg9[%c1088_504, %c0_505] : memref<1264x128xbf16, #tpu.memory_space<vmem>>, vector<32x128xbf16>
    tpu.vector_store %arg9[%c1088_504, %c0_505], %861 {strides = array<i32>} : memref<1264x128xbf16, #tpu.memory_space<vmem>>, vector<32x128xbf16>,
    %c112_i32_506 = arith.constant 112 : i32
    %863 = tpu.dynamic_rotate %622 by %c112_i32_506 dim 1 : vector<32x128xf32>, i32 -> vector<32x128xf32>
    %c48_i32_507 = arith.constant 48 : i32
    %864 = vector.broadcast %c48_i32_507 : i32 to vector<32x128xi32>
    %865 = arith.cmpi slt, %16, %864 : vector<32x128xi32>
    %cst_508 = arith.constant 0.000000e+00 : f32
    %866 = vector.broadcast %cst_508 : f32 to vector<32x128xf32>
    %867 = arith.select %865, %863, %866 : vector<32x128xi1>, vector<32x128xf32>
    %868 = arith.truncf %867 : vector<32x128xf32> to vector<32x128xbf16>
    %c1120_509 = arith.constant 1120 : index
    %c0_510 = arith.constant 0 : index
    %869 = vector.load %arg9[%c1120_509, %c0_510] : memref<1264x128xbf16, #tpu.memory_space<vmem>>, vector<32x128xbf16>
    tpu.vector_store %arg9[%c1120_509, %c0_510], %868 {strides = array<i32>} : memref<1264x128xbf16, #tpu.memory_space<vmem>>, vector<32x128xbf16>,
    %c111_i32_511 = arith.constant 111 : i32
    %870 = tpu.dynamic_rotate %622 by %c111_i32_511 dim 1 : vector<32x128xf32>, i32 -> vector<32x128xf32>
    %c47_i32_512 = arith.constant 47 : i32
    %871 = vector.broadcast %c47_i32_512 : i32 to vector<32x128xi32>
    %872 = arith.cmpi slt, %16, %871 : vector<32x128xi32>
    %cst_513 = arith.constant 0.000000e+00 : f32
    %873 = vector.broadcast %cst_513 : f32 to vector<32x128xf32>
    %874 = arith.select %872, %870, %873 : vector<32x128xi1>, vector<32x128xf32>
    %875 = arith.truncf %874 : vector<32x128xf32> to vector<32x128xbf16>
    %c1152_514 = arith.constant 1152 : index
    %c0_515 = arith.constant 0 : index
    %876 = vector.load %arg9[%c1152_514, %c0_515] : memref<1264x128xbf16, #tpu.memory_space<vmem>>, vector<32x128xbf16>
    tpu.vector_store %arg9[%c1152_514, %c0_515], %875 {strides = array<i32>} : memref<1264x128xbf16, #tpu.memory_space<vmem>>, vector<32x128xbf16>,
    %c110_i32_516 = arith.constant 110 : i32
    %877 = tpu.dynamic_rotate %622 by %c110_i32_516 dim 1 : vector<32x128xf32>, i32 -> vector<32x128xf32>
    %c46_i32_517 = arith.constant 46 : i32
    %878 = vector.broadcast %c46_i32_517 : i32 to vector<32x128xi32>
    %879 = arith.cmpi slt, %16, %878 : vector<32x128xi32>
    %cst_518 = arith.constant 0.000000e+00 : f32
    %880 = vector.broadcast %cst_518 : f32 to vector<32x128xf32>
    %881 = arith.select %879, %877, %880 : vector<32x128xi1>, vector<32x128xf32>
    %882 = arith.truncf %881 : vector<32x128xf32> to vector<32x128xbf16>
    %c1184_519 = arith.constant 1184 : index
    %c0_520 = arith.constant 0 : index
    %883 = vector.load %arg9[%c1184_519, %c0_520] : memref<1264x128xbf16, #tpu.memory_space<vmem>>, vector<32x128xbf16>
    tpu.vector_store %arg9[%c1184_519, %c0_520], %882 {strides = array<i32>} : memref<1264x128xbf16, #tpu.memory_space<vmem>>, vector<32x128xbf16>,
    %c109_i32_521 = arith.constant 109 : i32
    %884 = tpu.dynamic_rotate %622 by %c109_i32_521 dim 1 : vector<32x128xf32>, i32 -> vector<32x128xf32>
    %c45_i32_522 = arith.constant 45 : i32
    %885 = vector.broadcast %c45_i32_522 : i32 to vector<32x128xi32>
    %886 = arith.cmpi slt, %16, %885 : vector<32x128xi32>
    %cst_523 = arith.constant 0.000000e+00 : f32
    %887 = vector.broadcast %cst_523 : f32 to vector<32x128xf32>
    %888 = arith.select %886, %884, %887 : vector<32x128xi1>, vector<32x128xf32>
    %889 = arith.truncf %888 : vector<32x128xf32> to vector<32x128xbf16>
    %c1216_524 = arith.constant 1216 : index
    %c0_525 = arith.constant 0 : index
    %890 = vector.load %arg9[%c1216_524, %c0_525] : memref<1264x128xbf16, #tpu.memory_space<vmem>>, vector<32x128xbf16>
    tpu.vector_store %arg9[%c1216_524, %c0_525], %889 {strides = array<i32>} : memref<1264x128xbf16, #tpu.memory_space<vmem>>, vector<32x128xbf16>,
    %c1_i32_526 = arith.constant 1 : i32
    %891 = tpu.dynamic_rotate %621 by %c1_i32_526 dim 1 : vector<16x128xf32>, i32 -> vector<16x128xf32>
    %cst_527 = arith.constant -3.40282347E+38 : f32
    %892 = vector.broadcast %cst_527 : f32 to vector<16x128xf32>
    %893 = arith.select %35, %891, %892 : vector<16x128xi1>, vector<16x128xf32>
    %c127_i32_528 = arith.constant 127 : i32
    %894 = tpu.dynamic_rotate %621 by %c127_i32_528 dim 1 : vector<16x128xf32>, i32 -> vector<16x128xf32>
    %cst_529 = arith.constant -3.40282347E+38 : f32
    %895 = vector.broadcast %cst_529 : f32 to vector<16x128xf32>
    %896 = arith.select %37, %894, %895 : vector<16x128xi1>, vector<16x128xf32>
    %897 = arith.maximumf %893, %896 : vector<16x128xf32>
    %898 = arith.maximumf %621, %897 : vector<16x128xf32>
    %899 = arith.truncf %898 : vector<16x128xf32> to vector<16x128xbf16>
    %c1248_530 = arith.constant 1248 : index
    %c0_531 = arith.constant 0 : index
    %900 = vector.load %arg9[%c1248_530, %c0_531] : memref<1264x128xbf16, #tpu.memory_space<vmem>>, vector<16x128xbf16>
    tpu.vector_store %arg9[%c1248_530, %c0_531], %899 {strides = array<i32>} : memref<1264x128xbf16, #tpu.memory_space<vmem>>, vector<16x128xbf16>,
    %c2 = arith.constant 2 : index
    %c0_532 = arith.constant 0 : index
    %c0_533 = arith.constant 0 : index
    %901 = vector.load %arg4[%c2, %c0_532, %c0_533] : memref<3x48x1264xbf16, #tpu.memory_space<vmem>>, vector<1x48x1264xbf16>
    %902 = vector.shape_cast %901 : vector<1x48x1264xbf16> to vector<48x1264xbf16>
    %c0_534 = arith.constant 0 : index
    %c0_535 = arith.constant 0 : index
    %903 = vector.load %arg9[%c0_534, %c0_535] : memref<1264x128xbf16, #tpu.memory_space<vmem>>, vector<1264x128xbf16>
    %cst_536 = arith.constant dense<0.000000e+00> : vector<48x128xf32>
    %904 = tpu.matmul %902, %903, %cst_536 {dimension_numbers = #tpu.dot_dimension_numbers<[1], [0], [0], [1], [0, 0, 1, 1], [], []>} : vector<48x1264xbf16>, vector<1264x128xbf16>, vector<48x128xf32> -> vector<48x128xf32>
    %c2_537 = arith.constant 2 : index
    %c0_538 = arith.constant 0 : index
    %c0_539 = arith.constant 0 : index
    %905 = vector.load %arg5[%c2_537, %c0_538, %c0_539] : memref<3x48x1xf32, #tpu.memory_space<vmem>>, vector<1x48x1xf32>
    %906 = vector.shape_cast %905 : vector<1x48x1xf32> to vector<48x1xf32>
    %907 = vector.broadcast %906 : vector<48x1xf32> to vector<48x128xf32>
    %908 = arith.addf %904, %907 : vector<48x128xf32>
    %909 = vector.extract_strided_slice %908 {offsets = [0, 0], sizes = [16, 128], strides = [1, 1]} : vector<48x128xf32> to vector<16x128xf32>
    %910 = arith.addf %909, %45 : vector<16x128xf32>
    %cst_540 = arith.constant dense<0.000000e+00> : vector<16xf32>
    %911 = vector.multi_reduction <add>, %910, %cst_540 [1] : vector<16x128xf32> to vector<16xf32>
    %912 = vector.shape_cast %911 : vector<16xf32> to vector<16x1xf32>
    %cst_541 = arith.constant 1.280000e+02 : f32
    %913 = vector.broadcast %cst_541 : f32 to vector<16x1xf32>
    %914 = arith.divf %912, %913 : vector<16x1xf32>
    %915 = vector.broadcast %914 : vector<16x1xf32> to vector<16x128xf32>
    %916 = arith.subf %910, %915 : vector<16x128xf32>
    %917 = arith.mulf %916, %916 : vector<16x128xf32>
    %cst_542 = arith.constant dense<0.000000e+00> : vector<16xf32>
    %918 = vector.multi_reduction <add>, %917, %cst_542 [1] : vector<16x128xf32> to vector<16xf32>
    %919 = vector.shape_cast %918 : vector<16xf32> to vector<16x1xf32>
    %cst_543 = arith.constant 1.280000e+02 : f32
    %920 = vector.broadcast %cst_543 : f32 to vector<16x1xf32>
    %921 = arith.divf %919, %920 : vector<16x1xf32>
    %cst_544 = arith.constant 9.99999974E-6 : f32
    %922 = vector.broadcast %cst_544 : f32 to vector<16x1xf32>
    %923 = arith.addf %921, %922 : vector<16x1xf32>
    %924 = math.rsqrt %923 : vector<16x1xf32>
    %925 = vector.broadcast %914 : vector<16x1xf32> to vector<16x128xf32>
    %926 = arith.subf %910, %925 : vector<16x128xf32>
    %c0_545 = arith.constant 0 : index
    %c0_546 = arith.constant 0 : index
    %927 = vector.load %arg6[%c0_545, %c0_546] : memref<16x1xf32, #tpu.memory_space<vmem>>, vector<16x1xf32>
    %928 = arith.mulf %924, %927 : vector<16x1xf32>
    %929 = vector.broadcast %928 : vector<16x1xf32> to vector<16x128xf32>
    %930 = arith.mulf %926, %929 : vector<16x128xf32>
    %c0_547 = arith.constant 0 : index
    %c0_548 = arith.constant 0 : index
    %931 = vector.load %arg7[%c0_547, %c0_548] : memref<16x1xf32, #tpu.memory_space<vmem>>, vector<16x1xf32>
    %932 = vector.broadcast %931 : vector<16x1xf32> to vector<16x128xf32>
    %933 = arith.addf %930, %932 : vector<16x128xf32>
    %cst_549 = arith.constant 0.000000e+00 : f32
    %934 = vector.broadcast %cst_549 : f32 to vector<16x128xf32>
    %935 = arith.maximumf %933, %934 : vector<16x128xf32>
    %c0_550 = arith.constant 0 : index
    %c0_551 = arith.constant 0 : index
    %936 = vector.load %arg8[%c0_550, %c0_551] : memref<16x128xf32, #tpu.memory_space<vmem>>, vector<16x128xf32>
    tpu.vector_store %arg8[%c0_550, %c0_551], %935 {strides = array<i32>} : memref<16x128xf32, #tpu.memory_space<vmem>>, vector<16x128xf32>,
    return
  }
  func.func @transform_0(%arg0: i32) -> (i32, i32) {
    %c0_i32 = arith.constant 0 : i32
    %c0_i32_0 = arith.constant 0 : i32
    %c0_i32_1 = arith.constant 0 : i32
    return %c0_i32, %c0_i32_0 : i32, i32
  }
  func.func @transform_1(%arg0: i32) -> (i32, i32) {
    %c0_i32 = arith.constant 0 : i32
    %c0_i32_0 = arith.constant 0 : i32
    %c0_i32_1 = arith.constant 0 : i32
    return %c0_i32, %c0_i32_0 : i32, i32
  }
  func.func @transform_2(%arg0: i32) -> (i32, i32) {
    %c0_i32 = arith.constant 0 : i32
    %c0_i32_0 = arith.constant 0 : i32
    %c0_i32_1 = arith.constant 0 : i32
    return %c0_i32, %c0_i32_0 : i32, i32
  }
  func.func @transform_3(%arg0: i32) -> (i32, i32, i32) {
    %c0_i32 = arith.constant 0 : i32
    %c0_i32_0 = arith.constant 0 : i32
    %c0_i32_1 = arith.constant 0 : i32
    %c0_i32_2 = arith.constant 0 : i32
    return %c0_i32, %c0_i32_0, %c0_i32_1 : i32, i32, i32
  }
  func.func @transform_4(%arg0: i32) -> (i32, i32, i32) {
    %c0_i32 = arith.constant 0 : i32
    %c0_i32_0 = arith.constant 0 : i32
    %c0_i32_1 = arith.constant 0 : i32
    %c0_i32_2 = arith.constant 0 : i32
    return %c0_i32, %c0_i32_0, %c0_i32_1 : i32, i32, i32
  }
  func.func @transform_5(%arg0: i32) -> (i32, i32) {
    %c0_i32 = arith.constant 0 : i32
    %c0_i32_0 = arith.constant 0 : i32
    %c0_i32_1 = arith.constant 0 : i32
    return %c0_i32, %c0_i32_0 : i32, i32
  }
  func.func @transform_6(%arg0: i32) -> (i32, i32) {
    %c0_i32 = arith.constant 0 : i32
    %c0_i32_0 = arith.constant 0 : i32
    %c0_i32_1 = arith.constant 0 : i32
    return %c0_i32, %c0_i32_0 : i32, i32
  }
  func.func @transform_7(%arg0: i32) -> (i32, i32) {
    %c0_i32 = arith.constant 0 : i32
    %c0_i32_0 = arith.constant 0 : i32
    %c0_i32_1 = arith.constant 0 : i32
    return %c0_i32, %c0_i32_0 : i32, i32
  }
}

</mosaic_0001>

<bundles_post_ra>
// kernel: inception_block_forward.1
= control target key start
LH: loop header
LB: loop body
LE: loop exit
PB: predicated region body
PF: predicated region fallthrough
CT: control target
= control target key end

     0   :  { %v6546_v0 = vmov 0.0   ;;  %vm6547_vm0 = vmmov 0   ;;  %v8674_v4 = vmov 0   ;;  %vm103_vm1 = vcmask 130048   ;;  %s8718_s19 = smov 15   ;;  %s8716_s20 = smov 18   ;;  %s8567_s0 = inlined_call_operand.vmem [shape: f32[16,128], index: 0, kind: input, shape index: {}]   ;;  %s8568_s1 = inlined_call_operand.vmem [shape: bf16[48,16], index: 1, kind: input, shape index: {}]   ;;  %s8569_s2 = inlined_call_operand.vmem [shape: f32[48,1], index: 2, kind: input, shape index: {}]   ;;  %s8570_s3 = inlined_call_operand.vmem [shape: bf16[3,48,1264], index: 3, kind: input, shape index: {}]   ;;  %s8571_s4 = inlined_call_operand.vmem [shape: f32[3,48,1], index: 4, kind: input, shape index: {}]   ;;  %s8572_s5 = inlined_call_operand.vmem [shape: f32[16,1], index: 5, kind: input, shape index: {}]   ;;  %s8573_s6 = inlined_call_operand.vmem [shape: f32[16,1], index: 6, kind: input, shape index: {}]   ;;  %s8574_s7 = inlined_call_operand.vmem [shape: f32[16,128], index: 7, kind: output, shape index: {}]  }
   0x1   :  { %8809 = sst [smem:[#allocation36_spill]] %s8569_s2  ;;  %5169 = vmatprep.subr.bf16.mxu1 %v6546_v0  ;;  %v6630_v1 = vld [vmem:[%s8567_s0] sm:$0xff]  ;;  %v6635_v2 = vld [vmem:[%s8567_s0 + $0x8] sm:$0xff]  ;;  %5171 = vmatprep.mubr.msk.bf16.mxu1 %vm6547_vm0, %v6546_v0  ;;  %v54_v6 = vld [vmem:[%s8569_s2 + $0x10] sm:$0xff]  ;;  %s8714_s21 = smov 14   ;;  %v27_v37 = vlaneseq  ;;  %v8816_v46 = vmov 0 }
   0x2   :  { %8810 = sst [smem:[#allocation37_spill]] %s8572_s5  ;;  %v51_v3 = vpack.c.bf16 %v6635_v2, %v6630_v1  ;;  %5230 = vset.pattern.permute.xlu0 %v8674_v4  ;;  %5231 = vset.pattern.permute.xlu1 %v8674_v4  ;;  %v6402_v5 = vld [vmem:[%s8568_s1] sm:$0xff]   ;;  %v55_v8 = vld [vmem:[%s8569_s2 + $0x18] sm:$0xff]  ;;  %v57_v9 = vld [vmem:[%s8569_s2 + $0x28] sm:$0xff]  ;;  %s8712_s22 = smov 17   ;;  %v8819_v49 = vmov 0 }
   0x3   :  { %8811 = sst [smem:[#allocation38_spill]] %s8573_s6  ;;  %70 = vperm.xlu0 %5230, %v54_v6   ;;  %v56_v7 = vld [vmem:[%s8569_s2 + $0x20] sm:$0xff]  ;;  %v6403_v10 = vld [vmem:[%s8568_s1 + $0x8] sm:$0xff]   ;;  %v6404_v11 = vld [vmem:[%s8568_s1 + $0x10] sm:$0xff]   ;;  %s8698_s1 = smov 19   ;;  %v28_v38 = vand.u32 127, %v27_v37 }
   0x4   :  { %8812 = sst [smem:[#allocation39_spill]] %s8574_s7  ;;  %5170 = vmatpush3.bf16.msra.mxu1 %v51_v3  ;;  %80 = vperm.xlu1 %5231, %v56_v7   ;;  %s8706_s23 = smov 13   ;;  %v6407_v36 = vld [vmem:[%s8570_s3 + $0x4] ss:$40 sps:$4 sm:$0xff]   ;;  %v6850_v7 = vpack.i.bf16 %v6635_v2, %v6630_v1 }
   0x5   :  { %s8704_s24 = smov 16   ;;  %s8710_s25 = smov 12   ;;  %v6804_v39 = vand.u32 63, %v28_v38 }
   0x6   :  { %s8694_s28 = smov 11   ;;  %s8589_s29 = smov 7  }
   0x7   :  { %5172 = vmatmul.mubr.msk.bf16.vlgmr.msra.gmra.mrb[0].mxu1 %vm103_vm1, %v6402_v5  ;;  %75 = vperm.xlu0 %5230, %v55_v8   ;;  %s8587_s30 = smov 10   ;;  %s8581_s8 = smov 6   ;;  %8815 = vst [vmem:[#allocation5_spill] sm:$0xff] %v6804_v39  ;;  %vm246_vm2 = vcmp.ge.s32.totalorder %v6804_v39, 15  ;;  %vm178_vm3 = vcmp.ge.s32.totalorder %v6804_v39, 19  ;;  %vm263_vm6 = vcmp.ge.s32.totalorder %v6804_v39, 14 }
   0x8   :  { %5175 = vmatprep.mubr.msk.bf16.mxu1 %vm6547_vm0, %v6546_v0  ;;  %85 = vperm.xlu1 %5231, %v57_v9   ;;  %s8583_s9 = smov 9   ;;  %s8577_s10 = smov 5   ;;  %vm6816_vm4 = vmpackc.low %vm246_vm2, %vm246_vm2  ;;  %vm195_vm8 = vcmp.ge.s32.totalorder %v6804_v39, 18  ;;  %vm280_vm10 = vcmp.ge.s32.totalorder %v6804_v39, 13  ;;  %vm212_vm12 = vcmp.ge.s32.totalorder %v6804_v39, 17  ;;  %vm297_vm14 = vcmp.ge.s32.totalorder %v6804_v39, 12 }
   0x9   :  { %s8579_s11 = smov 8   ;;  %s8575_s12 = smov 4   ;;  %v8817_v46 = vsel %vm6816_vm4, 4294967295, %v8816_v46  ;;  %vm6820_vm5 = vmpackc.low %vm178_vm3, %vm178_vm3  ;;  %vm382_vm2 = vcmp.ge.s32.totalorder %v6804_v39, 7 }
   0xa   :  { %s8702_s13 = smov 3   ;;  %s8720_s14 = smov 127   ;;  %8818 = vst [vmem:[#allocation6_spill] sm:$0xff] %v8817_v46  ;;  %v8820_v49 = vsel %vm6820_vm5, 4294967295, %v8819_v49  ;;  %vm6837_vm7 = vmpackc.low %vm263_vm6, %vm263_vm6  ;;  %vm314_vm6 = vcmp.ge.s32.totalorder %v6804_v39, 11 }
   0xb   :  { %s8700_s15 = smov 2   ;;  %s8708_s16 = smov 126   ;;  %8821 = vst [vmem:[#allocation7_spill] sm:$0xff] %v8820_v49  ;;  %vm6856_vm9 = vmpackc.low %vm195_vm8, %vm195_vm8 }
   0xc   :  { %s8724_s17 = smov 1   ;;  %s8696_s18 = smov 125   ;;  %vm6867_vm11 = vmpackc.low %vm280_vm10, %vm280_vm10  ;;  %vm399_vm10 = vcmp.ge.s32.totalorder %v6804_v39, 6 }
   0xd   :  { %s8722_s26 = smov 123   ;;  %s8585_s27 = smov 124   ;;  %vm6882_vm13 = vmpackc.low %vm212_vm12, %vm212_vm12 }
   0xe   :  { %vm6893_vm15 = vmpackc.low %vm297_vm14, %vm297_vm14  ;;  %vm331_vm14 = vcmp.ge.s32.totalorder %v6804_v39, 10  ;;  %s9018_s2 = smov 18   ;;  %s9019_s5 = smov 14  }
   0xf   :  { %5176 = vmatmul.mubr.msk.bf16.gmra.mrb[4].mxu1 %vm103_vm1, %v6403_v10  ;;  %vm6922_vm3 = vmpackc.low %vm382_vm2, %vm382_vm2  ;;  %vm416_vm2 = vcmp.ge.s32.totalorder %v6804_v39, 5  ;;  %s9020_s6 = smov 17   ;;  %s9021_s7 = smov 13  }
  0x10   :  { %5179 = vmatprep.mubr.msk.bf16.mxu1 %vm6547_vm0, %v6546_v0  ;;  %vm229_vm0 = vcmp.ge.s32.totalorder %v6804_v39, 16  ;;  %vm6943_vm8 = vmpackc.low %vm314_vm6, %vm314_vm6 }
  0x11   :  { %vm6965_vm12 = vmpackc.low %vm399_vm10, %vm399_vm10  ;;  %vm348_vm10 = vcmp.ge.s32.totalorder %v6804_v39, 9 }
  0x12   :  { %vm6998_vm6 = vmpackc.low %vm416_vm2, %vm416_vm2  ;;  %vm433_vm2 = vcmp.ge.s32.totalorder %v6804_v39, 4 }
  0x17   :  { %5180 = vmatmul.mubr.msk.bf16.gmra.mrb[8].mxu1 %vm103_vm1, %v6404_v11  ;;  %vm6908_vm1 = vmpackc.low %vm229_vm0, %vm229_vm0 }
  0x18   :  { %1170 = vmatprep.mubr.bf16.mxu1 %v6407_v36  ;;  %vm6982_vm0 = vmpackc.low %vm331_vm14, %vm331_vm14 }
  0x19   :  { %vm7015_vm14 = vmpackc.low %vm348_vm10, %vm348_vm10 }
  0x1a   :  { %vm7022_vm10 = vmpackc.low %vm433_vm2, %vm433_vm2  ;;  %vm8621_vm2 = vcmp.lt.s32.totalorder %v6804_v39, 63 }
  0x82   :  { %v71_v16 = vpop.permute.xlu0 %70 }
  0x83   :  { %v81_v24 = vpop.permute.xlu1 %80 }
  0x86   :  { %v76_v19 = vpop.permute.xlu0 %75 }
  0x87   :  { %v86_v29 = vpop.permute.xlu1 %85 }
  0xda   :  { %v6665_v12 = vpop.f32.mrb[0].mxu1 }
  0xdb   :  { %8813 = vst [vmem:[#allocation3_spill] sm:$0xff] %v6665_v12  ;;  %v5173_v13 = vpop.f32.mrb[1].mxu1 }
  0xdc   :  { %v6667_v14 = vpop.f32.mrb[2].mxu1 }
  0xdd   :  { %8814 = vst [vmem:[#allocation4_spill] sm:$0xff] %v6667_v14  ;;  %v5174_v15 = vpop.f32.mrb[3].mxu1 }
  0xe2   :  { %v155_v17 = vpop.f32.mrb[4].mxu1 }
  0xe3   :  { %v5177_v18 = vpop.f32.mrb[5].mxu1  ;;  %v6669_v21 = vadd.f32 %v155_v17, %v71_v16 }
  0xe4   :  { %v158_v20 = vpop.f32.mrb[6].mxu1 }
  0xe5   :  { %v6671_v22 = vadd.f32 %v158_v20, %v76_v19  ;;  %v5178_v23 = vpop.f32.mrb[7].mxu1 }
  0xe7   :  { %v6675_v25 = vpack.i.bf16 %v6671_v22, %v6669_v21  ;;  %v492_v34 = vpack.c.bf16 %v6671_v22, %v6669_v21  ;;  %v6426_v21 = vld [vmem:[%s8570_s3 + $0x64] ss:$40 sps:$4 sm:$0xff]   ;;  %v8872_v22 = vmov 0 }
  0xe9   :  { %5238 = vrot.lane.b32.xlu1 %v6675_v25, %s8698_s1  ;;  %5233 = vrot.lane.b32.xlu0 %v6675_v25, %s8718_s19 }
  0xea   :  { %v163_v26 = vpop.f32.mrb[8].mxu1 }
  0xeb   :  { %v6681_v27 = vadd.f32 %v163_v26, %v81_v24  ;;  %v5181_v28 = vpop.f32.mrb[9].mxu1 }
  0xec   :  { %v166_v30 = vpop.f32.mrb[10].mxu1 }
  0xed   :  { %v6683_v31 = vadd.f32 %v166_v30, %v86_v29  ;;  %5248 = vrot.lane.b32.xlu1 %v6675_v25, %s8716_s20  ;;  %5243 = vrot.lane.b32.xlu0 %v6675_v25, %s8714_s21  ;;  %v5182_v32 = vpop.f32.mrb[11].mxu1 }
  0xef   :  { %v6691_v33 = vpack.i.bf16 %v6683_v31, %v6681_v27  ;;  %v493_v35 = vpack.c.bf16 %v6683_v31, %v6681_v27 }
  0xf1   :  { %5263 = vrot.lane.b32.xlu1 %v6691_v33, %s8698_s1  ;;  %5253 = vrot.lane.b32.xlu0 %v6691_v33, %s8718_s19 }
  0xf5   :  { %5268 = vrot.lane.b32.xlu1 %v6675_v25, %s8712_s22  ;;  %5258 = vrot.lane.b32.xlu0 %v6675_v25, %s8706_s23 }
  0xf9   :  { %5283 = vrot.lane.b32.xlu1 %v6691_v33, %s8716_s20  ;;  %5273 = vrot.lane.b32.xlu0 %v6691_v33, %s8714_s21 }
  0xfd   :  { %5288 = vrot.lane.b32.xlu1 %v6675_v25, %s8704_s24  ;;  %5278 = vrot.lane.b32.xlu0 %v6675_v25, %s8710_s25 }
 0x101   :  { %5303 = vrot.lane.b32.xlu1 %v6691_v33, %s8712_s22  ;;  %5293 = vrot.lane.b32.xlu0 %v6691_v33, %s8706_s23 }
 0x105   :  { %5308 = vrot.lane.b32.xlu1 %v6675_v25, %s8694_s28  ;;  %5298 = vrot.lane.b32.xlu0 %v6675_v25, %s8589_s29 }
 0x109   :  { %5323 = vrot.lane.b32.xlu1 %v6691_v33, %s8704_s24  ;;  %5313 = vrot.lane.b32.xlu0 %v6691_v33, %s8710_s25 }
 0x10d   :  { %5328 = vrot.lane.b32.xlu1 %v6675_v25, %s8587_s30  ;;  %5318 = vrot.lane.b32.xlu0 %v6675_v25, %s8581_s8 }
 0x111   :  { %5343 = vrot.lane.b32.xlu1 %v6691_v33, %s8694_s28  ;;  %5333 = vrot.lane.b32.xlu0 %v6691_v33, %s8589_s29  ;;  %s8599_s29 = smov 118  }
 0x115   :  { %5348 = vrot.lane.b32.xlu1 %v6675_v25, %s8583_s9  ;;  %5338 = vrot.lane.b32.xlu0 %v6675_v25, %s8577_s10 }
 0x119   :  { %5363 = vrot.lane.b32.xlu1 %v6691_v33, %s8587_s30  ;;  %5353 = vrot.lane.b32.xlu0 %v6691_v33, %s8581_s8  ;;  %s8670_s8 = smov 121   ;;  %s8605_s30 = smov 112  }
 0x11d   :  { %5368 = vrot.lane.b32.xlu1 %v6675_v25, %s8579_s11  ;;  %5358 = vrot.lane.b32.xlu0 %v6675_v25, %s8575_s12 }
 0x121   :  { %5383 = vrot.lane.b32.xlu1 %v6691_v33, %s8583_s9  ;;  %5373 = vrot.lane.b32.xlu0 %v6691_v33, %s8577_s10  ;;  %s8672_s10 = smov 122   ;;  %s8595_s9 = smov 113  }
 0x125   :  { %5388 = vrot.lane.b32.xlu1 %v6675_v25, %s8702_s13  ;;  %5378 = vrot.lane.b32.xlu0 %v6675_v25, %s8720_s14 }
 0x129   :  { %5403 = vrot.lane.b32.xlu1 %v6691_v33, %s8579_s11  ;;  %5393 = vrot.lane.b32.xlu0 %v6691_v33, %s8575_s12  ;;  %s8597_s12 = smov 115   ;;  %s8591_s11 = smov 114  }
 0x12d   :  { %5408 = vrot.lane.b32.xlu1 %v6675_v25, %s8700_s15  ;;  %5398 = vrot.lane.b32.xlu0 %v6675_v25, %s8708_s16 }
 0x131   :  { %5423 = vrot.lane.b32.xlu1 %v6691_v33, %s8702_s13  ;;  %5413 = vrot.lane.b32.xlu0 %v6691_v33, %s8720_s14 }
 0x135   :  { %5428 = vrot.lane.b32.xlu1 %v6675_v25, %s8724_s17  ;;  %5418 = vrot.lane.b32.xlu0 %v6675_v25, %s8696_s18 }
 0x139   :  { %5443 = vrot.lane.b32.xlu1 %v6691_v33, %s8700_s15  ;;  %5433 = vrot.lane.b32.xlu0 %v6691_v33, %s8708_s16 }
 0x13d   :  { %5473 = vrot.lane.b32.xlu1 %v6675_v25, %s8722_s26  ;;  %5438 = vrot.lane.b32.xlu0 %v6675_v25, %s8585_s27 }
 0x141   :  { %5488 = vrot.lane.b32.xlu1 %v6691_v33, %s8724_s17  ;;  %5448 = vrot.lane.b32.xlu0 %v6691_v33, %s8696_s18 }
 0x145   :  { %5493 = vrot.lane.b32.xlu1 %v6691_v33, %s8585_s27  ;;  %5453 = vrot.lane.b32.xlu0 %v6675_v25, %s8597_s12  ;;  %s8593_s27 = smov 119  }
 0x149   :  { %5498 = vrot.lane.b32.xlu1 %v6675_v25, %s8672_s10  ;;  %5458 = vrot.lane.b32.xlu0 %v6675_v25, %s8591_s11 }
 0x14d   :  { %5513 = vrot.lane.b32.xlu1 %v6675_v25, %s8670_s8  ;;  %5463 = vrot.lane.b32.xlu0 %v6675_v25, %s8595_s9 }
 0x151   :  { %5523 = vrot.lane.b32.xlu1 %v6691_v33, %s8597_s12  ;;  %5468 = vrot.lane.b32.xlu0 %v6675_v25, %s8593_s27  ;;  %s8609_s12 = smov 110  }
 0x155   :  { %5528 = vrot.lane.b32.xlu1 %v6691_v33, %s8591_s11  ;;  %5478 = vrot.lane.b32.xlu0 %v6675_v25, %s8605_s30  ;;  %s8601_s11 = smov 111  }
 0x159   :  { %5533 = vrot.lane.b32.xlu1 %v6691_v33, %s8595_s9  ;;  %5483 = vrot.lane.b32.xlu0 %v6675_v25, %s8599_s29  ;;  %s8603_s9 = smov 117  }
 0x15b   :  { %v5239_v40 = vpop.permute.xlu1 %5238  ;;  %v5234_v41 = vpop.permute.xlu0 %5233 }
 0x15c   :  { %v5241_v42 = vunpack.i.h.bf16 %v5239_v40  ;;  %v5240_v43 = vunpack.i.l.bf16 %v5239_v40  ;;  %v5236_v44 = vunpack.i.h.bf16 %v5234_v41  ;;  %v5235_v45 = vunpack.i.l.bf16 %v5234_v41 }
 0x15d   :  { %5538 = vrot.lane.b32.xlu1 %v6691_v33, %s8593_s27  ;;  %5503 = vrot.lane.b32.xlu0 %v6675_v25, %s8601_s11  ;;  %s8613_s27 = smov 120  }
 0x15e   :  { %v4074_v47 = vpack.c.bf16 %v5241_v42, %v5240_v43  ;;  %v4098_v48 = vpack.c.bf16 %v5236_v44, %v5235_v45 }
 0x15f   :  { %v5249_v50 = vpop.permute.xlu1 %5248  ;;  %v5244_v51 = vpop.permute.xlu0 %5243 }
 0x160   :  { %4761 = vmatprep.subr.msk.bf16.mxu1 %vm6816_vm4, %v4098_v48  ;;  %v5246_v52 = vunpack.i.h.bf16 %v5244_v51  ;;  %v5245_v53 = vunpack.i.l.bf16 %v5244_v51  ;;  %v5251_v62 = vunpack.i.h.bf16 %v5249_v50  ;;  %v5250_v63 = vunpack.i.l.bf16 %v5249_v50 }
 0x161   :  { %4762 = vmatpush3.bf16.msk.msra.mxu1 %vm6820_vm5, %v4074_v47  ;;  %5553 = vrot.lane.b32.xlu1 %v6675_v25, %s8613_s27 }
 0x162   :  { %5508 = vrot.lane.b32.xlu0 %v6675_v25, %s8603_s9  ;;  %v4104_v6 = vpack.c.bf16 %v5246_v52, %v5245_v53  ;;  %v4080_v9 = vpack.c.bf16 %v5251_v62, %v5250_v63  ;;  %v8830_v53 = vmov 0 }
 0x163   :  { %v5264_v54 = vpop.permute.xlu1 %5263  ;;  %v5254_v55 = vpop.permute.xlu0 %5253  ;;  %v8831_v53 = vsel %vm6893_vm15, 4294967295, %v8830_v53 }
 0x164   :  { %v5266_v56 = vunpack.i.h.bf16 %v5264_v54  ;;  %v5265_v57 = vunpack.i.l.bf16 %v5264_v54  ;;  %v5256_v58 = vunpack.i.h.bf16 %v5254_v55  ;;  %v5255_v59 = vunpack.i.l.bf16 %v5254_v55  ;;  %v6434_v55 = vld [vmem:[%s8570_s3 + $0x1c] ss:$40 sps:$4 sm:$0xff]  }
 0x165   :  { %5558 = vrot.lane.b32.xlu1 %v6691_v33, %s8605_s30  ;;  %1341 = vmatprep.mubr.bf16.mxu0 %v6434_v55  ;;  %s8929_s30 = smov 124  }
 0x166   :  { %v4077_v60 = vpack.c.bf16 %v5266_v56, %v5265_v57  ;;  %v4101_v61 = vpack.c.bf16 %v5256_v58, %v5255_v59  ;;  %5518 = vrot.lane.b32.xlu0 %v6675_v25, %s8609_s12 }
 0x167   :  { %v5269_v0 = vpop.permute.xlu1 %5268  ;;  %v5259_v3 = vpop.permute.xlu0 %5258 }
 0x168   :  { %4763 = vmatprep.subr.msk.bf16.mxu1 %vm6816_vm4, %v4101_v61  ;;  %v5261_v10 = vunpack.i.h.bf16 %v5259_v3  ;;  %v5260_v11 = vunpack.i.l.bf16 %v5259_v3  ;;  %v5271_v20 = vunpack.i.h.bf16 %v5269_v0  ;;  %v5270_v23 = vunpack.i.l.bf16 %v5269_v0 }
 0x169   :  { %5563 = vrot.lane.b32.xlu1 %v6691_v33, %s8599_s29  ;;  %4764 = vmatpush3.bf16.msk.msra.mxu1 %vm6820_vm5, %v4077_v60  ;;  %s8607_s29 = smov 116  }
 0x16a   :  { %5543 = vrot.lane.b32.xlu0 %v6691_v33, %s8722_s26  ;;  %4765 = vmatprep.subr.msk.bf16.mxu1 %vm6837_vm7, %v4104_v6  ;;  %v4110_v29 = vpack.c.bf16 %v5261_v10, %v5260_v11  ;;  %v4086_v32 = vpack.c.bf16 %v5271_v20, %v5270_v23 }
 0x16b   :  { %v5284_v13 = vpop.permute.xlu1 %5283  ;;  %v5274_v15 = vpop.permute.xlu0 %5273 }
 0x16c   :  { %v5286_v16 = vunpack.i.h.bf16 %v5284_v13  ;;  %v5285_v1 = vunpack.i.l.bf16 %v5284_v13  ;;  %v5276_v2 = vunpack.i.h.bf16 %v5274_v15  ;;  %v5275_v17 = vunpack.i.l.bf16 %v5274_v15 }
 0x16d   :  { %5578 = vrot.lane.b32.xlu1 %v6850_v7, %s8724_s17  ;;  %4766 = vmatpush3.bf16.msk.msra.mxu1 %vm6856_vm9, %v4080_v9  ;;  %v8834_v15 = vmov 0 }
 0x16e   :  { %v4083_v18 = vpack.c.bf16 %v5286_v16, %v5285_v1  ;;  %v4107_v19 = vpack.c.bf16 %v5276_v2, %v5275_v17  ;;  %5548 = vrot.lane.b32.xlu0 %v6675_v25, %s8607_s29  ;;  %v8835_v15 = vsel %vm6922_vm3, 4294967295, %v8834_v15  ;;  %v6405_v1 = vld [vmem:[%s8570_s3] ss:$40 sps:$4 sm:$0xff]   ;;  %v948_v2 = vld [vmem:[%s8571_s4 + $0x18] sm:$0xff]  ;;  %v8836_v17 = vmov 0 }
 0x16f   :  { %v5289_v24 = vpop.permute.xlu1 %5288  ;;  %v5279_v26 = vpop.permute.xlu0 %5278  ;;  %v8837_v17 = vsel %vm6943_vm8, 4294967295, %v8836_v17 }
 0x170   :  { %4767 = vmatprep.subr.msk.bf16.mxu1 %vm6837_vm7, %v4107_v19  ;;  %v5281_v36 = vunpack.i.h.bf16 %v5279_v26  ;;  %v5280_v37 = vunpack.i.l.bf16 %v5279_v26  ;;  %v5291_v48 = vunpack.i.h.bf16 %v5289_v24  ;;  %v5290_v50 = vunpack.i.l.bf16 %v5289_v24  ;;  %v947_v24 = vld [vmem:[%s8571_s4 + $0x10] sm:$0xff] }
 0x171   :  { %5583 = vrot.lane.b32.xlu1 %v6691_v33, %s8601_s11  ;;  %4768 = vmatpush3.bf16.msk.msra.mxu1 %vm6856_vm9, %v4083_v18  ;;  %s8611_s11 = smov 109  }
 0x172   :  { %5568 = vrot.lane.b32.xlu0 %v6691_v33, %s8672_s10  ;;  %4769 = vmatprep.subr.msk.bf16.mxu1 %vm6867_vm11, %v4110_v29  ;;  %v4116_v54 = vpack.c.bf16 %v5281_v36, %v5280_v37  ;;  %v4092_v56 = vpack.c.bf16 %v5291_v48, %v5290_v50  ;;  %v6410_v50 = vld [vmem:[%s8570_s3 + $0x50] ss:$40 sps:$4 sm:$0xff]   ;;  %s8928_s10 = smov 10  }
 0x173   :  { %v5304_v38 = vpop.permute.xlu1 %5303  ;;  %v5294_v40 = vpop.permute.xlu0 %5293 }
 0x174   :  { %v5306_v41 = vunpack.i.h.bf16 %v5304_v38  ;;  %v5305_v42 = vunpack.i.l.bf16 %v5304_v38  ;;  %v5296_v43 = vunpack.i.h.bf16 %v5294_v40  ;;  %v5295_v44 = vunpack.i.l.bf16 %v5294_v40  ;;  %v950_v40 = vld [vmem:[%s8571_s4 + $0x28] sm:$0xff] }
 0x175   :  { %5588 = vrot.lane.b32.xlu1 %v6691_v33, %s8603_s9  ;;  %4770 = vmatpush3.bf16.msk.msra.mxu1 %vm6882_vm13, %v4086_v32  ;;  %s8930_s9 = smov 9  }
 0x176   :  { %v4089_v45 = vpack.c.bf16 %v5306_v41, %v5305_v42  ;;  %v4113_v47 = vpack.c.bf16 %v5296_v43, %v5295_v44  ;;  %5573 = vrot.lane.b32.xlu0 %v6675_v25, %s8611_s11  ;;  %v8832_v25 = vmov 0 }
 0x177   :  { %v5309_v51 = vpop.permute.xlu1 %5308  ;;  %v5299_v52 = vpop.permute.xlu0 %5298  ;;  %v8833_v25 = vsel %vm6908_vm1, 4294967295, %v8832_v25 }
 0x178   :  { %4771 = vmatprep.subr.msk.bf16.mxu1 %vm6867_vm11, %v4113_v47  ;;  %v5301_v57 = vunpack.i.h.bf16 %v5299_v52  ;;  %v5300_v58 = vunpack.i.l.bf16 %v5299_v52  ;;  %v5311_v9 = vunpack.i.h.bf16 %v5309_v51  ;;  %v5310_v10 = vunpack.i.l.bf16 %v5309_v51  ;;  %v945_v51 = vld [vmem:[%s8571_s4] sm:$0xff] }
 0x179   :  { %5598 = vrot.lane.b32.xlu1 %v6691_v33, %s8609_s12  ;;  %4772 = vmatpush3.bf16.msk.msra.mxu1 %vm6882_vm13, %v4089_v45  ;;  %v949_v45 = vld [vmem:[%s8571_s4 + $0x20] sm:$0xff]  ;;  %v8838_v47 = vmov 0  ;;  %v8840_v52 = vmov 0  ;;  %s8932_s12 = smov 8  }
 0x17a   :  { %5593 = vrot.lane.b32.xlu0 %v6691_v33, %s8670_s8  ;;  %4773 = vmatprep.subr.msk.bf16.mxu1 %vm6893_vm15, %v4116_v54  ;;  %v4146_v16 = vpack.c.bf16 %v5301_v57, %v5300_v58  ;;  %v4122_v18 = vpack.c.bf16 %v5311_v9, %v5310_v10  ;;  %v8839_v47 = vsel %vm6965_vm12, 4294967295, %v8838_v47  ;;  %v8841_v52 = vsel %vm6982_vm0, 4294967295, %v8840_v52  ;;  %v6411_v54 = vld [vmem:[%s8570_s3 + $0xa4] ss:$40 sps:$4 sm:$0xff]   ;;  %s8927_s8 = smov 7  }
 0x17b   :  { %v5324_v59 = vpop.permute.xlu1 %5323  ;;  %v5314_v60 = vpop.permute.xlu0 %5313 }
 0x17c   :  { %v5326_v61 = vunpack.i.h.bf16 %v5324_v59  ;;  %v5325_v62 = vunpack.i.l.bf16 %v5324_v59  ;;  %v5316_v63 = vunpack.i.h.bf16 %v5314_v60  ;;  %v5315_v0 = vunpack.i.l.bf16 %v5314_v60  ;;  %v946_v60 = vld [vmem:[%s8571_s4 + $0x8] sm:$0xff] }
 0x17d   :  { %5603 = vrot.lane.b32.xlu1 %v6691_v33, %s8607_s29  ;;  %4774 = vmatpush3.bf16.msk.msra.mxu1 %vm6908_vm1, %v4092_v56  ;;  %s8931_s29 = smov 6  }
 0x17e   :  { %v4095_v3 = vpack.c.bf16 %v5326_v61, %v5325_v62  ;;  %v4119_v6 = vpack.c.bf16 %v5316_v63, %v5315_v0  ;;  %5608 = vrot.lane.b32.xlu0 %v6691_v33, %s8613_s27  ;;  %s8934_s27 = smov 5  }
 0x17f   :  { %v5329_v11 = vpop.permute.xlu1 %5328  ;;  %v5319_v13 = vpop.permute.xlu0 %5318 }
 0x180   :  { %4775 = vmatprep.subr.msk.bf16.mxu1 %vm6893_vm15, %v4119_v6  ;;  %v5321_v19 = vunpack.i.h.bf16 %v5319_v13  ;;  %v5320_v20 = vunpack.i.l.bf16 %v5319_v13  ;;  %v5331_v41 = vunpack.i.h.bf16 %v5329_v11  ;;  %v5330_v42 = vunpack.i.l.bf16 %v5329_v11 }
 0x181   :  { %5618 = vrot.lane.b32.xlu1 %v6691_v33, %s8611_s11  ;;  %4776 = vmatpush3.bf16.msk.msra.mxu1 %vm6908_vm1, %v4095_v3  ;;  %v6408_v33 = vld [vmem:[%s8570_s3 + $0x54] ss:$40 sps:$4 sm:$0xff]   ;;  %vm724_vm15 = vcmp.lt.s32.totalorder %v6804_v39, 50  ;;  %s8933_s11 = smov 115  }
 0x182   :  { %5613 = vrot.lane.b32.xlu0 %v6850_v7, %s8720_s14  ;;  %4795 = vmatprep.subr.msk.bf16.mxu1 %vm6922_vm3, %v4146_v16  ;;  %v4152_v48 = vpack.c.bf16 %v5321_v19, %v5320_v20  ;;  %v4128_v55 = vpack.c.bf16 %v5331_v41, %v5330_v42  ;;  %v8842_v16 = vmov 0 }
 0x183   :  { %v5344_v23 = vpop.permute.xlu1 %5343  ;;  %v5334_v7 = vpop.permute.xlu0 %5333  ;;  %v8843_v16 = vsel %vm6998_vm6, 4294967295, %v8842_v16 }
 0x184   :  { %v5346_v26 = vunpack.i.h.bf16 %v5344_v23  ;;  %v5345_v29 = vunpack.i.l.bf16 %v5344_v23  ;;  %v5336_v32 = vunpack.i.h.bf16 %v5334_v7  ;;  %v5335_v36 = vunpack.i.l.bf16 %v5334_v7  ;;  %1171 = vmatmul.mubr.bf16.vlgmr.msra.gmra.mrb[12].mxu1 %v6405_v1 }
 0x185   :  { %968 = vperm.xlu1 %5231, %v948_v2   ;;  %4796 = vmatpush3.bf16.msk.msra.mxu1 %vm6943_vm8, %v4122_v18  ;;  %v6413_v2 = vld [vmem:[%s8570_s3 + $0xa0] ss:$40 sps:$4 sm:$0xff]   ;;  %v8844_v18 = vmov 0 }
 0x186   :  { %v4125_v37 = vpack.c.bf16 %v5346_v26, %v5345_v29  ;;  %v4149_v38 = vpack.c.bf16 %v5336_v32, %v5335_v36  ;;  %963 = vperm.xlu0 %5230, %v947_v24   ;;  %1178 = vmatprep.mubr.bf16.mxu1 %v6408_v33  ;;  %v6416_v33 = vld [vmem:[%s8570_s3 + $0xc] ss:$40 sps:$4 sm:$0xff]   ;;  %v8845_v18 = vsel %vm7015_vm14, 4294967295, %v8844_v18 }
 0x187   :  { %v5349_v43 = vpop.permute.xlu1 %5348  ;;  %v5339_v44 = vpop.permute.xlu0 %5338  ;;  %8846 = vst [vmem:[#allocation8_spill] sm:$0xff] %v8845_v18 }
 0x188   :  { %4797 = vmatprep.subr.msk.bf16.mxu1 %vm6922_vm3, %v4149_v38  ;;  %v5341_v56 = vunpack.i.h.bf16 %v5339_v44  ;;  %v5340_v57 = vunpack.i.l.bf16 %v5339_v44  ;;  %v5351_v9 = vunpack.i.h.bf16 %v5349_v43  ;;  %v5350_v10 = vunpack.i.l.bf16 %v5349_v43 }
 0x189   :  { %978 = vperm.xlu1 %5231, %v950_v40   ;;  %4798 = vmatpush3.bf16.msk.msra.mxu1 %vm6943_vm8, %v4125_v37  ;;  %v8847_v44 = vmov 0  ;;  %vm8632_vm8 = vcmp.ge.s32.totalorder %v6804_v39, 1  ;;  %vm554_vm3 = vcmp.lt.s32.totalorder %v6804_v39, 60 }
 0x18a   :  { %973 = vperm.xlu0 %5230, %v949_v45   ;;  %4799 = vmatprep.subr.msk.bf16.mxu1 %vm6965_vm12, %v4152_v48  ;;  %v4158_v1 = vpack.c.bf16 %v5341_v56, %v5340_v57  ;;  %v4134_v19 = vpack.c.bf16 %v5351_v9, %v5350_v10  ;;  %v8848_v44 = vsel %vm7022_vm10, 4294967295, %v8847_v44  ;;  %v8850_v48 = vmov 0 }
 0x18b   :  { %v5364_v58 = vpop.permute.xlu1 %5363  ;;  %v5354_v59 = vpop.permute.xlu0 %5353  ;;  %8849 = vst [vmem:[#allocation9_spill] sm:$0xff] %v8848_v44  ;;  %v8853_v9 = vmov 0 }
 0x18c   :  { %v5366_v61 = vunpack.i.h.bf16 %v5364_v58  ;;  %v5365_v62 = vunpack.i.l.bf16 %v5364_v58  ;;  %v5356_v63 = vunpack.i.h.bf16 %v5354_v59  ;;  %v5355_v0 = vunpack.i.l.bf16 %v5354_v59  ;;  %1179 = vmatmul.mubr.bf16.gmra.mrb[16].mxu1 %v6410_v50 }
 0x18d   :  { %953 = vperm.xlu1 %5231, %v945_v51   ;;  %4800 = vmatpush3.bf16.msk.msra.mxu1 %vm6982_vm0, %v4128_v55 }
 0x18e   :  { %v4131_v3 = vpack.c.bf16 %v5366_v61, %v5365_v62  ;;  %v4155_v6 = vpack.c.bf16 %v5356_v63, %v5355_v0  ;;  %958 = vperm.xlu0 %5230, %v946_v60   ;;  %1186 = vmatprep.mubr.bf16.mxu1 %v6411_v54 }
 0x18f   :  { %v5369_v11 = vpop.permute.xlu1 %5368  ;;  %v5359_v13 = vpop.permute.xlu0 %5358 }
 0x190   :  { %4801 = vmatprep.subr.msk.bf16.mxu1 %vm6965_vm12, %v4155_v6  ;;  %v5361_v20 = vunpack.i.h.bf16 %v5359_v13  ;;  %v5360_v23 = vunpack.i.l.bf16 %v5359_v13  ;;  %v5371_v40 = vunpack.i.h.bf16 %v5369_v11  ;;  %v5370_v41 = vunpack.i.l.bf16 %v5369_v11  ;;  %v6414_v11 = vld [vmem:[%s8570_s3 + $0x8] ss:$40 sps:$4 sm:$0xff]   ;;  %v6417_v13 = vld [vmem:[%s8570_s3 + $0x5c] ss:$40 sps:$4 sm:$0xff]  }
 0x191   :  { %4802 = vmatpush3.bf16.msk.msra.mxu1 %vm6982_vm0, %v4131_v3  ;;  %vm365_vm0 = vcmp.ge.s32.totalorder %v6804_v39, 8 }
 0x192   :  { %4803 = vmatprep.subr.msk.bf16.mxu1 %vm6998_vm6, %v4158_v1  ;;  %v4164_v45 = vpack.c.bf16 %v5361_v20, %v5360_v23  ;;  %vm7033_vm12 = vmpackc.low %vm365_vm0, %vm365_vm0  ;;  %v4140_v50 = vpack.c.bf16 %v5371_v40, %v5370_v41  ;;  %v8855_v1 = vmov 0 }
 0x193   :  { %v5384_v7 = vpop.permute.xlu1 %5383  ;;  %v5374_v24 = vpop.permute.xlu0 %5373  ;;  %v8851_v48 = vsel %vm7033_vm12, 4294967295, %v8850_v48  ;;  %vm7043_vm0 = vmpackc.low %vm8621_vm2, %vm8621_vm2 }
 0x194   :  { %v5386_v26 = vunpack.i.h.bf16 %v5384_v7  ;;  %v5385_v29 = vunpack.i.l.bf16 %v5384_v7  ;;  %v5376_v32 = vunpack.i.h.bf16 %v5374_v24  ;;  %v5375_v36 = vunpack.i.l.bf16 %v5374_v24  ;;  %1187 = vmatmul.mubr.bf16.gmra.mrb[20].mxu1 %v6413_v2  ;;  %8852 = vst [vmem:[#allocation10_spill] sm:$0xff] %v8851_v48 }
 0x195   :  { %4804 = vmatpush3.bf16.msk.msra.mxu1 %vm7015_vm14, %v4134_v19  ;;  %1227 = vmatprep.mubr.bf16.mxu1 %v6416_v33  ;;  %v8854_v9 = vsel %vm7043_vm0, 4294967295, %v8853_v9 }
 0x196   :  { %v4137_v37 = vpack.c.bf16 %v5386_v26, %v5385_v29  ;;  %v4161_v38 = vpack.c.bf16 %v5376_v32, %v5375_v36 }
 0x197   :  { %v5389_v42 = vpop.permute.xlu1 %5388  ;;  %v5379_v43 = vpop.permute.xlu0 %5378 }
 0x198   :  { %4805 = vmatprep.subr.msk.bf16.mxu1 %vm6998_vm6, %v4161_v38  ;;  %v5381_v51 = vunpack.i.h.bf16 %v5379_v43  ;;  %v5380_v54 = vunpack.i.l.bf16 %v5379_v43  ;;  %v5391_v63 = vunpack.i.h.bf16 %v5389_v42  ;;  %v5390_v0 = vunpack.i.l.bf16 %v5389_v42 }
 0x199   :  { %4806 = vmatpush3.bf16.msk.msra.mxu1 %vm7015_vm14, %v4137_v37  ;;  %vm450_vm14 = vcmp.ge.s32.totalorder %v6804_v39, 3  ;;  %v8857_v42 = vmov 0  ;;  %vm537_vm6 = vcmp.lt.s32.totalorder %v6804_v39, 61 }
 0x19a   :  { %4807 = vmatprep.subr.msk.bf16.mxu1 %vm7022_vm10, %v4164_v45  ;;  %v4188_v10 = vpack.c.bf16 %v5381_v51, %v5380_v54  ;;  %vm7060_vm2 = vmpackc.low %vm450_vm14, %vm450_vm14  ;;  %v4170_v2 = vpack.c.bf16 %v5391_v63, %v5390_v0  ;;  %v6419_v45 = vld [vmem:[%s8570_s3 + $0x58] ss:$40 sps:$4 sm:$0xff]   ;;  %v8860_v51 = vmov 0 }
 0x19b   :  { %v5404_v55 = vpop.permute.xlu1 %5403  ;;  %v5394_v56 = vpop.permute.xlu0 %5393  ;;  %v8856_v1 = vsel %vm7060_vm2, 4294967295, %v8855_v1 }
 0x19c   :  { %v5406_v57 = vunpack.i.h.bf16 %v5404_v55  ;;  %v5405_v58 = vunpack.i.l.bf16 %v5404_v55  ;;  %v5396_v59 = vunpack.i.h.bf16 %v5394_v56  ;;  %v5395_v60 = vunpack.i.l.bf16 %v5394_v56 }
 0x19d   :  { %4808 = vmatpush3.bf16.msk.msra.mxu1 %vm7033_vm12, %v4140_v50  ;;  %v6420_v50 = vld [vmem:[%s8570_s3 + $0xac] ss:$40 sps:$4 sm:$0xff]  }
 0x19e   :  { %v4143_v61 = vpack.c.bf16 %v5406_v57, %v5405_v58  ;;  %v4167_v62 = vpack.c.bf16 %v5396_v59, %v5395_v60 }
 0x19f   :  { %v5409_v3 = vpop.permute.xlu1 %5408  ;;  %v5399_v6 = vpop.permute.xlu0 %5398 }
 0x1a0   :  { %4809 = vmatprep.subr.msk.bf16.mxu1 %vm7022_vm10, %v4167_v62  ;;  %v5401_v33 = vunpack.i.h.bf16 %v5399_v6  ;;  %v5400_v19 = vunpack.i.l.bf16 %v5399_v6  ;;  %vm520_vm10 = vcmp.lt.s32.totalorder %v6804_v39, 62  ;;  %v5411_v37 = vunpack.i.h.bf16 %v5409_v3 }
 0x1a1   :  { %4810 = vmatpush3.bf16.msk.msra.mxu1 %vm7033_vm12, %v4143_v61  ;;  %v5410_v38 = vunpack.i.l.bf16 %v5409_v3  ;;  %vm7067_vm14 = vmpackc.low %vm520_vm10, %vm520_vm10  ;;  %vm467_vm12 = vcmp.ge.s32.totalorder %v6804_v39, 2 }
 0x1a2   :  { %4829 = vmatprep.subr.msk.bf16.mxu1 %vm7043_vm0, %v4188_v10  ;;  %v8858_v42 = vsel %vm7067_vm14, 4294967295, %v8857_v42  ;;  %v4194_v43 = vpack.c.bf16 %v5401_v33, %v5400_v19  ;;  %vm7084_vm10 = vmpackc.low %vm467_vm12, %vm467_vm12  ;;  %v6422_v33 = vld [vmem:[%s8570_s3 + $0xa8] ss:$40 sps:$4 sm:$0xff]   ;;  %v6425_v19 = vld [vmem:[%s8570_s3 + $0x14] ss:$40 sps:$4 sm:$0xff]  }
 0x1a3   :  { %v5424_v20 = vpop.permute.xlu1 %5423  ;;  %v5414_v23 = vpop.permute.xlu0 %5413  ;;  %8859 = vst [vmem:[#allocation11_spill] sm:$0xff] %v8858_v42  ;;  %v8861_v51 = vsel %vm7084_vm10, 4294967295, %v8860_v51  ;;  %v4176_v54 = vpack.c.bf16 %v5411_v37, %v5410_v38  ;;  %vm7093_vm12 = vmpackc.low %vm537_vm6, %vm537_vm6 }
 0x1a4   :  { %v5426_v7 = vunpack.i.h.bf16 %v5424_v20  ;;  %v5425_v24 = vunpack.i.l.bf16 %v5424_v20  ;;  %v5416_v26 = vunpack.i.h.bf16 %v5414_v23  ;;  %v5415_v29 = vunpack.i.l.bf16 %v5414_v23  ;;  %1228 = vmatmul.mubr.bf16.vlgmr.msra.gmra.mrb[24].mxu1 %v6414_v11  ;;  %8862 = vst [vmem:[#allocation12_spill] sm:$0xff] %v8861_v51  ;;  %vm7113_vm6 = vmpackc.low %vm8632_vm8, %vm8632_vm8 }
 0x1a5   :  { %4830 = vmatpush3.bf16.msk.msra.mxu1 %vm7060_vm2, %v4170_v2  ;;  %1235 = vmatprep.mubr.bf16.mxu1 %v6417_v13  ;;  %v8863_v13 = vmov 0  ;;  %v8866_v20 = vmov 0  ;;  %vm7120_vm8 = vmpackc.low %vm554_vm3, %vm554_vm3  ;;  %vm707_vm3 = vcmp.lt.s32.totalorder %v6804_v39, 51 }
 0x1a6   :  { %v4173_v32 = vpack.c.bf16 %v5426_v7, %v5425_v24  ;;  %v4191_v36 = vpack.c.bf16 %v5416_v26, %v5415_v29  ;;  %v8864_v13 = vsel %vm7093_vm12, 4294967295, %v8863_v13  ;;  %v8867_v20 = vsel %vm7113_vm6, 4294967295, %v8866_v20 }
 0x1a7   :  { %v5429_v40 = vpop.permute.xlu1 %5428  ;;  %v5419_v41 = vpop.permute.xlu0 %5418  ;;  %8865 = vst [vmem:[#allocation13_spill] sm:$0xff] %v8864_v13  ;;  %8868 = vst [vmem:[#allocation14_spill] sm:$0xff] %v8867_v20 }
 0x1a8   :  { %4831 = vmatprep.subr.msk.bf16.mxu1 %vm7043_vm0, %v4191_v36  ;;  %v5421_v55 = vunpack.i.h.bf16 %v5419_v41  ;;  %v5420_v56 = vunpack.i.l.bf16 %v5419_v41  ;;  %v5431_v3 = vunpack.i.h.bf16 %v5429_v40  ;;  %v5430_v6 = vunpack.i.l.bf16 %v5429_v40 }
 0x1a9   :  { %4832 = vmatpush3.bf16.msk.msra.mxu1 %vm7060_vm2, %v4173_v32 }
 0x1aa   :  { %4833 = vmatprep.subr.msk.bf16.mxu1 %vm7067_vm14, %v4194_v43  ;;  %v4200_v2 = vpack.c.bf16 %v5421_v55, %v5420_v56  ;;  %v4182_v23 = vpack.c.bf16 %v5431_v3, %v5430_v6 }
 0x1ab   :  { %v5444_v57 = vpop.permute.xlu1 %5443  ;;  %v5434_v58 = vpop.permute.xlu0 %5433 }
 0x1ac   :  { %v5446_v59 = vunpack.i.h.bf16 %v5444_v57  ;;  %v5445_v60 = vunpack.i.l.bf16 %v5444_v57  ;;  %v5436_v61 = vunpack.i.h.bf16 %v5434_v58  ;;  %v5435_v62 = vunpack.i.l.bf16 %v5434_v58  ;;  %1236 = vmatmul.mubr.bf16.gmra.mrb[28].mxu1 %v6419_v45 }
 0x1ad   :  { %4834 = vmatpush3.bf16.msk.msra.mxu1 %vm7084_vm10, %v4176_v54  ;;  %1243 = vmatprep.mubr.bf16.mxu1 %v6420_v50  ;;  %v8869_v50 = vmov 0 }
 0x1ae   :  { %v4179_v63 = vpack.c.bf16 %v5446_v59, %v5445_v60  ;;  %v4197_v0 = vpack.c.bf16 %v5436_v61, %v5435_v62  ;;  %v8870_v50 = vsel %vm7120_vm8, 4294967295, %v8869_v50 }
 0x1af   :  { %v7091_v10 = vpop.permute.xlu1 %5473  ;;  %v5439_v11 = vpop.permute.xlu0 %5438  ;;  %8871 = vst [vmem:[#allocation15_spill] sm:$0xff] %v8870_v50 }
 0x1b0   :  { %4835 = vmatprep.subr.msk.bf16.mxu1 %vm7067_vm14, %v4197_v0  ;;  %v5441_v7 = vunpack.i.h.bf16 %v5439_v11  ;;  %v5440_v24 = vunpack.i.l.bf16 %v5439_v11  ;;  %v6423_v0 = vld [vmem:[%s8570_s3 + $0x10] ss:$40 sps:$4 sm:$0xff]   ;;  %v5475_v3 = vunpack.i.l.bf16 %v7091_v10 }
 0x1b1   :  { %4836 = vmatpush3.bf16.msk.msra.mxu1 %vm7084_vm10, %v4179_v63 }
 0x1b2   :  { %4837 = vmatprep.subr.msk.bf16.mxu1 %vm7093_vm12, %v4200_v2  ;;  %v4206_v54 = vpack.c.bf16 %v5441_v7, %v5440_v24  ;;  %v8877_v7 = vmov 0 }
 0x1b3   :  { %v5489_v26 = vpop.permute.xlu1 %5488  ;;  %v5449_v29 = vpop.permute.xlu0 %5448 }
 0x1b4   :  { %v5491_v32 = vunpack.i.h.bf16 %v5489_v26  ;;  %v5490_v36 = vunpack.i.l.bf16 %v5489_v26  ;;  %v5451_v37 = vunpack.i.h.bf16 %v5449_v29  ;;  %v5450_v38 = vunpack.i.l.bf16 %v5449_v29  ;;  %1244 = vmatmul.mubr.bf16.gmra.mrb[32].mxu1 %v6422_v33 }
 0x1b5   :  { %4838 = vmatpush3.bf16.msk.msra.mxu1 %vm7113_vm6, %v4182_v23  ;;  %1284 = vmatprep.mubr.bf16.mxu1 %v6425_v19  ;;  %v8874_v19 = vmov 0 }
 0x1b6   :  { %v4185_v40 = vpack.c.bf16 %v5491_v32, %v5490_v36  ;;  %v4203_v41 = vpack.c.bf16 %v5451_v37, %v5450_v38  ;;  %v6428_v37 = vld [vmem:[%s8570_s3 + $0x60] ss:$40 sps:$4 sm:$0xff]   ;;  %v6429_v38 = vld [vmem:[%s8570_s3 + $0xb4] ss:$40 sps:$4 sm:$0xff]  }
 0x1b7   :  { %v5494_v43 = vpop.permute.xlu1 %5493  ;;  %v5454_v45 = vpop.permute.xlu0 %5453 }
 0x1b8   :  { %v5496_v55 = vunpack.i.h.bf16 %v5494_v43  ;;  %v5495_v56 = vunpack.i.l.bf16 %v5494_v43  ;;  %4839 = vmatprep.subr.msk.bf16.mxu1 %vm7093_vm12, %v4203_v41  ;;  %v5456_v60 = vunpack.i.h.bf16 %v5454_v45  ;;  %v5455_v61 = vunpack.i.l.bf16 %v5454_v45 }
 0x1b9   :  { %4840 = vmatpush3.bf16.msk.msra.mxu1 %vm7113_vm6, %v4185_v40  ;;  %vm639_vm6 = vcmp.lt.s32.totalorder %v6804_v39, 55  ;;  %vm571_vm12 = vcmp.lt.s32.totalorder %v6804_v39, 59  ;;  %v8880_v40 = vmov 0 }
 0x1ba   :  { %4841 = vmatprep.subr.msk.bf16.mxu1 %vm7120_vm8, %v4206_v54  ;;  %v4209_v59 = vpack.c.bf16 %v5496_v55, %v5495_v56  ;;  %v4260_v6 = vpack.c.bf16 %v5456_v60, %v5455_v61  ;;  %vm7167_vm1 = vmpackc.low %vm571_vm12, %vm571_vm12 }
 0x1bb   :  { %v7130_v57 = vpop.permute.xlu1 %5498  ;;  %v5459_v58 = vpop.permute.xlu0 %5458  ;;  %v8878_v7 = vsel %vm7167_vm1, 4294967295, %v8877_v7  ;;  %vm7185_vm12 = vmpackc.low %vm724_vm15, %vm724_vm15  ;;  %vm741_vm15 = vcmp.lt.s32.totalorder %v6804_v39, 49 }
 0x1bc   :  { %8879 = vst [vmem:[#allocation17_spill] sm:$0xff] %v8878_v7  ;;  %v5461_v24 = vunpack.i.h.bf16 %v5459_v58  ;;  %v5460_v26 = vunpack.i.l.bf16 %v5459_v58  ;;  %v8881_v40 = vsel %vm7185_vm12, 4294967295, %v8880_v40 }
 0x1bd   :  { %4842 = vmatpush3.bf16.msra.mxu1 %v492_v34  ;;  %v5476_v34 = vunpack.i.h.bf16 %v7091_v10  ;;  %8882 = vst [vmem:[#allocation18_spill] sm:$0xff] %v8881_v40 }
 0x1be   :  { %4843 = vmatprep.subr.msk.bf16.mxu1 %vm7120_vm8, %v4209_v59  ;;  %vm7152_vm8 = vmpackc.low %vm707_vm3, %vm707_vm3  ;;  %v4266_v41 = vpack.c.bf16 %v5461_v24, %v5460_v26 }
 0x1bf   :  { %v7137_v62 = vpop.permute.xlu1 %5513  ;;  %v7139_v63 = vpop.permute.xlu0 %5463  ;;  %v8873_v22 = vsel %vm7152_vm8, 4294967295, %v8872_v22  ;;  %vm7162_vm3 = vmpackc.low %vm639_vm6, %vm639_vm6  ;;  %v4212_v36 = vpack.c.bf16 %v5476_v34, %v5475_v3  ;;  %v6431_v34 = vld [vmem:[%s8570_s3 + $0xb0] ss:$40 sps:$4 sm:$0xff]   ;;  %v6437_v3 = vld [vmem:[%s8570_s3 + $0x24] ss:$40 sps:$4 sm:$0xff]  }
 0x1c0   :  { %v8875_v19 = vsel %vm7162_vm3, 4294967295, %v8874_v19  ;;  %v5466_v56 = vunpack.i.h.bf16 %v7139_v63  ;;  %v5465_v58 = vunpack.i.l.bf16 %v7139_v63  ;;  %vm7206_vm6 = vmpackc.low %vm741_vm15, %vm741_vm15  ;;  %vm758_vm15 = vcmp.lt.s32.totalorder %v6804_v39, 48 }
 0x1c1   :  { %4844 = vmatpush3.bf16.msra.mxu1 %v493_v35  ;;  %8876 = vst [vmem:[#allocation16_spill] sm:$0xff] %v8875_v19 }
 0x1c2   :  { %1366 = vmatprep.subr.bf16.mxu1 %v8674_v4 }
 0x1c3   :  { %v5524_v11 = vpop.permute.xlu1 %5523  ;;  %v5469_v27 = vpop.permute.xlu0 %5468 }
 0x1c4   :  { %v5526_v31 = vunpack.i.h.bf16 %v5524_v11  ;;  %v5525_v35 = vunpack.i.l.bf16 %v5524_v11  ;;  %1285 = vmatmul.mubr.bf16.vlgmr.msra.gmra.mrb[36].mxu1 %v6423_v0  ;;  %v5471_v2 = vunpack.i.h.bf16 %v5469_v27  ;;  %v5470_v33 = vunpack.i.l.bf16 %v5469_v27 }
 0x1c5   :  { %4261 = vmatpush1.bf16.msk.msra.mxu1 %vm7152_vm8, %v4260_v6  ;;  %1292 = vmatprep.mubr.bf16.mxu1 %v6426_v21  ;;  %v8883_v6 = vmov 0  ;;  %v4272_v11 = vpack.c.bf16 %v5466_v56, %v5465_v58  ;;  %v5501_v58 = vunpack.i.h.bf16 %v7130_v57 }
 0x1c6   :  { %v4263_v23 = vpack.c.bf16 %v5526_v31, %v5525_v35  ;;  %v4236_v10 = vpack.c.bf16 %v5471_v2, %v5470_v33  ;;  %1368 = vmatprep.subr.bf16.mxu1 %v8674_v4  ;;  %v8884_v6 = vsel %vm7206_vm6, 4294967295, %v8883_v6 }
 0x1c7   :  { %v5529_v29 = vpop.permute.xlu1 %5528  ;;  %v5479_v32 = vpop.permute.xlu0 %5478  ;;  %8885 = vst [vmem:[#allocation19_spill] sm:$0xff] %v8884_v6 }
 0x1c8   :  { %4863 = vmatprep.subr.msk.bf16.mxu0 %vm7162_vm3, %v4236_v10  ;;  %v5531_v43 = vunpack.i.h.bf16 %v5529_v29  ;;  %v5530_v45 = vunpack.i.l.bf16 %v5529_v29  ;;  %v5481_v33 = vunpack.i.h.bf16 %v5479_v32  ;;  %v8886_v29 = vmov 0 }
 0x1c9   :  { %4864 = vmatpush3.bf16.msk.msra.mxu0 %vm7167_vm1, %v4212_v36  ;;  %4264 = vmatpush1.bf16.msk.msra.mxu1 %vm7152_vm8, %v4263_v23  ;;  %vm8647_vm8 = vcmask 916480   ;;  %v5480_v23 = vunpack.i.l.bf16 %v5479_v32 }
 0x1ca   :  { %1370 = vmatprep.subr.bf16.mxu1 %v8674_v4  ;;  %v4269_v59 = vpack.c.bf16 %v5531_v43, %v5530_v45 }
 0x1cb   :  { %v5534_v54 = vpop.permute.xlu1 %5533  ;;  %v5484_v55 = vpop.permute.xlu0 %5483  ;;  %v4278_v36 = vpack.c.bf16 %v5481_v33, %v5480_v23 }
 0x1cc   :  { %1293 = vmatmul.mubr.bf16.gmra.mrb[40].mxu1 %v6428_v37  ;;  %v5536_v27 = vunpack.i.h.bf16 %v5534_v54  ;;  %v5535_v31 = vunpack.i.l.bf16 %v5534_v54  ;;  %v5486_v32 = vunpack.i.h.bf16 %v5484_v55  ;;  %v5485_v43 = vunpack.i.l.bf16 %v5484_v55 }
 0x1cd   :  { %4267 = vmatpush1.bf16.msk.msra.mxu1 %vm7185_vm12, %v4266_v41  ;;  %1300 = vmatprep.mubr.bf16.mxu1 %v6429_v38 }
 0x1ce   :  { %1372 = vmatprep.subr.bf16.mxu1 %v8674_v4  ;;  %v4275_v10 = vpack.c.bf16 %v5536_v27, %v5535_v31  ;;  %v8896_v31 = vmov 0 }
 0x1cf   :  { %v5539_v60 = vpop.permute.xlu1 %5538  ;;  %v7194_v61 = vpop.permute.xlu0 %5503 }
 0x1d0   :  { %v5541_v0 = vunpack.i.h.bf16 %v5539_v60  ;;  %v5540_v21 = vunpack.i.l.bf16 %v5539_v60  ;;  %v5506_v55 = vunpack.i.h.bf16 %v7194_v61  ;;  %v5505_v60 = vunpack.i.l.bf16 %v7194_v61 }
 0x1d1   :  { %4270 = vmatpush1.bf16.msk.msra.mxu1 %vm7185_vm12, %v4269_v59  ;;  %v5500_v59 = vunpack.i.l.bf16 %v7130_v57  ;;  %v8892_v61 = vmov 0 }
 0x1d2   :  { %v4239_v63 = vpack.c.bf16 %v5541_v0, %v5540_v21  ;;  %1374 = vmatprep.subr.bf16.mxu1 %v8674_v4  ;;  %v4284_v23 = vpack.c.bf16 %v5506_v55, %v5505_v60 }
 0x1d3   :  { %v7210_v35 = vpop.permute.xlu1 %5553  ;;  %v4218_v33 = vpack.c.bf16 %v5501_v58, %v5500_v59 }
 0x1d4   :  { %v7212_v2 = vpop.permute.xlu0 %5508  ;;  %1301 = vmatmul.mubr.bf16.gmra.mrb[44].mxu1 %v6431_v34  ;;  %4865 = vmatprep.subr.msk.bf16.mxu0 %vm7162_vm3, %v4239_v63  ;;  %vm7226_vm3 = vmpackc.low %vm758_vm15, %vm758_vm15  ;;  %vm588_vm15 = vcmp.lt.s32.totalorder %v6804_v39, 58  ;;  %v4242_v63 = vpack.c.bf16 %v5486_v32, %v5485_v43 }
 0x1d5   :  { %4273 = vmatpush1.bf16.msk.msra.mxu1 %vm7206_vm6, %v4272_v11  ;;  %3932 = vmatprep.mubr.msk.bf16.mxu1 %vm8647_vm8, %v6437_v3  ;;  %v8887_v29 = vsel %vm7226_vm3, 4294967295, %v8886_v29  ;;  %vm656_vm8 = vcmp.lt.s32.totalorder %v6804_v39, 54  ;;  %v8889_v3 = vmov 0 }
 0x1d6   :  { %1376 = vmatprep.subr.bf16.mxu1 %v8674_v4  ;;  %8888 = vst [vmem:[#allocation20_spill] sm:$0xff] %v8887_v29  ;;  %vm7242_vm12 = vmpackc.low %vm656_vm8, %vm656_vm8  ;;  %vm8895_vm8 = vcmp.lt.s32.totalorder %v6804_v39, 47 }
 0x1d7   :  { %v5559_v24 = vpop.permute.xlu1 %5558  ;;  %v8890_v3 = vsel %vm7242_vm12, 4294967295, %v8889_v3  ;;  %vm7262_vm10 = vmpackc.low %vm8895_vm8, %vm8895_vm8  ;;  %vm605_vm8 = vcmp.lt.s32.totalorder %v6804_v39, 57 }
 0x1d8   :  { %v7221_v26 = vpop.permute.xlu0 %5518  ;;  %v5561_v37 = vunpack.i.h.bf16 %v5559_v24  ;;  %v5560_v38 = vunpack.i.l.bf16 %v5559_v24  ;;  %8891 = vst [vmem:[#allocation21_spill] sm:$0xff] %v8890_v3  ;;  %v8897_v31 = vsel %vm7262_vm10, 4294967295, %v8896_v31 }
 0x1d9   :  { %4276 = vmatpush1.bf16.msk.msra.mxu1 %vm7206_vm6, %v4275_v10  ;;  %vm7252_vm6 = vmpackc.low %vm588_vm15, %vm588_vm15  ;;  %8898 = vst [vmem:[#allocation23_spill] sm:$0xff] %v8897_v31  ;;  %v5511_v10 = vunpack.i.h.bf16 %v7212_v2  ;;  %v5521_v58 = vunpack.i.h.bf16 %v7221_v26  ;;  %v5520_v59 = vunpack.i.l.bf16 %v7221_v26 }
 0x1da   :  { %1378 = vmatprep.subr.bf16.mxu1 %v8674_v4  ;;  %v4281_v0 = vpack.c.bf16 %v5561_v37, %v5560_v38  ;;  %v8893_v61 = vsel %vm7252_vm6, 4294967295, %v8892_v61  ;;  %vm7293_vm15 = vmpackc.low %vm605_vm8, %vm605_vm8  ;;  %vm690_vm8 = vcmp.lt.s32.totalorder %v6804_v39, 52 }
 0x1db   :  { %v5564_v41 = vpop.permute.xlu1 %5563  ;;  %8894 = vst [vmem:[#allocation22_spill] sm:$0xff] %v8893_v61 }
 0x1dc   :  { %v5544_v45 = vpop.permute.xlu0 %5543  ;;  %v5566_v57 = vunpack.i.h.bf16 %v5564_v41  ;;  %v5565_v11 = vunpack.i.l.bf16 %v5564_v41 }
 0x1dd   :  { %v5546_v54 = vunpack.i.h.bf16 %v5544_v45  ;;  %v5545_v56 = vunpack.i.l.bf16 %v5544_v45  ;;  %4279 = vmatpush1.bf16.msk.msra.mxu1 %vm7226_vm3, %v4278_v36  ;;  %v5510_v36 = vunpack.i.l.bf16 %v7212_v2  ;;  %v5515_v2 = vunpack.i.l.bf16 %v7137_v62 }
 0x1de   :  { %1380 = vmatprep.subr.bf16.mxu1 %v8674_v4  ;;  %v4245_v37 = vpack.c.bf16 %v5566_v57, %v5565_v11 }
 0x1df   :  { %v4215_v21 = vpack.c.bf16 %v5546_v54, %v5545_v56  ;;  %v7240_v34 = vpop.permute.xlu1 %5578  ;;  %v5516_v54 = vunpack.i.h.bf16 %v7137_v62  ;;  %v8903_v62 = vmov 0 }
 0x1e0   :  { %v7246_v27 = vpop.permute.xlu0 %5548  ;;  %v8904_v62 = vsel %vm7293_vm15, 4294967295, %v8903_v62 }
 0x1e1   :  { %4866 = vmatpush3.bf16.msk.msra.mxu0 %vm7167_vm1, %v4215_v21  ;;  %4282 = vmatpush1.bf16.msk.msra.mxu1 %vm7226_vm3, %v4281_v0  ;;  %vm8899_vm3 = vcmp.lt.s32.totalorder %v6804_v39, 53  ;;  %v8900_v0 = vmov 0  ;;  %v4248_v21 = vpack.c.bf16 %v5511_v10, %v5510_v36  ;;  %8905 = vst [vmem:[#allocation25_spill] sm:$0xff] %v8904_v62  ;;  %v4290_v10 = vpack.c.bf16 %v5521_v58, %v5520_v59 }
 0x1e2   :  { %4867 = vmatprep.subr.msk.bf16.mxu0 %vm7242_vm12, %v4242_v63  ;;  %1382 = vmatprep.subr.bf16.mxu1 %v8674_v4  ;;  %vm7285_vm1 = vmpackc.low %vm8899_vm3, %vm8899_vm3  ;;  %vm8906_vm3 = vcmp.lt.s32.totalorder %v6804_v39, 46  ;;  %v5551_v36 = vunpack.i.h.bf16 %v7246_v27 }
 0x1e3   :  { %v5584_v24 = vpop.permute.xlu1 %5583  ;;  %v8901_v0 = vsel %vm7285_vm1, 4294967295, %v8900_v0 }
 0x1e4   :  { %v5586_v38 = vunpack.i.h.bf16 %v5584_v24  ;;  %v5585_v41 = vunpack.i.l.bf16 %v5584_v24  ;;  %v5569_v32 = vpop.permute.xlu0 %5568  ;;  %8902 = vst [vmem:[#allocation24_spill] sm:$0xff] %v8901_v0 }
 0x1e5   :  { %v5571_v43 = vunpack.i.h.bf16 %v5569_v32  ;;  %v5570_v45 = vunpack.i.l.bf16 %v5569_v32  ;;  %4868 = vmatpush3.bf16.msk.msra.mxu0 %vm7252_vm6, %v4218_v33  ;;  %4285 = vmatpush1.bf16.msk.msra.mxu1 %vm7262_vm10, %v4284_v23  ;;  %v8907_v33 = vmov 0  ;;  %v4224_v23 = vpack.c.bf16 %v5516_v54, %v5515_v2 }
 0x1e6   :  { %v4287_v56 = vpack.c.bf16 %v5586_v38, %v5585_v41  ;;  %4869 = vmatprep.subr.msk.bf16.mxu0 %vm7242_vm12, %v4245_v37  ;;  %1384 = vmatprep.subr.bf16.mxu1 %v8674_v4  ;;  %vm7303_vm12 = vmpackc.low %vm8906_vm3, %vm8906_vm3  ;;  %v5550_v37 = vunpack.i.l.bf16 %v7246_v27  ;;  %v5556_v54 = vunpack.i.h.bf16 %v7210_v35  ;;  %vm622_vm3 = vcmp.lt.s32.totalorder %v6804_v39, 56 }
 0x1e7   :  { %v4221_v55 = vpack.c.bf16 %v5571_v43, %v5570_v45  ;;  %v5589_v60 = vpop.permute.xlu1 %5588  ;;  %v8908_v33 = vsel %vm7303_vm12, 4294967295, %v8907_v33 }
 0x1e8   :  { %v5591_v63 = vunpack.i.h.bf16 %v5589_v60  ;;  %v5590_v57 = vunpack.i.l.bf16 %v5589_v60  ;;  %v5574_v11 = vpop.permute.xlu0 %5573  ;;  %8909 = vst [vmem:[#allocation26_spill] sm:$0xff] %v8908_v33  ;;  %v8910_v60 = vmov 0 }
 0x1e9   :  { %4870 = vmatpush3.bf16.msk.msra.mxu0 %vm7252_vm6, %v4221_v55  ;;  %4288 = vmatpush1.bf16.msk.msra.mxu1 %vm7262_vm10, %v4287_v56  ;;  %v5555_v56 = vunpack.i.l.bf16 %v7210_v35  ;;  %v5576_v27 = vunpack.i.h.bf16 %v5574_v11  ;;  %v5575_v58 = vunpack.i.l.bf16 %v5574_v11  ;;  %vm7323_vm10 = vmpackc.low %vm690_vm8, %vm690_vm8  ;;  %vm809_vm6 = vcmp.lt.s32.totalorder %v6804_v39, 45 }
 0x1ea   :  { %v4251_v26 = vpack.c.bf16 %v5591_v63, %v5590_v57  ;;  %4871 = vmatprep.subr.msk.bf16.mxu0 %vm7285_vm1, %v4248_v21  ;;  %1386 = vmatprep.subr.bf16.mxu1 %v8674_v4  ;;  %v8911_v60 = vsel %vm7323_vm10, 4294967295, %v8910_v60  ;;  %v4254_v35 = vpack.c.bf16 %v5551_v36, %v5550_v37  ;;  %v8913_v11 = vmov 0  ;;  %vm7340_vm8 = vmpackc.low %vm809_vm6, %vm809_vm6 }
 0x1eb   :  { %v5599_v24 = vpop.permute.xlu1 %5598  ;;  %8912 = vst [vmem:[#allocation27_spill] sm:$0xff] %v8911_v60  ;;  %v5580_v36 = vunpack.i.l.bf16 %v7240_v34  ;;  %v4296_v37 = vpack.c.bf16 %v5576_v27, %v5575_v58  ;;  %vm8919_vm6 = vcmp.ge.s32.totalorder %v6804_v39, 1 }
 0x1ec   :  { %v5601_v38 = vunpack.i.h.bf16 %v5599_v24  ;;  %v5600_v41 = vunpack.i.l.bf16 %v5599_v24  ;;  %v5594_v32 = vpop.permute.xlu0 %5593  ;;  %v8916_v24 = vmov 0 }
 0x1ed   :  { %v5596_v43 = vunpack.i.h.bf16 %v5594_v32  ;;  %v5595_v45 = vunpack.i.l.bf16 %v5594_v32  ;;  %4872 = vmatpush3.bf16.msk.msra.mxu0 %vm7293_vm15, %v4224_v23  ;;  %4291 = vmatpush1.bf16.msk.msra.mxu1 %vm7303_vm12, %v4290_v10  ;;  %v5581_v23 = vunpack.i.h.bf16 %v7240_v34  ;;  %v8917_v24 = vsel %vm7340_vm8, 4294967295, %v8916_v24 }
 0x1ee   :  { %v4293_v2 = vpack.c.bf16 %v5601_v38, %v5600_v41  ;;  %4873 = vmatprep.subr.msk.bf16.mxu0 %vm7285_vm1, %v4251_v26  ;;  %1388 = vmatprep.subr.bf16.mxu1 %v8674_v4  ;;  %vm7332_vm1 = vmpackc.low %vm622_vm3, %vm622_vm3  ;;  %v4230_v26 = vpack.c.bf16 %v5556_v54, %v5555_v56  ;;  %8918 = vst [vmem:[#allocation29_spill] sm:$0xff] %v8917_v24 }
 0x1ef   :  { %v4227_v59 = vpack.c.bf16 %v5596_v43, %v5595_v45  ;;  %v5604_v55 = vpop.permute.xlu1 %5603  ;;  %v8914_v11 = vsel %vm7332_vm1, 4294967295, %v8913_v11  ;;  %vm8920_vm3 = vmmov %vm8919_vm6 }
 0x1f0   :  { %v5606_v21 = vunpack.i.h.bf16 %v5604_v55  ;;  %v5605_v63 = vunpack.i.l.bf16 %v5604_v55  ;;  %v5609_v57 = vpop.permute.xlu0 %5608  ;;  %8915 = vst [vmem:[#allocation28_spill] sm:$0xff] %v8914_v11  ;;  %v822_v34 = vsel %vm8920_vm3, %v5580_v36, -3.4028235e+38  ;;  %v6545_v36 = vld [vmem:[%s8567_s0] sm:$0xff]  ;;  %vm8957_vm3 = vnez %v8831_v53 }
 0x1f1   :  { %4874 = vmatpush3.bf16.msk.msra.mxu0 %vm7293_vm15, %v4227_v59  ;;  %4294 = vmatpush1.bf16.msk.msra.mxu1 %vm7303_vm12, %v4293_v2  ;;  %v5611_v38 = vunpack.i.h.bf16 %v5609_v57  ;;  %v5610_v41 = vunpack.i.l.bf16 %v5609_v57  ;;  %v823_v59 = vsel %vm8919_vm6, %v5581_v23, -3.4028235e+38  ;;  %vm8921_vm12 = vcmp.lt.s32.totalorder %v6804_v39, 63  ;;  %v6432_v57 = vld [vmem:[%s8570_s3 + $0x18] ss:$40 sps:$4 sm:$0xff]   ;;  %v6544_v23 = vld [vmem:[%s8567_s0 + $0x8] sm:$0xff] }
 0x1f2   :  { %v4257_v10 = vpack.c.bf16 %v5606_v21, %v5605_v63  ;;  %4875 = vmatprep.subr.msk.bf16.mxu0 %vm7323_vm10, %v4254_v35  ;;  %1390 = vmatprep.subr.bf16.mxu1 %v8674_v4  ;;  %vm8922_vm15 = vmmov %vm8921_vm12  ;;  %s8935_s0 = smov 114   ;;  %vm8956_vm6 = vnez %v8861_v51 }
 0x1f3   :  { %v5619_v32 = vpop.permute.xlu1 %5618  ;;  %v4233_v27 = vpack.c.bf16 %v5611_v38, %v5610_v41  ;;  %v6435_v41 = vld [vmem:[%s8570_s3 + $0x20] ss:$40 sps:$4 sm:$0xff]  }
 0x1f4   :  { %v5621_v43 = vunpack.i.h.bf16 %v5619_v32  ;;  %v5620_v45 = vunpack.i.l.bf16 %v5619_v32  ;;  %v5614_v54 = vpop.permute.xlu0 %5613  ;;  %v6441_v32 = vld [vmem:[%s8570_s3 + $0x74] ss:$40 sps:$4 sm:$0xff]  }
 0x1f5   :  { %v5616_v56 = vunpack.i.h.bf16 %v5614_v54  ;;  %v5615_v2 = vunpack.i.l.bf16 %v5614_v54  ;;  %4876 = vmatpush3.bf16.msk.msra.mxu0 %vm7332_vm1, %v4230_v26  ;;  %4297 = vmatpush1.bf16.msk.msra.mxu1 %vm7340_vm8, %v4296_v37  ;;  %v6438_v26 = vld [vmem:[%s8570_s3 + $0x6c] ss:$40 sps:$4 sm:$0xff]   ;;  %v6443_v54 = vld [vmem:[%s8570_s3 + $0x70] ss:$40 sps:$4 sm:$0xff]  }
 0x1f6   :  { %v4299_v55 = vpack.c.bf16 %v5621_v43, %v5620_v45  ;;  %4877 = vmatprep.subr.msk.bf16.mxu0 %vm7323_vm10, %v4257_v10  ;;  %1392 = vmatprep.subr.bf16.mxu1 %v8674_v4  ;;  %v6440_v43 = vld [vmem:[%s8570_s3 + $0x68] ss:$40 sps:$4 sm:$0xff]   ;;  %v6444_v45 = vld [vmem:[%s8570_s3 + $0xbc] ss:$40 sps:$4 sm:$0xff]  }
 0x1f7   :  { %v829_v58 = vsel %vm8921_vm12, %v5616_v56, -3.4028235e+38  ;;  %v828_v35 = vsel %vm8922_vm15, %v5615_v2, -3.4028235e+38  ;;  %vm8923_vm12 = vcmask 916480  }
 0x1f8   :  { %v831_v21 = vmax.f32 %v823_v59, %v829_v58  ;;  %v830_v63 = vmax.f32 %v822_v34, %v828_v35  ;;  %v6447_v56 = vld [vmem:[%s8570_s3 + $0xc4] ss:$40 sps:$4 sm:$0xff]   ;;  %v6446_v2 = vld [vmem:[%s8570_s3 + $0xb8] ss:$40 sps:$4 sm:$0xff]   ;;  %vm8924_vm15 = vmmov %vm8923_vm12 }
 0x1f9   :  { %4878 = vmatpush3.bf16.msk.msra.mxu0 %vm7332_vm1, %v4233_v27  ;;  %4300 = vmatpush1.bf16.msk.msra.mxu1 %vm7340_vm8, %v4299_v55  ;;  %v6449_v59 = vld [vmem:[%s8570_s3 + $0xc0] ss:$40 sps:$4 sm:$0xff]  }
 0x1fa   :  { %v833_v10 = vmax.f32 %v6544_v23, %v831_v21  ;;  %v832_v37 = vmax.f32 %v6545_v36, %v830_v63  ;;  %1394 = vmatprep.subr.bf16.mxu1 %v8674_v4 }
 0x1fc   :  { %1342 = vmatmul.mubr.bf16.vlgmr.msra.gmra.mrb[0].mxu0 %v6432_v57  ;;  %v834_v38 = vpack.c.bf16 %v833_v10, %v832_v37 }
 0x1fd   :  { %1349 = vmatprep.mubr.bf16.mxu0 %v6438_v26 }
 0x1fe   :  { %1395 = vmatpush1.bf16.msra.mxu1 %v834_v38 }
 0x201   :  { %1399 = vmatmul.mubr.bf16.vlgmr.msra.gmra.mrb[48].mxu1 %v6435_v41 }
 0x202   :  { %3933 = vmatprep.mubr.msk.bf16.mxu1 %vm8923_vm12, %v6441_v32  ;;  %vm8958_vm12 = vnez %v8833_v25 }
 0x204   :  { %1350 = vmatmul.mubr.bf16.gmra.mrb[4].mxu0 %v6440_v43 }
 0x205   :  { %1357 = vmatprep.mubr.bf16.mxu0 %v6444_v45 }
 0x209   :  { %1407 = vmatmul.mubr.bf16.gmra.mrb[52].mxu1 %v6443_v54  ;;  %v969_v54 = vpop.permute.xlu1 %968 }
 0x20a   :  { %3934 = vmatprep.mubr.msk.bf16.mxu1 %vm8924_vm15, %v6447_v56  ;;  %v964_v56 = vpop.permute.xlu0 %963  ;;  %vm8959_vm15 = vnez %v8864_v13 }
 0x20c   :  { %1358 = vmatmul.mubr.bf16.gmra.mrb[8].mxu0 %v6446_v2 }
 0x20d   :  { %v979_v2 = vpop.permute.xlu1 %978 }
 0x211   :  { %1415 = vmatmul.mubr.bf16.gmra.mrb[56].mxu1 %v6449_v59  ;;  %v974_v59 = vpop.permute.xlu0 %973 }
 0x257   :  { %v4777_v55 = vpop.f32.mrb[12].mxu1 }
 0x258   :  { %v4778_v34 = vpop.f32.mrb[13].mxu1 }
 0x259   :  { %v4779_v27 = vadd.f32 %v4778_v34, %v4777_v55  ;;  %v4780_v58 = vpop.f32.mrb[14].mxu1  ;;  %v954_v34 = vpop.permute.xlu1 %953 }
 0x25a   :  { %v4781_v35 = vpop.f32.mrb[15].mxu1 }
 0x25b   :  { %v4782_v21 = vadd.f32 %v4781_v35, %v4780_v58  ;;  %v1173_v58 = vadd.f32 %v4779_v27, %v954_v34 }
 0x25f   :  { %v4783_v63 = vpop.f32.mrb[16].mxu1 }
 0x260   :  { %v4784_v57 = vpop.f32.mrb[17].mxu1 }
 0x261   :  { %v4785_v26 = vadd.f32 %v4784_v57, %v4783_v63  ;;  %v4786_v23 = vpop.f32.mrb[18].mxu1  ;;  %v959_v63 = vpop.permute.xlu0 %958 }
 0x262   :  { %v4787_v10 = vpop.f32.mrb[19].mxu1  ;;  %v1176_v12 = vadd.f32 %v4782_v21, %v959_v63 }
 0x263   :  { %v4788_v36 = vadd.f32 %v4787_v10, %v4786_v23  ;;  %v1181_v11 = vadd.f32 %v4785_v26, %v964_v56 }
 0x265   :  { %v1184_v60 = vadd.f32 %v4788_v36, %v969_v54 }
 0x267   :  { %v4789_v37 = vpop.f32.mrb[20].mxu1 }
 0x268   :  { %v4790_v38 = vpop.f32.mrb[21].mxu1 }
 0x269   :  { %v4791_v41 = vadd.f32 %v4790_v38, %v4789_v37  ;;  %v4792_v32 = vpop.f32.mrb[22].mxu1 }
 0x26a   :  { %v4793_v43 = vpop.f32.mrb[23].mxu1 }
 0x26b   :  { %v4794_v45 = vadd.f32 %v4793_v43, %v4792_v32 }
 0x26d   :  { %v1192_v21 = vadd.f32 %v4794_v45, %v979_v2 }
 0x277   :  { %v4811_v55 = vpop.f32.mrb[24].mxu1 }
 0x278   :  { %v4812_v4 = vpop.f32.mrb[25].mxu1 }
 0x279   :  { %v4813_v35 = vadd.f32 %v4812_v4, %v4811_v55  ;;  %v4814_v14 = vpop.f32.mrb[26].mxu1  ;;  %v1189_v4 = vadd.f32 %v4791_v41, %v974_v59 }
 0x27a   :  { %v4815_v57 = vpop.f32.mrb[27].mxu1 }
 0x27b   :  { %v1230_v23 = vadd.f32 %v4813_v35, %v1173_v58  ;;  %v4816_v10 = vadd.f32 %v4815_v57, %v4814_v14 }
 0x27d   :  { %v1233_v24 = vadd.f32 %v4816_v10, %v1176_v12 }
 0x27f   :  { %v4817_v37 = vpop.f32.mrb[28].mxu1 }
 0x280   :  { %v4818_v38 = vpop.f32.mrb[29].mxu1 }
 0x281   :  { %v4819_v32 = vadd.f32 %v4818_v38, %v4817_v37  ;;  %v4820_v43 = vpop.f32.mrb[30].mxu1 }
 0x282   :  { %v4821_v39 = vpop.f32.mrb[31].mxu1 }
 0x283   :  { %v1238_v33 = vadd.f32 %v4819_v32, %v1181_v11  ;;  %v4822_v62 = vadd.f32 %v4821_v39, %v4820_v43 }
 0x285   :  { %v1241_v0 = vadd.f32 %v4822_v62, %v1184_v60 }
 0x287   :  { %v4823_v31 = vpop.f32.mrb[32].mxu1 }
 0x288   :  { %v4824_v27 = vpop.f32.mrb[33].mxu1 }
 0x289   :  { %v4825_v55 = vadd.f32 %v4824_v27, %v4823_v31  ;;  %v4826_v34 = vpop.f32.mrb[34].mxu1 }
 0x28a   :  { %v4827_v61 = vpop.f32.mrb[35].mxu1 }
 0x28b   :  { %v1246_v58 = vadd.f32 %v4825_v55, %v1189_v4  ;;  %v4828_v14 = vadd.f32 %v4827_v61, %v4826_v34 }
 0x28d   :  { %v1249_v12 = vadd.f32 %v4828_v14, %v1192_v21 }
 0x297   :  { %v4845_v35 = vpop.f32.mrb[36].mxu1 }
 0x298   :  { %v4846_v63 = vpop.f32.mrb[37].mxu1 }
 0x299   :  { %v4847_v26 = vadd.f32 %v4846_v63, %v4845_v35  ;;  %v4848_v56 = vpop.f32.mrb[38].mxu1 }
 0x29a   :  { %v4849_v57 = vpop.f32.mrb[39].mxu1 }
 0x29b   :  { %v1287_v10 = vadd.f32 %v4847_v26, %v1230_v23  ;;  %v4850_v36 = vadd.f32 %v4849_v57, %v4848_v56 }
 0x29d   :  { %v1290_v11 = vadd.f32 %v4850_v36, %v1233_v24 }
 0x29f   :  { %v4851_v39 = vpop.f32.mrb[40].mxu1 }
 0x2a0   :  { %v4852_v62 = vpop.f32.mrb[41].mxu1 }
 0x2a1   :  { %v4853_v60 = vadd.f32 %v4852_v62, %v4851_v39  ;;  %v4854_v54 = vpop.f32.mrb[42].mxu1 }
 0x2a2   :  { %v4855_v41 = vpop.f32.mrb[43].mxu1 }
 0x2a3   :  { %v1295_v31 = vadd.f32 %v4853_v60, %v1238_v33  ;;  %v4856_v59 = vadd.f32 %v4855_v41, %v4854_v54 }
 0x2a5   :  { %v1298_v37 = vadd.f32 %v4856_v59, %v1241_v0 }
 0x2a7   :  { %v4857_v45 = vpop.f32.mrb[44].mxu1 }
 0x2a8   :  { %v4858_v2 = vpop.f32.mrb[45].mxu1 }
 0x2a9   :  { %v4859_v61 = vadd.f32 %v4858_v2, %v4857_v45  ;;  %v4860_v38 = vpop.f32.mrb[46].mxu1 }
 0x2aa   :  { %v4861_v32 = vpop.f32.mrb[47].mxu1 }
 0x2ab   :  { %v1303_v43 = vadd.f32 %v4859_v61, %v1246_v58  ;;  %v4862_v27 = vadd.f32 %v4861_v32, %v4860_v38 }
 0x2ad   :  { %v1306_v4 = vadd.f32 %v4862_v27, %v1249_v12 }
 0x2cf   :  { %v4879_v55 = vpop.f32.mrb[0].mxu0 }
 0x2d0   :  { %v4880_v23 = vpop.f32.mrb[1].mxu0 }
 0x2d1   :  { %v4881_v34 = vadd.f32 %v4880_v23, %v4879_v55  ;;  %v4882_v24 = vpop.f32.mrb[2].mxu0 }
 0x2d2   :  { %v4883_v21 = vpop.f32.mrb[3].mxu0 }
 0x2d3   :  { %v4884_v14 = vadd.f32 %v4883_v21, %v4882_v24  ;;  %v1344_v35 = vadd.f32 %v4881_v34, %v1287_v10 }
 0x2d4   :  { %v1400_v63 = vpop.f32.mrb[48].mxu1 }
 0x2d5   :  { %v7403_v26 = vadd.f32 %v1400_v63, %v1344_v35  ;;  %v1402_v33 = vpop.f32.mrb[49].mxu1  ;;  %v1347_v0 = vadd.f32 %v4884_v14, %v1290_v11 }
 0x2d6   :  { %v1403_v56 = vpop.f32.mrb[50].mxu1 }
 0x2d7   :  { %8925 = vst [vmem:[#allocation30_spill] sm:$0xff] %v7403_v26  ;;  %v7405_v57 = vadd.f32 %v1403_v56, %v1347_v0  ;;  %v4885_v36 = vpop.f32.mrb[4].mxu0  ;;  %v1405_v39 = vpop.f32.mrb[51].mxu1 }
 0x2d8   :  { %v4886_v58 = vpop.f32.mrb[5].mxu0  ;;  %v6452_v39 = vld [vmem:[%s8570_s3 + $0xf4] ss:$40 sps:$4 sm:$0xff]  }
 0x2d9   :  { %8926 = vst [vmem:[#allocation31_spill] sm:$0xff] %v7405_v57  ;;  %v4887_v62 = vadd.f32 %v4886_v58, %v4885_v36  ;;  %v4888_v12 = vpop.f32.mrb[6].mxu0  ;;  %2388 = vmatprep.mubr.bf16.mxu0 %v6452_v39  ;;  %v6458_v58 = vld [vmem:[%s8570_s3 + $0x104] ss:$40 sps:$4 sm:$0xff]  }
 0x2da   :  { %v4889_v60 = vpop.f32.mrb[7].mxu0  ;;  %2502 = vmatprep.mubr.bf16.mxu1 %v6458_v58 }
 0x2db   :  { %v1352_v54 = vadd.f32 %v4887_v62, %v1295_v31  ;;  %v4890_v41 = vadd.f32 %v4889_v60, %v4888_v12 }
 0x2dc   :  { %v1408_v59 = vpop.f32.mrb[52].mxu1 }
 0x2dd   :  { %v1355_v45 = vadd.f32 %v4890_v41, %v1298_v37  ;;  %v7407_v2 = vadd.f32 %v1408_v59, %v1352_v54  ;;  %v1410_v10 = vpop.f32.mrb[53].mxu1 }
 0x2de   :  { %v1411_v61 = vpop.f32.mrb[54].mxu1 }
 0x2df   :  { %v7409_v38 = vadd.f32 %v1411_v61, %v1355_v45  ;;  %v4891_v11 = vpop.f32.mrb[8].mxu0  ;;  %v1413_v32 = vpop.f32.mrb[55].mxu1 }
 0x2e0   :  { %v4892_v27 = vpop.f32.mrb[9].mxu0 }
 0x2e1   :  { %v4893_v55 = vadd.f32 %v4892_v27, %v4891_v11  ;;  %v4894_v23 = vpop.f32.mrb[10].mxu0  ;;  %v7413_v34 = vpack.i.bf16 %v7409_v38, %v7407_v2 }
 0x2e2   :  { %v4895_v24 = vpop.f32.mrb[11].mxu0 }
 0x2e3   :  { %v1360_v31 = vadd.f32 %v4893_v55, %v1303_v43  ;;  %v4896_v21 = vadd.f32 %v4895_v24, %v4894_v23  ;;  %5628 = vrot.lane.b32.xlu1 %v7413_v34, %s8698_s1  ;;  %5623 = vrot.lane.b32.xlu0 %v7413_v34, %s8718_s19 }
 0x2e4   :  { %v1416_v37 = vpop.f32.mrb[56].mxu1 }
 0x2e5   :  { %v1363_v14 = vadd.f32 %v4896_v21, %v1306_v4  ;;  %v7419_v35 = vadd.f32 %v1416_v37, %v1360_v31  ;;  %v1418_v63 = vpop.f32.mrb[57].mxu1 }
 0x2e6   :  { %v1419_v33 = vpop.f32.mrb[58].mxu1 }
 0x2e7   :  { %v7421_v0 = vadd.f32 %v1419_v33, %v1363_v14  ;;  %5638 = vrot.lane.b32.xlu1 %v7413_v34, %s8716_s20  ;;  %5633 = vrot.lane.b32.xlu0 %v7413_v34, %s8714_s21  ;;  %v1421_v43 = vpop.f32.mrb[59].mxu1  ;;  %v5967_v33 = vpack.i.bf16 %v7405_v57, %v7403_v26 }
 0x2e9   :  { %v7429_v56 = vpack.i.bf16 %v7421_v0, %v7419_v35 }
 0x2eb   :  { %5648 = vrot.lane.b32.xlu1 %v7413_v34, %s8702_s13  ;;  %5643 = vrot.lane.b32.xlu0 %v7413_v34, %s8720_s14 }
 0x2ef   :  { %5658 = vrot.lane.b32.xlu1 %v7413_v34, %s8712_s22  ;;  %5653 = vrot.lane.b32.xlu0 %v7413_v34, %s8706_s23 }
 0x2f3   :  { %5668 = vrot.lane.b32.xlu1 %v7413_v34, %s8700_s15  ;;  %5663 = vrot.lane.b32.xlu0 %v7413_v34, %s8708_s16 }
 0x2f7   :  { %5678 = vrot.lane.b32.xlu1 %v7413_v34, %s8704_s24  ;;  %5673 = vrot.lane.b32.xlu0 %v7413_v34, %s8710_s25 }
 0x2fb   :  { %5688 = vrot.lane.b32.xlu1 %v7413_v34, %s8724_s17  ;;  %5683 = vrot.lane.b32.xlu0 %v7413_v34, %s8696_s18  ;;  %s8937_s18 = smov 113  }
 0x2ff   :  { %5698 = vrot.lane.b32.xlu1 %v7413_v34, %s8694_s28  ;;  %5693 = vrot.lane.b32.xlu0 %v7413_v34, %s8927_s8  ;;  %s8936_s28 = smov 4  }
 0x303   :  { %5713 = vrot.lane.b32.xlu1 %v7413_v34, %s8928_s10  ;;  %5703 = vrot.lane.b32.xlu0 %v7413_v34, %s8929_s30 }
 0x307   :  { %5728 = vrot.lane.b32.xlu1 %v7413_v34, %s8930_s9  ;;  %5708 = vrot.lane.b32.xlu0 %v7413_v34, %s8931_s29 }
 0x30b   :  { %5743 = vrot.lane.b32.xlu1 %v7413_v34, %s8932_s12  ;;  %5718 = vrot.lane.b32.xlu0 %v7413_v34, %s8933_s11 }
 0x30f   :  { %5763 = vrot.lane.b32.xlu1 %v7413_v34, %s8722_s26  ;;  %5723 = vrot.lane.b32.xlu0 %v7413_v34, %s8934_s27 }
 0x313   :  { %5768 = vrot.lane.b32.xlu1 %v7429_v56, %s8698_s1  ;;  %5733 = vrot.lane.b32.xlu0 %v7413_v34, %s8935_s0  ;;  %s8938_s1 = smov 119  }
 0x317   :  { %5778 = vrot.lane.b32.xlu1 %v7429_v56, %s8716_s20  ;;  %5738 = vrot.lane.b32.xlu0 %v7413_v34, %s8936_s28  ;;  %s8947_s20 = smov 120  }
 0x31b   :  { %5788 = vrot.lane.b32.xlu1 %v7429_v56, %s8702_s13  ;;  %5748 = vrot.lane.b32.xlu0 %v7413_v34, %s8937_s18  ;;  %s8945_s13 = smov 111  }
 0x31f   :  { %5798 = vrot.lane.b32.xlu1 %v7429_v56, %s8712_s22  ;;  %5753 = vrot.lane.b32.xlu0 %v7429_v56, %s8718_s19  ;;  %s8943_s22 = smov 121   ;;  %s8948_s19 = smov 110  }
 0x323   :  { %5808 = vrot.lane.b32.xlu1 %v7429_v56, %s8700_s15  ;;  %5758 = vrot.lane.b32.xlu0 %v7413_v34, %s8938_s1  ;;  %s8946_s15 = smov 117  }
 0x327   :  { %5818 = vrot.lane.b32.xlu1 %v7429_v56, %s8704_s24  ;;  %5773 = vrot.lane.b32.xlu0 %v7429_v56, %s8714_s21  ;;  %s8939_s24 = smov 122   ;;  %s8944_s21 = smov 118  }
 0x32b   :  { %5833 = vrot.lane.b32.xlu1 %v7429_v56, %s8724_s17  ;;  %5783 = vrot.lane.b32.xlu0 %v7429_v56, %s8720_s14  ;;  %s8949_s14 = smov 116  }
 0x32f   :  { %5838 = vrot.lane.b32.xlu1 %v7429_v56, %s8927_s8  ;;  %5793 = vrot.lane.b32.xlu0 %v7429_v56, %s8706_s23  ;;  %s8940_s23 = smov 125  }
 0x333   :  { %5853 = vrot.lane.b32.xlu1 %v7413_v34, %s8939_s24  ;;  %5803 = vrot.lane.b32.xlu0 %v7429_v56, %s8708_s16  ;;  %s8941_s16 = smov 112  }
 0x337   :  { %5858 = vrot.lane.b32.xlu1 %v7429_v56, %s8929_s30  ;;  %5813 = vrot.lane.b32.xlu0 %v7429_v56, %s8710_s25  ;;  %s8942_s25 = smov 11  }
 0x33b   :  { %5863 = vrot.lane.b32.xlu1 %v7429_v56, %s8931_s29  ;;  %5823 = vrot.lane.b32.xlu0 %v7429_v56, %s8940_s23  ;;  %s9016_s23 = smov 19  }
 0x33f   :  { %5878 = vrot.lane.b32.xlu1 %v7429_v56, %s8933_s11  ;;  %5828 = vrot.lane.b32.xlu0 %v7413_v34, %s8941_s16 }
 0x343   :  { %5883 = vrot.lane.b32.xlu1 %v7429_v56, %s8934_s27  ;;  %5843 = vrot.lane.b32.xlu0 %v7429_v56, %s8942_s25 }
 0x347   :  { %5898 = vrot.lane.b32.xlu1 %v7413_v34, %s8943_s22  ;;  %5848 = vrot.lane.b32.xlu0 %v7413_v34, %s8944_s21 }
 0x34b   :  { %5903 = vrot.lane.b32.xlu1 %v7429_v56, %s8935_s0  ;;  %5868 = vrot.lane.b32.xlu0 %v7429_v56, %s8928_s10 }
 0x34f   :  { %5908 = vrot.lane.b32.xlu1 %v7429_v56, %s8936_s28  ;;  %5873 = vrot.lane.b32.xlu0 %v7413_v34, %s8945_s13 }
 0x353   :  { %5923 = vrot.lane.b32.xlu1 %v7429_v56, %s8937_s18  ;;  %5888 = vrot.lane.b32.xlu0 %v7429_v56, %s8930_s9 }
 0x355   :  { %v5629_v62 = vpop.permute.xlu1 %5628  ;;  %v5624_v12 = vpop.permute.xlu0 %5623 }
 0x356   :  { %v5631_v60 = vunpack.i.h.bf16 %v5629_v62  ;;  %v5630_v54 = vunpack.i.l.bf16 %v5629_v62  ;;  %v5626_v41 = vunpack.i.h.bf16 %v5624_v12  ;;  %v5625_v59 = vunpack.i.l.bf16 %v5624_v12 }
 0x357   :  { %5928 = vrot.lane.b32.xlu1 %v7429_v56, %s8938_s1  ;;  %5893 = vrot.lane.b32.xlu0 %v7413_v34, %s8946_s15 }
 0x358   :  { %v4302_v45 = vpack.c.bf16 %v5631_v60, %v5630_v54  ;;  %v4326_v10 = vpack.c.bf16 %v5626_v41, %v5625_v59 }
 0x359   :  { %v7553_v61 = vpop.permute.xlu1 %5638  ;;  %v7555_v11 = vpop.permute.xlu0 %5633 }
 0x35a   :  { %4897 = vmatprep.subr.msk.bf16.mxu0 %vm6816_vm4, %v4326_v10  ;;  %v5636_v7 = vunpack.i.h.bf16 %v7555_v11  ;;  %v5635_v19 = vunpack.i.l.bf16 %v7555_v11  ;;  %v5640_v6 = vunpack.i.l.bf16 %v7553_v61 }
 0x35b   :  { %5943 = vrot.lane.b32.xlu1 %v7413_v34, %s8947_s20  ;;  %5913 = vrot.lane.b32.xlu0 %v7429_v56, %s8932_s12 }
 0x35c   :  { %4898 = vmatpush3.bf16.msk.msra.mxu0 %vm6820_vm5, %v4302_v45 }
 0x35d   :  { %v5649_v32 = vpop.permute.xlu1 %5648  ;;  %v5644_v27 = vpop.permute.xlu0 %5643 }
 0x35e   :  { %v5651_v55 = vunpack.i.h.bf16 %v5649_v32  ;;  %v5650_v23 = vunpack.i.l.bf16 %v5649_v32  ;;  %v5646_v24 = vunpack.i.h.bf16 %v5644_v27  ;;  %v5645_v31 = vunpack.i.l.bf16 %v5644_v27  ;;  %v3967_v32 = vld [vmem:[%s8571_s4 + $0x40] sm:$0xff]  ;;  %v3968_v27 = vld [vmem:[%s8571_s4 + $0x48] sm:$0xff] }
 0x35f   :  { %5948 = vrot.lane.b32.xlu1 %v7429_v56, %s8941_s16  ;;  %5918 = vrot.lane.b32.xlu0 %v7413_v34, %s8948_s19 }
 0x360   :  { %v4398_v21 = vpack.c.bf16 %v5651_v55, %v5650_v23  ;;  %v4416_v37 = vpack.c.bf16 %v5646_v24, %v5645_v31  ;;  %v3969_v24 = vld [vmem:[%s8571_s4 + $0x50] sm:$0xff] }
 0x361   :  { %v7569_v14 = vpop.permute.xlu1 %5658  ;;  %v7571_v63 = vpop.permute.xlu0 %5653 }
 0x362   :  { %4965 = vmatprep.subr.msk.bf16.mxu1 %vm7043_vm0, %v4416_v37  ;;  %v5660_v49 = vunpack.i.l.bf16 %v7569_v14 }
 0x363   :  { %5953 = vrot.lane.b32.xlu1 %v7429_v56, %s8944_s21  ;;  %5933 = vrot.lane.b32.xlu0 %v7429_v56, %s8722_s26  ;;  %s8950_s26 = smov 109  }
 0x364   :  { %4966 = vmatpush3.bf16.msk.msra.mxu1 %vm7060_vm2, %v4398_v21 }
 0x365   :  { %v7583_v43 = vpop.permute.xlu1 %5668  ;;  %v7585_v39 = vpop.permute.xlu0 %5663 }
 0x366   :  { %v5665_v40 = vunpack.i.l.bf16 %v7585_v39 }
 0x367   :  { %5938 = vrot.lane.b32.xlu0 %v7413_v34, %s8949_s14  ;;  %5968 = vrot.lane.b32.xlu1 %v5967_v33, %s8724_s17  ;;  %s8951_s17 = smov 127  }
 0x369   :  { %v7590_v58 = vpop.permute.xlu1 %5678  ;;  %v7592_v62 = vpop.permute.xlu0 %5673 }
 0x36b   :  { %5958 = vrot.lane.b32.xlu0 %v7429_v56, %s8939_s24  ;;  %5973 = vrot.lane.b32.xlu1 %v7429_v56, %s8945_s13  ;;  %s9017_s13 = smov 15  }
 0x36d   :  { %v7598_v12 = vpop.permute.xlu1 %5688  ;;  %v7600_v60 = vpop.permute.xlu0 %5683 }
 0x36f   :  { %5963 = vrot.lane.b32.xlu0 %v7413_v34, %s8950_s26  ;;  %5978 = vrot.lane.b32.xlu1 %v7429_v56, %s8946_s15 }
 0x371   :  { %v7606_v54 = vpop.permute.xlu1 %5698  ;;  %v7608_v41 = vpop.permute.xlu0 %5693 }
 0x373   :  { %5983 = vrot.lane.b32.xlu0 %v7429_v56, %s8943_s22  ;;  %5988 = vrot.lane.b32.xlu1 %v7429_v56, %s8948_s19  ;;  %s9022_s19 = smov 16  }
 0x375   :  { %v7614_v59 = vpop.permute.xlu1 %5713  ;;  %v7616_v45 = vpop.permute.xlu0 %5703 }
 0x377   :  { %5998 = vrot.lane.b32.xlu0 %v7429_v56, %s8947_s20  ;;  %5993 = vrot.lane.b32.xlu1 %v7429_v56, %s8949_s14 }
 0x379   :  { %v7622_v34 = vpop.permute.xlu1 %5728  ;;  %v7624_v10 = vpop.permute.xlu0 %5708 }
 0x37b   :  { %6003 = vrot.lane.b32.xlu0 %v5967_v33, %s8951_s17  ;;  %6008 = vrot.lane.b32.xlu1 %v7429_v56, %s8950_s26  ;;  %v3970_v56 = vld [vmem:[%s8571_s4 + $0x58] sm:$0xff]  ;;  %s9023_s26 = smov 12  }
 0x37d   :  { %v7635_v55 = vpop.permute.xlu1 %5743  ;;  %v7637_v23 = vpop.permute.xlu0 %5718 }
 0x37e   :  { %8952 = vst [vmem:[#allocation32_spill] sm:$0xff] %v7635_v55 }
 0x37f   :  { %2182 = vperm.xlu0 %5230, %v3967_v32   ;;  %2187 = vperm.xlu1 %5231, %v3968_v27  }
 0x381   :  { %v7645_v31 = vpop.permute.xlu1 %5763  ;;  %v7647_v21 = vpop.permute.xlu0 %5723 }
 0x382   :  { %8953 = vst [vmem:[#allocation33_spill] sm:$0xff] %v7645_v31  ;;  %v5641_v31 = vunpack.i.h.bf16 %v7553_v61  ;;  %v5655_v61 = vunpack.i.l.bf16 %v7571_v63 }
 0x383   :  { %2192 = vperm.xlu0 %5230, %v3969_v24   ;;  %2197 = vperm.xlu1 %5231, %v3970_v56  }
 0x384   :  { %v4308_v11 = vpack.c.bf16 %v5641_v31, %v5640_v6 }
 0x385   :  { %v5769_v37 = vpop.permute.xlu1 %5768  ;;  %v7649_v33 = vpop.permute.xlu0 %5733 }
 0x386   :  { %v5771_v57 = vunpack.i.h.bf16 %v5769_v37  ;;  %v5770_v26 = vunpack.i.l.bf16 %v5769_v37  ;;  %v4332_v37 = vpack.c.bf16 %v5636_v7, %v5635_v19 }
 0x388   :  { %v4305_v44 = vpack.c.bf16 %v5771_v57, %v5770_v26 }
 0x389   :  { %v5779_v36 = vpop.permute.xlu1 %5778  ;;  %v7651_v32 = vpop.permute.xlu0 %5738 }
 0x38a   :  { %v5781_v26 = vunpack.i.h.bf16 %v5779_v36  ;;  %v5780_v57 = vunpack.i.l.bf16 %v5779_v36 }
 0x38c   :  { %v4311_v31 = vpack.c.bf16 %v5781_v26, %v5780_v57 }
 0x38d   :  { %v5789_v27 = vpop.permute.xlu1 %5788  ;;  %v7653_v4 = vpop.permute.xlu0 %5748 }
 0x38e   :  { %8954 = vst [vmem:[#allocation34_spill] sm:$0xff] %v7653_v4  ;;  %v5790_v46 = vunpack.i.l.bf16 %v5789_v27 }
 0x391   :  { %v7655_v3 = vpop.permute.xlu1 %5798  ;;  %v5754_v29 = vpop.permute.xlu0 %5753 }
 0x392   :  { %v5756_v24 = vunpack.i.h.bf16 %v5754_v29  ;;  %v5755_v56 = vunpack.i.l.bf16 %v5754_v29  ;;  %v5656_v29 = vunpack.i.h.bf16 %v7571_v63  ;;  %v5801_v57 = vunpack.i.h.bf16 %v7655_v3 }
 0x394   :  { %v4329_v48 = vpack.c.bf16 %v5756_v24, %v5755_v56  ;;  %v4338_v6 = vpack.c.bf16 %v5656_v29, %v5655_v61  ;;  %v5676_v29 = vunpack.i.h.bf16 %v7592_v62 }
 0x395   :  { %v7661_v55 = vpop.permute.xlu1 %5808  ;;  %v7663_v4 = vpop.permute.xlu0 %5758 }
 0x396   :  { %8955 = vst [vmem:[#allocation35_spill] sm:$0xff] %v7663_v4  ;;  %4899 = vmatprep.subr.msk.bf16.mxu0 %vm6816_vm4, %v4329_v48  ;;  %v5661_v48 = vunpack.i.h.bf16 %v7569_v14  ;;  %v5666_v4 = vunpack.i.h.bf16 %v7585_v39  ;;  %v5675_v39 = vunpack.i.l.bf16 %v7592_v62  ;;  %v5811_v62 = vunpack.i.h.bf16 %v7661_v55 }
 0x397   :  { %4900 = vmatpush3.bf16.msk.msra.mxu0 %vm6820_vm5, %v4305_v44 }
 0x398   :  { %4901 = vmatprep.subr.msk.bf16.mxu0 %vm6837_vm7, %v4332_v37  ;;  %v5791_v37 = vunpack.i.h.bf16 %v5789_v27  ;;  %v4314_v14 = vpack.c.bf16 %v5661_v48, %v5660_v49  ;;  %v5670_v27 = vunpack.i.l.bf16 %v7583_v43  ;;  %v5800_v49 = vunpack.i.l.bf16 %v7655_v3 }
 0x399   :  { %v7673_v24 = vpop.permute.xlu1 %5818  ;;  %v5774_v56 = vpop.permute.xlu0 %5773  ;;  %v4422_v48 = vpack.c.bf16 %v5666_v4, %v5665_v40  ;;  %v5680_v3 = vunpack.i.l.bf16 %v7590_v58  ;;  %v4344_v40 = vpack.c.bf16 %v5676_v29, %v5675_v39  ;;  %v5690_v29 = vunpack.i.l.bf16 %v7598_v12 }
 0x39a   :  { %v5776_v19 = vunpack.i.h.bf16 %v5774_v56  ;;  %v5775_v7 = vunpack.i.l.bf16 %v5774_v56  ;;  %v4401_v26 = vpack.c.bf16 %v5791_v37, %v5790_v46  ;;  %v4317_v4 = vpack.c.bf16 %v5801_v57, %v5800_v49 }
 0x39b   :  { %4902 = vmatpush3.bf16.msk.msra.mxu0 %vm6856_vm9, %v4308_v11  ;;  %v5671_v11 = vunpack.i.h.bf16 %v7583_v43  ;;  %v5821_v57 = vunpack.i.h.bf16 %v7673_v24 }
 0x39c   :  { %v4335_v44 = vpack.c.bf16 %v5776_v19, %v5775_v7 }
 0x39d   :  { %v7679_v63 = vpop.permute.xlu1 %5833  ;;  %v5784_v36 = vpop.permute.xlu0 %5783  ;;  %v4404_v46 = vpack.c.bf16 %v5671_v11, %v5670_v27 }
 0x39e   :  { %v5786_v56 = vunpack.i.h.bf16 %v5784_v36  ;;  %v5785_v18 = vunpack.i.l.bf16 %v5784_v36  ;;  %4903 = vmatprep.subr.msk.bf16.mxu0 %vm6837_vm7, %v4335_v44 }
 0x39f   :  { %4904 = vmatpush3.bf16.msk.msra.mxu0 %vm6856_vm9, %v4311_v31 }
 0x3a0   :  { %v4419_v61 = vpack.c.bf16 %v5786_v56, %v5785_v18  ;;  %4905 = vmatprep.subr.msk.bf16.mxu0 %vm6867_vm11, %v4338_v6  ;;  %v5681_v18 = vunpack.i.h.bf16 %v7590_v58  ;;  %v5810_v6 = vunpack.i.l.bf16 %v7661_v55  ;;  %v5686_v56 = vunpack.i.h.bf16 %v7600_v60 }
 0x3a1   :  { %v7695_v19 = vpop.permute.xlu1 %5838  ;;  %v5794_v7 = vpop.permute.xlu0 %5793  ;;  %v5691_v58 = vunpack.i.h.bf16 %v7598_v12  ;;  %v5696_v55 = vunpack.i.h.bf16 %v7608_v41  ;;  %v5820_v12 = vunpack.i.l.bf16 %v7673_v24 }
 0x3a2   :  { %v5796_v44 = vunpack.i.h.bf16 %v5794_v7  ;;  %v5795_v31 = vunpack.i.l.bf16 %v5794_v7  ;;  %4967 = vmatprep.subr.msk.bf16.mxu1 %vm7043_vm0, %v4419_v61  ;;  %v5695_v61 = vunpack.i.l.bf16 %v7608_v41  ;;  %v4320_v39 = vpack.c.bf16 %v5681_v18, %v5680_v3 }
 0x3a3   :  { %4906 = vmatpush3.bf16.msk.msra.mxu0 %vm6882_vm13, %v4314_v14  ;;  %4968 = vmatpush3.bf16.msk.msra.mxu1 %vm7060_vm2, %v4401_v26  ;;  %v5685_v14 = vunpack.i.l.bf16 %v7600_v60  ;;  %v4407_v26 = vpack.c.bf16 %v5811_v62, %v5810_v6  ;;  %v5701_v41 = vunpack.i.h.bf16 %v7606_v54  ;;  %v5700_v18 = vunpack.i.l.bf16 %v7606_v54 }
 0x3a4   :  { %v4341_v43 = vpack.c.bf16 %v5796_v44, %v5795_v31  ;;  %4969 = vmatprep.subr.msk.bf16.mxu1 %vm7067_vm14, %v4422_v48  ;;  %v4374_v24 = vpack.c.bf16 %v5696_v55, %v5695_v61  ;;  %v5706_v3 = vunpack.i.h.bf16 %v7616_v45  ;;  %v5836_v62 = vunpack.i.h.bf16 %v7679_v63  ;;  %v6453_v61 = vld [vmem:[%s8570_s3 + $0x144] ss:$40 sps:$4 sm:$0xff]  }
 0x3a5   :  { %v7709_v37 = vpop.permute.xlu1 %5853  ;;  %v5804_v36 = vpop.permute.xlu0 %5803  ;;  %v4428_v48 = vpack.c.bf16 %v5686_v56, %v5685_v14  ;;  %v5835_v6 = vunpack.i.l.bf16 %v7679_v63  ;;  %v5841_v14 = vunpack.i.h.bf16 %v7695_v19  ;;  %v5840_v54 = vunpack.i.l.bf16 %v7695_v19 }
 0x3a6   :  { %v5806_v11 = vunpack.i.h.bf16 %v5804_v36  ;;  %v5805_v27 = vunpack.i.l.bf16 %v5804_v36  ;;  %4907 = vmatprep.subr.msk.bf16.mxu0 %vm6867_vm11, %v4341_v43  ;;  %v4350_v19 = vpack.c.bf16 %v5701_v41, %v5700_v18  ;;  %vm8962_vm2 = vnez %v8837_v17  ;;  %v6455_v41 = vld [vmem:[%s8570_s3 + $0x140] ss:$40 sps:$4 sm:$0xff]  }
 0x3a7   :  { %4908 = vmatpush3.bf16.msk.msra.mxu0 %vm6882_vm13, %v4317_v4  ;;  %4970 = vmatpush3.bf16.msk.msra.mxu1 %vm8956_vm6, %v4404_v46  ;;  %v4410_v46 = vpack.c.bf16 %v5691_v58, %v5690_v29  ;;  %v4323_v4 = vpack.c.bf16 %v5821_v57, %v5820_v12  ;;  %v4413_v58 = vpack.c.bf16 %v5836_v62, %v5835_v6  ;;  %v5711_v12 = vunpack.i.h.bf16 %v7624_v10 }
 0x3a8   :  { %v4425_v60 = vpack.c.bf16 %v5806_v11, %v5805_v27  ;;  %4909 = vmatprep.subr.msk.bf16.mxu0 %vm8957_vm3, %v4344_v40  ;;  %v5705_v40 = vunpack.i.l.bf16 %v7616_v45  ;;  %v6450_v45 = vld [vmem:[%s8570_s3 + $0xf0] ss:$40 sps:$4 sm:$0xff]   ;;  %vm8963_vm0 = vnez %v8870_v50  ;;  %v8964_v18 = vpack.c.bf16 %v7409_v38, %v7407_v2  ;;  %v6459_v2 = vld [vmem:[%s8570_s3 + $0x194] ss:$40 sps:$4 sm:$0xff]  }
 0x3a9   :  { %v5859_v49 = vpop.permute.xlu1 %5858  ;;  %v5814_v7 = vpop.permute.xlu0 %5813 }
 0x3aa   :  { %v5816_v44 = vunpack.i.h.bf16 %v5814_v7  ;;  %v5815_v31 = vunpack.i.l.bf16 %v5814_v7  ;;  %4971 = vmatprep.subr.msk.bf16.mxu1 %vm7067_vm14, %v4425_v60  ;;  %vm8961_vm14 = vnez %v8835_v15  ;;  %v4434_v60 = vpack.c.bf16 %v5706_v3, %v5705_v40 }
 0x3ab   :  { %4910 = vmatpush3.bf16.msk.msra.mxu0 %vm8958_vm12, %v4320_v39  ;;  %4972 = vmatpush3.bf16.msk.msra.mxu1 %vm8956_vm6, %v4407_v26  ;;  %vm8960_vm6 = vnez %v8867_v20  ;;  %v4377_v39 = vpack.c.bf16 %v5841_v14, %v5840_v54  ;;  %v5861_v26 = vunpack.i.h.bf16 %v5859_v49  ;;  %v5860_v57 = vunpack.i.l.bf16 %v5859_v49 }
 0x3ac   :  { %v4347_v43 = vpack.c.bf16 %v5816_v44, %v5815_v31  ;;  %4973 = vmatprep.subr.msk.bf16.mxu1 %vm8959_vm15, %v4428_v48  ;;  %v5710_v48 = vunpack.i.l.bf16 %v7624_v10  ;;  %v5715_v3 = vunpack.i.l.bf16 %v7614_v59  ;;  %v5721_v10 = vunpack.i.h.bf16 %v7637_v23 }
 0x3ad   :  { %v7741_v36 = vpop.permute.xlu1 %5863  ;;  %v5824_v56 = vpop.permute.xlu0 %5823  ;;  %v4437_v44 = vpack.c.bf16 %v5861_v26, %v5860_v57  ;;  %v5720_v40 = vunpack.i.l.bf16 %v7637_v23  ;;  %v8965_v23 = vpack.c.bf16 %v7421_v0, %v7419_v35  ;;  %v8967_v54 = vmov 0   ;;  %v6468_v35 = vld [vmem:[%s8570_s3 + $0x154] ss:$40 sps:$4 sm:$0xff]  }
 0x3ae   :  { %v5826_v11 = vunpack.i.h.bf16 %v5824_v56  ;;  %v5825_v27 = vunpack.i.l.bf16 %v5824_v56  ;;  %4911 = vmatprep.subr.msk.bf16.mxu0 %vm8957_vm3, %v4347_v43  ;;  %v4380_v38 = vpack.c.bf16 %v5711_v12, %v5710_v48  ;;  %v5866_v6 = vunpack.i.h.bf16 %v7741_v36  ;;  %v6456_v56 = vld [vmem:[%s8570_s3 + $0x100] ss:$40 sps:$4 sm:$0xff]  }
 0x3af   :  { %4912 = vmatpush3.bf16.msk.msra.mxu0 %vm8958_vm12, %v4323_v4  ;;  %4974 = vmatpush3.bf16.msk.msra.mxu1 %vm8960_vm6, %v4410_v46  ;;  %v5725_v0 = vunpack.i.l.bf16 %v7647_v21  ;;  %v5730_v26 = vunpack.i.l.bf16 %v7622_v34  ;;  %v5735_v12 = vunpack.i.l.bf16 %v7649_v33 }
 0x3b0   :  { %v4431_v63 = vpack.c.bf16 %v5826_v11, %v5825_v27  ;;  %4931 = vmatprep.subr.msk.bf16.mxu0 %vm8961_vm14, %v4374_v24  ;;  %v5716_v24 = vunpack.i.h.bf16 %v7614_v59  ;;  %v5865_v59 = vunpack.i.l.bf16 %v7741_v36  ;;  %v4488_v11 = vpack.c.bf16 %v5721_v10, %v5720_v40 }
 0x3b1   :  { %v7756_v29 = vpop.permute.xlu1 %5878  ;;  %v7758_v55 = vpop.permute.xlu0 %5828  ;;  %v5726_v36 = vunpack.i.h.bf16 %v7647_v21  ;;  %v5736_v21 = vunpack.i.h.bf16 %v7649_v33 }
 0x3b2   :  { %2389 = vmatmul.mubr.bf16.vlgmr.msra.gmra.mrb[12].mxu0 %v6450_v45  ;;  %4975 = vmatprep.subr.msk.bf16.mxu1 %vm8959_vm15, %v4431_v63  ;;  %v4356_v14 = vpack.c.bf16 %v5716_v24, %v5715_v3  ;;  %v5881_v27 = vunpack.i.h.bf16 %v7756_v29  ;;  %v5880_v45 = vunpack.i.l.bf16 %v7756_v29  ;;  %vm8969_vm15 = vnez %v8873_v22 }
 0x3b3   :  { %4932 = vmatpush3.bf16.msk.msra.mxu0 %vm8962_vm2, %v4350_v19  ;;  %4976 = vmatpush3.bf16.msk.msra.mxu1 %vm8960_vm6, %v4413_v58  ;;  %v4383_v58 = vpack.c.bf16 %v5866_v6, %v5865_v59  ;;  %vm8968_vm6 = vnez %v8841_v52  ;;  %v5731_v29 = vunpack.i.h.bf16 %v7622_v34  ;;  %v4386_v34 = vpack.c.bf16 %v5726_v36, %v5725_v0 }
 0x3b4   :  { %4933 = vmatprep.subr.msk.bf16.mxu0 %vm8961_vm14, %v4377_v39  ;;  %4977 = vmatprep.subr.msk.bf16.mxu1 %vm8963_vm0, %v4434_v60  ;;  %v6461_v39 = vld [vmem:[%s8570_s3 + $0x190] ss:$40 sps:$4 sm:$0xff]   ;;  %v4494_v24 = vpack.c.bf16 %v5736_v21, %v5735_v12  ;;  %v8979_v12 = vld [vmem:[#allocation35_spill] sm:$0xff] }
 0x3b5   :  { %v7774_v7 = vpop.permute.xlu1 %5883  ;;  %v5844_v49 = vpop.permute.xlu0 %5843  ;;  %2396 = vmatprep.mubr.bf16.mxu0 %v6453_v61  ;;  %v4362_v33 = vpack.c.bf16 %v5731_v29, %v5730_v26  ;;  %v6476_v29 = vld [vmem:[%s8570_s3 + $0x1a0] ss:$40 sps:$4 sm:$0xff]  }
 0x3b6   :  { %v5846_v31 = vunpack.i.h.bf16 %v5844_v49  ;;  %v5845_v46 = vunpack.i.l.bf16 %v5844_v49  ;;  %v4491_v49 = vpack.c.bf16 %v5881_v27, %v5880_v45 }
 0x3b7   :  { %4978 = vmatpush3.bf16.msra.mxu1 %v8964_v18  ;;  %v6470_v18 = vld [vmem:[%s8570_s3 + $0x150] ss:$40 sps:$4 sm:$0xff]  }
 0x3b8   :  { %v4353_v43 = vpack.c.bf16 %v5846_v31, %v5845_v46  ;;  %4979 = vmatprep.subr.msk.bf16.mxu1 %vm8963_vm0, %v4437_v44  ;;  %vm8966_vm0 = vnez %v8839_v47  ;;  %v6464_v31 = vld [vmem:[%s8570_s3 + $0xfc] ss:$40 sps:$4 sm:$0xff]   ;;  %v5886_v46 = vunpack.i.h.bf16 %v7774_v7 }
 0x3b9   :  { %v7789_v4 = vpop.permute.xlu1 %5898  ;;  %v7791_v62 = vpop.permute.xlu0 %5848 }
 0x3ba   :  { %2397 = vmatmul.mubr.bf16.gmra.mrb[16].mxu0 %v6455_v41  ;;  %v5885_v41 = vunpack.i.l.bf16 %v7774_v7  ;;  %v5741_v7 = vunpack.i.h.bf16 %v7651_v32 }
 0x3bb   :  { %4934 = vmatpush3.bf16.msk.msra.mxu0 %vm8962_vm2, %v4353_v43  ;;  %4980 = vmatpush3.bf16.msra.mxu1 %v8965_v23  ;;  %v8971_v23 = vld [vmem:[#allocation8_spill] sm:$0xff]  ;;  %vm8985_vm2 = vcmask 916480  }
 0x3bc   :  { %4935 = vmatprep.subr.msk.bf16.mxu0 %vm8966_vm0, %v4380_v38  ;;  %2584 = vmatprep.subr.bf16.mxu1 %v8967_v54  ;;  %v5740_v38 = vunpack.i.l.bf16 %v7651_v32  ;;  %v4389_v6 = vpack.c.bf16 %v5886_v46, %v5885_v41  ;;  %v8976_v32 = vld [vmem:[#allocation34_spill] sm:$0xff] }
 0x3bd   :  { %v5904_v63 = vpop.permute.xlu1 %5903  ;;  %v5869_v19 = vpop.permute.xlu0 %5868  ;;  %2404 = vmatprep.mubr.bf16.mxu0 %v6459_v2  ;;  %v6474_v2 = vld [vmem:[%s8570_s3 + $0x1a4] ss:$40 sps:$4 sm:$0xff]   ;;  %v6482_v41 = vld [vmem:[%s8570_s3 + $0x114] ss:$40 sps:$4 sm:$0xff]  }
 0x3be   :  { %v5871_v61 = vunpack.i.h.bf16 %v5869_v19  ;;  %v5870_v60 = vunpack.i.l.bf16 %v5869_v19  ;;  %2503 = vmatmul.mubr.bf16.vlgmr.msra.gmra.mrb[60].mxu1 %v6456_v56  ;;  %v5906_v3 = vunpack.i.h.bf16 %v5904_v63  ;;  %v5905_v43 = vunpack.i.l.bf16 %v5904_v63 }
 0x3bf   :  { %4936 = vmatpush3.bf16.msk.msra.mxu0 %vm8968_vm6, %v4356_v14  ;;  %4489 = vmatpush1.bf16.msk.msra.mxu1 %vm8969_vm15, %v4488_v11  ;;  %v8973_v14 = vld [vmem:[#allocation18_spill] sm:$0xff]  ;;  %v8975_v11 = vld [vmem:[#allocation32_spill] sm:$0xff]  ;;  %v5751_v63 = vunpack.i.h.bf16 %v8976_v32  ;;  %v5750_v19 = vunpack.i.l.bf16 %v8976_v32 }
 0x3c0   :  { %v4359_v57 = vpack.c.bf16 %v5871_v61, %v5870_v60  ;;  %4937 = vmatprep.subr.msk.bf16.mxu0 %vm8966_vm0, %v4383_v58  ;;  %2586 = vmatprep.subr.bf16.mxu1 %v8967_v54  ;;  %vm8970_vm0 = vnez %v8843_v16  ;;  %v5746_v36 = vunpack.i.h.bf16 %v8975_v11  ;;  %v5745_v27 = vunpack.i.l.bf16 %v8975_v11 }
 0x3c1   :  { %v5909_v48 = vpop.permute.xlu1 %5908  ;;  %v7830_v44 = vpop.permute.xlu0 %5873  ;;  %2510 = vmatprep.mubr.bf16.mxu1 %v6468_v35  ;;  %v4497_v35 = vpack.c.bf16 %v5906_v3, %v5905_v43  ;;  %v4392_v61 = vpack.c.bf16 %v5741_v7, %v5740_v38  ;;  %v4500_v21 = vpack.c.bf16 %v5751_v63, %v5750_v19  ;;  %v8980_v3 = vld [vmem:[#allocation10_spill] sm:$0xff]  ;;  %v8982_v43 = vld [vmem:[#allocation19_spill] sm:$0xff]  ;;  %v8986_v19 = vld [vmem:[#allocation16_spill] sm:$0xff] }
 0x3c2   :  { %2405 = vmatmul.mubr.bf16.gmra.mrb[20].mxu0 %v6461_v39  ;;  %v5911_v60 = vunpack.i.h.bf16 %v5909_v48  ;;  %v5910_v39 = vunpack.i.l.bf16 %v5909_v48  ;;  %v4368_v26 = vpack.c.bf16 %v5746_v36, %v5745_v27  ;;  %v6462_v63 = vld [vmem:[%s8570_s3 + $0xf8] ss:$40 sps:$4 sm:$0xff]  }
 0x3c3   :  { %4938 = vmatpush3.bf16.msk.msra.mxu0 %vm8968_vm6, %v4359_v57  ;;  %4492 = vmatpush1.bf16.msk.msra.mxu1 %vm8969_vm15, %v4491_v49  ;;  %vm8972_vm15 = vnez %v8971_v23  ;;  %vm8974_vm6 = vnez %v8973_v14  ;;  %v8977_v57 = vld [vmem:[#allocation9_spill] sm:$0xff]  ;;  %v5761_v49 = vunpack.i.h.bf16 %v8979_v12 }
 0x3c4   :  { %4939 = vmatprep.subr.msk.bf16.mxu0 %vm8970_vm0, %v4386_v34  ;;  %2588 = vmatprep.subr.bf16.mxu1 %v8967_v54 }
 0x3c5   :  { %v5924_v10 = vpop.permute.xlu1 %5923  ;;  %v5889_v40 = vpop.permute.xlu0 %5888  ;;  %2445 = vmatprep.mubr.bf16.mxu0 %v6464_v31 }
 0x3c6   :  { %v5891_v59 = vunpack.i.h.bf16 %v5889_v40  ;;  %v5890_v56 = vunpack.i.l.bf16 %v5889_v40  ;;  %2511 = vmatmul.mubr.bf16.gmra.mrb[64].mxu1 %v6470_v18  ;;  %v5926_v48 = vunpack.i.h.bf16 %v5924_v10  ;;  %v5925_v31 = vunpack.i.l.bf16 %v5924_v10  ;;  %v8984_v10 = vld [vmem:[#allocation33_spill] sm:$0xff] }
 0x3c7   :  { %4940 = vmatpush3.bf16.msk.msra.mxu0 %vm8972_vm15, %v4362_v33  ;;  %4495 = vmatpush1.bf16.msk.msra.mxu1 %vm8974_vm6, %v4494_v24  ;;  %v5760_v18 = vunpack.i.l.bf16 %v8979_v12  ;;  %v4395_v33 = vpack.c.bf16 %v5911_v60, %v5910_v39  ;;  %v5766_v40 = vunpack.i.h.bf16 %v8984_v10 }
 0x3c8   :  { %v4365_v45 = vpack.c.bf16 %v5891_v59, %v5890_v56  ;;  %4941 = vmatprep.subr.msk.bf16.mxu0 %vm8970_vm0, %v4389_v6  ;;  %2590 = vmatprep.subr.bf16.mxu1 %v8967_v54  ;;  %vm8978_vm0 = vnez %v8977_v57  ;;  %v5831_v6 = vunpack.i.h.bf16 %v7758_v55  ;;  %v5830_v59 = vunpack.i.l.bf16 %v7758_v55 }
 0x3c9   :  { %v5929_v0 = vpop.permute.xlu1 %5928  ;;  %v7863_v58 = vpop.permute.xlu0 %5893  ;;  %2518 = vmatprep.mubr.bf16.mxu1 %v6474_v2  ;;  %v5765_v2 = vunpack.i.l.bf16 %v8984_v10  ;;  %v4503_v56 = vpack.c.bf16 %v5926_v48, %v5925_v31  ;;  %v4464_v27 = vpack.c.bf16 %v5761_v49, %v5760_v18  ;;  %v8988_v31 = vld [vmem:[#allocation17_spill] sm:$0xff]  ;;  %v5855_v18 = vunpack.i.l.bf16 %v7709_v37 }
 0x3ca   :  { %v5930_v32 = vunpack.i.l.bf16 %v5929_v0 }
 0x3cb   :  { %4942 = vmatpush3.bf16.msk.msra.mxu0 %vm8972_vm15, %v4365_v45  ;;  %4498 = vmatpush1.bf16.msk.msra.mxu1 %vm8974_vm6, %v4497_v35  ;;  %vm8981_vm6 = vnez %v8980_v3  ;;  %vm8983_vm15 = vnez %v8982_v43  ;;  %v5931_v45 = vunpack.i.h.bf16 %v5929_v0  ;;  %v4440_v55 = vpack.c.bf16 %v5766_v40, %v5765_v2 }
 0x3cc   :  { %4943 = vmatprep.subr.msk.bf16.mxu0 %vm8978_vm0, %v4392_v61  ;;  %2592 = vmatprep.subr.bf16.mxu1 %v8967_v54  ;;  %v4506_v35 = vpack.c.bf16 %v5831_v6, %v5830_v59  ;;  %v5851_v61 = vunpack.i.h.bf16 %v7791_v62  ;;  %v8992_v59 = vld [vmem:[#allocation21_spill] sm:$0xff] }
 0x3cd   :  { %v7876_v34 = vpop.permute.xlu1 %5943  ;;  %v5914_v46 = vpop.permute.xlu0 %5913  ;;  %v4467_v12 = vpack.c.bf16 %v5931_v45, %v5930_v32 }
 0x3ce   :  { %v5916_v24 = vunpack.i.h.bf16 %v5914_v46  ;;  %v5915_v7 = vunpack.i.l.bf16 %v5914_v46  ;;  %2519 = vmatmul.mubr.bf16.gmra.mrb[68].mxu1 %v6476_v29  ;;  %v8990_v46 = vld [vmem:[#allocation20_spill] sm:$0xff] }
 0x3cf   :  { %4944 = vmatpush3.bf16.msk.msra.mxu0 %vm8981_vm6, %v4368_v26  ;;  %4501 = vmatpush1.bf16.msk.msra.mxu1 %vm8983_vm15, %v4500_v21  ;;  %v6465_v26 = vld [vmem:[%s8570_s3 + $0x14c] ss:$40 sps:$4 sm:$0xff]   ;;  %v5850_v21 = vunpack.i.l.bf16 %v7791_v62  ;;  %v5875_v62 = vunpack.i.l.bf16 %v7830_v44 }
 0x3d0   :  { %v4371_v38 = vpack.c.bf16 %v5916_v24, %v5915_v7  ;;  %4945 = vmatprep.subr.msk.bf16.mxu0 %vm8978_vm0, %v4395_v33  ;;  %2594 = vmatprep.subr.bf16.mxu1 %v8967_v54  ;;  %vm8987_vm0 = vnez %v8986_v19  ;;  %v5876_v33 = vunpack.i.h.bf16 %v7830_v44 }
 0x3d1   :  { %v5949_v11 = vpop.permute.xlu1 %5948  ;;  %v7893_v36 = vpop.permute.xlu0 %5918  ;;  %4001 = vmatprep.mubr.msk.bf16.mxu1 %vm8985_vm2, %v6482_v41  ;;  %vm8989_vm2 = vnez %v8988_v31  ;;  %v5856_v41 = vunpack.i.h.bf16 %v7709_v37  ;;  %v4470_v6 = vpack.c.bf16 %v5851_v61, %v5850_v21  ;;  %v6467_v37 = vld [vmem:[%s8570_s3 + $0x148] ss:$40 sps:$4 sm:$0xff]   ;;  %v5901_v21 = vunpack.i.h.bf16 %v7789_v4 }
 0x3d2   :  { %v5951_v0 = vunpack.i.h.bf16 %v5949_v11  ;;  %v5950_v60 = vunpack.i.l.bf16 %v5949_v11  ;;  %v5896_v11 = vunpack.i.h.bf16 %v7863_v58 }
 0x3d3   :  { %4946 = vmatpush3.bf16.msk.msra.mxu0 %vm8981_vm6, %v4371_v38  ;;  %4504 = vmatpush1.bf16.msk.msra.mxu1 %vm8983_vm15, %v4503_v56  ;;  %vm8991_vm15 = vnez %v8990_v46  ;;  %v4446_v44 = vpack.c.bf16 %v5856_v41, %v5855_v18  ;;  %v4512_v56 = vpack.c.bf16 %v5876_v33, %v5875_v62 }
 0x3d4   :  { %4999 = vmatprep.subr.msk.bf16.mxu0 %vm8987_vm0, %v4464_v27  ;;  %2596 = vmatprep.subr.bf16.mxu1 %v8967_v54  ;;  %v4509_v7 = vpack.c.bf16 %v5951_v0, %v5950_v60  ;;  %v5895_v27 = vunpack.i.l.bf16 %v7863_v58 }
 0x3d5   :  { %v5954_v39 = vpop.permute.xlu1 %5953  ;;  %v5934_v29 = vpop.permute.xlu0 %5933 }
 0x3d6   :  { %v5936_v49 = vunpack.i.h.bf16 %v5934_v29  ;;  %v5935_v48 = vunpack.i.l.bf16 %v5934_v29  ;;  %2446 = vmatmul.mubr.bf16.vlgmr.msra.gmra.mrb[24].mxu0 %v6462_v63  ;;  %v5956_v10 = vunpack.i.h.bf16 %v5954_v39  ;;  %v5955_v40 = vunpack.i.l.bf16 %v5954_v39  ;;  %v8994_v39 = vld [vmem:[#allocation22_spill] sm:$0xff]  ;;  %v8996_v29 = vld [vmem:[#allocation23_spill] sm:$0xff] }
 0x3d7   :  { %5000 = vmatpush3.bf16.msk.msra.mxu0 %vm8989_vm2, %v4440_v55  ;;  %4507 = vmatpush1.bf16.msk.msra.mxu1 %vm8991_vm15, %v4506_v35  ;;  %v6471_v55 = vld [vmem:[%s8570_s3 + $0x19c] ss:$40 sps:$4 sm:$0xff]   ;;  %v4476_v33 = vpack.c.bf16 %v5896_v11, %v5895_v27  ;;  %v6479_v11 = vld [vmem:[%s8570_s3 + $0x10c] ss:$40 sps:$4 sm:$0xff]  }
 0x3d8   :  { %v4443_v24 = vpack.c.bf16 %v5936_v49, %v5935_v48  ;;  %5001 = vmatprep.subr.msk.bf16.mxu0 %vm8987_vm0, %v4467_v12  ;;  %2598 = vmatprep.subr.bf16.mxu1 %v8967_v54  ;;  %vm8993_vm0 = vnez %v8992_v59  ;;  %v4473_v45 = vpack.c.bf16 %v5956_v10, %v5955_v40  ;;  %v5900_v12 = vunpack.i.l.bf16 %v7789_v4  ;;  %v8998_v10 = vld [vmem:[#allocation24_spill] sm:$0xff] }
 0x3d9   :  { %v7922_v2 = vpop.permute.xlu0 %5938  ;;  %v7924_v38 = vpop.permute.xlu1 %5968  ;;  %2453 = vmatprep.mubr.bf16.mxu0 %v6465_v26  ;;  %v5921_v49 = vunpack.i.h.bf16 %v7893_v36  ;;  %v5920_v48 = vunpack.i.l.bf16 %v7893_v36 }
 0x3da   :  { %v4452_v36 = vpack.c.bf16 %v5901_v21, %v5900_v12 }
 0x3db   :  { %5002 = vmatpush3.bf16.msk.msra.mxu0 %vm8989_vm2, %v4443_v24  ;;  %4510 = vmatpush1.bf16.msk.msra.mxu1 %vm8991_vm15, %v4509_v7  ;;  %vm8995_vm15 = vnez %v8994_v39  ;;  %vm8997_vm2 = vnez %v8996_v29  ;;  %v6473_v7 = vld [vmem:[%s8570_s3 + $0x198] ss:$40 sps:$4 sm:$0xff]   ;;  %v4518_v40 = vpack.c.bf16 %v5921_v49, %v5920_v48 }
 0x3dc   :  { %5003 = vmatprep.subr.msk.bf16.mxu0 %vm8993_vm0, %v4470_v6  ;;  %2600 = vmatprep.subr.bf16.mxu1 %v8967_v54  ;;  %v5941_v6 = vunpack.i.h.bf16 %v7922_v2 }
 0x3dd   :  { %v5959_v32 = vpop.permute.xlu0 %5958  ;;  %v5974_v63 = vpop.permute.xlu1 %5973 }
 0x3de   :  { %v5961_v35 = vunpack.i.h.bf16 %v5959_v32  ;;  %v5960_v61 = vunpack.i.l.bf16 %v5959_v32  ;;  %2454 = vmatmul.mubr.bf16.gmra.mrb[28].mxu0 %v6467_v37  ;;  %v5976_v0 = vunpack.i.h.bf16 %v5974_v63  ;;  %v5975_v60 = vunpack.i.l.bf16 %v5974_v63 }
 0x3df   :  { %5004 = vmatpush3.bf16.msk.msra.mxu0 %vm8995_vm15, %v4446_v44  ;;  %4513 = vmatpush1.bf16.msk.msra.mxu1 %vm8997_vm2, %v4512_v56  ;;  %v5940_v37 = vunpack.i.l.bf16 %v7922_v2  ;;  %v5946_v2 = vunpack.i.h.bf16 %v7876_v34 }
 0x3e0   :  { %v4449_v26 = vpack.c.bf16 %v5961_v35, %v5960_v61  ;;  %v4515_v58 = vpack.c.bf16 %v5976_v0, %v5975_v60  ;;  %5005 = vmatprep.subr.msk.bf16.mxu0 %vm8993_vm0, %v4473_v45  ;;  %2602 = vmatprep.subr.bf16.mxu1 %v8967_v54  ;;  %vm8999_vm0 = vnez %v8998_v10  ;;  %v9002_v35 = vld [vmem:[#allocation26_spill] sm:$0xff]  ;;  %v5945_v60 = vunpack.i.l.bf16 %v7876_v34 }
 0x3e1   :  { %v5964_v41 = vpop.permute.xlu0 %5963  ;;  %v5979_v18 = vpop.permute.xlu1 %5978  ;;  %2461 = vmatprep.mubr.bf16.mxu0 %v6471_v55  ;;  %v9000_v55 = vld [vmem:[#allocation25_spill] sm:$0xff]  ;;  %v4482_v49 = vpack.c.bf16 %v5941_v6, %v5940_v37 }
 0x3e2   :  { %v5981_v24 = vunpack.i.h.bf16 %v5979_v18  ;;  %v5980_v62 = vunpack.i.l.bf16 %v5979_v18 }
 0x3e3   :  { %5006 = vmatpush3.bf16.msk.msra.mxu0 %vm8995_vm15, %v4449_v26  ;;  %4516 = vmatpush1.bf16.msk.msra.mxu1 %vm8997_vm2, %v4515_v58  ;;  %vm9001_vm2 = vnez %v9000_v55  ;;  %vm9003_vm15 = vnez %v9002_v35  ;;  %v5966_v26 = vunpack.i.h.bf16 %v5964_v41  ;;  %v5965_v58 = vunpack.i.l.bf16 %v5964_v41 }
 0x3e4   :  { %v4479_v4 = vpack.c.bf16 %v5981_v24, %v5980_v62  ;;  %5007 = vmatprep.subr.msk.bf16.mxu0 %vm8999_vm0, %v4476_v33  ;;  %2604 = vmatprep.subr.bf16.mxu1 %v8967_v54  ;;  %v5971_v33 = vunpack.i.h.bf16 %v7924_v38  ;;  %v5970_v24 = vunpack.i.l.bf16 %v7924_v38  ;;  %v4458_v41 = vpack.c.bf16 %v5946_v2, %v5945_v60 }
 0x3e5   :  { %v5984_v44 = vpop.permute.xlu0 %5983  ;;  %v5989_v56 = vpop.permute.xlu1 %5988 }
 0x3e6   :  { %v5986_v27 = vunpack.i.h.bf16 %v5984_v44  ;;  %v5985_v45 = vunpack.i.l.bf16 %v5984_v44  ;;  %2462 = vmatmul.mubr.bf16.gmra.mrb[32].mxu0 %v6473_v7  ;;  %v5991_v32 = vunpack.i.h.bf16 %v5989_v56  ;;  %v5990_v63 = vunpack.i.l.bf16 %v5989_v56 }
 0x3e7   :  { %5008 = vmatpush3.bf16.msk.msra.mxu0 %vm9001_vm2, %v4452_v36  ;;  %4519 = vmatpush1.bf16.msk.msra.mxu1 %vm9003_vm15, %v4518_v40  ;;  %v4524_v7 = vpack.c.bf16 %v5966_v26, %v5965_v58 }
 0x3e8   :  { %v4455_v61 = vpack.c.bf16 %v5986_v27, %v5985_v45  ;;  %v4521_v0 = vpack.c.bf16 %v5991_v32, %v5990_v63  ;;  %5009 = vmatprep.subr.msk.bf16.mxu0 %vm8999_vm0, %v4479_v4  ;;  %2606 = vmatprep.subr.bf16.mxu1 %v8967_v54  ;;  %v9005_v27 = vld [vmem:[#allocation5_spill] sm:$0xff] }
 0x3e9   :  { %v5999_v21 = vpop.permute.xlu0 %5998  ;;  %v5994_v12 = vpop.permute.xlu1 %5993  ;;  %2559 = vmatprep.mubr.bf16.mxu0 %v6479_v11  ;;  %vm9010_vm0 = vcmp.lt.s32.totalorder %v9005_v27, 63 }
 0x3ea   :  { %v5996_v48 = vunpack.i.h.bf16 %v5994_v12  ;;  %v5995_v18 = vunpack.i.l.bf16 %v5994_v12  ;;  %v6001_v4 = vunpack.i.h.bf16 %v5999_v21  ;;  %v6000_v36 = vunpack.i.l.bf16 %v5999_v21  ;;  %vm9011_vm6 = vmmov %vm9010_vm0  ;;  %v6477_v21 = vld [vmem:[%s8570_s3 + $0x108] ss:$40 sps:$4 sm:$0xff]   ;;  %v9012_v12 = vld [vmem:[#allocation30_spill] sm:$0xff] }
 0x3eb   :  { %5010 = vmatpush3.bf16.msk.msra.mxu0 %vm9001_vm2, %v4455_v61  ;;  %4522 = vmatpush1.bf16.msk.msra.mxu1 %vm9003_vm15, %v4521_v0  ;;  %vm9006_vm15 = vcmp.ge.s32.totalorder %v9005_v27, 1 }
 0x3ec   :  { %v4485_v62 = vpack.c.bf16 %v5996_v48, %v5995_v18  ;;  %5011 = vmatprep.subr.msk.bf16.mxu0 %vm7323_vm10, %v4482_v49  ;;  %2608 = vmatprep.subr.bf16.mxu1 %v8967_v54  ;;  %v2040_v45 = vsel %vm9006_vm15, %v5971_v33, -3.4028235e+38  ;;  %vm9009_vm2 = vmmov %vm9006_vm15  ;;  %v4461_v60 = vpack.c.bf16 %v6001_v4, %v6000_v36  ;;  %v9013_v48 = vld [vmem:[#allocation31_spill] sm:$0xff]  ;;  %v6489_v4 = vld [vmem:[%s8570_s3 + $0x1ac] ss:$40 sps:$4 sm:$0xff]   ;;  %vm9045_vm15 = vnez %v8992_v59 }
 0x3ed   :  { %v6004_v40 = vpop.permute.xlu0 %6003  ;;  %v6009_v6 = vpop.permute.xlu1 %6008  ;;  %v2039_v63 = vsel %vm9009_vm2, %v5970_v24, -3.4028235e+38  ;;  %v6483_v33 = vld [vmem:[%s8570_s3 + $0x15c] ss:$40 sps:$4 sm:$0xff]   ;;  %v6488_v36 = vld [vmem:[%s8570_s3 + $0x160] ss:$40 sps:$4 sm:$0xff]   ;;  %vm9046_vm2 = vnez %v8994_v39 }
 0x3ee   :  { %v6006_v37 = vunpack.i.h.bf16 %v6004_v40  ;;  %v6005_v44 = vunpack.i.l.bf16 %v6004_v40  ;;  %v6011_v56 = vunpack.i.h.bf16 %v6009_v6  ;;  %v6010_v11 = vunpack.i.l.bf16 %v6009_v6  ;;  %v6492_v40 = vld [vmem:[%s8570_s3 + $0x1b4] ss:$40 sps:$4 sm:$0xff]   ;;  %v6491_v6 = vld [vmem:[%s8570_s3 + $0x1a8] ss:$40 sps:$4 sm:$0xff]  }
 0x3ef   :  { %5012 = vmatpush3.bf16.msk.msra.mxu0 %vm7332_vm1, %v4458_v41  ;;  %4525 = vmatpush1.bf16.msk.msra.mxu1 %vm7340_vm8, %v4524_v7  ;;  %v6486_v41 = vld [vmem:[%s8570_s3 + $0x164] ss:$40 sps:$4 sm:$0xff]   ;;  %v6485_v7 = vld [vmem:[%s8570_s3 + $0x158] ss:$40 sps:$4 sm:$0xff]  }
 0x3f0   :  { %v2046_v61 = vsel %vm9010_vm0, %v6006_v37, -3.4028235e+38  ;;  %v2045_v0 = vsel %vm9011_vm6, %v6005_v44, -3.4028235e+38  ;;  %v4527_v2 = vpack.c.bf16 %v6011_v56, %v6010_v11  ;;  %5013 = vmatprep.subr.msk.bf16.mxu0 %vm7323_vm10, %v4485_v62  ;;  %2610 = vmatprep.subr.bf16.mxu1 %v8967_v54  ;;  %v6480_v62 = vld [vmem:[%s8570_s3 + $0x110] ss:$40 sps:$4 sm:$0xff]  }
 0x3f1   :  { %v2047_v26 = vmax.f32 %v2039_v63, %v2045_v0  ;;  %v2048_v58 = vmax.f32 %v2040_v45, %v2046_v61  ;;  %vm9014_vm0 = vcmask 916480   ;;  %v6494_v37 = vld [vmem:[%s8570_s3 + $0x1b0] ss:$40 sps:$4 sm:$0xff]  }
 0x3f2   :  { %vm9015_vm6 = vmmov %vm9014_vm0 }
 0x3f3   :  { %v2049_v49 = vmax.f32 %v9012_v12, %v2047_v26  ;;  %v2050_v18 = vmax.f32 %v9013_v48, %v2048_v58  ;;  %5014 = vmatpush3.bf16.msk.msra.mxu0 %vm7332_vm1, %v4461_v60  ;;  %4528 = vmatpush1.bf16.msk.msra.mxu1 %vm7340_vm8, %v4527_v2 }
 0x3f4   :  { %2612 = vmatprep.subr.bf16.mxu1 %v8967_v54 }
 0x3f5   :  { %v2051_v24 = vpack.c.bf16 %v2050_v18, %v2049_v49 }
 0x3f6   :  { %2560 = vmatmul.mubr.bf16.vlgmr.msra.gmra.mrb[36].mxu0 %v6477_v21 }
 0x3f7   :  { %2613 = vmatpush1.bf16.msra.mxu1 %v2051_v24  ;;  %2567 = vmatprep.mubr.bf16.mxu0 %v6483_v33 }
 0x3fa   :  { %2617 = vmatmul.mubr.bf16.vlgmr.msra.gmra.mrb[72].mxu1 %v6480_v62 }
 0x3fb   :  { %4002 = vmatprep.mubr.msk.bf16.mxu1 %vm9014_vm0, %v6486_v41  ;;  %vm9048_vm0 = vnez %v8998_v10 }
 0x3fe   :  { %2568 = vmatmul.mubr.bf16.gmra.mrb[40].mxu0 %v6485_v7 }
 0x3ff   :  { %2575 = vmatprep.mubr.bf16.mxu0 %v6489_v4 }
 0x402   :  { %2625 = vmatmul.mubr.bf16.gmra.mrb[76].mxu1 %v6488_v36 }
 0x403   :  { %4003 = vmatprep.mubr.msk.bf16.mxu1 %vm9015_vm6, %v6492_v40  ;;  %vm9049_vm6 = vnez %v9000_v55 }
 0x406   :  { %2576 = vmatmul.mubr.bf16.gmra.mrb[44].mxu0 %v6491_v6 }
 0x40a   :  { %2633 = vmatmul.mubr.bf16.gmra.mrb[80].mxu1 %v6494_v37 }
 0x485   :  { %v4913_v44 = vpop.f32.mrb[12].mxu0 }
 0x486   :  { %v4914_v56 = vpop.f32.mrb[13].mxu0 }
 0x487   :  { %v8039_v11 = vadd.f32 %v4914_v56, %v4913_v44  ;;  %v4916_v45 = vpop.f32.mrb[14].mxu0 }
 0x488   :  { %v4917_v63 = vpop.f32.mrb[15].mxu0 }
 0x489   :  { %v8041_v61 = vadd.f32 %v4917_v63, %v4916_v45 }
 0x48d   :  { %v4919_v0 = vpop.f32.mrb[16].mxu0 }
 0x48e   :  { %v4920_v2 = vpop.f32.mrb[17].mxu0 }
 0x48f   :  { %v4921_v60 = vadd.f32 %v4920_v2, %v4919_v0  ;;  %v4922_v26 = vpop.f32.mrb[18].mxu0 }
 0x490   :  { %v4923_v58 = vpop.f32.mrb[19].mxu0 }
 0x491   :  { %v4924_v21 = vadd.f32 %v4923_v58, %v4922_v26  ;;  %v4981_v12 = vpop.f32.mrb[60].mxu1 }
 0x492   :  { %v4982_v49 = vpop.f32.mrb[61].mxu1 }
 0x493   :  { %v8043_v48 = vadd.f32 %v4982_v49, %v4981_v12  ;;  %v4984_v18 = vpop.f32.mrb[62].mxu1 }
 0x494   :  { %v4985_v33 = vpop.f32.mrb[63].mxu1 }
 0x495   :  { %v8045_v24 = vadd.f32 %v4985_v33, %v4984_v18  ;;  %v4925_v62 = vpop.f32.mrb[20].mxu0 }
 0x496   :  { %v4926_v41 = vpop.f32.mrb[21].mxu0 }
 0x497   :  { %v4927_v7 = vadd.f32 %v4926_v41, %v4925_v62  ;;  %v4928_v4 = vpop.f32.mrb[22].mxu0 }
 0x498   :  { %v4929_v36 = vpop.f32.mrb[23].mxu0 }
 0x499   :  { %v4930_v40 = vadd.f32 %v4929_v36, %v4928_v4  ;;  %v4987_v6 = vpop.f32.mrb[64].mxu1  ;;  %v2183_v36 = vpop.permute.xlu0 %2182 }
 0x49a   :  { %v4988_v37 = vpop.f32.mrb[65].mxu1 }
 0x49b   :  { %v4989_v44 = vadd.f32 %v4988_v37, %v4987_v6  ;;  %v4990_v56 = vpop.f32.mrb[66].mxu1  ;;  %v2399_v37 = vadd.f32 %v4921_v60, %v2183_v36 }
 0x49c   :  { %v4991_v45 = vpop.f32.mrb[67].mxu1 }
 0x49d   :  { %v4992_v63 = vadd.f32 %v4991_v45, %v4990_v56  ;;  %v2188_v45 = vpop.permute.xlu1 %2187 }
 0x4a1   :  { %v4993_v0 = vpop.f32.mrb[68].mxu1  ;;  %v2198_v51 = vpop.permute.xlu1 %2197 }
 0x4a2   :  { %v4994_v2 = vpop.f32.mrb[69].mxu1  ;;  %v2410_v43 = vadd.f32 %v4930_v40, %v2198_v51 }
 0x4a3   :  { %v4995_v26 = vadd.f32 %v4994_v2, %v4993_v0  ;;  %v4996_v58 = vpop.f32.mrb[70].mxu1  ;;  %v2402_v0 = vadd.f32 %v4924_v21, %v2188_v45 }
 0x4a4   :  { %v4997_v12 = vpop.f32.mrb[71].mxu1 }
 0x4a5   :  { %v4998_v49 = vadd.f32 %v4997_v12, %v4996_v58 }
 0x4a9   :  { %v4947_v18 = vpop.f32.mrb[24].mxu0 }
 0x4aa   :  { %v4948_v33 = vpop.f32.mrb[25].mxu0 }
 0x4ab   :  { %v8047_v27 = vadd.f32 %v4948_v33, %v4947_v18  ;;  %v4950_v62 = vpop.f32.mrb[26].mxu0  ;;  %v2193_v33 = vpop.permute.xlu0 %2192 }
 0x4ac   :  { %v4951_v41 = vpop.f32.mrb[27].mxu0  ;;  %v2407_v46 = vadd.f32 %v4927_v7, %v2193_v33 }
 0x4ad   :  { %v8049_v32 = vadd.f32 %v4951_v41, %v4950_v62 }
 0x4b1   :  { %v4953_v4 = vpop.f32.mrb[28].mxu0 }
 0x4b2   :  { %v4954_v6 = vpop.f32.mrb[29].mxu0 }
 0x4b3   :  { %v4955_v35 = vadd.f32 %v4954_v6, %v4953_v4  ;;  %v4956_v56 = vpop.f32.mrb[30].mxu0 }
 0x4b4   :  { %v4957_v50 = vpop.f32.mrb[31].mxu0 }
 0x4b5   :  { %v2456_v2 = vadd.f32 %v4955_v35, %v2399_v37  ;;  %v4958_v29 = vadd.f32 %v4957_v50, %v4956_v56 }
 0x4b7   :  { %v2459_v58 = vadd.f32 %v4958_v29, %v2402_v0  ;;  %v2513_v12 = vadd.f32 %v4989_v44, %v2456_v2 }
 0x4b9   :  { %v2516_v20 = vadd.f32 %v4992_v63, %v2459_v58  ;;  %v4959_v18 = vpop.f32.mrb[32].mxu0 }
 0x4ba   :  { %v4960_v13 = vpop.f32.mrb[33].mxu0 }
 0x4bb   :  { %v4961_v62 = vadd.f32 %v4960_v13, %v4959_v18  ;;  %v4962_v41 = vpop.f32.mrb[34].mxu0 }
 0x4bc   :  { %v4963_v42 = vpop.f32.mrb[35].mxu0 }
 0x4bd   :  { %v2464_v60 = vadd.f32 %v4961_v62, %v2407_v46  ;;  %v4964_v4 = vadd.f32 %v4963_v42, %v4962_v41 }
 0x4bf   :  { %v2467_v36 = vadd.f32 %v4964_v4, %v2410_v43  ;;  %v2521_v6 = vadd.f32 %v4995_v26, %v2464_v60 }
 0x4c1   :  { %v2524_v14 = vadd.f32 %v4998_v49, %v2467_v36 }
 0x4c9   :  { %v5015_v21 = vpop.f32.mrb[36].mxu0 }
 0x4ca   :  { %v5016_v35 = vpop.f32.mrb[37].mxu0 }
 0x4cb   :  { %v8051_v50 = vadd.f32 %v5016_v35, %v5015_v21  ;;  %v5018_v29 = vpop.f32.mrb[38].mxu0 }
 0x4cc   :  { %v5019_v44 = vpop.f32.mrb[39].mxu0 }
 0x4cd   :  { %v8053_v63 = vadd.f32 %v5019_v44, %v5018_v29  ;;  %v8055_v37 = vpop.f32.mrb[72].mxu1 }
 0x4ce   :  { %v2620_v13 = vpop.f32.mrb[73].mxu1 }
 0x4cf   :  { %v8057_v7 = vpop.f32.mrb[74].mxu1 }
 0x4d0   :  { %v2623_v56 = vpop.f32.mrb[75].mxu1 }
 0x4d1   :  { %v5021_v51 = vpop.f32.mrb[40].mxu0 }
 0x4d2   :  { %v5022_v46 = vpop.f32.mrb[41].mxu0 }
 0x4d3   :  { %v5023_v42 = vadd.f32 %v5022_v46, %v5021_v51  ;;  %v5024_v43 = vpop.f32.mrb[42].mxu0 }
 0x4d4   :  { %v5025_v40 = vpop.f32.mrb[43].mxu0 }
 0x4d5   :  { %v2570_v26 = vadd.f32 %v5023_v42, %v2513_v12  ;;  %v5026_v49 = vadd.f32 %v5025_v40, %v5024_v43  ;;  %v2626_v45 = vpop.f32.mrb[76].mxu1  ;;  %v6497_v40 = vld [vmem:[%s8570_s3 + $0x1e4] ss:$40 sps:$4 sm:$0xff]  }
 0x4d6   :  { %v2628_v0 = vpop.f32.mrb[77].mxu1  ;;  %3602 = vmatprep.mubr.bf16.mxu0 %v6497_v40 }
 0x4d7   :  { %v2573_v2 = vadd.f32 %v5026_v49, %v2516_v20  ;;  %v8059_v58 = vadd.f32 %v2626_v45, %v2570_v26  ;;  %v2629_v18 = vpop.f32.mrb[78].mxu1  ;;  %v3965_v26 = vld [vmem:[%s8571_s4 + $0x30] sm:$0xff]  ;;  %v3966_v49 = vld [vmem:[%s8571_s4 + $0x38] sm:$0xff] }
 0x4d8   :  { %v2631_v33 = vpop.f32.mrb[79].mxu1 }
 0x4d9   :  { %v8061_v62 = vadd.f32 %v2629_v18, %v2573_v2  ;;  %v5027_v41 = vpop.f32.mrb[44].mxu0 }
 0x4da   :  { %v5028_v60 = vpop.f32.mrb[45].mxu0 }
 0x4db   :  { %v5029_v4 = vadd.f32 %v5028_v60, %v5027_v41  ;;  %v5030_v36 = vpop.f32.mrb[46].mxu0  ;;  %v8065_v21 = vpack.i.bf16 %v8061_v62, %v8059_v58 }
 0x4dc   :  { %v5031_v35 = vpop.f32.mrb[47].mxu0 }
 0x4dd   :  { %v2578_v12 = vadd.f32 %v5029_v4, %v2521_v6  ;;  %v5032_v29 = vadd.f32 %v5031_v35, %v5030_v36  ;;  %6018 = vrot.lane.b32.xlu1 %v8065_v21, %s9016_s23  ;;  %6013 = vrot.lane.b32.xlu0 %v8065_v21, %s9017_s13  ;;  %v2634_v20 = vpop.f32.mrb[80].mxu1 }
 0x4de   :  { %v2636_v44 = vpop.f32.mrb[81].mxu1 }
 0x4df   :  { %v2581_v13 = vadd.f32 %v5032_v29, %v2524_v14  ;;  %v8071_v56 = vadd.f32 %v2634_v20, %v2578_v12  ;;  %v2637_v51 = vpop.f32.mrb[82].mxu1  ;;  %v2945_v14 = vpack.c.bf16 %v8061_v62, %v8059_v58 }
 0x4e0   :  { %v2639_v46 = vpop.f32.mrb[83].mxu1 }
 0x4e1   :  { %v8073_v42 = vadd.f32 %v2637_v51, %v2581_v13  ;;  %6028 = vrot.lane.b32.xlu1 %v8065_v21, %s9018_s2  ;;  %6023 = vrot.lane.b32.xlu0 %v8065_v21, %s9019_s5 }
 0x4e3   :  { %v8081_v6 = vpack.i.bf16 %v8073_v42, %v8071_v56  ;;  %v2946_v43 = vpack.c.bf16 %v8073_v42, %v8071_v56  ;;  %v9075_v56 = vld [vmem:[#allocation5_spill] sm:$0xff] }
 0x4e5   :  { %6038 = vrot.lane.b32.xlu1 %v8065_v21, %s9020_s6  ;;  %6033 = vrot.lane.b32.xlu0 %v8065_v21, %s9021_s7 }
 0x4e9   :  { %6053 = vrot.lane.b32.xlu1 %v8081_v6, %s9016_s23  ;;  %6043 = vrot.lane.b32.xlu0 %v8081_v6, %s9017_s13  ;;  %s9024_s13 = smov 123   ;;  %s9085_s23 = sld [smem:[#allocation38_spill]] }
 0x4ed   :  { %6058 = vrot.lane.b32.xlu1 %v8065_v21, %s9022_s19  ;;  %6048 = vrot.lane.b32.xlu0 %v8065_v21, %s9023_s26 }
 0x4f1   :  { %6073 = vrot.lane.b32.xlu1 %v8081_v6, %s9018_s2  ;;  %6063 = vrot.lane.b32.xlu0 %v8081_v6, %s9019_s5 }
 0x4f5   :  { %6078 = vrot.lane.b32.xlu1 %v8065_v21, %s8942_s25  ;;  %6068 = vrot.lane.b32.xlu0 %v8065_v21, %s8927_s8 }
 0x4f9   :  { %6093 = vrot.lane.b32.xlu1 %v8081_v6, %s9020_s6  ;;  %6083 = vrot.lane.b32.xlu0 %v8081_v6, %s9021_s7  ;;  %s9084_s6 = sld [smem:[#allocation37_spill]] }
 0x4fd   :  { %6098 = vrot.lane.b32.xlu1 %v8065_v21, %s8928_s10  ;;  %6088 = vrot.lane.b32.xlu0 %v8065_v21, %s8931_s29 }
 0x501   :  { %6113 = vrot.lane.b32.xlu1 %v8081_v6, %s9022_s19  ;;  %6103 = vrot.lane.b32.xlu0 %v8081_v6, %s9023_s26 }
 0x505   :  { %6118 = vrot.lane.b32.xlu1 %v8065_v21, %s8930_s9  ;;  %6108 = vrot.lane.b32.xlu0 %v8065_v21, %s8934_s27 }
 0x509   :  { %6133 = vrot.lane.b32.xlu1 %v8081_v6, %s8942_s25  ;;  %6123 = vrot.lane.b32.xlu0 %v8081_v6, %s8927_s8 }
 0x50d   :  { %6138 = vrot.lane.b32.xlu1 %v8065_v21, %s8932_s12  ;;  %6128 = vrot.lane.b32.xlu0 %v8065_v21, %s8936_s28 }
 0x511   :  { %6153 = vrot.lane.b32.xlu1 %v8081_v6, %s8928_s10  ;;  %6143 = vrot.lane.b32.xlu0 %v8081_v6, %s8931_s29  ;;  %s9086_s29 = sld [smem:[#allocation39_spill]] }
 0x515   :  { %6158 = vrot.lane.b32.xlu1 %v8065_v21, %s9024_s13  ;;  %6148 = vrot.lane.b32.xlu0 %v8065_v21, %s8938_s1 }
 0x519   :  { %6173 = vrot.lane.b32.xlu1 %v8081_v6, %s8930_s9  ;;  %6163 = vrot.lane.b32.xlu0 %v8081_v6, %s8934_s27  ;;  %s9047_s9 = sld [smem:[#allocation36_spill]] }
 0x51d   :  { %2172 = vperm.xlu1 %5231, %v3965_v26   ;;  %6168 = vrot.lane.b32.xlu0 %v8065_v21, %s8944_s21 }
 0x51f   :  { %v53_v39 = vld [vmem:[%s9047_s9 + $0x8] sm:$0xff] }
 0x521   :  { %6183 = vrot.lane.b32.xlu1 %v8081_v6, %s8932_s12  ;;  %6178 = vrot.lane.b32.xlu0 %v8081_v6, %s8936_s28  ;;  %s9032_s28 = smov 1  }
 0x525   :  { %6188 = vrot.lane.b32.xlu1 %v8065_v21, %s8939_s24  ;;  %2177 = vperm.xlu0 %5230, %v3966_v49  }
 0x529   :  { %6203 = vrot.lane.b32.xlu1 %v8081_v6, %s9024_s13  ;;  %6193 = vrot.lane.b32.xlu0 %v8081_v6, %s8938_s1  ;;  %s9025_s1 = smov 126  }
 0x52d   :  { %6208 = vrot.lane.b32.xlu1 %v8065_v21, %s8943_s22  ;;  %6198 = vrot.lane.b32.xlu0 %v8065_v21, %s8946_s15 }
 0x531   :  { %6223 = vrot.lane.b32.xlu1 %v8081_v6, %s8939_s24  ;;  %6213 = vrot.lane.b32.xlu0 %v8081_v6, %s8944_s21  ;;  %s9026_s21 = smov 3   ;;  %s9031_s24 = smov 111  }
 0x535   :  { %6228 = vrot.lane.b32.xlu1 %v8065_v21, %s8947_s20  ;;  %6218 = vrot.lane.b32.xlu0 %v8065_v21, %s8949_s14 }
 0x539   :  { %6243 = vrot.lane.b32.xlu1 %v8081_v6, %s8943_s22  ;;  %6233 = vrot.lane.b32.xlu0 %v8081_v6, %s8946_s15  ;;  %s9029_s22 = smov 2  }
 0x53d   :  { %6263 = vrot.lane.b32.xlu1 %v8065_v21, %s8951_s17  ;;  %6238 = vrot.lane.b32.xlu0 %v8065_v21, %s8933_s11 }
 0x541   :  { %6278 = vrot.lane.b32.xlu1 %v8081_v6, %s8947_s20  ;;  %6248 = vrot.lane.b32.xlu0 %v8081_v6, %s8949_s14  ;;  %s9028_s20 = smov 125   ;;  %s9033_s14 = smov 124  }
 0x545   :  { %6283 = vrot.lane.b32.xlu1 %v8065_v21, %s9025_s1  ;;  %6253 = vrot.lane.b32.xlu0 %v8065_v21, %s8935_s0 }
 0x549   :  { %6293 = vrot.lane.b32.xlu1 %v8081_v6, %s8933_s11  ;;  %6258 = vrot.lane.b32.xlu0 %v8065_v21, %s8937_s18 }
 0x54d   :  { %6298 = vrot.lane.b32.xlu1 %v8081_v6, %s8935_s0  ;;  %6268 = vrot.lane.b32.xlu0 %v8065_v21, %s9026_s21 }
 0x54f   :  { %v6019_v45 = vpop.permute.xlu1 %6018  ;;  %v6014_v0 = vpop.permute.xlu0 %6013 }
 0x550   :  { %v6021_v2 = vunpack.i.h.bf16 %v6019_v45  ;;  %v6020_v18 = vunpack.i.l.bf16 %v6019_v45  ;;  %v6016_v33 = vunpack.i.h.bf16 %v6014_v0  ;;  %v6015_v41 = vunpack.i.l.bf16 %v6014_v0 }
 0x551   :  { %6303 = vrot.lane.b32.xlu1 %v8081_v6, %s8937_s18  ;;  %6273 = vrot.lane.b32.xlu0 %v8065_v21, %s8941_s16  ;;  %s9035_s18 = smov 109  }
 0x552   :  { %v4530_v60 = vpack.c.bf16 %v6021_v2, %v6020_v18  ;;  %v4554_v4 = vpack.c.bf16 %v6016_v33, %v6015_v41 }
 0x553   :  { %v6029_v36 = vpop.permute.xlu1 %6028  ;;  %v6024_v35 = vpop.permute.xlu0 %6023 }
 0x554   :  { %5033 = vmatprep.subr.msk.bf16.mxu0 %vm6816_vm4, %v4554_v4  ;;  %v6026_v45 = vunpack.i.h.bf16 %v6024_v35  ;;  %v6025_v0 = vunpack.i.l.bf16 %v6024_v35  ;;  %v6031_v33 = vunpack.i.h.bf16 %v6029_v36  ;;  %v6030_v41 = vunpack.i.l.bf16 %v6029_v36 }
 0x555   :  { %6318 = vrot.lane.b32.xlu1 %v8065_v21, %s9028_s20  ;;  %6288 = vrot.lane.b32.xlu0 %v8065_v21, %s9029_s22 }
 0x556   :  { %5034 = vmatpush3.bf16.msk.msra.mxu0 %vm6820_vm5, %v4530_v60  ;;  %v4536_v35 = vpack.c.bf16 %v6031_v33, %v6030_v41 }
 0x557   :  { %v6039_v20 = vpop.permute.xlu1 %6038  ;;  %v6034_v44 = vpop.permute.xlu0 %6033 }
 0x559   :  { %6323 = vrot.lane.b32.xlu1 %v8081_v6, %s9026_s21  ;;  %6308 = vrot.lane.b32.xlu0 %v8081_v6, %s8951_s17 }
 0x55b   :  { %v6054_v13 = vpop.permute.xlu1 %6053  ;;  %v6044_v51 = vpop.permute.xlu0 %6043 }
 0x55c   :  { %v6056_v46 = vunpack.i.h.bf16 %v6054_v13  ;;  %v6055_v40 = vunpack.i.l.bf16 %v6054_v13  ;;  %v6046_v26 = vunpack.i.h.bf16 %v6044_v51  ;;  %v6045_v49 = vunpack.i.l.bf16 %v6044_v51 }
 0x55d   :  { %6328 = vrot.lane.b32.xlu1 %v8081_v6, %s8941_s16  ;;  %6313 = vrot.lane.b32.xlu0 %v8065_v21, %s9031_s24  ;;  %v4560_v13 = vpack.c.bf16 %v6026_v45, %v6025_v0  ;;  %v6035_v45 = vunpack.i.l.bf16 %v6034_v44  ;;  %s9034_s16 = smov 110  }
 0x55e   :  { %v4533_v2 = vpack.c.bf16 %v6056_v46, %v6055_v40  ;;  %v4557_v18 = vpack.c.bf16 %v6046_v26, %v6045_v49  ;;  %v6036_v49 = vunpack.i.h.bf16 %v6034_v44 }
 0x55f   :  { %v6059_v60 = vpop.permute.xlu1 %6058  ;;  %v6049_v4 = vpop.permute.xlu0 %6048 }
 0x560   :  { %5035 = vmatprep.subr.msk.bf16.mxu0 %vm6816_vm4, %v4557_v18  ;;  %v6040_v18 = vunpack.i.l.bf16 %v6039_v20  ;;  %vm9036_vm4 = vnez %v8837_v17 }
 0x561   :  { %6343 = vrot.lane.b32.xlu1 %v8081_v6, %s9029_s22  ;;  %6333 = vrot.lane.b32.xlu0 %v8081_v6, %s9025_s1 }
 0x562   :  { %5036 = vmatpush3.bf16.msk.msra.mxu0 %vm6820_vm5, %v4533_v2  ;;  %v6041_v2 = vunpack.i.h.bf16 %v6039_v20  ;;  %vm9037_vm5 = vnez %v8839_v47 }
 0x563   :  { %5037 = vmatprep.subr.msk.bf16.mxu0 %vm6837_vm7, %v4560_v13  ;;  %v6074_v36 = vpop.permute.xlu1 %6073  ;;  %v6064_v51 = vpop.permute.xlu0 %6063  ;;  %v4566_v13 = vpack.c.bf16 %v6036_v49, %v6035_v45  ;;  %v6061_v49 = vunpack.i.h.bf16 %v6059_v60  ;;  %v6060_v45 = vunpack.i.l.bf16 %v6059_v60 }
 0x564   :  { %v6076_v46 = vunpack.i.h.bf16 %v6074_v36  ;;  %v6075_v40 = vunpack.i.l.bf16 %v6074_v36  ;;  %v6066_v12 = vunpack.i.h.bf16 %v6064_v51  ;;  %v6065_v26 = vunpack.i.l.bf16 %v6064_v51 }
 0x565   :  { %6348 = vrot.lane.b32.xlu1 %v8081_v6, %s9031_s24  ;;  %6338 = vrot.lane.b32.xlu0 %v8065_v21, %s9032_s28  ;;  %v4542_v44 = vpack.c.bf16 %v6041_v2, %v6040_v18 }
 0x566   :  { %v4539_v29 = vpack.c.bf16 %v6076_v46, %v6075_v40  ;;  %v4563_v0 = vpack.c.bf16 %v6066_v12, %v6065_v26  ;;  %5038 = vmatpush3.bf16.msk.msra.mxu0 %vm6856_vm9, %v4536_v35  ;;  %v6051_v40 = vunpack.i.h.bf16 %v6049_v4  ;;  %v6050_v12 = vunpack.i.l.bf16 %v6049_v4 }
 0x567   :  { %v6079_v33 = vpop.permute.xlu1 %6078  ;;  %v6069_v41 = vpop.permute.xlu0 %6068  ;;  %v4548_v4 = vpack.c.bf16 %v6061_v49, %v6060_v45 }
 0x568   :  { %5039 = vmatprep.subr.msk.bf16.mxu0 %vm6837_vm7, %v4563_v0  ;;  %v4572_v2 = vpack.c.bf16 %v6051_v40, %v6050_v12  ;;  %v6081_v30 = vunpack.i.h.bf16 %v6079_v33  ;;  %vm9038_vm7 = vnez %v8841_v52 }
 0x569   :  { %6363 = vrot.lane.b32.xlu1 %v8081_v6, %s9032_s28  ;;  %6353 = vrot.lane.b32.xlu0 %v8081_v6, %s9028_s20 }
 0x56a   :  { %5040 = vmatpush3.bf16.msk.msra.mxu0 %vm6856_vm9, %v4539_v29  ;;  %vm9039_vm9 = vnez %v8843_v16 }
 0x56b   :  { %5041 = vmatprep.subr.msk.bf16.mxu0 %vm6867_vm11, %v4566_v13  ;;  %v6094_v20 = vpop.permute.xlu1 %6093  ;;  %v6084_v35 = vpop.permute.xlu0 %6083 }
 0x56c   :  { %v6096_v36 = vunpack.i.h.bf16 %v6094_v20  ;;  %v6095_v51 = vunpack.i.l.bf16 %v6094_v20  ;;  %v6086_v5 = vunpack.i.h.bf16 %v6084_v35  ;;  %v6085_v46 = vunpack.i.l.bf16 %v6084_v35 }
 0x56d   :  { %6368 = vrot.lane.b32.xlu1 %v8065_v21, %s9033_s14  ;;  %6358 = vrot.lane.b32.xlu0 %v8065_v21, %s9034_s16  ;;  %v6071_v35 = vunpack.i.h.bf16 %v6069_v41 }
 0x56e   :  { %v4545_v8 = vpack.c.bf16 %v6096_v36, %v6095_v51  ;;  %v4569_v26 = vpack.c.bf16 %v6086_v5, %v6085_v46  ;;  %5042 = vmatpush3.bf16.msk.msra.mxu0 %vm6882_vm13, %v4542_v44  ;;  %v6070_v36 = vunpack.i.l.bf16 %v6069_v41  ;;  %v6080_v46 = vunpack.i.l.bf16 %v6079_v33  ;;  %v6498_v33 = vld [vmem:[%s8570_s3 + $0x234] ss:$40 sps:$4 sm:$0xff]  }
 0x56f   :  { %v6099_v29 = vpop.permute.xlu1 %6098  ;;  %v6089_v0 = vpop.permute.xlu0 %6088 }
 0x570   :  { %5043 = vmatprep.subr.msk.bf16.mxu0 %vm6867_vm11, %v4569_v26  ;;  %v4602_v41 = vpack.c.bf16 %v6071_v35, %v6070_v36  ;;  %v4578_v26 = vpack.c.bf16 %v6081_v30, %v6080_v46  ;;  %vm9040_vm11 = vnez %v8971_v23 }
 0x571   :  { %6383 = vrot.lane.b32.xlu1 %v8081_v6, %s9033_s14  ;;  %6373 = vrot.lane.b32.xlu0 %v8081_v6, %s9034_s16 }
 0x572   :  { %5044 = vmatpush3.bf16.msk.msra.mxu0 %vm6882_vm13, %v4545_v8  ;;  %v6518_v8 = vld [vmem:[%s8570_s3 + $0x1f4] ss:$40 sps:$4 sm:$0xff]   ;;  %vm9041_vm13 = vnez %v8977_v57 }
 0x573   :  { %5045 = vmatprep.subr.msk.bf16.mxu0 %vm8957_vm3, %v4572_v2  ;;  %v6114_v60 = vpop.permute.xlu1 %6113  ;;  %v6104_v18 = vpop.permute.xlu0 %6103  ;;  %3708 = vmatprep.mubr.bf16.mxu1 %v6518_v8 }
 0x574   :  { %v6116_v13 = vunpack.i.h.bf16 %v6114_v60  ;;  %v6115_v44 = vunpack.i.l.bf16 %v6114_v60  ;;  %v6106_v28 = vunpack.i.h.bf16 %v6104_v18  ;;  %v6105_v20 = vunpack.i.l.bf16 %v6104_v18 }
 0x575   :  { %6378 = vrot.lane.b32.xlu0 %v8065_v21, %s9035_s18  ;;  %v6495_v21 = vld [vmem:[%s8570_s3 + $0x1e0] ss:$40 sps:$4 sm:$0xff]   ;;  %v6091_v18 = vunpack.i.h.bf16 %v6089_v0 }
 0x576   :  { %v4551_v51 = vpack.c.bf16 %v6116_v13, %v6115_v44  ;;  %v4575_v5 = vpack.c.bf16 %v6106_v28, %v6105_v20  ;;  %5046 = vmatpush3.bf16.msk.msra.mxu0 %vm8958_vm12, %v4548_v4  ;;  %v6090_v13 = vunpack.i.l.bf16 %v6089_v0  ;;  %v6101_v28 = vunpack.i.h.bf16 %v6099_v29  ;;  %v6501_v0 = vld [vmem:[%s8570_s3 + $0x284] ss:$40 sps:$4 sm:$0xff]  }
 0x577   :  { %v6119_v40 = vpop.permute.xlu1 %6118  ;;  %v6109_v12 = vpop.permute.xlu0 %6108  ;;  %v6100_v20 = vunpack.i.l.bf16 %v6099_v29 }
 0x578   :  { %5047 = vmatprep.subr.msk.bf16.mxu0 %vm8957_vm3, %v4575_v5  ;;  %v6500_v5 = vld [vmem:[%s8570_s3 + $0x230] ss:$40 sps:$4 sm:$0xff]   ;;  %vm9043_vm3 = vnez %v8986_v19 }
 0x579   :  { %v4584_v30 = vpack.c.bf16 %v6101_v28, %v6100_v20 }
 0x57a   :  { %5048 = vmatpush3.bf16.msk.msra.mxu0 %vm8958_vm12, %v4551_v51  ;;  %v4608_v51 = vpack.c.bf16 %v6091_v18, %v6090_v13  ;;  %v6503_v18 = vld [vmem:[%s8570_s3 + $0x280] ss:$40 sps:$4 sm:$0xff]   ;;  %vm9044_vm12 = vnez %v8988_v31 }
 0x57b   :  { %5067 = vmatprep.subr.msk.bf16.mxu0 %vm8961_vm14, %v4602_v41  ;;  %v6134_v49 = vpop.permute.xlu1 %6133  ;;  %v6124_v53 = vpop.permute.xlu0 %6123 }
 0x57c   :  { %v6136_v45 = vunpack.i.h.bf16 %v6134_v49  ;;  %v6135_v2 = vunpack.i.l.bf16 %v6134_v49  ;;  %v6126_v4 = vunpack.i.h.bf16 %v6124_v53  ;;  %v6125_v60 = vunpack.i.l.bf16 %v6124_v53 }
 0x57d   :  { %3603 = vmatmul.mubr.bf16.vlgmr.msra.gmra.mrb[48].mxu0 %v6495_v21  ;;  %v6121_v53 = vunpack.i.h.bf16 %v6119_v40 }
 0x57e   :  { %v4581_v44 = vpack.c.bf16 %v6136_v45, %v6135_v2  ;;  %v4605_v25 = vpack.c.bf16 %v6126_v4, %v6125_v60  ;;  %5068 = vmatpush3.bf16.msk.msra.mxu0 %vm9036_vm4, %v4578_v26  ;;  %3610 = vmatprep.mubr.bf16.mxu0 %v6498_v33  ;;  %v6111_v33 = vunpack.i.h.bf16 %v6109_v12  ;;  %v6110_v26 = vunpack.i.l.bf16 %v6109_v12  ;;  %v6506_v12 = vld [vmem:[%s8570_s3 + $0x1ec] ss:$40 sps:$4 sm:$0xff]  }
 0x57f   :  { %v6139_v35 = vpop.permute.xlu1 %6138  ;;  %v6129_v36 = vpop.permute.xlu0 %6128  ;;  %v6120_v45 = vunpack.i.l.bf16 %v6119_v40 }
 0x580   :  { %5069 = vmatprep.subr.msk.bf16.mxu0 %vm8961_vm14, %v4605_v25  ;;  %v4614_v60 = vpack.c.bf16 %v6111_v33, %v6110_v26  ;;  %vm9042_vm14 = vnez %v8980_v3 }
 0x581   :  { %v4590_v13 = vpack.c.bf16 %v6121_v53, %v6120_v45 }
 0x582   :  { %5070 = vmatpush3.bf16.msk.msra.mxu0 %vm9036_vm4, %v4581_v44  ;;  %vm9050_vm4 = vnez %v8854_v9 }
 0x583   :  { %5071 = vmatprep.subr.msk.bf16.mxu0 %vm9037_vm5, %v4608_v51  ;;  %v6154_v29 = vpop.permute.xlu1 %6153  ;;  %v6144_v46 = vpop.permute.xlu0 %6143  ;;  %v6131_v51 = vunpack.i.h.bf16 %v6129_v36 }
 0x584   :  { %v6156_v15 = vunpack.i.h.bf16 %v6154_v29  ;;  %v6155_v8 = vunpack.i.l.bf16 %v6154_v29  ;;  %v6146_v41 = vunpack.i.h.bf16 %v6144_v46  ;;  %v6145_v21 = vunpack.i.l.bf16 %v6144_v46 }
 0x585   :  { %3611 = vmatmul.mubr.bf16.gmra.mrb[52].mxu0 %v6500_v5  ;;  %v6130_v5 = vunpack.i.l.bf16 %v6129_v36  ;;  %v6141_v29 = vunpack.i.h.bf16 %v6139_v35  ;;  %v6140_v46 = vunpack.i.l.bf16 %v6139_v35 }
 0x586   :  { %v4587_v49 = vpack.c.bf16 %v6156_v15, %v6155_v8  ;;  %v4611_v17 = vpack.c.bf16 %v6146_v41, %v6145_v21  ;;  %5072 = vmatpush3.bf16.msk.msra.mxu0 %vm9038_vm7, %v4584_v30  ;;  %3616 = vmatprep.mubr.bf16.mxu0 %v6501_v0 }
 0x587   :  { %v6159_v2 = vpop.permute.xlu1 %6158  ;;  %v6149_v4 = vpop.permute.xlu0 %6148  ;;  %v4620_v15 = vpack.c.bf16 %v6131_v51, %v6130_v5  ;;  %v4596_v8 = vpack.c.bf16 %v6141_v29, %v6140_v46 }
 0x588   :  { %5073 = vmatprep.subr.msk.bf16.mxu0 %vm9037_vm5, %v4611_v17  ;;  %v6151_v26 = vunpack.i.h.bf16 %v6149_v4 }
 0x58a   :  { %5074 = vmatpush3.bf16.msk.msra.mxu0 %vm9038_vm7, %v4587_v49  ;;  %v6150_v49 = vunpack.i.l.bf16 %v6149_v4 }
 0x58b   :  { %5075 = vmatprep.subr.msk.bf16.mxu0 %vm9039_vm9, %v4614_v60  ;;  %v6174_v40 = vpop.permute.xlu1 %6173  ;;  %v6164_v44 = vpop.permute.xlu0 %6163 }
 0x58c   :  { %v6176_v47 = vunpack.i.h.bf16 %v6174_v40  ;;  %v6175_v25 = vunpack.i.l.bf16 %v6174_v40  ;;  %v6166_v28 = vunpack.i.h.bf16 %v6164_v44  ;;  %v6165_v20 = vunpack.i.l.bf16 %v6164_v44 }
 0x58d   :  { %3617 = vmatmul.mubr.bf16.gmra.mrb[56].mxu0 %v6503_v18  ;;  %v6161_v18 = vunpack.i.h.bf16 %v6159_v2  ;;  %v4692_v44 = vpack.c.bf16 %v6151_v26, %v6150_v49 }
 0x58e   :  { %v4593_v0 = vpack.c.bf16 %v6176_v47, %v6175_v25  ;;  %v4617_v52 = vpack.c.bf16 %v6166_v28, %v6165_v20  ;;  %5076 = vmatpush3.bf16.msk.msra.mxu0 %vm9040_vm11, %v4590_v13  ;;  %3655 = vmatprep.mubr.bf16.mxu0 %v6506_v12  ;;  %v6160_v12 = vunpack.i.l.bf16 %v6159_v2 }
 0x58f   :  { %v6169_v30 = vpop.permute.xlu0 %6168 }
 0x590   :  { %5077 = vmatprep.subr.msk.bf16.mxu0 %vm9039_vm9, %v4617_v52  ;;  %v6171_v3 = vunpack.i.h.bf16 %v6169_v30  ;;  %v6170_v5 = vunpack.i.l.bf16 %v6169_v30  ;;  %vm9057_vm9 = vcmask 916480  }
 0x592   :  { %5078 = vmatpush3.bf16.msk.msra.mxu0 %vm9040_vm11, %v4593_v0 }
 0x593   :  { %5079 = vmatprep.subr.msk.bf16.mxu0 %vm9041_vm13, %v4620_v15  ;;  %v6179_v36 = vpop.permute.xlu0 %6178 }
 0x594   :  { %v6181_v41 = vunpack.i.h.bf16 %v6179_v36  ;;  %v6180_v21 = vunpack.i.l.bf16 %v6179_v36 }
 0x596   :  { %v4623_v33 = vpack.c.bf16 %v6181_v41, %v6180_v21  ;;  %5080 = vmatpush3.bf16.msk.msra.mxu0 %vm9042_vm14, %v4596_v8  ;;  %v4698_v21 = vpack.c.bf16 %v6171_v3, %v6170_v5 }
 0x598   :  { %5081 = vmatprep.subr.msk.bf16.mxu0 %vm9041_vm13, %v4623_v33 }
 0x59c   :  { %v2173_v16 = vpop.permute.xlu1 %2172 }
 0x59d   :  { %v2391_v35 = vadd.f32 %v8039_v11, %v2173_v16  ;;  %v6504_v11 = vld [vmem:[%s8570_s3 + $0x1e8] ss:$40 sps:$4 sm:$0xff]  }
 0x59f   :  { %v2448_v23 = vadd.f32 %v8047_v27, %v2391_v35 }
 0x5a0   :  { %v6184_v17 = vpop.permute.xlu1 %6183 }
 0x5a1   :  { %v2505_v53 = vadd.f32 %v8043_v48, %v2448_v23  ;;  %v6186_v45 = vunpack.i.h.bf16 %v6184_v17  ;;  %v6185_v60 = vunpack.i.l.bf16 %v6184_v17  ;;  %v6507_v48 = vld [vmem:[%s8570_s3 + $0x23c] ss:$40 sps:$4 sm:$0xff]  }
 0x5a2   :  { %v4034_v17 = vld [vmem:[%s8571_s4 + $0x60] sm:$0xff] }
 0x5a3   :  { %v2562_v13 = vadd.f32 %v8051_v50, %v2505_v53  ;;  %v4599_v40 = vpack.c.bf16 %v6186_v45, %v6185_v60  ;;  %v4668_v50 = vpack.c.bf16 %v6161_v18, %v6160_v12 }
 0x5a4   :  { %v6189_v57 = vpop.permute.xlu1 %6188  ;;  %v2178_v47 = vpop.permute.xlu0 %2177 }
 0x5a5   :  { %v8329_v27 = vadd.f32 %v8055_v37, %v2562_v13  ;;  %v2394_v4 = vadd.f32 %v8041_v61, %v2178_v47  ;;  %5082 = vmatpush3.bf16.msk.msra.mxu0 %vm9042_vm14, %v4599_v40  ;;  %v6191_v46 = vunpack.i.h.bf16 %v6189_v57  ;;  %v6512_v40 = vld [vmem:[%s8570_s3 + $0x288] ss:$40 sps:$4 sm:$0xff]  }
 0x5a6   :  { %5135 = vmatprep.subr.msk.bf16.mxu0 %vm9043_vm3, %v4692_v44  ;;  %v4035_v47 = vld [vmem:[%s8571_s4 + $0x68] sm:$0xff] }
 0x5a7   :  { %v2451_v2 = vadd.f32 %v8049_v32, %v2394_v4  ;;  %v6190_v32 = vunpack.i.l.bf16 %v6189_v57  ;;  %v52_v57 = vld [vmem:[%s9047_s9] sm:$0xff] }
 0x5a8   :  { %v6204_v25 = vpop.permute.xlu1 %6203  ;;  %v6194_v28 = vpop.permute.xlu0 %6193  ;;  %3656 = vmatmul.mubr.bf16.vlgmr.msra.gmra.mrb[60].mxu0 %v6504_v11  ;;  %v6515_v11 = vld [vmem:[%s8570_s3 + $0x1fc] ss:$40 sps:$4 sm:$0xff]  }
 0x5a9   :  { %v2508_v37 = vadd.f32 %v8045_v24, %v2451_v2  ;;  %v6206_v20 = vunpack.i.h.bf16 %v6204_v25  ;;  %v6205_v61 = vunpack.i.l.bf16 %v6204_v25  ;;  %v6196_v51 = vunpack.i.h.bf16 %v6194_v28  ;;  %5136 = vmatpush3.bf16.msk.msra.mxu0 %vm9044_vm12, %v4668_v50  ;;  %3663 = vmatprep.mubr.bf16.mxu0 %v6507_v48  ;;  %v6509_v24 = vld [vmem:[%s8570_s3 + $0x238] ss:$40 sps:$4 sm:$0xff]  }
 0x5aa   :  { %v6195_v0 = vunpack.i.l.bf16 %v6194_v28  ;;  %v4674_v33 = vpack.c.bf16 %v6191_v46, %v6190_v32 }
 0x5ab   :  { %v2565_v52 = vadd.f32 %v8053_v63, %v2508_v37  ;;  %v4671_v29 = vpack.c.bf16 %v6206_v20, %v6205_v61  ;;  %v6510_v63 = vld [vmem:[%s8570_s3 + $0x28c] ss:$40 sps:$4 sm:$0xff]  }
 0x5ac   :  { %v4695_v15 = vpack.c.bf16 %v6196_v51, %v6195_v0  ;;  %v6209_v36 = vpop.permute.xlu1 %6208  ;;  %v6199_v8 = vpop.permute.xlu0 %6198 }
 0x5ad   :  { %v8348_v41 = vadd.f32 %v8057_v7, %v2565_v52  ;;  %v6201_v31 = vunpack.i.h.bf16 %v6199_v8  ;;  %v6200_v49 = vunpack.i.l.bf16 %v6199_v8  ;;  %v6211_v60 = vunpack.i.h.bf16 %v6209_v36 }
 0x5ae   :  { %5137 = vmatprep.subr.msk.bf16.mxu0 %vm9043_vm3, %v4695_v15  ;;  %v6210_v18 = vunpack.i.l.bf16 %v6209_v36 }
 0x5af   :  { %5138 = vmatpush3.bf16.msk.msra.mxu0 %vm9044_vm12, %v4671_v29  ;;  %v6392_v30 = vpack.i.bf16 %v8348_v41, %v8329_v27  ;;  %v4704_v44 = vpack.c.bf16 %v6201_v31, %v6200_v49 }
 0x5b0   :  { %5139 = vmatprep.subr.msk.bf16.mxu0 %vm9045_vm15, %v4698_v21  ;;  %v6224_v7 = vpop.permute.xlu1 %6223  ;;  %v6214_v16 = vpop.permute.xlu0 %6213  ;;  %3664 = vmatmul.mubr.bf16.gmra.mrb[64].mxu0 %v6509_v24 }
 0x5b1   :  { %v6226_v35 = vunpack.i.h.bf16 %v6224_v7  ;;  %v6225_v19 = vunpack.i.l.bf16 %v6224_v7  ;;  %v6216_v23 = vunpack.i.h.bf16 %v6214_v16  ;;  %v6215_v26 = vunpack.i.l.bf16 %v6214_v16  ;;  %6393 = vrot.lane.b32.xlu0 %v6392_v30, %s8951_s17  ;;  %6388 = vrot.lane.b32.xlu1 %v6392_v30, %s9032_s28 }
 0x5b2   :  { %3669 = vmatprep.mubr.bf16.mxu0 %v6510_v63 }
 0x5b3   :  { %v4677_v53 = vpack.c.bf16 %v6226_v35, %v6225_v19  ;;  %v4701_v45 = vpack.c.bf16 %v6216_v23, %v6215_v26  ;;  %5140 = vmatpush3.bf16.msk.msra.mxu0 %vm9046_vm2, %v4674_v33  ;;  %v6513_v19 = vld [vmem:[%s8570_s3 + $0x1f8] ss:$40 sps:$4 sm:$0xff]   ;;  %v6519_v23 = vld [vmem:[%s8570_s3 + $0x24c] ss:$40 sps:$4 sm:$0xff]  }
 0x5b4   :  { %v6229_v12 = vpop.permute.xlu1 %6228  ;;  %v6219_v13 = vpop.permute.xlu0 %6218 }
 0x5b5   :  { %3390 = vperm.xlu0 %5230, %v4034_v17   ;;  %6398 = vrot.lane.b32.xlu1 %v8081_v6, %s9035_s18  ;;  %v4680_v6 = vpack.c.bf16 %v6211_v60, %v6210_v18  ;;  %v6221_v28 = vunpack.i.h.bf16 %v6219_v13  ;;  %v6220_v37 = vunpack.i.l.bf16 %v6219_v13  ;;  %v6231_v51 = vunpack.i.h.bf16 %v6229_v12 }
 0x5b6   :  { %5141 = vmatprep.subr.msk.bf16.mxu0 %vm9045_vm15, %v4701_v45  ;;  %v6230_v3 = vunpack.i.l.bf16 %v6229_v12 }
 0x5b7   :  { %5142 = vmatpush3.bf16.msk.msra.mxu0 %vm9046_vm2, %v4677_v53  ;;  %v4710_v46 = vpack.c.bf16 %v6221_v28, %v6220_v37  ;;  %v6524_v37 = vld [vmem:[%s8570_s3 + $0x298] ss:$40 sps:$4 sm:$0xff]  }
 0x5b8   :  { %5143 = vmatprep.subr.msk.bf16.mxu0 %vm9048_vm0, %v4704_v44  ;;  %v6244_v59 = vpop.permute.xlu1 %6243  ;;  %v6234_v4 = vpop.permute.xlu0 %6233  ;;  %3670 = vmatmul.mubr.bf16.gmra.mrb[68].mxu0 %v6512_v40  ;;  %v4686_v15 = vpack.c.bf16 %v6231_v51, %v6230_v3  ;;  %v6521_v40 = vld [vmem:[%s8570_s3 + $0x248] ss:$40 sps:$4 sm:$0xff]  }
 0x5b9   :  { %v6246_v48 = vunpack.i.h.bf16 %v6244_v59  ;;  %v6245_v50 = vunpack.i.l.bf16 %v6244_v59  ;;  %v6236_v2 = vunpack.i.h.bf16 %v6234_v4  ;;  %v6235_v25 = vunpack.i.l.bf16 %v6234_v4  ;;  %60 = vperm.xlu0 %5230, %v52_v57   ;;  %3395 = vperm.xlu1 %5231, %v4035_v47   ;;  %v6522_v57 = vld [vmem:[%s8570_s3 + $0x29c] ss:$40 sps:$4 sm:$0xff]  }
 0x5ba   :  { %3761 = vmatprep.mubr.bf16.mxu0 %v6515_v11 }
 0x5bb   :  { %v4683_v20 = vpack.c.bf16 %v6246_v48, %v6245_v50  ;;  %v4707_v61 = vpack.c.bf16 %v6236_v2, %v6235_v25  ;;  %5144 = vmatpush3.bf16.msk.msra.mxu0 %vm9049_vm6, %v4680_v6  ;;  %v9053_v48 = vld [vmem:[#allocation18_spill] sm:$0xff] }
 0x5bc   :  { %v6264_v5 = vpop.permute.xlu1 %6263  ;;  %v6239_v0 = vpop.permute.xlu0 %6238  ;;  %vm9054_vm5 = vnez %v9053_v48 }
 0x5bd   :  { %v6266_v52 = vunpack.i.h.bf16 %v6264_v5  ;;  %v6265_v29 = vunpack.i.l.bf16 %v6264_v5  ;;  %65 = vperm.xlu1 %5231, %v53_v39   ;;  %5145 = vmatprep.subr.msk.bf16.mxu0 %vm9048_vm0, %v4707_v61  ;;  %v6241_v16 = vunpack.i.h.bf16 %v6239_v0  ;;  %v6240_v35 = vunpack.i.l.bf16 %v6239_v0 }
 0x5bf   :  { %v4644_v32 = vpack.c.bf16 %v6266_v52, %v6265_v29  ;;  %5146 = vmatpush3.bf16.msk.msra.mxu0 %vm9049_vm6, %v4683_v20  ;;  %v4716_v49 = vpack.c.bf16 %v6241_v16, %v6240_v35  ;;  %v6527_v20 = vld [vmem:[%s8570_s3 + $0x204] ss:$40 sps:$4 sm:$0xff]   ;;  %vm9076_vm6 = vcmp.ge.s32.totalorder %v9075_v56, 1 }
 0x5c0   :  { %5147 = vmatprep.subr.msk.bf16.mxu0 %vm7323_vm10, %v4710_v46  ;;  %v6279_v36 = vpop.permute.xlu1 %6278  ;;  %v6249_v8 = vpop.permute.xlu0 %6248 }
 0x5c1   :  { %v6281_v24 = vunpack.i.h.bf16 %v6279_v36  ;;  %v6280_v21 = vunpack.i.l.bf16 %v6279_v36  ;;  %v6251_v63 = vunpack.i.h.bf16 %v6249_v8  ;;  %v6250_v30 = vunpack.i.l.bf16 %v6249_v8  ;;  %5101 = vmatprep.subr.msk.bf16.mxu1 %vm9050_vm4, %v4644_v32 }
 0x5c3   :  { %v4689_v10 = vpack.c.bf16 %v6281_v24, %v6280_v21  ;;  %v4713_v33 = vpack.c.bf16 %v6251_v63, %v6250_v30  ;;  %5148 = vmatpush3.bf16.msk.msra.mxu0 %vm7332_vm1, %v4686_v15  ;;  %v9055_v63 = vld [vmem:[#allocation19_spill] sm:$0xff] }
 0x5c4   :  { %v8403_v55 = vpop.permute.xlu1 %6283  ;;  %v6254_v7 = vpop.permute.xlu0 %6253  ;;  %vm9056_vm7 = vnez %v9055_v63 }
 0x5c5   :  { %5149 = vmatprep.subr.msk.bf16.mxu0 %vm7323_vm10, %v4713_v33  ;;  %vm9051_vm10 = vnez %v8873_v22  ;;  %v6256_v60 = vunpack.i.h.bf16 %v6254_v7  ;;  %v6255_v18 = vunpack.i.l.bf16 %v6254_v7  ;;  %v6286_v39 = vunpack.i.h.bf16 %v8403_v55 }
 0x5c6   :  { %v6285_v61 = vunpack.i.l.bf16 %v8403_v55 }
 0x5c7   :  { %5150 = vmatpush3.bf16.msk.msra.mxu0 %vm7332_vm1, %v4689_v10  ;;  %v4722_v6 = vpack.c.bf16 %v6256_v60, %v6255_v18  ;;  %vm9052_vm1 = vnez %v8856_v1  ;;  %v9060_v60 = vld [vmem:[#allocation12_spill] sm:$0xff] }
 0x5c8   :  { %v6294_v26 = vpop.permute.xlu1 %6293  ;;  %v6259_v31 = vpop.permute.xlu0 %6258  ;;  %3782 = vmatprep.subr.bf16.mxu0 %v8967_v54  ;;  %v4650_v7 = vpack.c.bf16 %v6286_v39, %v6285_v61  ;;  %vm9061_vm13 = vnez %v9060_v60 }
 0x5c9   :  { %v6296_v17 = vunpack.i.h.bf16 %v6294_v26  ;;  %v6295_v53 = vunpack.i.l.bf16 %v6294_v26  ;;  %v6261_v22 = vunpack.i.h.bf16 %v6259_v31  ;;  %v6260_v50 = vunpack.i.l.bf16 %v6259_v31 }
 0x5ca   :  { %3762 = vmatmul.mubr.bf16.vlgmr.msra.gmra.mrb[72].mxu0 %v6513_v19 }
 0x5cb   :  { %v4719_v34 = vpack.c.bf16 %v6296_v17, %v6295_v53  ;;  %4717 = vmatpush1.bf16.msk.msra.mxu0 %vm9051_vm10, %v4716_v49  ;;  %3769 = vmatprep.mubr.bf16.mxu0 %v6519_v23  ;;  %v4728_v51 = vpack.c.bf16 %v6261_v22, %v6260_v50  ;;  %v9058_v23 = vld [vmem:[#allocation11_spill] sm:$0xff]  ;;  %v9064_v22 = vld [vmem:[#allocation13_spill] sm:$0xff] }
 0x5cc   :  { %v6299_v45 = vpop.permute.xlu1 %6298  ;;  %v6269_v38 = vpop.permute.xlu0 %6268  ;;  %3784 = vmatprep.subr.bf16.mxu0 %v8967_v54  ;;  %vm9059_vm11 = vnez %v9058_v23  ;;  %vm9065_vm3 = vnez %v9064_v22 }
 0x5cd   :  { %v6271_v12 = vunpack.i.h.bf16 %v6269_v38  ;;  %v6270_v13 = vunpack.i.l.bf16 %v6269_v38  ;;  %v6301_v59 = vunpack.i.h.bf16 %v6299_v45  ;;  %v6300_v4 = vunpack.i.l.bf16 %v6299_v45 }
 0x5cf   :  { %v4626_v44 = vpack.c.bf16 %v6271_v12, %v6270_v13  ;;  %4720 = vmatpush1.bf16.msk.msra.mxu0 %vm9051_vm10, %v4719_v34  ;;  %v4725_v28 = vpack.c.bf16 %v6301_v59, %v6300_v4  ;;  %v9062_v13 = vld [vmem:[#allocation20_spill] sm:$0xff]  ;;  %vm9078_vm10 = vcmp.lt.s32.totalorder %v9075_v56, 63 }
 0x5d0   :  { %v6304_v47 = vpop.permute.xlu1 %6303  ;;  %v6274_v11 = vpop.permute.xlu0 %6273  ;;  %3786 = vmatprep.subr.bf16.mxu0 %v8967_v54  ;;  %vm9063_vm14 = vnez %v9062_v13 }
 0x5d1   :  { %5102 = vmatpush3.bf16.msk.msra.mxu1 %vm9052_vm1, %v4626_v44  ;;  %v6306_v3 = vunpack.i.h.bf16 %v6304_v47  ;;  %v6305_v5 = vunpack.i.l.bf16 %v6304_v47  ;;  %v6276_v36 = vunpack.i.h.bf16 %v6274_v11  ;;  %v6275_v8 = vunpack.i.l.bf16 %v6274_v11 }
 0x5d2   :  { %3770 = vmatmul.mubr.bf16.gmra.mrb[76].mxu0 %v6521_v40 }
 0x5d3   :  { %4723 = vmatpush1.bf16.msk.msra.mxu0 %vm9054_vm5, %v4722_v6  ;;  %3775 = vmatprep.mubr.bf16.mxu0 %v6522_v57  ;;  %v4731_v16 = vpack.c.bf16 %v6306_v3, %v6305_v5  ;;  %v4734_v35 = vpack.c.bf16 %v6276_v36, %v6275_v8  ;;  %v9066_v3 = vld [vmem:[#allocation14_spill] sm:$0xff] }
 0x5d4   :  { %v6319_v2 = vpop.permute.xlu1 %6318  ;;  %v6289_v25 = vpop.permute.xlu0 %6288  ;;  %3788 = vmatprep.subr.bf16.mxu0 %v8967_v54  ;;  %vm9067_vm12 = vnez %v9066_v3 }
 0x5d5   :  { %v6291_v30 = vunpack.i.h.bf16 %v6289_v25  ;;  %v6290_v10 = vunpack.i.l.bf16 %v6289_v25  ;;  %v6321_v19 = vunpack.i.h.bf16 %v6319_v2  ;;  %v6320_v26 = vunpack.i.l.bf16 %v6319_v2 }
 0x5d7   :  { %4726 = vmatpush1.bf16.msk.msra.mxu0 %vm9054_vm5, %v4725_v28  ;;  %v4632_v31 = vpack.c.bf16 %v6291_v30, %v6290_v10  ;;  %v4656_v11 = vpack.c.bf16 %v6321_v19, %v6320_v26  ;;  %v9072_v26 = vld [vmem:[#allocation26_spill] sm:$0xff] }
 0x5d8   :  { %v6324_v0 = vpop.permute.xlu1 %6323  ;;  %v6309_v52 = vpop.permute.xlu0 %6308  ;;  %3790 = vmatprep.subr.bf16.mxu0 %v8967_v54  ;;  %vm9073_vm0 = vnez %v9072_v26 }
 0x5d9   :  { %v6326_v29 = vunpack.i.h.bf16 %v6324_v0  ;;  %v6325_v46 = vunpack.i.l.bf16 %v6324_v0  ;;  %v6311_v32 = vunpack.i.h.bf16 %v6309_v52  ;;  %v6310_v15 = vunpack.i.l.bf16 %v6309_v52  ;;  %v9068_v52 = vld [vmem:[#allocation23_spill] sm:$0xff] }
 0x5da   :  { %3776 = vmatmul.mubr.bf16.gmra.mrb[80].mxu0 %v6524_v37  ;;  %vm9069_vm15 = vnez %v9068_v52 }
 0x5db   :  { %v4629_v24 = vpack.c.bf16 %v6326_v29, %v6325_v46  ;;  %v4647_v21 = vpack.c.bf16 %v6311_v32, %v6310_v15  ;;  %4729 = vmatpush1.bf16.msk.msra.mxu0 %vm9056_vm7, %v4728_v51  ;;  %4070 = vmatprep.mubr.msk.bf16.mxu0 %vm9057_vm9, %v6527_v20 }
 0x5dc   :  { %v6329_v33 = vpop.permute.xlu1 %6328  ;;  %v6314_v55 = vpop.permute.xlu0 %6313  ;;  %3792 = vmatprep.subr.bf16.mxu0 %v8967_v54 }
 0x5dd   :  { %5103 = vmatprep.subr.msk.bf16.mxu1 %vm9050_vm4, %v4647_v21  ;;  %v6331_v49 = vunpack.i.h.bf16 %v6329_v33  ;;  %v6330_v17 = vunpack.i.l.bf16 %v6329_v33  ;;  %v6316_v40 = vunpack.i.h.bf16 %v6314_v55  ;;  %v6315_v44 = vunpack.i.l.bf16 %v6314_v55  ;;  %vm9077_vm4 = vmmov %vm9076_vm6 }
 0x5de   :  { %5104 = vmatpush3.bf16.msk.msra.mxu1 %vm9052_vm1, %v4629_v24  ;;  %vm9079_vm1 = vmmov %vm9078_vm10 }
 0x5df   :  { %4732 = vmatpush1.bf16.msk.msra.mxu0 %vm9056_vm7, %v4731_v16  ;;  %5105 = vmatprep.subr.msk.bf16.mxu1 %vm9059_vm11, %v4650_v7  ;;  %v4737_v6 = vpack.c.bf16 %v6331_v49, %v6330_v17  ;;  %v4740_v50 = vpack.c.bf16 %v6316_v40, %v6315_v44 }
 0x5e0   :  { %v6344_v53 = vpop.permute.xlu1 %6343  ;;  %v6334_v34 = vpop.permute.xlu0 %6333  ;;  %3794 = vmatprep.subr.bf16.mxu0 %v8967_v54 }
 0x5e1   :  { %v6346_v9 = vunpack.i.h.bf16 %v6344_v53  ;;  %v6345_v45 = vunpack.i.l.bf16 %v6344_v53  ;;  %v6336_v1 = vunpack.i.h.bf16 %v6334_v34  ;;  %v6335_v38 = vunpack.i.l.bf16 %v6334_v34  ;;  %v6516_v53 = vld [vmem:[%s8570_s3 + $0x1f0] ss:$40 sps:$4 sm:$0xff]  }
 0x5e2   :  { %5106 = vmatpush3.bf16.msk.msra.mxu1 %vm9061_vm13, %v4632_v31 }
 0x5e3   :  { %v4635_v18 = vpack.c.bf16 %v6346_v9, %v6345_v45  ;;  %v4653_v12 = vpack.c.bf16 %v6336_v1, %v6335_v38  ;;  %4735 = vmatpush1.bf16.msk.msra.mxu0 %vm9063_vm14, %v4734_v35  ;;  %v9070_v35 = vld [vmem:[#allocation15_spill] sm:$0xff] }
 0x5e4   :  { %v6349_v57 = vpop.permute.xlu1 %6348  ;;  %v6339_v47 = vpop.permute.xlu0 %6338  ;;  %3796 = vmatprep.subr.bf16.mxu0 %v8967_v54  ;;  %vm9071_vm2 = vnez %v9070_v35 }
 0x5e5   :  { %v6341_v59 = vunpack.i.h.bf16 %v6339_v47  ;;  %v6340_v4 = vunpack.i.l.bf16 %v6339_v47  ;;  %5107 = vmatprep.subr.msk.bf16.mxu1 %vm9059_vm11, %v4653_v12  ;;  %v6351_v2 = vunpack.i.h.bf16 %v6349_v57  ;;  %v6350_v25 = vunpack.i.l.bf16 %v6349_v57 }
 0x5e6   :  { %5108 = vmatpush3.bf16.msk.msra.mxu1 %vm9061_vm13, %v4635_v18 }
 0x5e7   :  { %v4638_v48 = vpack.c.bf16 %v6341_v59, %v6340_v4  ;;  %4738 = vmatpush1.bf16.msk.msra.mxu0 %vm9063_vm14, %v4737_v6  ;;  %5109 = vmatprep.subr.msk.bf16.mxu1 %vm9065_vm3, %v4656_v11  ;;  %v4743_v29 = vpack.c.bf16 %v6351_v2, %v6350_v25  ;;  %v6525_v4 = vld [vmem:[%s8570_s3 + $0x200] ss:$40 sps:$4 sm:$0xff]  }
 0x5e8   :  { %v6364_v28 = vpop.permute.xlu1 %6363  ;;  %v6354_v37 = vpop.permute.xlu0 %6353  ;;  %3798 = vmatprep.subr.bf16.mxu0 %v8967_v54 }
 0x5e9   :  { %v6366_v39 = vunpack.i.h.bf16 %v6364_v28  ;;  %v6365_v20 = vunpack.i.l.bf16 %v6364_v28  ;;  %v6356_v61 = vunpack.i.h.bf16 %v6354_v37  ;;  %v6355_v51 = vunpack.i.l.bf16 %v6354_v37 }
 0x5ea   :  { %5110 = vmatpush3.bf16.msk.msra.mxu1 %vm9067_vm12, %v4638_v48 }
 0x5eb   :  { %v4641_v5 = vpack.c.bf16 %v6366_v39, %v6365_v20  ;;  %v4659_v0 = vpack.c.bf16 %v6356_v61, %v6355_v51  ;;  %4741 = vmatpush1.bf16.msk.msra.mxu0 %vm9069_vm15, %v4740_v50 }
 0x5ec   :  { %v6369_v46 = vpop.permute.xlu1 %6368  ;;  %v6359_v32 = vpop.permute.xlu0 %6358  ;;  %3800 = vmatprep.subr.bf16.mxu0 %v8967_v54 }
 0x5ed   :  { %v6371_v15 = vunpack.i.h.bf16 %v6369_v46  ;;  %v6370_v36 = vunpack.i.l.bf16 %v6369_v46  ;;  %v6361_v8 = vunpack.i.h.bf16 %v6359_v32  ;;  %v6360_v24 = vunpack.i.l.bf16 %v6359_v32  ;;  %5111 = vmatprep.subr.msk.bf16.mxu1 %vm9065_vm3, %v4659_v0 }
 0x5ee   :  { %5112 = vmatpush3.bf16.msk.msra.mxu1 %vm9067_vm12, %v4641_v5 }
 0x5ef   :  { %v4662_v21 = vpack.c.bf16 %v6371_v15, %v6370_v36  ;;  %v4746_v63 = vpack.c.bf16 %v6361_v8, %v6360_v24  ;;  %4744 = vmatpush1.bf16.msk.msra.mxu0 %vm9069_vm15, %v4743_v29 }
 0x5f0   :  { %v6384_v30 = vpop.permute.xlu1 %6383  ;;  %v6374_v10 = vpop.permute.xlu0 %6373  ;;  %3802 = vmatprep.subr.bf16.mxu0 %v8967_v54 }
 0x5f1   :  { %v6386_v33 = vunpack.i.h.bf16 %v6384_v30  ;;  %v6385_v55 = vunpack.i.l.bf16 %v6384_v30  ;;  %v6376_v7 = vunpack.i.h.bf16 %v6374_v10  ;;  %v6375_v16 = vunpack.i.l.bf16 %v6374_v10  ;;  %5113 = vmatprep.subr.msk.bf16.mxu1 %vm9071_vm2, %v4662_v21 }
 0x5f2   :  { %5114 = vmatpush3.bf16.msra.mxu1 %v2945_v14 }
 0x5f3   :  { %v4665_v19 = vpack.c.bf16 %v6386_v33, %v6385_v55  ;;  %v4749_v23 = vpack.c.bf16 %v6376_v7, %v6375_v16  ;;  %4747 = vmatpush1.bf16.msk.msra.mxu0 %vm9073_vm0, %v4746_v63 }
 0x5f4   :  { %v6379_v31 = vpop.permute.xlu0 %6378  ;;  %3804 = vmatprep.subr.bf16.mxu0 %v8967_v54 }
 0x5f5   :  { %v6381_v49 = vunpack.i.h.bf16 %v6379_v31  ;;  %v6380_v17 = vunpack.i.l.bf16 %v6379_v31  ;;  %5115 = vmatprep.subr.msk.bf16.mxu1 %vm9071_vm2, %v4665_v19 }
 0x5f6   :  { %5116 = vmatpush3.bf16.msra.mxu1 %v2946_v43 }
 0x5f7   :  { %v4752_v58 = vpack.c.bf16 %v6381_v49, %v6380_v17  ;;  %4750 = vmatpush1.bf16.msk.msra.mxu0 %vm9073_vm0, %v4749_v23 }
 0x5f8   :  { %3806 = vmatprep.subr.bf16.mxu0 %v8967_v54 }
 0x5f9   :  { %3709 = vmatmul.mubr.bf16.vlgmr.msra.gmra.mrb[84].mxu1 %v6516_v53 }
 0x5fb   :  { %4753 = vmatpush1.bf16.msk.msra.mxu0 %vm7340_vm8, %v4752_v58 }
 0x5fc   :  { %3808 = vmatprep.subr.bf16.mxu0 %v8967_v54 }
 0x623   :  { %v6389_v14 = vpop.permute.xlu1 %6388  ;;  %v6394_v34 = vpop.permute.xlu0 %6393 }
 0x624   :  { %v6391_v9 = vunpack.i.h.bf16 %v6389_v14  ;;  %v6390_v45 = vunpack.i.l.bf16 %v6389_v14  ;;  %v6396_v1 = vunpack.i.h.bf16 %v6394_v34  ;;  %v6395_v38 = vunpack.i.l.bf16 %v6394_v34 }
 0x626   :  { %v3258_v42 = vsel %vm9076_vm6, %v6391_v9, -3.4028235e+38  ;;  %v3257_v43 = vsel %vm9077_vm4, %v6390_v45, -3.4028235e+38  ;;  %v3264_v60 = vsel %vm9078_vm10, %v6396_v1, -3.4028235e+38 }
 0x627   :  { %v3266_v18 = vmax.f32 %v3258_v42, %v3264_v60  ;;  %v3263_v12 = vsel %vm9079_vm1, %v6395_v38, -3.4028235e+38  ;;  %v6399_v13 = vpop.permute.xlu1 %6398 }
 0x628   :  { %v3265_v40 = vmax.f32 %v3257_v43, %v3263_v12  ;;  %v6401_v44 = vunpack.i.h.bf16 %v6399_v13  ;;  %v6400_v57 = vunpack.i.l.bf16 %v6399_v13 }
 0x629   :  { %v3268_v47 = vmax.f32 %v8348_v41, %v3266_v18 }
 0x62a   :  { %v3267_v11 = vmax.f32 %v8329_v27, %v3265_v40  ;;  %v4755_v6 = vpack.c.bf16 %v6401_v44, %v6400_v57  ;;  %v9080_v44 = vld [vmem:[#allocation3_spill] sm:$0xff] }
 0x62c   :  { %4756 = vmatpush1.bf16.msk.msra.mxu0 %vm7340_vm8, %v4755_v6  ;;  %v3269_v59 = vpack.c.bf16 %v3268_v47, %v3267_v11  ;;  %v9081_v6 = vld [vmem:[#allocation4_spill] sm:$0xff]  ;;  %vm9082_vm8 = vmmov %vm9057_vm9 }
 0x62d   :  { %3810 = vmatprep.subr.bf16.mxu0 %v8967_v54  ;;  %vm9083_vm5 = vmmov %vm9082_vm8 }
 0x630   :  { %3811 = vmatpush1.bf16.msra.mxu0 %v3269_v59 }
 0x633   :  { %3815 = vmatmul.mubr.bf16.vlgmr.msra.gmra.mrb[84].mxu0 %v6525_v4 }
 0x634   :  { %v3391_v5 = vpop.permute.xlu0 %3390 }
 0x638   :  { %v3396_v32 = vpop.permute.xlu1 %3395  ;;  %v61_v60 = vpop.permute.xlu0 %60 }
 0x639   :  { %v148_v57 = vadd.f32 %v9080_v44, %v61_v60 }
 0x63c   :  { %v66_v40 = vpop.permute.xlu1 %65 }
 0x63d   :  { %v151_v59 = vadd.f32 %v9081_v6, %v66_v40 }
 0x650   :  { %v5049_v48 = vpop.f32.mrb[48].mxu0 }
 0x651   :  { %v5050_v22 = vpop.f32.mrb[49].mxu0 }
 0x652   :  { %v5051_v50 = vadd.f32 %v5050_v22, %v5049_v48  ;;  %v5052_v2 = vpop.f32.mrb[50].mxu0 }
 0x653   :  { %v5053_v41 = vpop.f32.mrb[51].mxu0 }
 0x654   :  { %v5054_v25 = vadd.f32 %v5053_v41, %v5052_v2  ;;  %v3605_v52 = vadd.f32 %v5051_v50, %v3391_v5  ;;  %v6539_v5 = vld [vmem:[%s8570_s3 + $0x2a0] ss:$40 sps:$4 sm:$0xff]  }
 0x656   :  { %v3608_v36 = vadd.f32 %v5054_v25, %v3396_v32 }
 0x658   :  { %v5055_v27 = vpop.f32.mrb[52].mxu0 }
 0x659   :  { %v5056_v28 = vpop.f32.mrb[53].mxu0 }
 0x65a   :  { %v5058_v37 = vpop.f32.mrb[54].mxu0 }
 0x65b   :  { %v5059_v39 = vpop.f32.mrb[55].mxu0  ;;  %v6528_v37 = vld [vmem:[%s8570_s3 + $0x244] ss:$40 sps:$4 sm:$0xff]  }
 0x65c   :  { %v6530_v39 = vld [vmem:[%s8570_s3 + $0x254] ss:$40 sps:$4 sm:$0xff]   ;;  %3716 = vmatprep.mubr.bf16.mxu1 %v6528_v37 }
 0x65d   :  { %4071 = vmatprep.mubr.msk.bf16.mxu0 %vm9082_vm8, %v6530_v39 }
 0x660   :  { %v5061_v20 = vpop.f32.mrb[56].mxu0 }
 0x661   :  { %v5062_v61 = vpop.f32.mrb[57].mxu0  ;;  %v6532_v20 = vld [vmem:[%s8570_s3 + $0x240] ss:$40 sps:$4 sm:$0xff]  }
 0x662   :  { %v5064_v54 = vpop.f32.mrb[58].mxu0  ;;  %v6533_v61 = vld [vmem:[%s8570_s3 + $0x250] ss:$40 sps:$4 sm:$0xff]   ;;  %3717 = vmatmul.mubr.bf16.gmra.mrb[88].mxu1 %v6532_v20 }
 0x663   :  { %v5065_v51 = vpop.f32.mrb[59].mxu0  ;;  %v6534_v54 = vld [vmem:[%s8570_s3 + $0x294] ss:$40 sps:$4 sm:$0xff]   ;;  %3823 = vmatmul.mubr.bf16.gmra.mrb[88].mxu0 %v6533_v61 }
 0x664   :  { %v6536_v51 = vld [vmem:[%s8570_s3 + $0x2a4] ss:$40 sps:$4 sm:$0xff]   ;;  %3722 = vmatprep.mubr.bf16.mxu1 %v6534_v54 }
 0x665   :  { %4072 = vmatprep.mubr.msk.bf16.mxu0 %vm9083_vm5, %v6536_v51 }
 0x66b   :  { %3829 = vmatmul.mubr.bf16.gmra.mrb[92].mxu0 %v6539_v5 }
 0x67b   :  { %v5083_v3 = vpop.f32.mrb[60].mxu0 }
 0x67c   :  { %v5084_v0 = vpop.f32.mrb[61].mxu0 }
 0x67d   :  { %v5085_v29 = vadd.f32 %v5084_v0, %v5083_v3  ;;  %v5086_v46 = vpop.f32.mrb[62].mxu0  ;;  %v6538_v3 = vld [vmem:[%s8570_s3 + $0x290] ss:$40 sps:$4 sm:$0xff]  }
 0x67e   :  { %v5087_v15 = vpop.f32.mrb[63].mxu0  ;;  %3723 = vmatmul.mubr.bf16.gmra.mrb[92].mxu1 %v6538_v3 }
 0x67f   :  { %v3658_v8 = vadd.f32 %v5085_v29, %v3605_v52  ;;  %v5088_v24 = vadd.f32 %v5087_v15, %v5086_v46 }
 0x681   :  { %v3661_v21 = vadd.f32 %v5088_v24, %v3608_v36 }
 0x683   :  { %v5089_v63 = vpop.f32.mrb[64].mxu0 }
 0x684   :  { %v5090_v30 = vpop.f32.mrb[65].mxu0 }
 0x685   :  { %v5092_v10 = vpop.f32.mrb[66].mxu0 }
 0x686   :  { %v5093_v33 = vpop.f32.mrb[67].mxu0 }
 0x68b   :  { %v5095_v55 = vpop.f32.mrb[68].mxu0 }
 0x68c   :  { %v5096_v7 = vpop.f32.mrb[69].mxu0 }
 0x68d   :  { %v5098_v16 = vpop.f32.mrb[70].mxu0 }
 0x68e   :  { %v5099_v35 = vpop.f32.mrb[71].mxu0 }
 0x69d   :  { %v5151_v19 = vpop.f32.mrb[72].mxu0 }
 0x69e   :  { %v5152_v23 = vpop.f32.mrb[73].mxu0 }
 0x69f   :  { %v5153_v26 = vadd.f32 %v5152_v23, %v5151_v19  ;;  %v5154_v31 = vpop.f32.mrb[74].mxu0 }
 0x6a0   :  { %v5155_v49 = vpop.f32.mrb[75].mxu0 }
 0x6a1   :  { %v5156_v17 = vadd.f32 %v5155_v49, %v5154_v31 }
 0x6a5   :  { %v5157_v53 = vpop.f32.mrb[76].mxu0 }
 0x6a6   :  { %v5158_v58 = vpop.f32.mrb[77].mxu0 }
 0x6a7   :  { %v5160_v62 = vpop.f32.mrb[78].mxu0 }
 0x6a8   :  { %v5161_v14 = vpop.f32.mrb[79].mxu0 }
 0x6ad   :  { %v5163_v34 = vpop.f32.mrb[80].mxu0 }
 0x6ae   :  { %v5164_v9 = vpop.f32.mrb[81].mxu0 }
 0x6af   :  { %v5166_v45 = vpop.f32.mrb[82].mxu0 }
 0x6b0   :  { %v5167_v1 = vpop.f32.mrb[83].mxu0  ;;  %v3858_v45 = vld [vmem:[%s9084_s6] sm:$0xff] }
 0x6cc   :  { %v5117_v38 = vpop.f32.mrb[84].mxu1 }
 0x6cd   :  { %v5118_v56 = vpop.f32.mrb[85].mxu1 }
 0x6ce   :  { %v5119_v42 = vadd.f32 %v5118_v56, %v5117_v38  ;;  %v5120_v43 = vpop.f32.mrb[86].mxu1  ;;  %v3859_v56 = vld [vmem:[%s9084_s6 + $0x8] sm:$0xff] }
 0x6cf   :  { %v5121_v18 = vpop.f32.mrb[87].mxu1 }
 0x6d0   :  { %v3711_v12 = vadd.f32 %v5119_v42, %v3658_v8  ;;  %v5122_v13 = vadd.f32 %v5121_v18, %v5120_v43  ;;  %v3874_v43 = vld [vmem:[%s9085_s23] sm:$0xff]  ;;  %v3875_v18 = vld [vmem:[%s9085_s23 + $0x8] sm:$0xff] }
 0x6d2   :  { %v3714_v47 = vadd.f32 %v5122_v13, %v3661_v21  ;;  %v3764_v11 = vadd.f32 %v5153_v26, %v3711_v12 }
 0x6d4   :  { %v5184_v4 = vadd.f32 %v3764_v11, %v148_v57  ;;  %v3767_v48 = vadd.f32 %v5156_v17, %v3714_v47 }
 0x6d6   :  { %v5187_v22 = vadd.f32 %v3767_v48, %v151_v59 }
 0x706   :  { %v3816_v50 = vpop.f32.mrb[84].mxu0 }
 0x707   :  { %v5185_v2 = vadd.f32 %v5184_v4, %v3816_v50  ;;  %v3818_v41 = vpop.f32.mrb[85].mxu0 }
 0x708   :  { %v3819_v25 = vpop.f32.mrb[86].mxu0 }
 0x709   :  { %v5188_v27 = vadd.f32 %v5187_v22, %v3819_v25  ;;  %v3821_v28 = vpop.f32.mrb[87].mxu0  ;;  %3837 = vadd.xlane.f32.xlu0 %v5185_v2 }
 0x70b   :  { %3839 = vadd.xlane.f32.xlu1 %v5188_v27 }
 0x735   :  { %v5123_v24 = vpop.f32.mrb[88].mxu1 }
 0x736   :  { %v3824_v21 = vpop.f32.mrb[88].mxu0  ;;  %v5124_v63 = vpop.f32.mrb[89].mxu1 }
 0x737   :  { %v3825_v30 = vpop.f32.mrb[89].mxu0  ;;  %v5126_v10 = vpop.f32.mrb[90].mxu1 }
 0x738   :  { %v3826_v33 = vpop.f32.mrb[90].mxu0  ;;  %v5127_v55 = vpop.f32.mrb[91].mxu1 }
 0x739   :  { %v3827_v7 = vpop.f32.mrb[91].mxu0 }
 0x73e   :  { %v3830_v35 = vpop.f32.mrb[92].mxu0 }
 0x73f   :  { %v3831_v23 = vpop.f32.mrb[93].mxu0 }
 0x740   :  { %v3832_v31 = vpop.f32.mrb[94].mxu0 }
 0x741   :  { %v3833_v17 = vpop.f32.mrb[95].mxu0 }
 0x751   :  { %v5129_v16 = vpop.f32.mrb[92].mxu1 }
 0x752   :  { %v5130_v19 = vpop.f32.mrb[93].mxu1 }
 0x753   :  { %v5132_v26 = vpop.f32.mrb[94].mxu1 }
 0x754   :  { %v5133_v49 = vpop.f32.mrb[95].mxu1 }
 0x796   :  { %v3838_v0 = vpop.xlane.xlu0 %3837 }
 0x797   :  { %v3842_v52 = vmul.f32 0.0078125, %v3838_v0 }
 0x798   :  { %v3840_v29 = vpop.xlane.xlu1 %3839 }
 0x799   :  { %v3844_v46 = vsub.f32 %v5185_v2, %v3842_v52  ;;  %v3843_v32 = vmul.f32 0.0078125, %v3840_v29 }
 0x79b   :  { %v3845_v15 = vsub.f32 %v5188_v27, %v3843_v32  ;;  %v3846_v36 = vmul.f32 %v3844_v46, %v3844_v46 }
 0x79d   :  { %3848 = vadd.xlane.f32.xlu0 %v3846_v36  ;;  %v3847_v8 = vmul.f32 %v3845_v15, %v3845_v15 }
 0x7a1   :  { %3850 = vadd.xlane.f32.xlu0 %v3847_v8 }
 0x82a   :  { %v3849_v53 = vpop.xlane.xlu0 %3848 }
 0x82b   :  { %v3852_v58 = vmul.f32 0.0078125, %v3849_v53 }
 0x82d   :  { %v3854_v62 = vadd.f32 1e-05, %v3852_v58 }
 0x82e   :  { %v3851_v14 = vpop.xlane.xlu0 %3850 }
 0x82f   :  { %6540 = vrsqrt.f32 %v3854_v62  ;;  %v3853_v34 = vmul.f32 0.0078125, %v3851_v14 }
 0x831   :  { %v3855_v9 = vadd.f32 1e-05, %v3853_v34 }
 0x833   :  { %6542 = vrsqrt.f32 %v3855_v9 }
 0x839   :  { %v6541_v1 = vpop.eup %6540 }
 0x83a   :  { %v3860_v38 = vmul.f32 %v6541_v1, %v3858_v45 }
 0x83c   :  { %3864 = vperm.xlu1 %5231, %v3860_v38  }
 0x83d   :  { %v6543_v42 = vpop.eup %6542 }
 0x83e   :  { %v3861_v60 = vmul.f32 %v6543_v42, %v3859_v56 }
 0x840   :  { %3878 = vperm.xlu1 %5231, %v3874_v43   ;;  %3869 = vperm.xlu0 %5230, %v3861_v60  }
 0x844   :  { %3883 = vperm.xlu1 %5231, %v3875_v18  }
 0x8bb   :  { %v3865_v12 = vpop.permute.xlu1 %3864 }
 0x8bc   :  { %v3872_v13 = vmul.f32 %v3865_v12, %v3844_v46 }
 0x8bf   :  { %v3879_v40 = vpop.permute.xlu1 %3878  ;;  %v3870_v44 = vpop.permute.xlu0 %3869 }
 0x8c0   :  { %v3886_v57 = vadd.f32 %v3879_v40, %v3872_v13  ;;  %v3873_v11 = vmul.f32 %v3870_v44, %v3845_v15 }
 0x8c2   :  { %v3888_v47 = vmax.f32 %v3886_v57, 0.0 }
 0x8c3   :  { %v3884_v6 = vpop.permute.xlu1 %3883 }
 0x8c4   :  { %3890 = vst [vmem:[%s9086_s29] sm:$0xff] %v3888_v47  ;;  %v3887_v59 = vadd.f32 %v3884_v6, %v3873_v11 }
 0x8c6   :  { %v3889_v4 = vmax.f32 %v3887_v59, 0.0 }
 0x8c8   :  { %3891 = vst [vmem:[%s9086_s29 + $0x8] sm:$0xff] %v3889_v4 }

</bundles_post_ra>
